<compile_context>
chip_gen: v5e
topology: v5e:2x2
jax: 0.10.0
libtpu: 0.0.40
codegen_flags: <defaults>
</compile_context>

<pallas_src>
import jax
import jax.numpy as jnp
from jax import lax
from jax.experimental import pallas as pl
from jax.experimental.pallas import tpu as pltpu

# ----------------------------- config ---------------------------------------
BATCH = 2
IN_CH = 4
IMG = 16
PATCH = 4
GRID = IMG // PATCH            # 4
N_PATCH = GRID * GRID          # 16
SEQ = N_PATCH + 1              # 17 (CLS token)
SEQ_PAD = 24                   # padded to a sublane multiple; keys >= SEQ are masked
CPP = IN_CH * PATCH * PATCH    # 64 (im2col row width)
WIDTH = 32
HEADS = 4
HEAD_DIM = WIDTH // HEADS      # 8
MLP_HIDDEN = 4 * WIDTH         # 128
LAYERS = 2
OUT_DIM = 16
LN_EPS = 1e-5

WA_COLS = 3 * WIDTH + WIDTH + MLP_HIDDEN    # in_proj | out_proj | mlp_w1 = 256
VEC_ROWS = 4 + 8 * LAYERS                   # ln_pre/ln_post + 8 rows per layer
VEC_LANES = 128                             # widest vector (mlp_b1)


# --------------------------- fused encoder kernel ---------------------------
def _make_kernel(imgs):
    """Builds the fused-encoder kernel for `imgs` images stacked per grid step."""
    R = imgs * SEQ_PAD  # rows in the stacked sequence slab

    def kernel(patch_ref, wa_ref, w2_ref, misc_ref, vec_ref, bias_ref, out_ref):
        f32 = jnp.float32

        def ln(z, g, b):
            # single-pass LayerNorm: var = E[x^2] - mu^2 (one fewer dependent reduce)
            mu = jnp.mean(z, axis=-1, keepdims=True)
            ms = jnp.mean(z * z, axis=-1, keepdims=True)
            return (z - mu) * lax.rsqrt(ms - mu * mu + LN_EPS) * g + b

        def vrow(r, n):
            return vec_ref[r:r + 1, 0:n]                       # (1, n)

        conv_w = misc_ref[0:CPP, :]                            # (CPP, W)
        proj_w = misc_ref[CPP:CPP + WIDTH, 0:OUT_DIM]          # (W, OUT_DIM)
        poscls = misc_ref[CPP + WIDTH:CPP + WIDTH + R, :]      # (R, W)  cls+pos, tiled

        # ---- patch embedding + (CLS + positional embedding), fused ----
        # patch rows 0 and >=SEQ (per image) are zero, so the matmul writes straight
        # into the padded stacked (R, W) sequence slab.
        x = jnp.dot(patch_ref[0], conv_w, preferred_element_type=f32) + poscls

        # ---- ln_pre ----
        x = ln(x, vrow(0, WIDTH), vrow(1, WIDTH))

        # additive attention mask: 0 for valid (same-image, real) keys, -1e30 otherwise
        bias = bias_ref[...]                                   # (R, R)

        # ---- transformer blocks (statically unrolled; all weights resident) ----
        for l in range(LAYERS):
            base = 4 + l * 8
            # --- MHSA ---
            y = ln(x, vrow(base + 0, WIDTH), vrow(base + 1, WIDTH))
            # in_proj columns are head-grouped host-side: [h0:(q k v), h1:(q k v), ...]
            # with the 1/sqrt(Dh) scale already folded into the q columns.
            qkv = jnp.dot(y, wa_ref[l, :, 0:3 * WIDTH],
                          preferred_element_type=f32) + vrow(base + 2, 3 * WIDTH)
            qkvh = pltpu.einshape("rhc->hrc",
                                  qkv.reshape(R, HEADS, 3 * HEAD_DIM))   # (H, R, 3D)
            q = qkvh[:, :, 0:HEAD_DIM]
            k = qkvh[:, :, HEAD_DIM:2 * HEAD_DIM]
            v = qkvh[:, :, 2 * HEAD_DIM:3 * HEAD_DIM]

            # one batched score matmul + ONE masked softmax for all heads
            s = jnp.einsum('hqd,hkd->hqk', q, k,
                           preferred_element_type=f32) + bias            # (H, R, R)
            p = jnp.exp(s - jnp.max(s, axis=-1, keepdims=True))
            p = p / jnp.sum(p, axis=-1, keepdims=True)
            pv = jnp.einsum('hqk,hkd->hqd', p, v,
                            preferred_element_type=f32)                  # (H, R, D)

            # head recombine + out-proj + residual, fused
            attn = pltpu.einshape("hrd->rhd", pv).reshape(R, WIDTH)
            x = x + jnp.dot(attn, wa_ref[l, :, 3 * WIDTH:4 * WIDTH],
                            preferred_element_type=f32) + vrow(base + 3, WIDTH)

            # --- MLP with QuickGELU ---
            y = ln(x, vrow(base + 4, WIDTH), vrow(base + 5, WIDTH))
            h = jnp.dot(y, wa_ref[l, :, 4 * WIDTH:4 * WIDTH + MLP_HIDDEN],
                        preferred_element_type=f32) + vrow(base + 6, MLP_HIDDEN)
            h = h * jax.nn.sigmoid(1.702 * h)                            # QuickGELU
            x = x + jnp.dot(h, w2_ref[l],
                            preferred_element_type=f32) + vrow(base + 7, WIDTH)

        # ---- ln_post on each image's CLS token, then projection (no bias) ----
        cls = x.reshape(imgs, SEQ_PAD, WIDTH)[:, 0:1, :].reshape(imgs, WIDTH)
        cls = ln(cls, vrow(2, WIDTH), vrow(3, WIDTH))
        out_ref[0] = jnp.dot(cls, proj_w, preferred_element_type=f32)    # (imgs, OUT)

    return kernel


# --------------------------- parameter init ---------------------------------
def init_params(key):
    def nrm(k, shape, std=0.02):
        return std * jax.random.normal(k, shape, dtype=jnp.float32)

    ks = iter(jax.random.split(key, 16 + LAYERS * 16))
    params = {
        "conv1_w": nrm(next(ks), (WIDTH, IN_CH, PATCH, PATCH)),   # Conv2d (no bias)
        "class_embedding": nrm(next(ks), (WIDTH,)),
        "pos_embedding": nrm(next(ks), (SEQ, WIDTH)),
        "ln_pre_g": jnp.ones((WIDTH,), jnp.float32),
        "ln_pre_b": jnp.zeros((WIDTH,), jnp.float32),
        "ln_post_g": jnp.ones((WIDTH,), jnp.float32),
        "ln_post_b": jnp.zeros((WIDTH,), jnp.float32),
        "proj": nrm(next(ks), (WIDTH, OUT_DIM)),
        "blocks": [],
    }
    for _ in range(LAYERS):
        params["blocks"].append({
            "ln1_g": jnp.ones((WIDTH,), jnp.float32),
            "ln1_b": jnp.zeros((WIDTH,), jnp.float32),
            "in_proj_w": nrm(next(ks), (WIDTH, 3 * WIDTH)),
            "in_proj_b": jnp.zeros((3 * WIDTH,), jnp.float32),
            "out_proj_w": nrm(next(ks), (WIDTH, WIDTH)),
            "out_proj_b": jnp.zeros((WIDTH,), jnp.float32),
            "ln2_g": jnp.ones((WIDTH,), jnp.float32),
            "ln2_b": jnp.zeros((WIDTH,), jnp.float32),
            "mlp_w1": nrm(next(ks), (WIDTH, MLP_HIDDEN)),
            "mlp_b1": jnp.zeros((MLP_HIDDEN,), jnp.float32),
            "mlp_w2": nrm(next(ks), (MLP_HIDDEN, WIDTH)),
            "mlp_b2": jnp.zeros((WIDTH,), jnp.float32),
        })
    return params


# ----------------------------- forward pass ---------------------------------
def encode_image(params, image, *, grid_steps=1):
    """image: (B, C, H, W) float32 (NCHW). Returns (B, OUT_DIM).

    grid_steps=1 folds the whole batch into one grid step (best on single-TC
    v5e/v6e).  On v7x use grid_steps=2 so each TensorCore gets B/2 images.
    """
    B, C, H, W = image.shape
    assert (C, H, W) == (IN_CH, IMG, IMG)
    assert B % grid_steps == 0
    imgs = B // grid_steps
    R = imgs * SEQ_PAD

    # --- host-side layout plumbing only (one-time reshapes, fused under jit) ---
    # im2col for Conv2d(C, WIDTH, kernel=PATCH, stride=PATCH, bias=False):
    patches = image.reshape(B, C, GRID, PATCH, GRID, PATCH)
    patches = patches.transpose(0, 2, 4, 1, 3, 5).reshape(B, N_PATCH, CPP)
    patches = jnp.pad(patches, ((0, 0), (1, SEQ_PAD - SEQ), (0, 0)))  # CLS + pad rows = 0
    patches = patches.reshape(grid_steps, R, CPP)

    conv_w = params["conv1_w"].reshape(WIDTH, CPP).T                   # (CPP, W)

    # combined CLS + positional embedding slab, tiled over the images in a grid step
    poscls = jnp.zeros((SEQ_PAD, WIDTH), jnp.float32)
    poscls = poscls.at[0].set(params["class_embedding"] + params["pos_embedding"][0])
    poscls = poscls.at[1:SEQ].set(params["pos_embedding"][1:])
    poscls = jnp.tile(poscls, (imgs, 1))                               # (R, W)

    proj_pad = jnp.pad(params["proj"], ((0, 0), (0, WIDTH - OUT_DIM)))  # (W, W)
    wmisc = jnp.concatenate([conv_w, proj_pad, poscls], axis=0)        # (CPP+W+R, W)

    # head-grouped column permutation for in_proj: new col h*3D + t*D + d <- t*W + h*D + d
    scale = HEAD_DIM ** -0.5
    perm = jnp.array([t * WIDTH + h * HEAD_DIM + d
                      for h in range(HEADS)
                      for t in range(3)
                      for d in range(HEAD_DIM)], dtype=jnp.int32)

    def pad128(v):
        return jnp.pad(v, (0, VEC_LANES - v.shape[0]))

    vec_rows = [pad128(params["ln_pre_g"]), pad128(params["ln_pre_b"]),
                pad128(params["ln_post_g"]), pad128(params["ln_post_b"])]
    wa_list, w2_list = [], []
    for blk in params["blocks"]:
        # fold the 1/sqrt(Dh) scale into the q columns, then head-group the columns
        inw = blk["in_proj_w"].at[:, :WIDTH].multiply(scale)[:, perm]
        inb = blk["in_proj_b"].at[:WIDTH].multiply(scale)[perm]
        wa_list.append(jnp.concatenate([inw, blk["out_proj_w"], blk["mlp_w1"]], axis=1))
        w2_list.append(blk["mlp_w2"])
        vec_rows += [pad128(blk["ln1_g"]), pad128(blk["ln1_b"]), pad128(inb),
                     pad128(blk["out_proj_b"]), pad128(blk["ln2_g"]), pad128(blk["ln2_b"]),
                     pad128(blk["mlp_b1"]), pad128(blk["mlp_b2"])]
    wa = jnp.stack(wa_list)                                            # (L, W, 256)
    w2 = jnp.stack(w2_list)                                            # (L, 4W, W)
    vec = jnp.stack(vec_rows)                                          # (VEC_ROWS, 128)

    # block-diagonal key-validity additive mask (images don't attend across each other;
    # padded sequence positions are never valid keys)
    idx = jnp.arange(R)
    same_img = (idx[:, None] // SEQ_PAD) == (idx[None, :] // SEQ_PAD)
    key_ok = (idx[None, :] % SEQ_PAD) < SEQ
    attn_bias = jnp.where(same_img & key_ok, 0.0, -1e30).astype(jnp.float32)  # (R, R)

    misc_rows = CPP + WIDTH + R
    out = pl.pallas_call(
        _make_kernel(imgs),
        out_shape=jax.ShapeDtypeStruct((grid_steps, imgs, OUT_DIM), jnp.float32),
        grid=(grid_steps,),
        in_specs=[
            pl.BlockSpec((1, R, CPP), lambda g: (g, 0, 0)),                     # patches
            pl.BlockSpec((LAYERS, WIDTH, WA_COLS), lambda g: (0, 0, 0)),        # qkv|out|mlp1
            pl.BlockSpec((LAYERS, MLP_HIDDEN, WIDTH), lambda g: (0, 0, 0)),     # mlp2
            pl.BlockSpec((misc_rows, WIDTH), lambda g: (0, 0)),                 # conv|proj|poscls
            pl.BlockSpec((VEC_ROWS, VEC_LANES), lambda g: (0, 0)),              # LN params + biases
            pl.BlockSpec((R, R), lambda g: (0, 0)),                             # attention mask
        ],
        out_specs=pl.BlockSpec((1, imgs, OUT_DIM), lambda g: (g, 0, 0)),
        compiler_params=pltpu.CompilerParams(
            dimension_semantics=("parallel",)),          # v7x: TCs split the grid steps
    )(patches, wa, w2, wmisc, vec, attn_bias)

    return out.reshape(B, OUT_DIM)


# ------------------------ pure-JAX reference (for checking) ------------------
def encode_image_ref(params, image):
    B = image.shape[0]
    patches = image.reshape(B, IN_CH, GRID, PATCH, GRID, PATCH)
    patches = patches.transpose(0, 2, 4, 1, 3, 5).reshape(B, N_PATCH, CPP)
    x = patches @ params["conv1_w"].reshape(WIDTH, CPP).T
    cls = jnp.broadcast_to(params["class_embedding"], (B, 1, WIDTH))
    x = jnp.concatenate([cls, x], axis=1) + params["pos_embedding"][None]

    def ln(z, g, b):
        mu = z.mean(-1, keepdims=True)
        var = ((z - mu) ** 2).mean(-1, keepdims=True)
        return (z - mu) / jnp.sqrt(var + LN_EPS) * g + b

    x = ln(x, params["ln_pre_g"], params["ln_pre_b"])
    scale = HEAD_DIM ** -0.5
    for blk in params["blocks"]:
        y = ln(x, blk["ln1_g"], blk["ln1_b"])
        qkv = y @ blk["in_proj_w"] + blk["in_proj_b"]
        q, k, v = jnp.split(qkv, 3, axis=-1)
        q = q.reshape(B, SEQ, HEADS, HEAD_DIM).transpose(0, 2, 1, 3) * scale
        k = k.reshape(B, SEQ, HEADS, HEAD_DIM).transpose(0, 2, 1, 3)
        v = v.reshape(B, SEQ, HEADS, HEAD_DIM).transpose(0, 2, 1, 3)
        a = jax.nn.softmax(q @ k.transpose(0, 1, 3, 2), axis=-1)
        o = (a @ v).transpose(0, 2, 1, 3).reshape(B, SEQ, WIDTH)
        x = x + o @ blk["out_proj_w"] + blk["out_proj_b"]
        y = ln(x, blk["ln2_g"], blk["ln2_b"])
        h = y @ blk["mlp_w1"] + blk["mlp_b1"]
        h = h * jax.nn.sigmoid(1.702 * h)
        x = x + h @ blk["mlp_w2"] + blk["mlp_b2"]
    cls = ln(x[:, 0, :], params["ln_post_g"], params["ln_post_b"])
    return cls @ params["proj"]


# ------------------------------- main ----------------------------------------
if __name__ == "__main__":
    key = jax.random.PRNGKey(0)
    params = init_params(key)
    image = jax.random.normal(jax.random.fold_in(key, 999),
                              (BATCH, IN_CH, IMG, IMG), dtype=jnp.float32)

    fwd = jax.jit(encode_image)
    out = jax.block_until_ready(fwd(params, image))

    assert out.shape == (BATCH, OUT_DIM), out.shape
    assert bool(jnp.all(jnp.isfinite(out)))

    # sanity check against the pure-JAX reference (loose bound: catches layout/
    # permutation bugs, tolerates MXU precision noise)
    ref = encode_image_ref(params, image)
    max_diff = float(jnp.max(jnp.abs(out - ref)))
    assert max_diff < 1e-2, max_diff

    print("KERNEL_OK")
</pallas_src>

<mosaic_0001>
module attributes {stable_mosaic.version = 11 : i64} {
  func.func @kernel(%arg0: i32, %arg1: memref<1x48x64xf32, #tpu.memory_space<vmem>>, %arg2: memref<2x32x256xf32, #tpu.memory_space<vmem>>, %arg3: memref<2x128x32xf32, #tpu.memory_space<vmem>>, %arg4: memref<144x32xf32, #tpu.memory_space<vmem>>, %arg5: memref<20x128xf32, #tpu.memory_space<vmem>>, %arg6: memref<48x48xf32, #tpu.memory_space<vmem>>, %arg7: memref<1x2x16xf32, #tpu.memory_space<vmem>>) attributes {dimension_semantics = [#tpu.dimension_semantics<parallel>], iteration_bounds = array<i64: 1>, scalar_prefetch = 0 : i64, scratch_operands = 0 : i64, tpu.core_type = #tpu.core_type<tc>, window_params = [{transform_indices = @transform_0, window_bounds = array<i64: 1, 48, 64>}, {pipeline_mode = #tpu.pipeline_mode<synchronous>, transform_indices = @transform_1, window_bounds = array<i64: 2, 32, 256>}, {pipeline_mode = #tpu.pipeline_mode<synchronous>, transform_indices = @transform_2, window_bounds = array<i64: 2, 128, 32>}, {pipeline_mode = #tpu.pipeline_mode<synchronous>, transform_indices = @transform_3, window_bounds = array<i64: 144, 32>}, {pipeline_mode = #tpu.pipeline_mode<synchronous>, transform_indices = @transform_4, window_bounds = array<i64: 20, 128>}, {pipeline_mode = #tpu.pipeline_mode<synchronous>, transform_indices = @transform_5, window_bounds = array<i64: 48, 48>}, {transform_indices = @transform_6, window_bounds = array<i64: 1, 2, 16>}]} {
    %c0 = arith.constant 0 : index
    %c0_0 = arith.constant 0 : index
    %0 = vector.load %arg4[%c0, %c0_0] : memref<144x32xf32, #tpu.memory_space<vmem>>, vector<64x32xf32>
    %c64 = arith.constant 64 : index
    %c0_1 = arith.constant 0 : index
    %1 = vector.load %arg4[%c64, %c0_1] : memref<144x32xf32, #tpu.memory_space<vmem>>, vector<32x16xf32>
    %c96 = arith.constant 96 : index
    %c0_2 = arith.constant 0 : index
    %2 = vector.load %arg4[%c96, %c0_2] : memref<144x32xf32, #tpu.memory_space<vmem>>, vector<48x32xf32>
    %c0_3 = arith.constant 0 : index
    %c0_4 = arith.constant 0 : index
    %c0_5 = arith.constant 0 : index
    %3 = vector.load %arg1[%c0_3, %c0_4, %c0_5] : memref<1x48x64xf32, #tpu.memory_space<vmem>>, vector<1x48x64xf32>
    %4 = vector.shape_cast %3 : vector<1x48x64xf32> to vector<48x64xf32>
    %cst = arith.constant dense<0.000000e+00> : vector<48x32xf32>
    %5 = tpu.matmul %4, %0, %cst {dimension_numbers = #tpu.dot_dimension_numbers<[1], [0], [0], [1], [0, 0, 1, 1], [], []>} : vector<48x64xf32>, vector<64x32xf32>, vector<48x32xf32> -> vector<48x32xf32>
    %6 = arith.addf %5, %2 : vector<48x32xf32>
    %c0_6 = arith.constant 0 : index
    %c0_7 = arith.constant 0 : index
    %7 = vector.load %arg5[%c0_6, %c0_7] : memref<20x128xf32, #tpu.memory_space<vmem>>, vector<1x32xf32>
    %c1 = arith.constant 1 : index
    %c0_8 = arith.constant 0 : index
    %8 = vector.load %arg5[%c1, %c0_8] : memref<20x128xf32, #tpu.memory_space<vmem>>, vector<1x32xf32>
    %cst_9 = arith.constant dense<0.000000e+00> : vector<48xf32>
    %9 = vector.multi_reduction <add>, %6, %cst_9 [1] : vector<48x32xf32> to vector<48xf32>
    %10 = vector.shape_cast %9 : vector<48xf32> to vector<48x1xf32>
    %cst_10 = arith.constant 3.200000e+01 : f32
    %11 = vector.broadcast %cst_10 : f32 to vector<48x1xf32>
    %12 = arith.divf %10, %11 : vector<48x1xf32>
    %13 = arith.mulf %6, %6 : vector<48x32xf32>
    %cst_11 = arith.constant dense<0.000000e+00> : vector<48xf32>
    %14 = vector.multi_reduction <add>, %13, %cst_11 [1] : vector<48x32xf32> to vector<48xf32>
    %15 = vector.shape_cast %14 : vector<48xf32> to vector<48x1xf32>
    %cst_12 = arith.constant 3.200000e+01 : f32
    %16 = vector.broadcast %cst_12 : f32 to vector<48x1xf32>
    %17 = arith.divf %15, %16 : vector<48x1xf32>
    %18 = vector.broadcast %12 : vector<48x1xf32> to vector<48x32xf32>
    %19 = arith.subf %6, %18 : vector<48x32xf32>
    %20 = arith.mulf %12, %12 : vector<48x1xf32>
    %21 = arith.subf %17, %20 : vector<48x1xf32>
    %cst_13 = arith.constant 9.99999974E-6 : f32
    %22 = vector.broadcast %cst_13 : f32 to vector<48x1xf32>
    %23 = arith.addf %21, %22 : vector<48x1xf32>
    %24 = math.rsqrt %23 : vector<48x1xf32>
    %25 = vector.broadcast %24 : vector<48x1xf32> to vector<48x32xf32>
    %26 = arith.mulf %19, %25 : vector<48x32xf32>
    %27 = vector.broadcast %7 : vector<1x32xf32> to vector<48x32xf32>
    %28 = arith.mulf %26, %27 : vector<48x32xf32>
    %29 = vector.broadcast %8 : vector<1x32xf32> to vector<48x32xf32>
    %30 = arith.addf %28, %29 : vector<48x32xf32>
    %c0_14 = arith.constant 0 : index
    %c0_15 = arith.constant 0 : index
    %31 = vector.load %arg6[%c0_14, %c0_15] : memref<48x48xf32, #tpu.memory_space<vmem>>, vector<48x48xf32>
    %c4 = arith.constant 4 : index
    %c0_16 = arith.constant 0 : index
    %32 = vector.load %arg5[%c4, %c0_16] : memref<20x128xf32, #tpu.memory_space<vmem>>, vector<1x32xf32>
    %c5 = arith.constant 5 : index
    %c0_17 = arith.constant 0 : index
    %33 = vector.load %arg5[%c5, %c0_17] : memref<20x128xf32, #tpu.memory_space<vmem>>, vector<1x32xf32>
    %cst_18 = arith.constant dense<0.000000e+00> : vector<48xf32>
    %34 = vector.multi_reduction <add>, %30, %cst_18 [1] : vector<48x32xf32> to vector<48xf32>
    %35 = vector.shape_cast %34 : vector<48xf32> to vector<48x1xf32>
    %cst_19 = arith.constant 3.200000e+01 : f32
    %36 = vector.broadcast %cst_19 : f32 to vector<48x1xf32>
    %37 = arith.divf %35, %36 : vector<48x1xf32>
    %38 = arith.mulf %30, %30 : vector<48x32xf32>
    %cst_20 = arith.constant dense<0.000000e+00> : vector<48xf32>
    %39 = vector.multi_reduction <add>, %38, %cst_20 [1] : vector<48x32xf32> to vector<48xf32>
    %40 = vector.shape_cast %39 : vector<48xf32> to vector<48x1xf32>
    %cst_21 = arith.constant 3.200000e+01 : f32
    %41 = vector.broadcast %cst_21 : f32 to vector<48x1xf32>
    %42 = arith.divf %40, %41 : vector<48x1xf32>
    %43 = vector.broadcast %37 : vector<48x1xf32> to vector<48x32xf32>
    %44 = arith.subf %30, %43 : vector<48x32xf32>
    %45 = arith.mulf %37, %37 : vector<48x1xf32>
    %46 = arith.subf %42, %45 : vector<48x1xf32>
    %cst_22 = arith.constant 9.99999974E-6 : f32
    %47 = vector.broadcast %cst_22 : f32 to vector<48x1xf32>
    %48 = arith.addf %46, %47 : vector<48x1xf32>
    %49 = math.rsqrt %48 : vector<48x1xf32>
    %50 = vector.broadcast %49 : vector<48x1xf32> to vector<48x32xf32>
    %51 = arith.mulf %44, %50 : vector<48x32xf32>
    %52 = vector.broadcast %32 : vector<1x32xf32> to vector<48x32xf32>
    %53 = arith.mulf %51, %52 : vector<48x32xf32>
    %54 = vector.broadcast %33 : vector<1x32xf32> to vector<48x32xf32>
    %55 = arith.addf %53, %54 : vector<48x32xf32>
    %c0_23 = arith.constant 0 : index
    %c0_24 = arith.constant 0 : index
    %c0_25 = arith.constant 0 : index
    %56 = vector.load %arg2[%c0_23, %c0_24, %c0_25] : memref<2x32x256xf32, #tpu.memory_space<vmem>>, vector<1x32x96xf32>
    %57 = vector.shape_cast %56 : vector<1x32x96xf32> to vector<32x96xf32>
    %cst_26 = arith.constant dense<0.000000e+00> : vector<48x96xf32>
    %58 = tpu.matmul %55, %57, %cst_26 {dimension_numbers = #tpu.dot_dimension_numbers<[1], [0], [0], [1], [0, 0, 1, 1], [], []>} : vector<48x32xf32>, vector<32x96xf32>, vector<48x96xf32> -> vector<48x96xf32>
    %c6 = arith.constant 6 : index
    %c0_27 = arith.constant 0 : index
    %59 = vector.load %arg5[%c6, %c0_27] : memref<20x128xf32, #tpu.memory_space<vmem>>, vector<1x96xf32>
    %60 = vector.broadcast %59 : vector<1x96xf32> to vector<48x96xf32>
    %61 = arith.addf %58, %60 : vector<48x96xf32>
    %62 = vector.shape_cast %61 : vector<48x96xf32> to vector<48x4x24xf32>
    %63 = tpu.transpose %62, [1, 0, 2] : vector<48x4x24xf32> -> vector<4x48x24xf32>
    %64 = vector.extract_strided_slice %63 {offsets = [0, 0, 0], sizes = [4, 48, 8], strides = [1, 1, 1]} : vector<4x48x24xf32> to vector<4x48x8xf32>
    %65 = vector.extract_strided_slice %63 {offsets = [0, 0, 8], sizes = [4, 48, 8], strides = [1, 1, 1]} : vector<4x48x24xf32> to vector<4x48x8xf32>
    %66 = vector.extract_strided_slice %63 {offsets = [0, 0, 16], sizes = [4, 48, 8], strides = [1, 1, 1]} : vector<4x48x24xf32> to vector<4x48x8xf32>
    "tpu.trace_start"() <{level = 10 : i32, message = "hqd,hkd->hqk"}> : () -> ()
    %cst_28 = arith.constant dense<0.000000e+00> : vector<4x48x48xf32>
    %67 = tpu.matmul %64, %65, %cst_28 {dimension_numbers = #tpu.dot_dimension_numbers<[2], [2], [1], [1], [0, 0, 0, 1, 1, 1], [0], [0]>} : vector<4x48x8xf32>, vector<4x48x8xf32>, vector<4x48x48xf32> -> vector<4x48x48xf32>
    "tpu.trace_stop"() : () -> ()
    %68 = vector.shape_cast %31 : vector<48x48xf32> to vector<1x48x48xf32>
    %69 = vector.broadcast %68 : vector<1x48x48xf32> to vector<4x48x48xf32>
    %70 = arith.addf %67, %69 : vector<4x48x48xf32>
    %cst_29 = arith.constant dense<0xFF800000> : vector<4x48xf32>
    %71 = vector.multi_reduction <maximumf>, %70, %cst_29 [2] : vector<4x48x48xf32> to vector<4x48xf32>
    %72 = vector.shape_cast %71 : vector<4x48xf32> to vector<4x48x1xf32>
    %73 = vector.broadcast %72 : vector<4x48x1xf32> to vector<4x48x48xf32>
    %74 = arith.subf %70, %73 : vector<4x48x48xf32>
    %75 = math.exp %74 : vector<4x48x48xf32>
    %cst_30 = arith.constant dense<0.000000e+00> : vector<4x48xf32>
    %76 = vector.multi_reduction <add>, %75, %cst_30 [2] : vector<4x48x48xf32> to vector<4x48xf32>
    %77 = vector.shape_cast %76 : vector<4x48xf32> to vector<4x48x1xf32>
    %78 = vector.broadcast %77 : vector<4x48x1xf32> to vector<4x48x48xf32>
    %79 = arith.divf %75, %78 : vector<4x48x48xf32>
    "tpu.trace_start"() <{level = 10 : i32, message = "hqk,hkd->hqd"}> : () -> ()
    %cst_31 = arith.constant dense<0.000000e+00> : vector<4x48x8xf32>
    %80 = tpu.matmul %79, %66, %cst_31 {dimension_numbers = #tpu.dot_dimension_numbers<[2], [1], [1], [2], [0, 0, 0, 1, 1, 2], [0], [0]>} : vector<4x48x48xf32>, vector<4x48x8xf32>, vector<4x48x8xf32> -> vector<4x48x8xf32>
    "tpu.trace_stop"() : () -> ()
    %81 = tpu.transpose %80, [1, 0, 2] : vector<4x48x8xf32> -> vector<48x4x8xf32>
    %82 = vector.shape_cast %81 : vector<48x4x8xf32> to vector<48x32xf32>
    %c0_32 = arith.constant 0 : index
    %c0_33 = arith.constant 0 : index
    %c96_34 = arith.constant 96 : index
    %83 = vector.load %arg2[%c0_32, %c0_33, %c96_34] : memref<2x32x256xf32, #tpu.memory_space<vmem>>, vector<1x32x32xf32>
    %84 = vector.shape_cast %83 : vector<1x32x32xf32> to vector<32x32xf32>
    %cst_35 = arith.constant dense<0.000000e+00> : vector<48x32xf32>
    %85 = tpu.matmul %82, %84, %cst_35 {dimension_numbers = #tpu.dot_dimension_numbers<[1], [0], [0], [1], [0, 0, 1, 1], [], []>} : vector<48x32xf32>, vector<32x32xf32>, vector<48x32xf32> -> vector<48x32xf32>
    %86 = arith.addf %30, %85 : vector<48x32xf32>
    %c7 = arith.constant 7 : index
    %c0_36 = arith.constant 0 : index
    %87 = vector.load %arg5[%c7, %c0_36] : memref<20x128xf32, #tpu.memory_space<vmem>>, vector<1x32xf32>
    %88 = vector.broadcast %87 : vector<1x32xf32> to vector<48x32xf32>
    %89 = arith.addf %86, %88 : vector<48x32xf32>
    %c8 = arith.constant 8 : index
    %c0_37 = arith.constant 0 : index
    %90 = vector.load %arg5[%c8, %c0_37] : memref<20x128xf32, #tpu.memory_space<vmem>>, vector<1x32xf32>
    %c9 = arith.constant 9 : index
    %c0_38 = arith.constant 0 : index
    %91 = vector.load %arg5[%c9, %c0_38] : memref<20x128xf32, #tpu.memory_space<vmem>>, vector<1x32xf32>
    %cst_39 = arith.constant dense<0.000000e+00> : vector<48xf32>
    %92 = vector.multi_reduction <add>, %89, %cst_39 [1] : vector<48x32xf32> to vector<48xf32>
    %93 = vector.shape_cast %92 : vector<48xf32> to vector<48x1xf32>
    %cst_40 = arith.constant 3.200000e+01 : f32
    %94 = vector.broadcast %cst_40 : f32 to vector<48x1xf32>
    %95 = arith.divf %93, %94 : vector<48x1xf32>
    %96 = arith.mulf %89, %89 : vector<48x32xf32>
    %cst_41 = arith.constant dense<0.000000e+00> : vector<48xf32>
    %97 = vector.multi_reduction <add>, %96, %cst_41 [1] : vector<48x32xf32> to vector<48xf32>
    %98 = vector.shape_cast %97 : vector<48xf32> to vector<48x1xf32>
    %cst_42 = arith.constant 3.200000e+01 : f32
    %99 = vector.broadcast %cst_42 : f32 to vector<48x1xf32>
    %100 = arith.divf %98, %99 : vector<48x1xf32>
    %101 = vector.broadcast %95 : vector<48x1xf32> to vector<48x32xf32>
    %102 = arith.subf %89, %101 : vector<48x32xf32>
    %103 = arith.mulf %95, %95 : vector<48x1xf32>
    %104 = arith.subf %100, %103 : vector<48x1xf32>
    %cst_43 = arith.constant 9.99999974E-6 : f32
    %105 = vector.broadcast %cst_43 : f32 to vector<48x1xf32>
    %106 = arith.addf %104, %105 : vector<48x1xf32>
    %107 = math.rsqrt %106 : vector<48x1xf32>
    %108 = vector.broadcast %107 : vector<48x1xf32> to vector<48x32xf32>
    %109 = arith.mulf %102, %108 : vector<48x32xf32>
    %110 = vector.broadcast %90 : vector<1x32xf32> to vector<48x32xf32>
    %111 = arith.mulf %109, %110 : vector<48x32xf32>
    %112 = vector.broadcast %91 : vector<1x32xf32> to vector<48x32xf32>
    %113 = arith.addf %111, %112 : vector<48x32xf32>
    %c0_44 = arith.constant 0 : index
    %c0_45 = arith.constant 0 : index
    %c128 = arith.constant 128 : index
    %114 = vector.load %arg2[%c0_44, %c0_45, %c128] : memref<2x32x256xf32, #tpu.memory_space<vmem>>, vector<1x32x128xf32>
    %115 = vector.shape_cast %114 : vector<1x32x128xf32> to vector<32x128xf32>
    %cst_46 = arith.constant dense<0.000000e+00> : vector<48x128xf32>
    %116 = tpu.matmul %113, %115, %cst_46 {dimension_numbers = #tpu.dot_dimension_numbers<[1], [0], [0], [1], [0, 0, 1, 1], [], []>} : vector<48x32xf32>, vector<32x128xf32>, vector<48x128xf32> -> vector<48x128xf32>
    %c10 = arith.constant 10 : index
    %c0_47 = arith.constant 0 : index
    %117 = vector.load %arg5[%c10, %c0_47] : memref<20x128xf32, #tpu.memory_space<vmem>>, vector<1x128xf32>
    %118 = vector.broadcast %117 : vector<1x128xf32> to vector<48x128xf32>
    %119 = arith.addf %116, %118 : vector<48x128xf32>
    %cst_48 = arith.constant 1.702000e+00 : f32
    %120 = vector.broadcast %cst_48 : f32 to vector<48x128xf32>
    %121 = arith.mulf %120, %119 : vector<48x128xf32>
    %122 = arith.negf %121 : vector<48x128xf32>
    %123 = math.exp %122 : vector<48x128xf32>
    %cst_49 = arith.constant 1.000000e+00 : f32
    %124 = vector.broadcast %cst_49 : f32 to vector<48x128xf32>
    %125 = arith.addf %124, %123 : vector<48x128xf32>
    %126 = arith.divf %124, %125 : vector<48x128xf32>
    %127 = arith.mulf %119, %126 : vector<48x128xf32>
    %c0_50 = arith.constant 0 : index
    %c0_51 = arith.constant 0 : index
    %c0_52 = arith.constant 0 : index
    %128 = vector.load %arg3[%c0_50, %c0_51, %c0_52] : memref<2x128x32xf32, #tpu.memory_space<vmem>>, vector<1x128x32xf32>
    %129 = vector.shape_cast %128 : vector<1x128x32xf32> to vector<128x32xf32>
    %cst_53 = arith.constant dense<0.000000e+00> : vector<48x32xf32>
    %130 = tpu.matmul %127, %129, %cst_53 {dimension_numbers = #tpu.dot_dimension_numbers<[1], [0], [0], [1], [0, 0, 1, 1], [], []>} : vector<48x128xf32>, vector<128x32xf32>, vector<48x32xf32> -> vector<48x32xf32>
    %131 = arith.addf %89, %130 : vector<48x32xf32>
    %c11 = arith.constant 11 : index
    %c0_54 = arith.constant 0 : index
    %132 = vector.load %arg5[%c11, %c0_54] : memref<20x128xf32, #tpu.memory_space<vmem>>, vector<1x32xf32>
    %133 = vector.broadcast %132 : vector<1x32xf32> to vector<48x32xf32>
    %134 = arith.addf %131, %133 : vector<48x32xf32>
    %c12 = arith.constant 12 : index
    %c0_55 = arith.constant 0 : index
    %135 = vector.load %arg5[%c12, %c0_55] : memref<20x128xf32, #tpu.memory_space<vmem>>, vector<1x32xf32>
    %c13 = arith.constant 13 : index
    %c0_56 = arith.constant 0 : index
    %136 = vector.load %arg5[%c13, %c0_56] : memref<20x128xf32, #tpu.memory_space<vmem>>, vector<1x32xf32>
    %cst_57 = arith.constant dense<0.000000e+00> : vector<48xf32>
    %137 = vector.multi_reduction <add>, %134, %cst_57 [1] : vector<48x32xf32> to vector<48xf32>
    %138 = vector.shape_cast %137 : vector<48xf32> to vector<48x1xf32>
    %cst_58 = arith.constant 3.200000e+01 : f32
    %139 = vector.broadcast %cst_58 : f32 to vector<48x1xf32>
    %140 = arith.divf %138, %139 : vector<48x1xf32>
    %141 = arith.mulf %134, %134 : vector<48x32xf32>
    %cst_59 = arith.constant dense<0.000000e+00> : vector<48xf32>
    %142 = vector.multi_reduction <add>, %141, %cst_59 [1] : vector<48x32xf32> to vector<48xf32>
    %143 = vector.shape_cast %142 : vector<48xf32> to vector<48x1xf32>
    %cst_60 = arith.constant 3.200000e+01 : f32
    %144 = vector.broadcast %cst_60 : f32 to vector<48x1xf32>
    %145 = arith.divf %143, %144 : vector<48x1xf32>
    %146 = vector.broadcast %140 : vector<48x1xf32> to vector<48x32xf32>
    %147 = arith.subf %134, %146 : vector<48x32xf32>
    %148 = arith.mulf %140, %140 : vector<48x1xf32>
    %149 = arith.subf %145, %148 : vector<48x1xf32>
    %cst_61 = arith.constant 9.99999974E-6 : f32
    %150 = vector.broadcast %cst_61 : f32 to vector<48x1xf32>
    %151 = arith.addf %149, %150 : vector<48x1xf32>
    %152 = math.rsqrt %151 : vector<48x1xf32>
    %153 = vector.broadcast %152 : vector<48x1xf32> to vector<48x32xf32>
    %154 = arith.mulf %147, %153 : vector<48x32xf32>
    %155 = vector.broadcast %135 : vector<1x32xf32> to vector<48x32xf32>
    %156 = arith.mulf %154, %155 : vector<48x32xf32>
    %157 = vector.broadcast %136 : vector<1x32xf32> to vector<48x32xf32>
    %158 = arith.addf %156, %157 : vector<48x32xf32>
    %c1_62 = arith.constant 1 : index
    %c0_63 = arith.constant 0 : index
    %c0_64 = arith.constant 0 : index
    %159 = vector.load %arg2[%c1_62, %c0_63, %c0_64] : memref<2x32x256xf32, #tpu.memory_space<vmem>>, vector<1x32x96xf32>
    %160 = vector.shape_cast %159 : vector<1x32x96xf32> to vector<32x96xf32>
    %cst_65 = arith.constant dense<0.000000e+00> : vector<48x96xf32>
    %161 = tpu.matmul %158, %160, %cst_65 {dimension_numbers = #tpu.dot_dimension_numbers<[1], [0], [0], [1], [0, 0, 1, 1], [], []>} : vector<48x32xf32>, vector<32x96xf32>, vector<48x96xf32> -> vector<48x96xf32>
    %c14 = arith.constant 14 : index
    %c0_66 = arith.constant 0 : index
    %162 = vector.load %arg5[%c14, %c0_66] : memref<20x128xf32, #tpu.memory_space<vmem>>, vector<1x96xf32>
    %163 = vector.broadcast %162 : vector<1x96xf32> to vector<48x96xf32>
    %164 = arith.addf %161, %163 : vector<48x96xf32>
    %165 = vector.shape_cast %164 : vector<48x96xf32> to vector<48x4x24xf32>
    %166 = tpu.transpose %165, [1, 0, 2] : vector<48x4x24xf32> -> vector<4x48x24xf32>
    %167 = vector.extract_strided_slice %166 {offsets = [0, 0, 0], sizes = [4, 48, 8], strides = [1, 1, 1]} : vector<4x48x24xf32> to vector<4x48x8xf32>
    %168 = vector.extract_strided_slice %166 {offsets = [0, 0, 8], sizes = [4, 48, 8], strides = [1, 1, 1]} : vector<4x48x24xf32> to vector<4x48x8xf32>
    %169 = vector.extract_strided_slice %166 {offsets = [0, 0, 16], sizes = [4, 48, 8], strides = [1, 1, 1]} : vector<4x48x24xf32> to vector<4x48x8xf32>
    "tpu.trace_start"() <{level = 10 : i32, message = "hqd,hkd->hqk"}> : () -> ()
    %cst_67 = arith.constant dense<0.000000e+00> : vector<4x48x48xf32>
    %170 = tpu.matmul %167, %168, %cst_67 {dimension_numbers = #tpu.dot_dimension_numbers<[2], [2], [1], [1], [0, 0, 0, 1, 1, 1], [0], [0]>} : vector<4x48x8xf32>, vector<4x48x8xf32>, vector<4x48x48xf32> -> vector<4x48x48xf32>
    "tpu.trace_stop"() : () -> ()
    %171 = vector.shape_cast %31 : vector<48x48xf32> to vector<1x48x48xf32>
    %172 = vector.broadcast %171 : vector<1x48x48xf32> to vector<4x48x48xf32>
    %173 = arith.addf %170, %172 : vector<4x48x48xf32>
    %cst_68 = arith.constant dense<0xFF800000> : vector<4x48xf32>
    %174 = vector.multi_reduction <maximumf>, %173, %cst_68 [2] : vector<4x48x48xf32> to vector<4x48xf32>
    %175 = vector.shape_cast %174 : vector<4x48xf32> to vector<4x48x1xf32>
    %176 = vector.broadcast %175 : vector<4x48x1xf32> to vector<4x48x48xf32>
    %177 = arith.subf %173, %176 : vector<4x48x48xf32>
    %178 = math.exp %177 : vector<4x48x48xf32>
    %cst_69 = arith.constant dense<0.000000e+00> : vector<4x48xf32>
    %179 = vector.multi_reduction <add>, %178, %cst_69 [2] : vector<4x48x48xf32> to vector<4x48xf32>
    %180 = vector.shape_cast %179 : vector<4x48xf32> to vector<4x48x1xf32>
    %181 = vector.broadcast %180 : vector<4x48x1xf32> to vector<4x48x48xf32>
    %182 = arith.divf %178, %181 : vector<4x48x48xf32>
    "tpu.trace_start"() <{level = 10 : i32, message = "hqk,hkd->hqd"}> : () -> ()
    %cst_70 = arith.constant dense<0.000000e+00> : vector<4x48x8xf32>
    %183 = tpu.matmul %182, %169, %cst_70 {dimension_numbers = #tpu.dot_dimension_numbers<[2], [1], [1], [2], [0, 0, 0, 1, 1, 2], [0], [0]>} : vector<4x48x48xf32>, vector<4x48x8xf32>, vector<4x48x8xf32> -> vector<4x48x8xf32>
    "tpu.trace_stop"() : () -> ()
    %184 = tpu.transpose %183, [1, 0, 2] : vector<4x48x8xf32> -> vector<48x4x8xf32>
    %185 = vector.shape_cast %184 : vector<48x4x8xf32> to vector<48x32xf32>
    %c1_71 = arith.constant 1 : index
    %c0_72 = arith.constant 0 : index
    %c96_73 = arith.constant 96 : index
    %186 = vector.load %arg2[%c1_71, %c0_72, %c96_73] : memref<2x32x256xf32, #tpu.memory_space<vmem>>, vector<1x32x32xf32>
    %187 = vector.shape_cast %186 : vector<1x32x32xf32> to vector<32x32xf32>
    %cst_74 = arith.constant dense<0.000000e+00> : vector<48x32xf32>
    %188 = tpu.matmul %185, %187, %cst_74 {dimension_numbers = #tpu.dot_dimension_numbers<[1], [0], [0], [1], [0, 0, 1, 1], [], []>} : vector<48x32xf32>, vector<32x32xf32>, vector<48x32xf32> -> vector<48x32xf32>
    %189 = arith.addf %134, %188 : vector<48x32xf32>
    %c15 = arith.constant 15 : index
    %c0_75 = arith.constant 0 : index
    %190 = vector.load %arg5[%c15, %c0_75] : memref<20x128xf32, #tpu.memory_space<vmem>>, vector<1x32xf32>
    %191 = vector.broadcast %190 : vector<1x32xf32> to vector<48x32xf32>
    %192 = arith.addf %189, %191 : vector<48x32xf32>
    %c16 = arith.constant 16 : index
    %c0_76 = arith.constant 0 : index
    %193 = vector.load %arg5[%c16, %c0_76] : memref<20x128xf32, #tpu.memory_space<vmem>>, vector<1x32xf32>
    %c17 = arith.constant 17 : index
    %c0_77 = arith.constant 0 : index
    %194 = vector.load %arg5[%c17, %c0_77] : memref<20x128xf32, #tpu.memory_space<vmem>>, vector<1x32xf32>
    %cst_78 = arith.constant dense<0.000000e+00> : vector<48xf32>
    %195 = vector.multi_reduction <add>, %192, %cst_78 [1] : vector<48x32xf32> to vector<48xf32>
    %196 = vector.shape_cast %195 : vector<48xf32> to vector<48x1xf32>
    %cst_79 = arith.constant 3.200000e+01 : f32
    %197 = vector.broadcast %cst_79 : f32 to vector<48x1xf32>
    %198 = arith.divf %196, %197 : vector<48x1xf32>
    %199 = arith.mulf %192, %192 : vector<48x32xf32>
    %cst_80 = arith.constant dense<0.000000e+00> : vector<48xf32>
    %200 = vector.multi_reduction <add>, %199, %cst_80 [1] : vector<48x32xf32> to vector<48xf32>
    %201 = vector.shape_cast %200 : vector<48xf32> to vector<48x1xf32>
    %cst_81 = arith.constant 3.200000e+01 : f32
    %202 = vector.broadcast %cst_81 : f32 to vector<48x1xf32>
    %203 = arith.divf %201, %202 : vector<48x1xf32>
    %204 = vector.broadcast %198 : vector<48x1xf32> to vector<48x32xf32>
    %205 = arith.subf %192, %204 : vector<48x32xf32>
    %206 = arith.mulf %198, %198 : vector<48x1xf32>
    %207 = arith.subf %203, %206 : vector<48x1xf32>
    %cst_82 = arith.constant 9.99999974E-6 : f32
    %208 = vector.broadcast %cst_82 : f32 to vector<48x1xf32>
    %209 = arith.addf %207, %208 : vector<48x1xf32>
    %210 = math.rsqrt %209 : vector<48x1xf32>
    %211 = vector.broadcast %210 : vector<48x1xf32> to vector<48x32xf32>
    %212 = arith.mulf %205, %211 : vector<48x32xf32>
    %213 = vector.broadcast %193 : vector<1x32xf32> to vector<48x32xf32>
    %214 = arith.mulf %212, %213 : vector<48x32xf32>
    %215 = vector.broadcast %194 : vector<1x32xf32> to vector<48x32xf32>
    %216 = arith.addf %214, %215 : vector<48x32xf32>
    %c1_83 = arith.constant 1 : index
    %c0_84 = arith.constant 0 : index
    %c128_85 = arith.constant 128 : index
    %217 = vector.load %arg2[%c1_83, %c0_84, %c128_85] : memref<2x32x256xf32, #tpu.memory_space<vmem>>, vector<1x32x128xf32>
    %218 = vector.shape_cast %217 : vector<1x32x128xf32> to vector<32x128xf32>
    %cst_86 = arith.constant dense<0.000000e+00> : vector<48x128xf32>
    %219 = tpu.matmul %216, %218, %cst_86 {dimension_numbers = #tpu.dot_dimension_numbers<[1], [0], [0], [1], [0, 0, 1, 1], [], []>} : vector<48x32xf32>, vector<32x128xf32>, vector<48x128xf32> -> vector<48x128xf32>
    %c18 = arith.constant 18 : index
    %c0_87 = arith.constant 0 : index
    %220 = vector.load %arg5[%c18, %c0_87] : memref<20x128xf32, #tpu.memory_space<vmem>>, vector<1x128xf32>
    %221 = vector.broadcast %220 : vector<1x128xf32> to vector<48x128xf32>
    %222 = arith.addf %219, %221 : vector<48x128xf32>
    %cst_88 = arith.constant 1.702000e+00 : f32
    %223 = vector.broadcast %cst_88 : f32 to vector<48x128xf32>
    %224 = arith.mulf %223, %222 : vector<48x128xf32>
    %225 = arith.negf %224 : vector<48x128xf32>
    %226 = math.exp %225 : vector<48x128xf32>
    %cst_89 = arith.constant 1.000000e+00 : f32
    %227 = vector.broadcast %cst_89 : f32 to vector<48x128xf32>
    %228 = arith.addf %227, %226 : vector<48x128xf32>
    %229 = arith.divf %227, %228 : vector<48x128xf32>
    %230 = arith.mulf %222, %229 : vector<48x128xf32>
    %c1_90 = arith.constant 1 : index
    %c0_91 = arith.constant 0 : index
    %c0_92 = arith.constant 0 : index
    %231 = vector.load %arg3[%c1_90, %c0_91, %c0_92] : memref<2x128x32xf32, #tpu.memory_space<vmem>>, vector<1x128x32xf32>
    %232 = vector.shape_cast %231 : vector<1x128x32xf32> to vector<128x32xf32>
    %cst_93 = arith.constant dense<0.000000e+00> : vector<48x32xf32>
    %233 = tpu.matmul %230, %232, %cst_93 {dimension_numbers = #tpu.dot_dimension_numbers<[1], [0], [0], [1], [0, 0, 1, 1], [], []>} : vector<48x128xf32>, vector<128x32xf32>, vector<48x32xf32> -> vector<48x32xf32>
    %234 = arith.addf %192, %233 : vector<48x32xf32>
    %c19 = arith.constant 19 : index
    %c0_94 = arith.constant 0 : index
    %235 = vector.load %arg5[%c19, %c0_94] : memref<20x128xf32, #tpu.memory_space<vmem>>, vector<1x32xf32>
    %236 = vector.broadcast %235 : vector<1x32xf32> to vector<48x32xf32>
    %237 = arith.addf %234, %236 : vector<48x32xf32>
    %238 = vector.shape_cast %237 : vector<48x32xf32> to vector<2x24x32xf32>
    %239 = vector.extract_strided_slice %238 {offsets = [0, 0, 0], sizes = [2, 1, 32], strides = [1, 1, 1]} : vector<2x24x32xf32> to vector<2x1x32xf32>
    %240 = vector.shape_cast %239 : vector<2x1x32xf32> to vector<2x32xf32>
    %c2 = arith.constant 2 : index
    %c0_95 = arith.constant 0 : index
    %241 = vector.load %arg5[%c2, %c0_95] : memref<20x128xf32, #tpu.memory_space<vmem>>, vector<1x32xf32>
    %c3 = arith.constant 3 : index
    %c0_96 = arith.constant 0 : index
    %242 = vector.load %arg5[%c3, %c0_96] : memref<20x128xf32, #tpu.memory_space<vmem>>, vector<1x32xf32>
    %cst_97 = arith.constant dense<0.000000e+00> : vector<2xf32>
    %243 = vector.multi_reduction <add>, %240, %cst_97 [1] : vector<2x32xf32> to vector<2xf32>
    %244 = vector.shape_cast %243 : vector<2xf32> to vector<2x1xf32>
    %cst_98 = arith.constant 3.200000e+01 : f32
    %245 = vector.broadcast %cst_98 : f32 to vector<2x1xf32>
    %246 = arith.divf %244, %245 : vector<2x1xf32>
    %247 = arith.mulf %240, %240 : vector<2x32xf32>
    %cst_99 = arith.constant dense<0.000000e+00> : vector<2xf32>
    %248 = vector.multi_reduction <add>, %247, %cst_99 [1] : vector<2x32xf32> to vector<2xf32>
    %249 = vector.shape_cast %248 : vector<2xf32> to vector<2x1xf32>
    %cst_100 = arith.constant 3.200000e+01 : f32
    %250 = vector.broadcast %cst_100 : f32 to vector<2x1xf32>
    %251 = arith.divf %249, %250 : vector<2x1xf32>
    %252 = vector.broadcast %246 : vector<2x1xf32> to vector<2x32xf32>
    %253 = arith.subf %240, %252 : vector<2x32xf32>
    %254 = arith.mulf %246, %246 : vector<2x1xf32>
    %255 = arith.subf %251, %254 : vector<2x1xf32>
    %cst_101 = arith.constant 9.99999974E-6 : f32
    %256 = vector.broadcast %cst_101 : f32 to vector<2x1xf32>
    %257 = arith.addf %255, %256 : vector<2x1xf32>
    %258 = math.rsqrt %257 : vector<2x1xf32>
    %259 = vector.broadcast %258 : vector<2x1xf32> to vector<2x32xf32>
    %260 = arith.mulf %253, %259 : vector<2x32xf32>
    %261 = vector.broadcast %241 : vector<1x32xf32> to vector<2x32xf32>
    %262 = arith.mulf %260, %261 : vector<2x32xf32>
    %263 = vector.broadcast %242 : vector<1x32xf32> to vector<2x32xf32>
    %264 = arith.addf %262, %263 : vector<2x32xf32>
    %cst_102 = arith.constant dense<0.000000e+00> : vector<2x16xf32>
    %265 = tpu.matmul %264, %1, %cst_102 {dimension_numbers = #tpu.dot_dimension_numbers<[1], [0], [0], [1], [0, 0, 1, 1], [], []>} : vector<2x32xf32>, vector<32x16xf32>, vector<2x16xf32> -> vector<2x16xf32>
    %c0_103 = arith.constant 0 : index
    %c0_104 = arith.constant 0 : index
    %c0_105 = arith.constant 0 : index
    %266 = vector.load %arg7[%c0_103, %c0_104, %c0_105] : memref<1x2x16xf32, #tpu.memory_space<vmem>>, vector<1x2x16xf32>
    %267 = vector.shape_cast %266 : vector<1x2x16xf32> to vector<2x16xf32>
    %268 = vector.shape_cast %265 : vector<2x16xf32> to vector<1x2x16xf32>
    tpu.vector_store %arg7[%c0_103, %c0_104, %c0_105], %268 {strides = array<i32>} : memref<1x2x16xf32, #tpu.memory_space<vmem>>, vector<1x2x16xf32>,
    return
  }
  func.func @transform_0(%arg0: i32) -> (i32, i32, i32) {
    %c0_i32 = arith.constant 0 : i32
    %c0_i32_0 = arith.constant 0 : i32
    %c0_i32_1 = arith.constant 0 : i32
    return %arg0, %c0_i32, %c0_i32_0 : i32, i32, i32
  }
  func.func @transform_1(%arg0: i32) -> (i32, i32, i32) {
    %c0_i32 = arith.constant 0 : i32
    %c0_i32_0 = arith.constant 0 : i32
    %c0_i32_1 = arith.constant 0 : i32
    %c0_i32_2 = arith.constant 0 : i32
    return %c0_i32, %c0_i32_0, %c0_i32_1 : i32, i32, i32
  }
  func.func @transform_2(%arg0: i32) -> (i32, i32, i32) {
    %c0_i32 = arith.constant 0 : i32
    %c0_i32_0 = arith.constant 0 : i32
    %c0_i32_1 = arith.constant 0 : i32
    %c0_i32_2 = arith.constant 0 : i32
    return %c0_i32, %c0_i32_0, %c0_i32_1 : i32, i32, i32
  }
  func.func @transform_3(%arg0: i32) -> (i32, i32) {
    %c0_i32 = arith.constant 0 : i32
    %c0_i32_0 = arith.constant 0 : i32
    %c0_i32_1 = arith.constant 0 : i32
    return %c0_i32, %c0_i32_0 : i32, i32
  }
  func.func @transform_4(%arg0: i32) -> (i32, i32) {
    %c0_i32 = arith.constant 0 : i32
    %c0_i32_0 = arith.constant 0 : i32
    %c0_i32_1 = arith.constant 0 : i32
    return %c0_i32, %c0_i32_0 : i32, i32
  }
  func.func @transform_5(%arg0: i32) -> (i32, i32) {
    %c0_i32 = arith.constant 0 : i32
    %c0_i32_0 = arith.constant 0 : i32
    %c0_i32_1 = arith.constant 0 : i32
    return %c0_i32, %c0_i32_0 : i32, i32
  }
  func.func @transform_6(%arg0: i32) -> (i32, i32, i32) {
    %c0_i32 = arith.constant 0 : i32
    %c0_i32_0 = arith.constant 0 : i32
    %c0_i32_1 = arith.constant 0 : i32
    return %arg0, %c0_i32, %c0_i32_0 : i32, i32, i32
  }
}

</mosaic_0001>

<bundles_post_ra>
// kernel: encode_image.1
= control target key start
LH: loop header
LB: loop body
LE: loop exit
PB: predicated region body
PF: predicated region fallthrough
CT: control target
= control target key end

     0   :  { %s11918_s0 = inlined_call_operand.vmem [shape: f32[1,48,64], index: 0, kind: input, shape index: {}]   ;;  %s11919_s1 = inlined_call_operand.vmem [shape: f32[2,32,256], index: 1, kind: input, shape index: {}]   ;;  %s11920_s2 = inlined_call_operand.vmem [shape: f32[2,128,32], index: 2, kind: input, shape index: {}]   ;;  %s11921_s3 = inlined_call_operand.vmem [shape: f32[144,32], index: 3, kind: input, shape index: {}]   ;;  %s11922_s4 = inlined_call_operand.vmem [shape: f32[20,128], index: 4, kind: input, shape index: {}]   ;;  %s11923_s5 = inlined_call_operand.vmem [shape: f32[48,48], index: 5, kind: input, shape index: {}]   ;;  %s11924_s6 = inlined_call_operand.hbm [shape: f32[1,2,16], index: 6, kind: output, shape index: {}]  }
   0x1   :  { %v31_v0 = vld [vmem:[%s11921_s3 + $0x38] sm:$0xff]  ;;  %v30_v1 = vld [vmem:[%s11921_s3 + $0x30] sm:$0xff]  ;;  %v29_v2 = vld [vmem:[%s11921_s3 + $0x28] sm:$0xff] }
   0x2   :  { %75 = vmatpush.msra.mxu0 %v31_v0  ;;  %v28_v3 = vld [vmem:[%s11921_s3 + $0x20] sm:$0xff]  ;;  %v27_v4 = vld [vmem:[%s11921_s3 + $0x18] sm:$0xff]  ;;  %v26_v5 = vld [vmem:[%s11921_s3 + $0x10] sm:$0xff] }
   0x3   :  { %v25_v6 = vld [vmem:[%s11921_s3 + $0x8] sm:$0xff] }
   0x4   :  { %76 = vmatpush.msra.mxu0 %v30_v1 }
   0x6   :  { %77 = vmatpush.msra.mxu0 %v29_v2 }
   0x8   :  { %78 = vmatpush.msra.mxu0 %v28_v3 }
   0xa   :  { %79 = vmatpush.msra.mxu0 %v27_v4 }
   0xc   :  { %80 = vmatpush.msra.mxu0 %v26_v5 }
   0xd   :  { %11 = vsyncpa [#allocation3], 0  ;;  %v24_v7 = vld [vmem:[%s11921_s3] sm:$0xff]  ;;  %vm48_vm0 = vcmask 523264   ;;  %v43_v9 = vld [vmem:[%s11918_s0 + $0x8] sm:$0xff]  ;;  %vm104_vm1 = vcmask 261120  }
   0xe   :  { %81 = vmatpush.msra.mxu0 %v25_v6  ;;  %v42_v8 = vld [vmem:[%s11918_s0] sm:$0xff]  ;;  %v44_v10 = vld [vmem:[%s11918_s0 + $0x10] sm:$0xff]  ;;  %v45_v11 = vld [vmem:[%s11918_s0 + $0x18] sm:$0xff]  ;;  %v7830_v50 = vmov 32.0   ;;  %s7831_s29 = smov 104   ;;  %s7832_s30 = smov 80  }
   0xf   :  { %v46_v12 = vld [vmem:[%s11918_s0 + $0x20] sm:$0xff]  ;;  %v47_v13 = vld [vmem:[%s11918_s0 + $0x28] sm:$0xff]  ;;  %v39_v17 = vld [vmem:[%s11921_s3 + $0x78] sm:$0xff]  ;;  %7494 = vrcp.f32 %v7830_v50  ;;  %s7833_s7 = smov 56   ;;  %s7836_s8 = smov 120  }
  0x10   :  { %82 = vmatpush.msra.mxu0 %v24_v7  ;;  %v40_v21 = vld [vmem:[%s11921_s3 + $0x80] sm:$0xff]  ;;  %v41_v27 = vld [vmem:[%s11921_s3 + $0x88] sm:$0xff]  ;;  %v38_v43 = vld [vmem:[%s11921_s3 + $0x70] sm:$0xff]  ;;  %s7837_s9 = smov 112   ;;  %s7838_s26 = smov 32  }
  0x11   :  { %7078 = vmatmul.msk.f32.vlgmr.msra.gmra.mxu0 %vm48_vm0, %v42_v8  ;;  %v36_v29 = vld [vmem:[%s11921_s3 + $0x60] sm:$0xff]  ;;  %v37_v32 = vld [vmem:[%s11921_s3 + $0x68] sm:$0xff]  ;;  %s7839_s11 = smov 16   ;;  %s7840_s12 = smov 8  }
  0x12   :  { %s7841_s13 = smov 24  }
  0x15   :  { %v7495_v51 = vpop.eup %7494 }
  0x16   :  { %v124_v52 = vmul.f32 32.0, %v7495_v51  ;;  %vm128_vm2 = vweird.f32 %v7495_v51 }
  0x18   :  { %v125_v53 = vsub.f32 1.0, %v124_v52 }
  0x19   :  { %7079 = vmatmul.msk.f32.gmra.mxu0 %vm48_vm0, %v43_v9 }
  0x1a   :  { %v126_v54 = vmul.f32 %v7495_v51, %v125_v53 }
  0x1c   :  { %v127_v55 = vadd.f32 %v7495_v51, %v126_v54 }
  0x1e   :  { %v7980_v57 = vsel %vm128_vm2, %v7495_v51, %v127_v55 }
  0x21   :  { %7080 = vmatmul.msk.f32.gmra.mxu0 %vm48_vm0, %v44_v10 }
  0x29   :  { %7081 = vmatmul.msk.f32.gmra.mxu0 %vm48_vm0, %v45_v11 }
  0x31   :  { %7082 = vmatmul.msk.f32.gmra.mxu0 %vm48_vm0, %v46_v12 }
  0x39   :  { %7083 = vmatmul.msk.f32.gmra.mxu0 %vm48_vm0, %v47_v13 }
  0x8e   :  { %v84_v14 = vpop.f32.mrf.mxu0 }
  0x8f   :  { %v7950_v33 = vadd.f32 %v84_v14, %v36_v29 }
  0x91   :  { %v136_v39 = vmul.f32 %v7950_v33, %v7950_v33  ;;  %v105_v42 = vsel %vm104_vm1, %v7950_v33, 0.0 }
  0x93   :  { %v142_v41 = vsel %vm104_vm1, %v136_v39, 0.0  ;;  %v8008_v39 = vld [vmem:[%s11922_s4] ss:$0 sm:$0xff] }
  0x96   :  { %v87_v15 = vpop.f32.mrf.mxu0 }
  0x97   :  { %v7957_v37 = vadd.f32 %v87_v15, %v37_v32 }
  0x99   :  { %v137_v40 = vmul.f32 %v7957_v37, %v7957_v37  ;;  %v108_v47 = vsel %vm104_vm1, %v7957_v37, 0.0 }
  0x9b   :  { %v145_v44 = vsel %vm104_vm1, %v137_v40, 0.0 }
  0x9e   :  { %v90_v16 = vpop.f32.mrf.mxu0 }
  0x9f   :  { %v7971_v45 = vadd.f32 %v90_v16, %v38_v43 }
  0xa1   :  { %v111_v46 = vsel %vm104_vm1, %v7971_v45, 0.0  ;;  %v138_v48 = vmul.f32 %v7971_v45, %v7971_v45 }
  0xa3   :  { %v148_v49 = vsel %vm104_vm1, %v138_v48, 0.0 }
  0xa6   :  { %v93_v18 = vpop.f32.mrf.mxu0 }
  0xa7   :  { %v7923_v19 = vadd.f32 %v93_v18, %v39_v17 }
  0xa9   :  { %v114_v20 = vsel %vm104_vm1, %v7923_v19, 0.0  ;;  %v139_v22 = vmul.f32 %v7923_v19, %v7923_v19 }
  0xaa   :  { %115 = vadd.xlane.f32.xlu0 %v114_v20 }
  0xab   :  { %v151_v26 = vsel %vm104_vm1, %v139_v22, 0.0 }
  0xae   :  { %v96_v23 = vpop.f32.mrf.mxu0 }
  0xaf   :  { %v7932_v24 = vadd.f32 %v96_v23, %v40_v21 }
  0xb1   :  { %v117_v25 = vsel %vm104_vm1, %v7932_v24, 0.0  ;;  %v140_v28 = vmul.f32 %v7932_v24, %v7932_v24 }
  0xb2   :  { %118 = vadd.xlane.f32.xlu1 %v117_v25  ;;  %152 = vadd.xlane.f32.xlu0 %v151_v26 }
  0xb3   :  { %v154_v35 = vsel %vm104_vm1, %v140_v28, 0.0 }
  0xb6   :  { %v99_v30 = vpop.f32.mrf.mxu0 }
  0xb7   :  { %v7945_v31 = vadd.f32 %v99_v30, %v41_v27 }
  0xb9   :  { %v120_v34 = vsel %vm104_vm1, %v7945_v31, 0.0  ;;  %v141_v36 = vmul.f32 %v7945_v31, %v7945_v31 }
  0xba   :  { %121 = vadd.xlane.f32.xlu2 %v120_v34  ;;  %155 = vadd.xlane.f32.xlu1 %v154_v35 }
  0xbb   :  { %v157_v38 = vsel %vm104_vm1, %v141_v36, 0.0 }
  0xbc   :  { %158 = vadd.xlane.f32.xlu0 %v157_v38 }
  0xc2   :  { %143 = vadd.xlane.f32.xlu1 %v142_v41  ;;  %106 = vadd.xlane.f32.xlu2 %v105_v42 }
  0xc4   :  { %146 = vadd.xlane.f32.xlu0 %v145_v44 }
  0xca   :  { %112 = vadd.xlane.f32.xlu1 %v111_v46  ;;  %109 = vadd.xlane.f32.xlu2 %v108_v47 }
  0xd2   :  { %149 = vadd.xlane.f32.xlu2 %v148_v49 }
 0x11d   :  { %v116_v56 = vpop.xlane.xlu0 %115 }
 0x11e   :  { %v133_v58 = vmul.f32 %v7980_v57, %v116_v56 }
 0x120   :  { %v175_v61 = vmul.f32 %v133_v58, %v133_v58  ;;  %v169_v34 = vsub.f32 %v7923_v19, %v133_v58  ;;  %v8017_v19 = vld [vmem:[%s11922_s4 + $0x1] ss:$0 sm:$0xff] }
 0x125   :  { %v119_v59 = vpop.xlane.xlu1 %118  ;;  %v153_v60 = vpop.xlane.xlu0 %152 }
 0x126   :  { %v163_v62 = vmul.f32 %v153_v60, %v7980_v57  ;;  %v7985_v0 = vmul.f32 %v7980_v57, %v119_v59 }
 0x128   :  { %v181_v63 = vsub.f32 %v163_v62, %v175_v61  ;;  %v176_v4 = vmul.f32 %v7985_v0, %v7985_v0  ;;  %v170_v60 = vsub.f32 %v7932_v24, %v7985_v0 }
 0x12a   :  { %v187_v1 = vadd.f32 1e-05, %v181_v63 }
 0x12c   :  { %7496 = vrsqrt.f32 %v187_v1  ;;  %vm226_vm4 = vweird.f32 %v187_v1 }
 0x12d   :  { %v122_v2 = vpop.xlane.xlu2 %121  ;;  %v156_v3 = vpop.xlane.xlu1 %155 }
 0x12e   :  { %v7990_v5 = vmul.f32 %v7980_v57, %v122_v2  ;;  %v164_v6 = vmul.f32 %v156_v3, %v7980_v57 }
 0x12f   :  { %v159_v7 = vpop.xlane.xlu0 %158 }
 0x130   :  { %v177_v8 = vmul.f32 %v7990_v5, %v7990_v5  ;;  %v182_v9 = vsub.f32 %v164_v6, %v176_v4  ;;  %v165_v10 = vmul.f32 %v159_v7, %v7980_v57  ;;  %v171_v61 = vsub.f32 %v7945_v31, %v7990_v5 }
 0x132   :  { %v7497_v11 = vpop.eup %7496  ;;  %v188_v12 = vadd.f32 1e-05, %v182_v9  ;;  %v183_v13 = vsub.f32 %v165_v10, %v177_v8 }
 0x133   :  { %v221_v14 = vmul.f32 %v7497_v11, %v187_v1  ;;  %vm227_vm3 = vweird.f32 %v7497_v11 }
 0x134   :  { %7498 = vrsqrt.f32 %v188_v12  ;;  %v189_v15 = vadd.f32 1e-05, %v183_v13  ;;  %vm228_vm5 = vmor %vm226_vm4, %vm227_vm3  ;;  %vm236_vm7 = vweird.f32 %v188_v12 }
 0x135   :  { %v222_v16 = vmul.f32 %v7497_v11, %v221_v14  ;;  %v144_v17 = vpop.xlane.xlu1 %143  ;;  %v107_v18 = vpop.xlane.xlu2 %106 }
 0x136   :  { %7500 = vrsqrt.f32 %v189_v15  ;;  %v7997_v20 = vmul.f32 %v7980_v57, %v107_v18  ;;  %v160_v22 = vmul.f32 %v144_v17, %v7980_v57  ;;  %vm246_vm10 = vweird.f32 %v189_v15 }
 0x137   :  { %v223_v21 = vmul.f32 0.5, %v222_v16  ;;  %v147_v40 = vpop.xlane.xlu0 %146 }
 0x138   :  { %v172_v23 = vmul.f32 %v7997_v20, %v7997_v20  ;;  %v161_v48 = vmul.f32 %v147_v40, %v7980_v57 }
 0x139   :  { %v224_v25 = vsub.f32 1.5, %v223_v21 }
 0x13a   :  { %v7499_v26 = vpop.eup %7498  ;;  %v178_v27 = vsub.f32 %v160_v22, %v172_v23 }
 0x13b   :  { %v225_v28 = vmul.f32 %v7497_v11, %v224_v25  ;;  %v231_v29 = vmul.f32 %v7499_v26, %v188_v12  ;;  %vm237_vm6 = vweird.f32 %v7499_v26 }
 0x13c   :  { %v7501_v30 = vpop.eup %7500  ;;  %v8002_v32 = vadd.f32 1e-05, %v178_v27  ;;  %vm8033_vm9 = vmor %vm236_vm7, %vm237_vm6 }
 0x13d   :  { %v229_v35 = vsel %vm228_vm5, %v7497_v11, %v225_v28  ;;  %v232_v36 = vmul.f32 %v7499_v26, %v231_v29  ;;  %v241_v38 = vmul.f32 %v7501_v30, %v189_v15  ;;  %v110_v41 = vpop.xlane.xlu2 %109  ;;  %v113_v46 = vpop.xlane.xlu1 %112  ;;  %vm247_vm8 = vweird.f32 %v7501_v30 }
 0x13e   :  { %7502 = vrsqrt.f32 %v8002_v32  ;;  %v8012_v42 = vmul.f32 %v7980_v57, %v110_v41  ;;  %v253_v47 = vmul.f32 %v229_v35, %v169_v34  ;;  %v8024_v53 = vmul.f32 %v7980_v57, %v113_v46  ;;  %vm248_vm11 = vmor %vm246_vm10, %vm247_vm8 }
 0x13f   :  { %v233_v43 = vmul.f32 0.5, %v232_v36  ;;  %v242_v44 = vmul.f32 %v7501_v30, %v241_v38  ;;  %vm196_vm13 = vweird.f32 %v8002_v32 }
 0x140   :  { %v173_v49 = vmul.f32 %v8012_v42, %v8012_v42  ;;  %v260_v52 = vmul.f32 %v8008_v39, %v253_v47  ;;  %v174_v24 = vmul.f32 %v8024_v53, %v8024_v53  ;;  %v167_v46 = vsub.f32 %v7957_v37, %v8012_v42 }
 0x141   :  { %v234_v50 = vsub.f32 1.5, %v233_v43  ;;  %v243_v51 = vmul.f32 0.5, %v242_v44 }
 0x142   :  { %v179_v54 = vsub.f32 %v161_v48, %v173_v49  ;;  %v8027_v58 = vadd.f32 %v8017_v19, %v260_v52 }
 0x143   :  { %v235_v55 = vmul.f32 %v7499_v26, %v234_v50  ;;  %v244_v56 = vsub.f32 1.5, %v243_v51 }
 0x144   :  { %v7503_v59 = vpop.eup %7502  ;;  %v185_v63 = vadd.f32 1e-05, %v179_v54  ;;  %v287_v31 = vsel %vm104_vm1, %v8027_v58, 0.0  ;;  %v305_v7 = vmul.f32 %v8027_v58, %v8027_v58 }
 0x145   :  { %v239_v1 = vsel %vm8033_vm9, %v7499_v26, %v235_v55  ;;  %v245_v2 = vmul.f32 %v7501_v30, %v244_v56  ;;  %v191_v3 = vmul.f32 %v7503_v59, %v8002_v32  ;;  %v150_v4 = vpop.xlane.xlu2 %149  ;;  %288 = vadd.xlane.f32.xlu0 %v287_v31  ;;  %vm197_vm12 = vweird.f32 %v7503_v59 }
 0x146   :  { %7504 = vrsqrt.f32 %v185_v63  ;;  %v162_v0 = vmul.f32 %v150_v4, %v7980_v57  ;;  %v254_v8 = vmul.f32 %v239_v1, %v170_v60  ;;  %v317_v12 = vsel %vm104_vm1, %v305_v7, 0.0  ;;  %vm198_vm14 = vmor %vm196_vm13, %vm197_vm12 }
 0x147   :  { %v249_v5 = vsel %vm248_vm11, %v7501_v30, %v245_v2  ;;  %v192_v6 = vmul.f32 %v7503_v59, %v191_v3  ;;  %318 = vadd.xlane.f32.xlu1 %v317_v12  ;;  %v166_v26 = vsub.f32 %v7950_v33, %v7997_v20  ;;  %vm206_vm0 = vweird.f32 %v185_v63 }
 0x148   :  { %v180_v9 = vsub.f32 %v162_v0, %v174_v24  ;;  %v255_v10 = vmul.f32 %v249_v5, %v171_v61  ;;  %v261_v13 = vmul.f32 %v8008_v39, %v254_v8  ;;  %v168_v56 = vsub.f32 %v7971_v45, %v8024_v53  ;;  %v439_v24 = vld [vmem:[%s11919_s1 + $0x30] sm:$0xff]  ;;  %v436_v0 = vld [vmem:[%s11919_s1] sm:$0xff] }
 0x149   :  { %v193_v11 = vmul.f32 0.5, %v192_v6  ;;  %7305 = vmatpush.msra.mxu3 %v439_v24  ;;  %472 = vmatpush.msra.mxu1 %v439_v24 }
 0x14a   :  { %v186_v14 = vadd.f32 1e-05, %v180_v9  ;;  %v262_v15 = vmul.f32 %v8008_v39, %v255_v10  ;;  %v8051_v17 = vadd.f32 %v8017_v19, %v261_v13 }
 0x14b   :  { %v194_v16 = vsub.f32 1.5, %v193_v11 }
 0x14c   :  { %v7505_v18 = vpop.eup %7504  ;;  %7506 = vrsqrt.f32 %v186_v14  ;;  %v8054_v21 = vadd.f32 %v8017_v19, %v262_v15  ;;  %v290_v25 = vsel %vm104_vm1, %v8051_v17, 0.0  ;;  %v306_v27 = vmul.f32 %v8051_v17, %v8051_v17 }
 0x14d   :  { %v195_v22 = vmul.f32 %v7503_v59, %v194_v16  ;;  %v201_v23 = vmul.f32 %v7505_v18, %v185_v63  ;;  %291 = vadd.xlane.f32.xlu2 %v290_v25  ;;  %vm207_vm15 = vweird.f32 %v7505_v18  ;;  %vm216_vm4 = vweird.f32 %v186_v14 }
 0x14e   :  { %v293_v30 = vsel %vm104_vm1, %v8054_v21, 0.0  ;;  %v320_v32 = vsel %vm104_vm1, %v306_v27, 0.0  ;;  %v307_v40 = vmul.f32 %v8054_v21, %v8054_v21  ;;  %vm208_vm2 = vmor %vm206_vm0, %vm207_vm15 }
 0x14f   :  { %v199_v28 = vsel %vm198_vm14, %v7503_v59, %v195_v22  ;;  %v202_v29 = vmul.f32 %v7505_v18, %v201_v23  ;;  %321 = vadd.xlane.f32.xlu0 %v320_v32  ;;  %294 = vadd.xlane.f32.xlu1 %v293_v30 }
 0x150   :  { %v250_v34 = vmul.f32 %v199_v28, %v166_v26  ;;  %v323_v52 = vsel %vm104_vm1, %v307_v40, 0.0 }
 0x151   :  { %v203_v35 = vmul.f32 0.5, %v202_v29 }
 0x152   :  { %v7507_v36 = vpop.eup %7506  ;;  %v257_v38 = vmul.f32 %v8008_v39, %v250_v34 }
 0x153   :  { %v204_v33 = vsub.f32 1.5, %v203_v35  ;;  %v211_v20 = vmul.f32 %v7507_v36, %v186_v14  ;;  %vm217_vm3 = vweird.f32 %v7507_v36 }
 0x154   :  { %v8070_v41 = vadd.f32 %v8017_v19, %v257_v38  ;;  %vm218_vm5 = vmor %vm216_vm4, %vm217_vm3 }
 0x155   :  { %v205_v43 = vmul.f32 %v7505_v18, %v204_v33  ;;  %v212_v44 = vmul.f32 %v7507_v36, %v211_v20 }
 0x156   :  { %v278_v47 = vsel %vm104_vm1, %v8070_v41, 0.0  ;;  %v302_v48 = vmul.f32 %v8070_v41, %v8070_v41 }
 0x157   :  { %v209_v49 = vsel %vm208_vm2, %v7505_v18, %v205_v43  ;;  %v213_v50 = vmul.f32 0.5, %v212_v44  ;;  %279 = vadd.xlane.f32.xlu2 %v278_v47  ;;  %324 = vadd.xlane.f32.xlu0 %v323_v52 }
 0x158   :  { %v251_v51 = vmul.f32 %v209_v49, %v167_v46  ;;  %v308_v54 = vsel %vm104_vm1, %v302_v48, 0.0 }
 0x159   :  { %v214_v55 = vsub.f32 1.5, %v213_v50  ;;  %309 = vadd.xlane.f32.xlu1 %v308_v54 }
 0x15a   :  { %v258_v37 = vmul.f32 %v8008_v39, %v251_v51 }
 0x15b   :  { %v215_v42 = vmul.f32 %v7507_v36, %v214_v55 }
 0x15c   :  { %v8084_v59 = vadd.f32 %v8017_v19, %v258_v37  ;;  %v8142_v37 = vld [vmem:[%s11922_s4 + $0x4] ss:$0 sm:$0xff] }
 0x15d   :  { %v219_v60 = vsel %vm218_vm5, %v7507_v36, %v215_v42 }
 0x15e   :  { %v281_v61 = vsel %vm104_vm1, %v8084_v59, 0.0  ;;  %v303_v62 = vmul.f32 %v8084_v59, %v8084_v59  ;;  %v252_v63 = vmul.f32 %v219_v60, %v168_v56 }
 0x15f   :  { %282 = vadd.xlane.f32.xlu2 %v281_v61 }
 0x160   :  { %v311_v1 = vsel %vm104_vm1, %v303_v62, 0.0  ;;  %v259_v2 = vmul.f32 %v8008_v39, %v252_v63  ;;  %v438_v39 = vld [vmem:[%s11919_s1 + $0x20] sm:$0xff] }
 0x161   :  { %312 = vadd.xlane.f32.xlu0 %v311_v1  ;;  %7306 = vmatpush.msra.mxu3 %v438_v39  ;;  %v8150_v63 = vld [vmem:[%s11922_s4 + $0x5] ss:$0 sm:$0xff] }
 0x162   :  { %v8093_v45 = vadd.f32 %v8017_v19, %v259_v2  ;;  %473 = vmatpush.msra.mxu1 %v438_v39  ;;  %v437_v19 = vld [vmem:[%s11919_s1 + $0x10] sm:$0xff] }
 0x163   :  { %7307 = vmatpush.msra.mxu3 %v437_v19 }
 0x164   :  { %v284_v53 = vsel %vm104_vm1, %v8093_v45, 0.0  ;;  %v304_v3 = vmul.f32 %v8093_v45, %v8093_v45  ;;  %474 = vmatpush.msra.mxu1 %v437_v19 }
 0x165   :  { %285 = vadd.xlane.f32.xlu1 %v284_v53  ;;  %7308 = vmatpush.msra.mxu3 %v436_v0 }
 0x166   :  { %v314_v4 = vsel %vm104_vm1, %v304_v3, 0.0  ;;  %475 = vmatpush.msra.mxu1 %v436_v0 }
 0x167   :  { %315 = vadd.xlane.f32.xlu2 %v314_v4 }
 0x1b8   :  { %v289_v31 = vpop.xlane.xlu0 %288 }
 0x1b9   :  { %v299_v5 = vmul.f32 %v289_v31, %v7980_v57 }
 0x1ba   :  { %v319_v7 = vpop.xlane.xlu1 %318 }
 0x1bb   :  { %v341_v6 = vmul.f32 %v299_v5, %v299_v5  ;;  %v329_v8 = vmul.f32 %v319_v7, %v7980_v57  ;;  %v335_v52 = vsub.f32 %v8027_v58, %v299_v5 }
 0x1bd   :  { %v347_v9 = vsub.f32 %v329_v8, %v341_v6 }
 0x1bf   :  { %v353_v11 = vadd.f32 1e-05, %v347_v9 }
 0x1c0   :  { %v292_v10 = vpop.xlane.xlu2 %291 }
 0x1c1   :  { %v8115_v12 = vmul.f32 %v292_v10, %v7980_v57  ;;  %7508 = vrsqrt.f32 %v353_v11  ;;  %vm392_vm7 = vweird.f32 %v353_v11 }
 0x1c2   :  { %v322_v14 = vpop.xlane.xlu0 %321  ;;  %v295_v16 = vpop.xlane.xlu1 %294 }
 0x1c3   :  { %v342_v13 = vmul.f32 %v8115_v12, %v8115_v12  ;;  %v330_v15 = vmul.f32 %v322_v14, %v7980_v57  ;;  %v8121_v23 = vmul.f32 %v295_v16, %v7980_v57  ;;  %v336_v8 = vsub.f32 %v8051_v17, %v8115_v12 }
 0x1c5   :  { %v348_v18 = vsub.f32 %v330_v15, %v342_v13  ;;  %v343_v34 = vmul.f32 %v8121_v23, %v8121_v23 }
 0x1c7   :  { %v354_v22 = vadd.f32 1e-05, %v348_v18  ;;  %v7509_v25 = vpop.eup %7508 }
 0x1c8   :  { %v387_v27 = vmul.f32 %v7509_v25, %v353_v11  ;;  %vm393_vm6 = vweird.f32 %v7509_v25 }
 0x1c9   :  { %7510 = vrsqrt.f32 %v354_v22  ;;  %vm394_vm8 = vmor %vm392_vm7, %vm393_vm6  ;;  %vm402_vm10 = vweird.f32 %v354_v22 }
 0x1ca   :  { %v280_v26 = vpop.xlane.xlu2 %279  ;;  %v325_v28 = vpop.xlane.xlu0 %324  ;;  %v388_v30 = vmul.f32 %v7509_v25, %v387_v27 }
 0x1cb   :  { %v8124_v29 = vmul.f32 %v280_v26, %v7980_v57  ;;  %v331_v32 = vmul.f32 %v325_v28, %v7980_v57 }
 0x1cc   :  { %v310_v35 = vpop.xlane.xlu1 %309  ;;  %v389_v33 = vmul.f32 0.5, %v388_v30 }
 0x1cd   :  { %v338_v36 = vmul.f32 %v8124_v29, %v8124_v29  ;;  %v326_v38 = vmul.f32 %v310_v35, %v7980_v57  ;;  %v349_v20 = vsub.f32 %v331_v32, %v343_v34 }
 0x1ce   :  { %v390_v44 = vsub.f32 1.5, %v389_v33 }
 0x1cf   :  { %v344_v40 = vsub.f32 %v326_v38, %v338_v36  ;;  %v7511_v43 = vpop.eup %7510  ;;  %v355_v46 = vadd.f32 1e-05, %v349_v20  ;;  %v337_v36 = vsub.f32 %v8054_v21, %v8121_v23  ;;  %v332_v38 = vsub.f32 %v8070_v41, %v8124_v29 }
 0x1d0   :  { %v397_v47 = vmul.f32 %v7511_v43, %v354_v22  ;;  %v391_v51 = vmul.f32 %v7509_v25, %v390_v44  ;;  %vm403_vm9 = vweird.f32 %v7511_v43 }
 0x1d1   :  { %v8132_v48 = vadd.f32 1e-05, %v344_v40  ;;  %7512 = vrsqrt.f32 %v355_v46  ;;  %vm404_vm11 = vmor %vm402_vm10, %vm403_vm9  ;;  %vm412_vm14 = vweird.f32 %v355_v46  ;;  %vm556_vm9 = vcmask 1047556  }
 0x1d2   :  { %v283_v49 = vpop.xlane.xlu2 %282  ;;  %v398_v54 = vmul.f32 %v7511_v43, %v397_v47  ;;  %v395_v60 = vsel %vm394_vm8, %v7509_v25, %v391_v51  ;;  %vm1234_vm10 = vcmask 64512  }
 0x1d3   :  { %v8135_v50 = vmul.f32 %v283_v49, %v7980_v57  ;;  %7514 = vrsqrt.f32 %v8132_v48  ;;  %v419_v62 = vmul.f32 %v395_v60, %v335_v52  ;;  %vm362_vm0 = vweird.f32 %v8132_v48 }
 0x1d4   :  { %v313_v55 = vpop.xlane.xlu0 %312  ;;  %v399_v61 = vmul.f32 0.5, %v398_v54 }
 0x1d5   :  { %v339_v42 = vmul.f32 %v8135_v50, %v8135_v50  ;;  %v327_v56 = vmul.f32 %v313_v55, %v7980_v57  ;;  %v426_v3 = vmul.f32 %v8142_v37, %v419_v62  ;;  %v333_v55 = vsub.f32 %v8084_v59, %v8135_v50 }
 0x1d6   :  { %v400_v2 = vsub.f32 1.5, %v399_v61 }
 0x1d7   :  { %v345_v1 = vsub.f32 %v327_v56, %v339_v42  ;;  %v7513_v4 = vpop.eup %7512  ;;  %v433_v0 = vadd.f32 %v8150_v63, %v426_v3 }
 0x1d8   :  { %v286_v53 = vpop.xlane.xlu1 %285  ;;  %v407_v31 = vmul.f32 %v7513_v4, %v355_v46  ;;  %v401_v6 = vmul.f32 %v7511_v43, %v400_v2  ;;  %vm413_vm12 = vweird.f32 %v7513_v4 }
 0x1d9   :  { %v351_v24 = vadd.f32 1e-05, %v345_v1  ;;  %v8154_v39 = vmul.f32 %v286_v53, %v7980_v57  ;;  %v7515_v19 = vpop.eup %7514  ;;  %7087 = vmatmul.msk.f32.vlgmr.msra.gmra.mxu3 %vm104_vm1, %v433_v0  ;;  %vm414_vm15 = vmor %vm412_vm14, %vm413_vm12 }
 0x1da   :  { %v316_v5 = vpop.xlane.xlu2 %315  ;;  %v357_v7 = vmul.f32 %v7515_v19, %v8132_v48  ;;  %v408_v9 = vmul.f32 %v7513_v4, %v407_v31  ;;  %v405_v14 = vsel %vm404_vm11, %v7511_v43, %v401_v6  ;;  %vm363_vm13 = vweird.f32 %v7515_v19  ;;  %v7478_v31 = vld [vmem:[%s11922_s4 + $0x6] ss:$0 sm:$0xff] }
 0x1db   :  { %7516 = vrsqrt.f32 %v351_v24  ;;  %v340_v10 = vmul.f32 %v8154_v39, %v8154_v39  ;;  %v328_v11 = vmul.f32 %v316_v5, %v7980_v57  ;;  %v420_v18 = vmul.f32 %v405_v14, %v336_v8  ;;  %vm364_vm2 = vmor %vm362_vm0, %vm363_vm13 }
 0x1dc   :  { %v358_v13 = vmul.f32 %v7515_v19, %v357_v7  ;;  %v409_v15 = vmul.f32 0.5, %v408_v9  ;;  %vm372_vm4 = vweird.f32 %v351_v24  ;;  %v334_v50 = vsub.f32 %v8093_v45, %v8154_v39 }
 0x1dd   :  { %v346_v16 = vsub.f32 %v328_v11, %v340_v10  ;;  %v427_v12 = vmul.f32 %v8142_v37, %v420_v18  ;;  %vm1525_vm11 = vcmask 392192  }
 0x1de   :  { %v359_v22 = vmul.f32 0.5, %v358_v13  ;;  %v410_v25 = vsub.f32 1.5, %v409_v15 }
 0x1df   :  { %v352_v26 = vadd.f32 1e-05, %v346_v16  ;;  %v434_v34 = vadd.f32 %v8150_v63, %v427_v12  ;;  %v7834_v16 = vmov 1983009808  }
 0x1e0   :  { %v360_v28 = vsub.f32 1.5, %v359_v22  ;;  %v411_v32 = vmul.f32 %v7513_v4, %v410_v25  ;;  %v561_v18 = vunpack.c.l.s4 %v7834_v16 }
 0x1e1   :  { %v7517_v27 = vpop.eup %7516  ;;  %7518 = vrsqrt.f32 %v352_v26  ;;  %7088 = vmatmul.msk.f32.gmra.mxu3 %vm104_vm1, %v434_v34  ;;  %vm382_vm7 = vweird.f32 %v352_v26 }
 0x1e2   :  { %v367_v30 = vmul.f32 %v7517_v27, %v351_v24  ;;  %v361_v35 = vmul.f32 %v7515_v19, %v360_v28  ;;  %v415_v20 = vsel %vm414_vm15, %v7513_v4, %v411_v32  ;;  %vm373_vm3 = vweird.f32 %v7517_v27 }
 0x1e3   :  { %v421_v44 = vmul.f32 %v415_v20, %v337_v36  ;;  %vm374_vm5 = vmor %vm372_vm4, %vm373_vm3  ;;  %v8226_v12 = vunpack.c.0.s8 %v561_v18  ;;  %v7835_v32 = vmov 1934713408  }
 0x1e4   :  { %v368_v33 = vmul.f32 %v7517_v27, %v367_v30  ;;  %v365_v40 = vsel %vm364_vm2, %v7515_v19, %v361_v35  ;;  %v585_v35 = vunpack.c.l.s4 %v7835_v32 }
 0x1e5   :  { %v416_v46 = vmul.f32 %v365_v40, %v332_v38  ;;  %v428_v49 = vmul.f32 %v8142_v37, %v421_v44 }
 0x1e6   :  { %v369_v43 = vmul.f32 0.5, %v368_v33 }
 0x1e7   :  { %v7519_v47 = vpop.eup %7518  ;;  %v423_v51 = vmul.f32 %v8142_v37, %v416_v46  ;;  %v435_v29 = vadd.f32 %v8150_v63, %v428_v49 }
 0x1e8   :  { %v370_v48 = vsub.f32 1.5, %v369_v43  ;;  %v377_v23 = vmul.f32 %v7519_v47, %v352_v26  ;;  %vm383_vm6 = vweird.f32 %v7519_v47 }
 0x1e9   :  { %v430_v52 = vadd.f32 %v8150_v63, %v423_v51  ;;  %7089 = vmatmul.msk.f32.gmra.mxu3 %vm104_vm1, %v435_v29  ;;  %vm384_vm8 = vmor %vm382_vm7, %vm383_vm6  ;;  %v8235_v51 = vunpack.c.0.s8 %v585_v35 }
 0x1ea   :  { %v371_v54 = vmul.f32 %v7517_v27, %v370_v48  ;;  %v378_v42 = vmul.f32 %v7519_v47, %v377_v23 }
 0x1eb   :  { %7084 = vmatmul.msk.f32.vlgmr.msra.gmra.mxu1 %vm104_vm1, %v430_v52 }
 0x1ec   :  { %v375_v56 = vsel %vm374_vm5, %v7517_v27, %v371_v54  ;;  %v379_v60 = vmul.f32 0.5, %v378_v42 }
 0x1ed   :  { %v417_v61 = vmul.f32 %v375_v56, %v333_v55 }
 0x1ee   :  { %v380_v62 = vsub.f32 1.5, %v379_v60 }
 0x1ef   :  { %v424_v1 = vmul.f32 %v8142_v37, %v417_v61 }
 0x1f0   :  { %v381_v53 = vmul.f32 %v7519_v47, %v380_v62 }
 0x1f1   :  { %v431_v2 = vadd.f32 %v8150_v63, %v424_v1 }
 0x1f2   :  { %v385_v3 = vsel %vm384_vm8, %v7519_v47, %v381_v53 }
 0x1f3   :  { %7085 = vmatmul.msk.f32.gmra.mxu1 %vm104_vm1, %v431_v2  ;;  %v418_v4 = vmul.f32 %v385_v3, %v334_v50 }
 0x1f5   :  { %v425_v24 = vmul.f32 %v8142_v37, %v418_v4 }
 0x1f7   :  { %v432_v19 = vadd.f32 %v8150_v63, %v425_v24 }
 0x1fb   :  { %7086 = vmatmul.msk.f32.gmra.mxu1 %vm104_vm1, %v432_v19 }
 0x25c   :  { %v486_v0 = vpop.f32.mrf.mxu3 }
 0x25d   :  { %v487_v5 = vadd.f32 %v7478_v31, %v486_v0 }
 0x25f   :  { %507 = vrot.lane.b32.xlu0 %v487_v5, %s7831_s29  ;;  %525 = vrot.lane.b32.xlu2 %v487_v5, %s7832_s30  ;;  %v726_v26 = vrot.slane %v487_v5, 4 }
 0x260   :  { %543 = vrot.lane.b32.xlu1 %v487_v5, %s7833_s7 }
 0x264   :  { %v489_v37 = vpop.f32.mrf.mxu3 }
 0x265   :  { %v490_v39 = vadd.f32 %v7478_v31, %v489_v37 }
 0x267   :  { %527 = vrot.lane.b32.xlu2 %v490_v39, %s7832_s30  ;;  %509 = vrot.lane.b32.xlu0 %v490_v39, %s7831_s29  ;;  %v782_v30 = vrot.slane %v490_v39, 4 }
 0x268   :  { %v477_v63 = vpop.f32.mrf.mxu1  ;;  %545 = vrot.lane.b32.xlu1 %v490_v39, %s7833_s7 }
 0x269   :  { %v8216_v13 = vadd.f32 %v7478_v31, %v477_v63 }
 0x26b   :  { %v558_v48 = vrot.slane %v8216_v13, 4 }
 0x26c   :  { %v492_v6 = vpop.f32.mrf.mxu3 }
 0x26d   :  { %v8197_v7 = vadd.f32 %v7478_v31, %v492_v6 }
 0x26f   :  { %547 = vrot.lane.b32.xlu2 %v8197_v7, %s7833_s7  ;;  %511 = vrot.lane.b32.xlu0 %v8197_v7, %s7831_s29  ;;  %v838_v62 = vrot.slane %v8197_v7, 4 }
 0x270   :  { %v480_v8 = vpop.f32.mrf.mxu1  ;;  %529 = vrot.lane.b32.xlu1 %v8197_v7, %s7832_s30 }
 0x271   :  { %v8208_v11 = vadd.f32 %v7478_v31, %v480_v8 }
 0x273   :  { %v614_v19 = vrot.slane %v8208_v11, 4 }
 0x278   :  { %v483_v9 = vpop.f32.mrf.mxu1 }
 0x279   :  { %v484_v10 = vadd.f32 %v7478_v31, %v483_v9 }
 0x27b   :  { %541 = vrot.lane.b32.xlu1 %v484_v10, %s7833_s7  ;;  %523 = vrot.lane.b32.xlu2 %v484_v10, %s7832_s30  ;;  %v670_v46 = vrot.slane %v484_v10, 4 }
 0x27c   :  { %505 = vrot.lane.b32.xlu0 %v484_v10, %s7831_s29 }
 0x283   :  { %539 = vrot.lane.b32.xlu1 %v8208_v11, %s7833_s7  ;;  %521 = vrot.lane.b32.xlu2 %v8208_v11, %s7832_s30 }
 0x284   :  { %503 = vrot.lane.b32.xlu0 %v8208_v11, %s7831_s29 }
 0x28b   :  { %537 = vrot.lane.b32.xlu1 %v8216_v13, %s7833_s7  ;;  %519 = vrot.lane.b32.xlu2 %v8216_v13, %s7832_s30 }
 0x28c   :  { %501 = vrot.lane.b32.xlu0 %v8216_v13, %s7831_s29 }
 0x2b9   :  { %v526_v14 = vpop.permute.xlu2 %525 }
 0x2ba   :  { %v724_v22 = vrot.slane %v526_v14, 4  ;;  %v727_v27 = vsel %vm556_vm9, %v526_v14, %v726_v26 }
 0x2bb   :  { %v735_v36 = vperm.slane %v727_v27, %v8226_v12 }
 0x2bc   :  { %v725_v28 = vsel %vm556_vm9, %v724_v22, %v487_v5 }
 0x2bd   :  { %v731_v33 = vperm.slane %v725_v28, %v8226_v12  ;;  %v762_v52 = vrot.slane %v735_v36, 4 }
 0x2bf   :  { %v750_v56 = vrot.slane %v731_v33, 4 }
 0x2c1   :  { %v528_v15 = vpop.permute.xlu2 %527 }
 0x2c2   :  { %v780_v34 = vrot.slane %v528_v15, 4  ;;  %v783_v20 = vsel %vm556_vm9, %v528_v15, %v782_v30 }
 0x2c3   :  { %v791_v54 = vperm.slane %v783_v20, %v8226_v12 }
 0x2c4   :  { %v781_v49 = vsel %vm556_vm9, %v780_v34, %v490_v39 }
 0x2c5   :  { %v787_v1 = vperm.slane %v781_v49, %v8226_v12  ;;  %v818_v31 = vrot.slane %v791_v54, 4 }
 0x2c9   :  { %v8224_v25 = vpop.permute.xlu2 %547 }
 0x2ca   :  { %v848_v34 = vrot.slane %v8224_v25, 4 }
 0x2d1   :  { %v508_v38 = vpop.permute.xlu0 %507 }
 0x2d2   :  { %v738_v40 = vrot.slane %v508_v38, 4  ;;  %v544_v43 = vpop.permute.xlu1 %543 }
 0x2d3   :  { %v736_v44 = vrot.slane %v544_v43, 4 }
 0x2d4   :  { %v739_v23 = vsel %vm556_vm9, %v544_v43, %v738_v40 }
 0x2d5   :  { %v524_v47 = vpop.permute.xlu2 %523  ;;  %v737_v55 = vsel %vm556_vm9, %v736_v44, %v508_v38  ;;  %v747_v42 = vperm.slane %v739_v23, %v8226_v12 }
 0x2d6   :  { %v668_v29 = vrot.slane %v524_v47, 4  ;;  %v743_v60 = vperm.slane %v737_v55, %v8226_v12  ;;  %v671_v61 = vsel %vm556_vm9, %v524_v47, %v670_v46 }
 0x2d7   :  { %v760_v2 = vrot.slane %v747_v42, 4  ;;  %v763_v53 = vsel %vm556_vm9, %v747_v42, %v762_v52  ;;  %v8253_v37 = vperm.slane %v671_v61, %v8226_v12 }
 0x2d8   :  { %v669_v50 = vsel %vm556_vm9, %v668_v29, %v484_v10  ;;  %v748_v3 = vrot.slane %v743_v60, 4  ;;  %v751_v4 = vsel %vm556_vm9, %v743_v60, %v750_v56  ;;  %v771_v24 = vperm.slane %v763_v53, %v8235_v51 }
 0x2d9   :  { %v759_v0 = vperm.slane %v751_v4, %v8235_v51  ;;  %v761_v5 = vsel %vm556_vm9, %v760_v2, %v735_v36  ;;  %v8262_v8 = vperm.slane %v669_v50, %v8226_v12  ;;  %v806_v10 = vrot.slane %v787_v1, 4  ;;  %v510_v18 = vpop.permute.xlu0 %509 }
 0x2da   :  { %v749_v39 = vsel %vm556_vm9, %v748_v3, %v731_v33  ;;  %v8257_v63 = vperm.slane %v761_v5, %v8235_v51  ;;  %v8259_v6 = vrot.slane %v771_v24, 4  ;;  %v546_v9 = vpop.permute.xlu1 %545  ;;  %v794_v28 = vrot.slane %v510_v18, 4 }
 0x2db   :  { %v755_v14 = vperm.slane %v749_v39, %v8235_v51  ;;  %v774_v15 = vrot.slane %v759_v0, 4  ;;  %v792_v16 = vrot.slane %v546_v9, 4  ;;  %v706_v35 = vrot.slane %v8253_v37, 4 }
 0x2dc   :  { %v776_v26 = vrot.slane %v8257_v63, 4  ;;  %v8268_v27 = vsel %vm556_vm9, 0.0, %v8259_v6  ;;  %v694_v33 = vrot.slane %v8262_v8, 4  ;;  %v795_v20 = vsel %vm556_vm9, %v546_v9, %v794_v28 }
 0x2dd   :  { %v522_v22 = vpop.permute.xlu2 %521  ;;  %v8272_v32 = vsel %vm556_vm9, 0.0, %v774_v15  ;;  %v793_v36 = vsel %vm556_vm9, %v792_v16, %v510_v18  ;;  %v772_v38 = vrot.slane %v755_v14, 4  ;;  %v1070_v43 = vrot.slane %v8268_v27, 4 }
 0x2de   :  { %v612_v30 = vrot.slane %v522_v22, 4  ;;  %v799_v40 = vperm.slane %v793_v36, %v8226_v12  ;;  %v803_v44 = vperm.slane %v795_v20, %v8226_v12  ;;  %v615_v47 = vsel %vm556_vm9, %v522_v22, %v614_v19 }
 0x2df   :  { %v8285_v49 = vsel %vm556_vm9, 0.0, %v776_v26  ;;  %v1059_v23 = vrot.slane %v8272_v32, 4  ;;  %v8297_v2 = vperm.slane %v615_v47, %v8226_v12  ;;  %v773_v50 = vsel %vm556_vm9, 0.0, %v772_v38 }
 0x2e0   :  { %v613_v46 = vsel %vm556_vm9, %v612_v30, %v8208_v11  ;;  %v804_v29 = vrot.slane %v799_v40, 4  ;;  %v807_v52 = vsel %vm556_vm9, %v799_v40, %v806_v10  ;;  %v816_v42 = vrot.slane %v803_v44, 4 }
 0x2e1   :  { %v815_v55 = vperm.slane %v807_v52, %v8235_v51  ;;  %v819_v56 = vsel %vm556_vm9, %v803_v44, %v818_v31  ;;  %v8292_v60 = vperm.slane %v613_v46, %v8226_v12  ;;  %v512_v31 = vpop.permute.xlu0 %511  ;;  %v1054_v18 = vsel %vm556_vm9, %v774_v15, %v755_v14 }
 0x2e2   :  { %v805_v11 = vsel %vm556_vm9, %v804_v29, %v787_v1  ;;  %v827_v61 = vperm.slane %v819_v56, %v8235_v51  ;;  %v530_v53 = vpop.permute.xlu1 %529  ;;  %v817_v4 = vsel %vm556_vm9, %v816_v42, %v791_v54  ;;  %v849_v39 = vsel %vm556_vm9, %v848_v34, %v512_v31 }
 0x2e3   :  { %v8301_v3 = vperm.slane %v805_v11, %v8235_v51  ;;  %v8304_v24 = vrot.slane %v815_v55, 4  ;;  %v836_v19 = vrot.slane %v530_v53, 4  ;;  %v8307_v0 = vperm.slane %v817_v4, %v8235_v51 }
 0x2e4   :  { %v8309_v1 = vrot.slane %v827_v61, 4  ;;  %v839_v5 = vsel %vm556_vm9, %v530_v53, %v838_v62  ;;  %v638_v9 = vrot.slane %v8292_v60, 4  ;;  %v650_v62 = vrot.slane %v8297_v2, 4 }
 0x2e5   :  { %v837_v10 = vsel %vm556_vm9, %v836_v19, %v8197_v7  ;;  %v847_v54 = vperm.slane %v839_v5, %v8226_v12  ;;  %v520_v16 = vpop.permute.xlu2 %519  ;;  %v8320_v22 = vsel %vm556_vm9, 0.0, %v8304_v24  ;;  %v828_v30 = vrot.slane %v8301_v3, 4 }
 0x2e6   :  { %v8324_v26 = vsel %vm556_vm9, 0.0, %v8309_v1  ;;  %v843_v28 = vperm.slane %v837_v10, %v8226_v12  ;;  %v850_v34 = vrot.slane %v512_v31, 4  ;;  %v855_v32 = vperm.slane %v849_v39, %v8226_v12 }
 0x2e7   :  { %v874_v15 = vrot.slane %v847_v54, 4  ;;  %v555_v36 = vrot.slane %v520_v16, 4  ;;  %v559_v38 = vsel %vm556_vm9, %v520_v16, %v558_v48  ;;  %v8359_v10 = vperm.slane %v1054_v18, %v8226_v12 }
 0x2e8   :  { %v862_v14 = vrot.slane %v843_v28, 4  ;;  %v851_v44 = vsel %vm556_vm9, %v8224_v25, %v850_v34  ;;  %v860_v46 = vrot.slane %v855_v32, 4  ;;  %v8343_v55 = vperm.slane %v559_v38, %v8226_v12 }
 0x2e9   :  { %v859_v47 = vperm.slane %v851_v44, %v8226_v12  ;;  %v557_v52 = vsel %vm556_vm9, %v555_v36, %v8216_v13  ;;  %v1060_v25 = vsel %vm556_vm9, %v1059_v23, %v773_v50  ;;  %v1065_v38 = vsel %vm556_vm9, %v8259_v6, %v8257_v63 }
 0x2ea   :  { %v863_v29 = vsel %vm556_vm9, %v855_v32, %v862_v14  ;;  %v861_v48 = vsel %vm556_vm9, %v860_v46, %v843_v28  ;;  %v8348_v56 = vperm.slane %v557_v52, %v8226_v12  ;;  %v8365_v28 = vperm.slane %v1060_v25, %v8226_v12 }
 0x2eb   :  { %v871_v42 = vperm.slane %v863_v29, %v8235_v51  ;;  %v8352_v61 = vperm.slane %v861_v48, %v8235_v51  ;;  %v872_v53 = vrot.slane %v859_v47, 4  ;;  %v875_v4 = vsel %vm556_vm9, %v859_v47, %v874_v15 }
 0x2ec   :  { %v883_v31 = vperm.slane %v875_v4, %v8235_v51  ;;  %v594_v14 = vrot.slane %v8343_v55, 4  ;;  %v1071_v29 = vsel %vm556_vm9, %v1070_v43, %v8285_v49  ;;  %v1076_v27 = vrot.slane %v8365_v28, 4 }
 0x2ed   :  { %v542_v11 = vpop.permute.xlu1 %541  ;;  %v8356_v5 = vrot.slane %v871_v42, 4  ;;  %v873_v16 = vsel %vm556_vm9, %v872_v53, %v847_v54  ;;  %v884_v23 = vrot.slane %v8352_v61, 4  ;;  %v582_v54 = vrot.slane %v8348_v56, 4 }
 0x2ee   :  { %v680_v13 = vrot.slane %v542_v11, 4  ;;  %v506_v19 = vpop.permute.xlu0 %505  ;;  %v8368_v34 = vperm.slane %v873_v16, %v8235_v51  ;;  %v8385_v46 = vrot.slane %v883_v31, 4  ;;  %v8401_v53 = vperm.slane %v1071_v29, %v8226_v12 }
 0x2ef   :  { %v682_v39 = vrot.slane %v506_v19, 4  ;;  %v8372_v32 = vsel %vm556_vm9, 0.0, %v8356_v5  ;;  %v8383_v44 = vsel %vm556_vm9, 0.0, %v884_v23 }
 0x2f0   :  { %v681_v50 = vsel %vm556_vm9, %v680_v13, %v506_v19  ;;  %v1167_v47 = vrot.slane %v8372_v32, 4  ;;  %v888_v52 = vrot.slane %v8368_v34, 4  ;;  %v8413_v16 = vsel %vm556_vm9, 0.0, %v8385_v46 }
 0x2f1   :  { %v683_v18 = vsel %vm556_vm9, %v542_v11, %v682_v39  ;;  %v687_v15 = vperm.slane %v681_v50, %v8226_v12  ;;  %v8417_v50 = vperm.slane %v1065_v38, %v8226_v12  ;;  %v1077_v38 = vsel %vm556_vm9, %v1076_v27, %v8359_v10 }
 0x2f2   :  { %v691_v36 = vperm.slane %v683_v18, %v8226_v12 }
 0x2f3   :  { %v692_v48 = vrot.slane %v687_v15, 4  ;;  %v695_v42 = vsel %vm556_vm9, %v687_v15, %v694_v33 }
 0x2f4   :  { %v704_v63 = vrot.slane %v691_v36, 4  ;;  %v703_v6 = vperm.slane %v695_v42, %v8235_v51  ;;  %v707_v11 = vsel %vm556_vm9, %v691_v36, %v706_v35 }
 0x2f5   :  { %v540_v25 = vpop.permute.xlu1 %539  ;;  %v693_v43 = vsel %vm556_vm9, %v692_v48, %v8262_v8  ;;  %v715_v33 = vperm.slane %v707_v11, %v8235_v51 }
 0x2f6   :  { %v705_v49 = vsel %vm556_vm9, %v704_v63, %v8253_v37  ;;  %v624_v4 = vrot.slane %v540_v25, 4  ;;  %v504_v13 = vpop.permute.xlu0 %503  ;;  %v699_v19 = vperm.slane %v693_v43, %v8235_v51  ;;  %v718_v31 = vrot.slane %v703_v6, 4 }
 0x2f7   :  { %v711_v35 = vperm.slane %v705_v49, %v8235_v51  ;;  %v626_v39 = vrot.slane %v504_v13, 4  ;;  %v722_v23 = vrot.slane %v715_v33, 4  ;;  %v1088_v43 = vrot.slane %v8401_v53, 4 }
 0x2f8   :  { %v625_v8 = vsel %vm556_vm9, %v624_v4, %v504_v13  ;;  %v716_v37 = vrot.slane %v699_v19, 4  ;;  %v719_v18 = vsel %vm556_vm9, 0.0, %v718_v31 }
 0x2f9   :  { %v720_v15 = vrot.slane %v711_v35, 4  ;;  %v627_v36 = vsel %vm556_vm9, %v540_v25, %v626_v39  ;;  %v723_v29 = vsel %vm556_vm9, 0.0, %v722_v23  ;;  %v1005_v48 = vrot.slane %v719_v18, 4 }
 0x2fa   :  { %v631_v42 = vperm.slane %v625_v8, %v8226_v12  ;;  %v635_v63 = vperm.slane %v627_v36, %v8226_v12  ;;  %v717_v6 = vsel %vm556_vm9, 0.0, %v716_v37  ;;  %v1016_v11 = vrot.slane %v723_v29, 4 }
 0x2fb   :  { %v721_v37 = vsel %vm556_vm9, 0.0, %v720_v15  ;;  %v1006_v27 = vsel %vm556_vm9, %v1005_v48, %v717_v6 }
 0x2fc   :  { %v636_v49 = vrot.slane %v631_v42, 4  ;;  %v639_v25 = vsel %vm556_vm9, %v631_v42, %v638_v9  ;;  %v648_v33 = vrot.slane %v635_v63, 4  ;;  %v651_v4 = vsel %vm556_vm9, %v635_v63, %v650_v62 }
 0x2fd   :  { %v647_v13 = vperm.slane %v639_v25, %v8235_v51  ;;  %v659_v39 = vperm.slane %v651_v4, %v8235_v51  ;;  %v538_v8 = vpop.permute.xlu1 %537  ;;  %v1000_v42 = vsel %vm556_vm9, %v718_v31, %v699_v19  ;;  %v8447_v48 = vperm.slane %v1006_v27, %v8226_v12 }
 0x2fe   :  { %v637_v18 = vsel %vm556_vm9, %v636_v49, %v8292_v60  ;;  %v649_v9 = vsel %vm556_vm9, %v648_v33, %v8297_v2  ;;  %v568_v36 = vrot.slane %v538_v8, 4  ;;  %v502_v29 = vpop.permute.xlu0 %501  ;;  %v1017_v60 = vsel %vm556_vm9, %v1016_v11, %v721_v37 }
 0x2ff   :  { %v643_v62 = vperm.slane %v637_v18, %v8235_v51  ;;  %v655_v63 = vperm.slane %v649_v9, %v8235_v51  ;;  %v662_v25 = vrot.slane %v647_v13, 4  ;;  %v666_v4 = vrot.slane %v659_v39, 4 }
 0x300   :  { %v569_v15 = vsel %vm556_vm9, %v568_v36, %v502_v29  ;;  %v570_v40 = vrot.slane %v502_v29, 4  ;;  %v8453_v19 = vperm.slane %v1000_v42, %v8226_v12  ;;  %v1011_v39 = vsel %vm556_vm9, %v722_v23, %v711_v35 }
 0x301   :  { %v660_v6 = vrot.slane %v643_v62, 4  ;;  %v663_v2 = vsel %vm556_vm9, 0.0, %v662_v25  ;;  %v667_v49 = vsel %vm556_vm9, 0.0, %v666_v4  ;;  %v664_v31 = vrot.slane %v655_v63, 4 }
 0x302   :  { %v571_v33 = vsel %vm556_vm9, %v538_v8, %v570_v40  ;;  %v575_v13 = vperm.slane %v569_v15, %v8226_v12  ;;  %v951_v18 = vrot.slane %v663_v2, 4  ;;  %v962_v27 = vrot.slane %v667_v49, 4 }
 0x303   :  { %v579_v9 = vperm.slane %v571_v33, %v8226_v12  ;;  %v8460_v11 = vperm.slane %v1017_v60, %v8226_v12  ;;  %v661_v37 = vsel %vm556_vm9, 0.0, %v660_v6  ;;  %v1022_v40 = vrot.slane %v8447_v48, 4 }
 0x304   :  { %v580_v36 = vrot.slane %v575_v13, 4  ;;  %v583_v29 = vsel %vm556_vm9, %v575_v13, %v582_v54  ;;  %v8476_v6 = vperm.slane %v1011_v39, %v8226_v12  ;;  %v1089_v54 = vsel %vm556_vm9, %v1088_v43, %v8417_v50 }
 0x305   :  { %v591_v8 = vperm.slane %v583_v29, %v8235_v51  ;;  %v592_v42 = vrot.slane %v579_v9, 4  ;;  %v595_v35 = vsel %vm556_vm9, %v579_v9, %v594_v14  ;;  %v1034_v23 = vrot.slane %v8460_v11, 4 }
 0x306   :  { %v581_v15 = vsel %vm556_vm9, %v580_v36, %v8348_v56  ;;  %v603_v60 = vperm.slane %v595_v35, %v8235_v51  ;;  %v1023_v14 = vsel %vm556_vm9, %v1022_v40, %v8453_v19  ;;  %v1095_v39 = vperm.slane %v1089_v54, %v8235_v51 }
 0x307   :  { %v587_v2 = vperm.slane %v581_v15, %v8235_v51  ;;  %v593_v49 = vsel %vm556_vm9, %v592_v42, %v8343_v55  ;;  %v606_v33 = vrot.slane %v591_v8, 4  ;;  %v1035_v9 = vsel %vm556_vm9, %v1034_v23, %v8476_v6 }
 0x308   :  { %v599_v13 = vperm.slane %v593_v49, %v8235_v51  ;;  %v610_v56 = vrot.slane %v603_v60, 4  ;;  %v8491_v29 = vperm.slane %v1035_v9, %v8235_v51  ;;  %v1083_v55 = vperm.slane %v1077_v38, %v8235_v51 }
 0x309   :  { %v604_v36 = vrot.slane %v587_v2, 4  ;;  %v607_v43 = vsel %vm556_vm9, 0.0, %v606_v33  ;;  %v8496_v40 = vperm.slane %v1023_v14, %v8235_v51  ;;  %v665_v35 = vsel %vm556_vm9, 0.0, %v664_v31 }
 0x30a   :  { %v608_v8 = vrot.slane %v599_v13, 4  ;;  %v611_v42 = vsel %vm556_vm9, 0.0, %v610_v56  ;;  %v897_v15 = vrot.slane %v607_v43, 4  ;;  %v1046_v23 = vrot.slane %v8491_v29, 4 }
 0x30b   :  { %v1100_v60 = vrot.slane %v1095_v39, 4  ;;  %v946_v54 = vsel %vm556_vm9, %v662_v25, %v643_v62  ;;  %v605_v49 = vsel %vm556_vm9, 0.0, %v604_v36  ;;  %v908_v9 = vrot.slane %v611_v42, 4 }
 0x30c   :  { %v952_v20 = vsel %vm556_vm9, %v951_v18, %v661_v37  ;;  %v957_v38 = vsel %vm556_vm9, %v666_v4, %v655_v63  ;;  %v8506_v7 = vsel %vm556_vm9, %v1046_v23, %v8496_v40  ;;  %v8509_v14 = vperm.slane %v946_v54, %v8226_v12 }
 0x30d   :  { %v8512_v31 = vperm.slane %v952_v20, %v8226_v12  ;;  %v963_v43 = vsel %vm556_vm9, %v962_v27, %v665_v35  ;;  %1226 = vrot.lane.b32.xlu0 %v8506_v7, %s7836_s8  ;;  %v1102_v63 = vrot.slane %v1083_v55, 4  ;;  %v1078_v25 = vrot.slane %v8359_v10, 4 }
 0x30e   :  { %v8518_v62 = vperm.slane %v963_v43, %v8226_v12  ;;  %v1090_v4 = vrot.slane %v8417_v50, 4  ;;  %v8523_v18 = vperm.slane %v957_v38, %v8226_v12  ;;  %v609_v37 = vsel %vm556_vm9, 0.0, %v608_v8 }
 0x30f   :  { %v968_v20 = vrot.slane %v8512_v31, 4  ;;  %v898_v27 = vsel %vm556_vm9, %v897_v15, %v605_v49  ;;  %v1079_v42 = vsel %vm556_vm9, %v8365_v28, %v1078_v25  ;;  %v892_v10 = vsel %vm556_vm9, %v606_v33, %v587_v2 }
 0x310   :  { %v980_v36 = vrot.slane %v8518_v62, 4  ;;  %v1091_v35 = vsel %vm556_vm9, %v8401_v53, %v1090_v4  ;;  %v1178_v50 = vrot.slane %v8413_v16, 4  ;;  %v8536_v23 = vsel %vm556_vm9, %v1100_v60, %v1083_v55 }
 0x311   :  { %v8539_v54 = vsel %vm556_vm9, %v1095_v39, %v1102_v63  ;;  %v8542_v8 = vperm.slane %v1091_v35, %v8235_v51  ;;  %v969_v15 = vsel %vm556_vm9, %v968_v20, %v8509_v14  ;;  %v8549_v53 = vperm.slane %v1079_v42, %v8235_v51 }
 0x312   :  { %v981_v28 = vsel %vm556_vm9, %v980_v36, %v8523_v18  ;;  %v8552_v16 = vperm.slane %v898_v27, %v8226_v12  ;;  %v8558_v33 = vperm.slane %v892_v10, %v8226_v12  ;;  %v903_v39 = vsel %vm556_vm9, %v610_v56, %v599_v13 }
 0x313   :  { %v8555_v2 = vperm.slane %v981_v28, %v8235_v51  ;;  %v909_v55 = vsel %vm556_vm9, %v908_v9, %v609_v37  ;;  %v889_v38 = vsel %vm556_vm9, 0.0, %v888_v52  ;;  %v1162_v43 = vsel %vm556_vm9, %v8356_v5, %v8352_v61 }
 0x314   :  { %v8563_v60 = vperm.slane %v909_v55, %v8226_v12  ;;  %v914_v49 = vrot.slane %v8552_v16, 4  ;;  %v8573_v63 = vperm.slane %v969_v15, %v8235_v51  ;;  %v1104_v56 = vrot.slane %v8542_v8, 4 }
 0x315   :  { %v992_v13 = vrot.slane %v8555_v2, 4  ;;  %v1168_v9 = vsel %vm556_vm9, %v1167_v47, %v8383_v44  ;;  %1228 = vrot.lane.b32.xlu0 %v8536_v23, %s7836_s8  ;;  %v8584_v52 = vperm.slane %v903_v39, %v8226_v12  ;;  %v8597_v32 = vperm.slane %v1162_v43, %v8226_v12 }
 0x316   :  { %v915_v61 = vsel %vm556_vm9, %v914_v49, %v8558_v33  ;;  %v926_v5 = vrot.slane %v8563_v60, 4  ;;  %v8590_v25 = vperm.slane %v1168_v9, %v8226_v12  ;;  %v1173_v44 = vsel %vm556_vm9, %v8385_v46, %v8368_v34 }
 0x317   :  { %v8594_v4 = vsel %vm556_vm9, %v992_v13, %v8573_v63  ;;  %v1179_v47 = vsel %vm556_vm9, %v1178_v50, %v889_v38  ;;  %v8606_v20 = vperm.slane %v915_v61, %v8235_v51  ;;  %v829_v36 = vsel %vm556_vm9, 0.0, %v828_v30 }
 0x318   :  { %1224 = vrot.lane.b32.xlu2 %v8594_v4, %s7836_s8  ;;  %v927_v37 = vsel %vm556_vm9, %v926_v5, %v8584_v52  ;;  %v8611_v27 = vperm.slane %v1179_v47, %v8226_v12  ;;  %v11927_v46 = vrot.slane %v8307_v0, 4  ;;  %v1108_v35 = vsel %vm556_vm9, %v8304_v24, %v8301_v3 }
 0x319   :  { %v8617_v34 = vperm.slane %v927_v37, %v8235_v51  ;;  %v11928_v10 = vrot.slane %v8320_v22, 4  ;;  %v1177_v15 = vperm.slane %v1173_v44, %v8226_v12  ;;  %v1184_v28 = vrot.slane %v8590_v25, 4 }
 0x31a   :  { %v833_v42 = vsel %vm556_vm9, 0.0, %v11927_v46  ;;  %v1196_v30 = vrot.slane %v8611_v27, 4  ;;  %v1112_v39 = vperm.slane %v1108_v35, %v8226_v12  ;;  %v1119_v3 = vsel %vm556_vm9, %v8309_v1, %v8307_v0 }
 0x31b   :  { %v1114_v50 = vsel %vm556_vm9, %v11928_v10, %v829_v36  ;;  %v938_v55 = vrot.slane %v8617_v34, 4  ;;  %v11929_v24 = vrot.slane %v8324_v26, 4  ;;  %v1123_v43 = vperm.slane %v1119_v3, %v8226_v12 }
 0x31c   :  { %v1118_v49 = vperm.slane %v1114_v50, %v8226_v12  ;;  %v1197_v38 = vsel %vm556_vm9, %v1196_v30, %v1177_v15  ;;  %v1132_v9 = vrot.slane %v1112_v39, 4  ;;  %v1024_v0 = vrot.slane %v8453_v19, 4 }
 0x31d   :  { %v1125_v22 = vsel %vm556_vm9, %v11929_v24, %v833_v42  ;;  %v8645_v61 = vsel %vm556_vm9, %v938_v55, %v8606_v20  ;;  %v8648_v5 = vperm.slane %v1197_v38, %v8235_v51  ;;  %v1036_v1 = vrot.slane %v8476_v6, 4  ;;  %1306 = vrot.lane.b32.xlu0 %v8539_v54, %s7836_s8 }
 0x31e   :  { %v1129_v13 = vperm.slane %v1125_v22, %v8226_v12  ;;  %1222 = vrot.lane.b32.xlu1 %v8645_v61, %s7836_s8  ;;  %v1185_v26 = vsel %vm556_vm9, %v1184_v28, %v8597_v32  ;;  %v1144_v44 = vrot.slane %v1123_v43, 4  ;;  %v982_v47 = vrot.slane %v8523_v18, 4 }
 0x31f   :  { %v8661_v37 = vsel %vm556_vm9, %v1104_v56, %v8549_v53  ;;  %v1037_v19 = vsel %vm556_vm9, %v8460_v11, %v1036_v1  ;;  %v1025_v36 = vsel %vm556_vm9, %v8447_v48, %v1024_v0  ;;  %v1191_v18 = vperm.slane %v1185_v26, %v8235_v51 }
 0x320   :  { %1383 = vrot.lane.b32.xlu2 %v8661_v37, %s7836_s8  ;;  %v1145_v6 = vsel %vm556_vm9, %v1129_v13, %v1144_v44  ;;  %v8671_v46 = vperm.slane %v1037_v19, %v8235_v51  ;;  %v1208_v42 = vrot.slane %v8648_v5, 4  ;;  %v1133_v56 = vsel %vm556_vm9, %v1118_v49, %v1132_v9 }
 0x321   :  { %v1153_v35 = vperm.slane %v1145_v6, %v8235_v51  ;;  %v983_v10 = vsel %vm556_vm9, %v8518_v62, %v982_v47  ;;  %v1130_v50 = vrot.slane %v1118_v49, 4  ;;  %v1142_v28 = vrot.slane %v1129_v13, 4 }
 0x322   :  { %v1050_v11 = vrot.slane %v8671_v46, 4  ;;  %v8681_v48 = vperm.slane %v1025_v36, %v8235_v51  ;;  %v1141_v55 = vperm.slane %v1133_v56, %v8235_v51  ;;  %v970_v3 = vrot.slane %v8509_v14, 4 }
 0x323   :  { %v1158_v30 = vrot.slane %v1153_v35, 4  ;;  %v1131_v24 = vsel %vm556_vm9, %v1130_v50, %v1112_v39  ;;  %v1143_v22 = vsel %vm556_vm9, %v1142_v28, %v1123_v43  ;;  %v8688_v38 = vsel %vm556_vm9, %v1208_v42, %v1191_v18 }
 0x324   :  { %v8692_v62 = vsel %vm556_vm9, %v1050_v11, %v8681_v48  ;;  %v8695_v49 = vperm.slane %v983_v10, %v8235_v51  ;;  %v1137_v13 = vperm.slane %v1131_v24, %v8235_v51  ;;  %v1186_v14 = vrot.slane %v8597_v32, 4 }
 0x325   :  { %1232 = vrot.lane.b32.xlu0 %v8688_v38, %s7836_s8  ;;  %v1198_v39 = vrot.slane %v1177_v15, 4  ;;  %v8704_v43 = vsel %vm556_vm9, %v1158_v30, %v1141_v55  ;;  %v1149_v9 = vperm.slane %v1143_v22, %v8235_v51  ;;  %v971_v0 = vsel %vm556_vm9, %v8512_v31, %v970_v3 }
 0x326   :  { %1381 = vrot.lane.b32.xlu1 %v8692_v62, %s7836_s8  ;;  %v996_v1 = vrot.slane %v8695_v49, 4  ;;  %v1156_v26 = vrot.slane %v1137_v13, 4  ;;  %v1187_v44 = vsel %vm556_vm9, %v8590_v25, %v1186_v14  ;;  %v979_v15 = vperm.slane %v971_v0, %v8235_v51 }
 0x327   :  { %v1199_v32 = vsel %vm556_vm9, %v8611_v27, %v1198_v39  ;;  %v1154_v47 = vrot.slane %v1149_v9, 4  ;;  %v1195_v31 = vperm.slane %v1187_v44, %v8235_v51  ;;  %v928_v25 = vrot.slane %v8584_v52, 4 }
 0x328   :  { %1385 = vrot.lane.b32.xlu2 %v8704_v43, %s7836_s8  ;;  %v8718_v19 = vsel %vm556_vm9, %v996_v1, %v979_v15  ;;  %v8721_v6 = vsel %vm556_vm9, %v1149_v9, %v1156_v26  ;;  %v1207_v36 = vperm.slane %v1199_v32, %v8235_v51  ;;  %v1160_v10 = vrot.slane %v1141_v55, 4 }
 0x329   :  { %v8731_v27 = vsel %vm556_vm9, %v1154_v47, %v1137_v13  ;;  %v1214_v42 = vrot.slane %v1195_v31, 4  ;;  %v929_v11 = vsel %vm556_vm9, %v8563_v60, %v928_v25  ;;  %v916_v50 = vrot.slane %v8558_v33, 4 }
 0x32a   :  { %v1212_v56 = vrot.slane %v1207_v36, 4  ;;  %v937_v52 = vperm.slane %v929_v11, %v8235_v51  ;;  %v8750_v3 = vsel %vm556_vm9, %v1153_v35, %v1160_v10  ;;  %v1210_v55 = vrot.slane %v1191_v18, 4 }
 0x32b   :  { %v8739_v28 = vsel %vm556_vm9, %v1207_v36, %v1214_v42  ;;  %v917_v33 = vsel %vm556_vm9, %v8552_v16, %v916_v50  ;;  %v1048_v24 = vrot.slane %v8496_v40, 4  ;;  %v940_v40 = vrot.slane %v8606_v20, 4 }
 0x32c   :  { %v8742_v30 = vsel %vm556_vm9, %v1212_v56, %v1195_v31  ;;  %v942_v60 = vrot.slane %v937_v52, 4  ;;  %v925_v22 = vperm.slane %v917_v33, %v8235_v51  ;;  %v8763_v14 = vsel %vm556_vm9, %v8648_v5, %v1210_v55 }
 0x32d   :  { %1379 = vrot.lane.b32.xlu0 %v8718_v19, %s7836_s8  ;;  %v8771_v16 = vsel %vm556_vm9, %v8491_v29, %v1048_v24  ;;  %v1106_v18 = vrot.slane %v8549_v53, 4  ;;  %v994_v5 = vrot.slane %v8573_v63, 4  ;;  %v8780_v35 = vsel %vm556_vm9, %v8617_v34, %v940_v40 }
 0x32e   :  { %1308 = vrot.lane.b32.xlu1 %v8721_v6, %s7836_s8  ;;  %v8759_v13 = vsel %vm556_vm9, %v942_v60, %v925_v22  ;;  %v1052_v53 = vrot.slane %v8681_v48, 4  ;;  %v998_v63 = vrot.slane %v979_v15, 4  ;;  %v944_v34 = vrot.slane %v925_v22, 4 }
 0x32f   :  { %v8784_v39 = vsel %vm556_vm9, %v8542_v8, %v1106_v18  ;;  %v8792_v29 = vsel %vm556_vm9, %v8555_v2, %v994_v5  ;;  %v7334_v8 = vpack.i.bf16 %v8688_v38, %v8742_v30  ;;  %v7349_v48 = vpack.i.bf16 %v8506_v7, %v8692_v62 }
 0x330   :  { %1230 = vrot.lane.b32.xlu2 %v8731_v27, %s7836_s8  ;;  %v8801_v20 = vsel %vm556_vm9, %v8671_v46, %v1052_v53  ;;  %v8808_v2 = vsel %vm556_vm9, %v8695_v49, %v998_v63  ;;  %v8815_v46 = vsel %vm556_vm9, %v937_v52, %v944_v34  ;;  %v7344_v9 = vpack.i.bf16 %v8536_v23, %v8661_v37 }
 0x331   :  { %v7379_v49 = vpack.i.bf16 %v8721_v6, %v8763_v14  ;;  %v7339_v0 = vpack.i.bf16 %v8731_v27, %v8704_v43  ;;  %v7359_v1 = vpack.i.bf16 %v8645_v61, %v8759_v13  ;;  %v7354_v26 = vpack.i.bf16 %v8594_v4, %v8718_v19 }
 0x332   :  { %v7369_v44 = vpack.i.bf16 %v8750_v3, %v8771_v16  ;;  %v7364_v32 = vpack.i.bf16 %v8739_v28, %v8539_v54  ;;  %v7374_v15 = vpack.i.bf16 %v8784_v39, %v8792_v29 }
 0x335   :  { %1464 = vrot.lane.b32.xlu0 %v8739_v28, %s7836_s8 }
 0x336   :  { %1387 = vrot.lane.b32.xlu1 %v8742_v30, %s7836_s8 }
 0x338   :  { %1462 = vrot.lane.b32.xlu2 %v8750_v3, %s7836_s8 }
 0x33d   :  { %1377 = vrot.lane.b32.xlu0 %v8759_v13, %s7836_s8 }
 0x33e   :  { %1310 = vrot.lane.b32.xlu1 %v8763_v14, %s7836_s8 }
 0x340   :  { %1304 = vrot.lane.b32.xlu2 %v8771_v16, %s7836_s8 }
 0x345   :  { %1300 = vrot.lane.b32.xlu0 %v8780_v35, %s7836_s8 }
 0x346   :  { %1460 = vrot.lane.b32.xlu1 %v8784_v39, %s7836_s8 }
 0x348   :  { %1302 = vrot.lane.b32.xlu2 %v8792_v29, %s7836_s8 }
 0x34d   :  { %7335 = vrot.lane.b32.xlu0 %v7334_v8, %s7837_s9 }
 0x34e   :  { %1458 = vrot.lane.b32.xlu1 %v8801_v20, %s7836_s8 }
 0x350   :  { %1456 = vrot.lane.b32.xlu2 %v8808_v2, %s7836_s8 }
 0x355   :  { %7350 = vrot.lane.b32.xlu0 %v7349_v48, %s7837_s9 }
 0x356   :  { %1454 = vrot.lane.b32.xlu1 %v8815_v46, %s7836_s8 }
 0x358   :  { %7345 = vrot.lane.b32.xlu2 %v7344_v9, %s7837_s9 }
 0x35d   :  { %7380 = vrot.lane.b32.xlu0 %v7379_v49, %s7837_s9 }
 0x35e   :  { %7340 = vrot.lane.b32.xlu1 %v7339_v0, %s7837_s9 }
 0x360   :  { %7360 = vrot.lane.b32.xlu2 %v7359_v1, %s7837_s9 }
 0x366   :  { %7355 = vrot.lane.b32.xlu1 %v7354_v26, %s7837_s9 }
 0x368   :  { %7370 = vrot.lane.b32.xlu2 %v7369_v44, %s7837_s9 }
 0x36e   :  { %7365 = vrot.lane.b32.xlu1 %v7364_v32, %s7837_s9 }
 0x370   :  { %7375 = vrot.lane.b32.xlu2 %v7374_v15, %s7837_s9 }
 0x372   :  { %v1225_v47 = vpop.permute.xlu2 %1224 }
 0x37a   :  { %v1384_v31 = vpop.permute.xlu2 %1383 }
 0x37f   :  { %v1227_v36 = vpop.permute.xlu0 %1226 }
 0x382   :  { %v1386_v25 = vpop.permute.xlu2 %1385 }
 0x387   :  { %v1229_v42 = vpop.permute.xlu0 %1228 }
 0x38a   :  { %v1231_v10 = vpop.permute.xlu2 %1230 }
 0x38f   :  { %v1307_v56 = vpop.permute.xlu0 %1306 }
 0x390   :  { %v1223_v11 = vpop.permute.xlu1 %1222 }
 0x392   :  { %v1463_v33 = vpop.permute.xlu2 %1462 }
 0x397   :  { %v1233_v50 = vpop.permute.xlu0 %1232 }
 0x398   :  { %v1382_v52 = vpop.permute.xlu1 %1381  ;;  %7090 = vmatpush.xpose.msk.msra.mxu2 %vm1234_vm10, %v1233_v50 }
 0x39a   :  { %v1305_v24 = vpop.permute.xlu2 %1304 }
 0x39c   :  { %7091 = vmatpush.xpose.msk.msra.mxu2 %vm1234_vm10, %v1231_v10 }
 0x39f   :  { %v1380_v60 = vpop.permute.xlu0 %1379 }
 0x3a0   :  { %v1309_v55 = vpop.permute.xlu1 %1308  ;;  %7092 = vmatpush.xpose.msk.msra.mxu2 %vm1234_vm10, %v1229_v42 }
 0x3a2   :  { %v1303_v18 = vpop.permute.xlu2 %1302 }
 0x3a4   :  { %7093 = vmatpush.xpose.msk.msra.mxu2 %vm1234_vm10, %v1227_v36 }
 0x3a7   :  { %v1465_v22 = vpop.permute.xlu0 %1464 }
 0x3a8   :  { %v1388_v40 = vpop.permute.xlu1 %1387  ;;  %7094 = vmatpush.xpose.msk.msra.mxu2 %vm1234_vm10, %v1225_v47  ;;  %7126 = vmatpush.xpose.msk.msrb.mxu0 %vm1234_vm10, %v1465_v22 }
 0x3a9   :  { %7114 = vmatpush.xpose.msk.msrb.mxu1 %vm1234_vm10, %v1388_v40 }
 0x3aa   :  { %v1457_v34 = vpop.permute.xlu2 %1456 }
 0x3ac   :  { %7095 = vmatpush.xpose.msk.msra.mxu2 %vm1234_vm10, %v1223_v11  ;;  %7127 = vmatpush.xpose.msk.msrb.mxu0 %vm1234_vm10, %v1463_v33 }
 0x3ad   :  { %7115 = vmatpush.xpose.msk.msrb.mxu1 %vm1234_vm10, %v1386_v25 }
 0x3af   :  { %v1378_v5 = vpop.permute.xlu0 %1377  ;;  %7096 = vmatmul.msk.f32.vlgmr.msra.gmra.mxu2 %vm1234_vm10, %v8645_v61 }
 0x3b0   :  { %v1311_v53 = vpop.permute.xlu1 %1310 }
 0x3b1   :  { %7102 = vmatpush.xpose.msk.msrb.mxu3 %vm1234_vm10, %v1311_v53  ;;  %7116 = vmatpush.xpose.msk.msrb.mxu1 %vm1234_vm10, %v1384_v31 }
 0x3b2   :  { %v7346_v49 = vpop.permute.xlu2 %7345 }
 0x3b3   :  { %v7348_v32 = vunpack.i.h.bf16 %v7346_v49  ;;  %v7347_v15 = vunpack.i.l.bf16 %v7346_v49 }
 0x3b5   :  { %7103 = vmatpush.xpose.msk.msrb.mxu3 %vm1234_vm10, %v1309_v55  ;;  %7117 = vmatpush.xpose.msk.msrb.mxu1 %vm1234_vm10, %v1382_v52 }
 0x3b7   :  { %v1301_v63 = vpop.permute.xlu0 %1300  ;;  %7097 = vmatmul.msk.f32.gmra.mxu2 %vm1234_vm10, %v8594_v4 }
 0x3b8   :  { %v1461_v8 = vpop.permute.xlu1 %1460 }
 0x3b9   :  { %7104 = vmatpush.xpose.msk.msrb.mxu3 %vm1234_vm10, %v1307_v56  ;;  %7118 = vmatpush.xpose.msk.msrb.mxu1 %vm1234_vm10, %v1380_v60 }
 0x3ba   :  { %7128 = vmatpush.xpose.msk.msrb.mxu0 %vm1234_vm10, %v1461_v8 }
 0x3bd   :  { %7105 = vmatpush.xpose.msk.msrb.mxu3 %vm1234_vm10, %v1305_v24  ;;  %7119 = vmatpush.xpose.msk.msrb.mxu1 %vm1234_vm10, %v1378_v5 }
 0x3bf   :  { %v7336_v61 = vpop.permute.xlu0 %7335  ;;  %7098 = vmatmul.msk.f32.gmra.mxu2 %vm1234_vm10, %v8506_v7  ;;  %v7361_v7 = vpop.permute.xlu2 %7360 }
 0x3c0   :  { %v1459_v48 = vpop.permute.xlu1 %1458  ;;  %7120 = vmatmul.msk.f32.vlgmr.msrb.gmra.mxu1 %vm1234_vm10, %v8759_v13  ;;  %v7337_v4 = vunpack.i.l.bf16 %v7336_v61  ;;  %v7338_v9 = vunpack.i.h.bf16 %v7336_v61  ;;  %v7363_v42 = vunpack.i.h.bf16 %v7361_v7  ;;  %v7362_v56 = vunpack.i.l.bf16 %v7361_v7 }
 0x3c1   :  { %7106 = vmatpush.xpose.msk.msrb.mxu3 %vm1234_vm10, %v1303_v18  ;;  %7129 = vmatpush.xpose.msk.msrb.mxu0 %vm1234_vm10, %v1459_v48 }
 0x3c2   :  { %2148 = vmatpush.msrb.mxu2 %v7338_v9  ;;  %7309 = vmatpush.msra.mxu1 %v7337_v4 }
 0x3c5   :  { %7107 = vmatpush.xpose.msk.msrb.mxu3 %vm1234_vm10, %v1301_v63  ;;  %7130 = vmatpush.xpose.msk.msrb.mxu0 %vm1234_vm10, %v1457_v34 }
 0x3c7   :  { %v7351_v0 = vpop.permute.xlu0 %7350  ;;  %7099 = vmatmul.msk.f32.gmra.mxu2 %vm1234_vm10, %v8536_v23 }
 0x3c8   :  { %v1455_v1 = vpop.permute.xlu1 %1454  ;;  %7108 = vmatmul.msk.f32.vlgmr.msrb.gmra.mxu3 %vm1234_vm10, %v8780_v35  ;;  %7121 = vmatmul.msk.f32.gmra.mxu1 %vm1234_vm10, %v8718_v19  ;;  %v7352_v31 = vunpack.i.l.bf16 %v7351_v0 }
 0x3c9   :  { %7131 = vmatpush.xpose.msk.msrb.mxu0 %vm1234_vm10, %v1455_v1 }
 0x3cc   :  { %7132 = vmatmul.msk.f32.vlgmr.msrb.gmra.mxu0 %vm1234_vm10, %v8815_v46 }
 0x3cd   :  { %2290 = vmatpush.msra.mxu0 %v7337_v4 }
 0x3cf   :  { %v7381_v13 = vpop.permute.xlu0 %7380  ;;  %7100 = vmatmul.msk.f32.gmra.mxu2 %vm1234_vm10, %v8731_v27  ;;  %v7353_v27 = vunpack.i.h.bf16 %v7351_v0 }
 0x3d0   :  { %v7341_v26 = vpop.permute.xlu1 %7340  ;;  %7109 = vmatmul.msk.f32.gmra.mxu3 %vm1234_vm10, %v8792_v29  ;;  %v7382_v23 = vunpack.i.l.bf16 %v7381_v13  ;;  %7122 = vmatmul.msk.f32.gmra.mxu1 %vm1234_vm10, %v8692_v62  ;;  %v7383_v47 = vunpack.i.h.bf16 %v7381_v13  ;;  %v7371_v29 = vpop.permute.xlu2 %7370  ;;  %v272_v13 = vld [vmem:[%s11923_s5 + $0x10] sm:$0xff] }
 0x3d1   :  { %v7342_v44 = vunpack.i.l.bf16 %v7341_v26  ;;  %v7343_v19 = vunpack.i.h.bf16 %v7341_v26  ;;  %v7373_v50 = vunpack.i.h.bf16 %v7371_v29 }
 0x3d2   :  { %2219 = vmatpush.msra.mxu3 %v7382_v23 }
 0x3d3   :  { %2149 = vmatpush.msrb.mxu2 %v7343_v19  ;;  %2291 = vmatpush.msra.mxu0 %v7342_v44 }
 0x3d4   :  { %7310 = vmatpush.msra.mxu1 %v7342_v44  ;;  %7133 = vmatmul.msk.f32.gmra.mxu0 %vm1234_vm10, %v8808_v2 }
 0x3d5   :  { %2150 = vmatpush.msrb.mxu2 %v7348_v32  ;;  %2220 = vmatpush.msra.mxu3 %v7383_v47 }
 0x3d6   :  { %2292 = vmatpush.msra.mxu0 %v7347_v15  ;;  %7311 = vmatpush.msra.mxu1 %v7347_v15 }
 0x3d7   :  { %2151 = vmatpush.msrb.mxu2 %v7353_v27 }
 0x3d8   :  { %2293 = vmatpush.msra.mxu0 %v7352_v31  ;;  %v7356_v62 = vpop.permute.xlu1 %7355  ;;  %7101 = vmatmul.msk.f32.gmra.mxu2 %vm1234_vm10, %v8688_v38 }
 0x3d9   :  { %7312 = vmatpush.msra.mxu1 %v7352_v31  ;;  %v7357_v36 = vunpack.i.l.bf16 %v7356_v62  ;;  %7110 = vmatmul.msk.f32.gmra.mxu3 %vm1234_vm10, %v8771_v16  ;;  %v7358_v25 = vunpack.i.h.bf16 %v7356_v62  ;;  %v7376_v16 = vpop.permute.xlu2 %7375 }
 0x3da   :  { %7123 = vmatmul.msk.f32.gmra.mxu1 %vm1234_vm10, %v8661_v37  ;;  %v7372_v37 = vunpack.i.l.bf16 %v7371_v29  ;;  %v7377_v52 = vunpack.i.l.bf16 %v7376_v16  ;;  %v7378_v33 = vunpack.i.h.bf16 %v7376_v16 }
 0x3db   :  { %2152 = vmatpush.msrb.mxu2 %v7358_v25  ;;  %2294 = vmatpush.msra.mxu0 %v7357_v36 }
 0x3dc   :  { %7313 = vmatpush.msra.mxu1 %v7357_v36  ;;  %7134 = vmatmul.msk.f32.gmra.mxu0 %vm1234_vm10, %v8801_v20  ;;  %v273_v36 = vld [vmem:[%s11923_s5 + $0x18] sm:$0xff] }
 0x3dd   :  { %2153 = vmatpush.msrb.mxu2 %v7363_v42  ;;  %2295 = vmatpush.msra.mxu0 %v7362_v56 }
 0x3de   :  { %7314 = vmatpush.msra.mxu1 %v7362_v56 }
 0x3e0   :  { %v7366_v38 = vpop.permute.xlu1 %7365 }
 0x3e1   :  { %v7368_v11 = vunpack.i.h.bf16 %v7366_v38  ;;  %v7367_v10 = vunpack.i.l.bf16 %v7366_v38  ;;  %7111 = vmatmul.msk.f32.gmra.mxu3 %vm1234_vm10, %v8539_v54  ;;  %v270_v54 = vld [vmem:[%s11923_s5] sm:$0xff] }
 0x3e2   :  { %7124 = vmatmul.msk.f32.gmra.mxu1 %vm1234_vm10, %v8704_v43 }
 0x3e3   :  { %2221 = vmatpush.msra.mxu3 %v7367_v10  ;;  %2361 = vmatpush.msrb.mxu0 %v7368_v11 }
 0x3e4   :  { %7315 = vmatpush.msra.mxu2 %v7368_v11  ;;  %7135 = vmatmul.msk.f32.gmra.mxu0 %vm1234_vm10, %v8784_v39 }
 0x3e5   :  { %2222 = vmatpush.msra.mxu3 %v7372_v37  ;;  %2362 = vmatpush.msrb.mxu0 %v7373_v50 }
 0x3e6   :  { %7316 = vmatpush.msra.mxu2 %v7373_v50 }
 0x3e7   :  { %2223 = vmatpush.msra.mxu3 %v7377_v52  ;;  %2363 = vmatpush.msrb.mxu0 %v7378_v33  ;;  %v274_v52 = vld [vmem:[%s11923_s5 + $0x20] sm:$0xff] }
 0x3e8   :  { %7317 = vmatpush.msra.mxu2 %v7378_v33 }
 0x3e9   :  { %7112 = vmatmul.msk.f32.gmra.mxu3 %vm1234_vm10, %v8721_v6 }
 0x3ea   :  { %7125 = vmatmul.msk.f32.gmra.mxu1 %vm1234_vm10, %v8742_v30 }
 0x3ec   :  { %7136 = vmatmul.msk.f32.gmra.mxu0 %vm1234_vm10, %v8750_v3 }
 0x3f1   :  { %7113 = vmatmul.msk.f32.gmra.mxu3 %vm1234_vm10, %v8763_v14 }
 0x3f4   :  { %7137 = vmatmul.msk.f32.gmra.mxu0 %vm1234_vm10, %v8739_v28  ;;  %v271_v28 = vld [vmem:[%s11923_s5 + $0x8] sm:$0xff] }
 0x432   :  { %v1276_v43 = vpop.f32.mrf.mxu2 }
 0x433   :  { %v8919_v39 = vadd.f32 %v1276_v43, %v270_v54 }
 0x435   :  { %v1526_v6 = vsel %vm1525_vm11, %v8919_v39, -inf }
 0x436   :  { %1527 = vmax.xlane.f32.xlu2 %v1526_v6 }
 0x43a   :  { %v1279_v60 = vpop.f32.mrf.mxu2 }
 0x43b   :  { %v8930_v55 = vadd.f32 %v1279_v60, %v271_v28 }
 0x43d   :  { %v1430_v30 = vpop.f32.mrf.mxu1  ;;  %v1529_v24 = vsel %vm1525_vm11, %v8930_v55, -inf }
 0x43e   :  { %v8923_v3 = vadd.f32 %v1430_v30, %v270_v54 }
 0x440   :  { %v1562_v14 = vsel %vm1525_vm11, %v8923_v3, -inf }
 0x441   :  { %1563 = vmax.xlane.f32.xlu0 %v1562_v14 }
 0x442   :  { %v1282_v1 = vpop.f32.mrf.mxu2 }
 0x443   :  { %v8967_v29 = vadd.f32 %v1282_v1, %v272_v13 }
 0x445   :  { %v1433_v40 = vpop.f32.mrf.mxu1  ;;  %v1532_v11 = vsel %vm1525_vm11, %v8967_v29, -inf }
 0x446   :  { %v8942_v34 = vadd.f32 %v1433_v40, %v271_v28 }
 0x448   :  { %v1565_v49 = vsel %vm1525_vm11, %v8942_v34, -inf }
 0x449   :  { %1530 = vmax.xlane.f32.xlu0 %v1529_v24  ;;  %v1507_v22 = vpop.f32.mrf.mxu0 }
 0x44a   :  { %v8934_v18 = vadd.f32 %v1507_v22, %v270_v54  ;;  %v1285_v62 = vpop.f32.mrf.mxu2 }
 0x44b   :  { %v1353_v5 = vpop.f32.mrf.mxu3  ;;  %v8997_v24 = vadd.f32 %v1285_v62, %v273_v36 }
 0x44c   :  { %v8936_v53 = vadd.f32 %v1353_v5, %v270_v54  ;;  %v1580_v63 = vsel %vm1525_vm11, %v8934_v18, -inf  ;;  %v275_v5 = vld [vmem:[%s11923_s5 + $0x28] sm:$0xff] }
 0x44d   :  { %1581 = vmax.xlane.f32.xlu1 %v1580_v63  ;;  %v1436_v4 = vpop.f32.mrf.mxu1 }
 0x44e   :  { %v1544_v8 = vsel %vm1525_vm11, %v8936_v53, -inf  ;;  %v8965_v31 = vadd.f32 %v1436_v4, %v272_v13 }
 0x44f   :  { %1545 = vmax.xlane.f32.xlu2 %v1544_v8  ;;  %v1535_v8 = vsel %vm1525_vm11, %v8997_v24, -inf }
 0x450   :  { %v1568_v38 = vsel %vm1525_vm11, %v8965_v31, -inf }
 0x451   :  { %v1510_v61 = vpop.f32.mrf.mxu0 }
 0x452   :  { %v8950_v7 = vadd.f32 %v1510_v61, %v271_v28  ;;  %v1288_v33 = vpop.f32.mrf.mxu2 }
 0x453   :  { %v1356_v48 = vpop.f32.mrf.mxu3  ;;  %v8999_v22 = vadd.f32 %v1288_v33, %v274_v52 }
 0x454   :  { %v8944_v9 = vadd.f32 %v1356_v48, %v271_v28  ;;  %v1583_v19 = vsel %vm1525_vm11, %v8950_v7, -inf }
 0x455   :  { %1566 = vmax.xlane.f32.xlu1 %v1565_v49  ;;  %v1538_v48 = vsel %vm1525_vm11, %v8999_v22, -inf }
 0x456   :  { %v1547_v0 = vsel %vm1525_vm11, %v8944_v9, -inf }
 0x457   :  { %1548 = vmax.xlane.f32.xlu2 %v1547_v0  ;;  %v1439_v47 = vpop.f32.mrf.mxu1 }
 0x458   :  { %v8982_v50 = vadd.f32 %v1439_v47, %v273_v36 }
 0x459   :  { %v1513_v26 = vpop.f32.mrf.mxu0 }
 0x45a   :  { %v8955_v23 = vadd.f32 %v1513_v26, %v272_v13  ;;  %v1571_v30 = vsel %vm1525_vm11, %v8982_v50, -inf }
 0x45b   :  { %v1291_v63 = vpop.f32.mrf.mxu2 }
 0x45c   :  { %v1359_v44 = vpop.f32.mrf.mxu3  ;;  %v1586_v15 = vsel %vm1525_vm11, %v8955_v23, -inf  ;;  %v9010_v4 = vadd.f32 %v1291_v63, %v275_v5 }
 0x45d   :  { %v8959_v32 = vadd.f32 %v1359_v44, %v272_v13  ;;  %1584 = vmax.xlane.f32.xlu1 %v1583_v19  ;;  %1587 = vmax.xlane.f32.xlu0 %v1586_v15 }
 0x45e   :  { %v1541_v13 = vsel %vm1525_vm11, %v9010_v4, -inf }
 0x45f   :  { %v1550_v27 = vsel %vm1525_vm11, %v8959_v32, -inf  ;;  %v1442_v16 = vpop.f32.mrf.mxu1 }
 0x460   :  { %1551 = vmax.xlane.f32.xlu2 %v1550_v27  ;;  %v8987_v54 = vadd.f32 %v1442_v16, %v274_v52 }
 0x461   :  { %v1516_v25 = vpop.f32.mrf.mxu0 }
 0x462   :  { %v8972_v42 = vadd.f32 %v1516_v25, %v273_v36  ;;  %v1574_v28 = vsel %vm1525_vm11, %v8987_v54, -inf }
 0x464   :  { %v1362_v56 = vpop.f32.mrf.mxu3  ;;  %v1589_v10 = vsel %vm1525_vm11, %v8972_v42, -inf }
 0x465   :  { %1569 = vmax.xlane.f32.xlu1 %v1568_v38  ;;  %1533 = vmax.xlane.f32.xlu0 %v1532_v11  ;;  %v8980_v37 = vadd.f32 %v1362_v56, %v273_v36  ;;  %v7384_v36 = vpack.i.bf16 %v8801_v20, %v8780_v35 }
 0x467   :  { %v1553_v43 = vsel %vm1525_vm11, %v8980_v37, -inf  ;;  %v1445_v61 = vpop.f32.mrf.mxu1 }
 0x468   :  { %1590 = vmax.xlane.f32.xlu2 %v1589_v10  ;;  %v9012_v0 = vadd.f32 %v1445_v61, %v275_v5 }
 0x469   :  { %v1519_v6 = vpop.f32.mrf.mxu0 }
 0x46a   :  { %v8995_v60 = vadd.f32 %v1519_v6, %v274_v52  ;;  %v1577_v26 = vsel %vm1525_vm11, %v9012_v0, -inf }
 0x46c   :  { %v1365_v14 = vpop.f32.mrf.mxu3  ;;  %v1592_v40 = vsel %vm1525_vm11, %v8995_v60, -inf }
 0x46d   :  { %1554 = vmax.xlane.f32.xlu1 %v1553_v43  ;;  %1572 = vmax.xlane.f32.xlu0 %v1571_v30  ;;  %v9022_v19 = vadd.f32 %v1365_v14, %v274_v52 }
 0x46f   :  { %v1556_v15 = vsel %vm1525_vm11, %v9022_v19, -inf }
 0x470   :  { %1575 = vmax.xlane.f32.xlu2 %v1574_v28 }
 0x471   :  { %v1522_v47 = vpop.f32.mrf.mxu0 }
 0x472   :  { %v9026_v27 = vadd.f32 %v1522_v47, %v275_v5 }
 0x474   :  { %v1368_v49 = vpop.f32.mrf.mxu3  ;;  %v1595_v62 = vsel %vm1525_vm11, %v9026_v27, -inf }
 0x475   :  { %1593 = vmax.xlane.f32.xlu1 %v1592_v40  ;;  %1536 = vmax.xlane.f32.xlu0 %v1535_v8  ;;  %v9014_v1 = vadd.f32 %v1368_v49, %v275_v5 }
 0x477   :  { %v1559_v44 = vsel %vm1525_vm11, %v9014_v1, -inf }
 0x478   :  { %1539 = vmax.xlane.f32.xlu2 %v1538_v48 }
 0x47d   :  { %1542 = vmax.xlane.f32.xlu1 %v1541_v13  ;;  %1578 = vmax.xlane.f32.xlu0 %v1577_v26 }
 0x480   :  { %1560 = vmax.xlane.f32.xlu2 %v1559_v44 }
 0x485   :  { %1557 = vmax.xlane.f32.xlu0 %v1556_v15 }
 0x48d   :  { %1596 = vmax.xlane.f32.xlu0 %v1595_v62 }
 0x4a1   :  { %7385 = vrot.lane.b32.xlu0 %v7384_v36, %s7837_s9 }
 0x4a9   :  { %v1528_v25 = vpop.xlane.xlu2 %1527 }
 0x4aa   :  { %v1598_v56 = vsub.f32 %v8919_v39, %v1528_v25 }
 0x4ac   :  { %v1622_v38 = vmul.f32 1.442695, %v1598_v56 }
 0x4ae   :  { %7520 = vpow2.f32 %v1622_v38 }
 0x4b4   :  { %v1564_v11 = vpop.xlane.xlu0 %1563  ;;  %v9034_v10 = vpop.eup %7520 }
 0x4b5   :  { %v1610_v16 = vsub.f32 %v8923_v3, %v1564_v11  ;;  %v1670_v52 = vsel %vm1525_vm11, %v9034_v10, 0.0 }
 0x4b6   :  { %1671 = vadd.xlane.f32.xlu2 %v1670_v52 }
 0x4b7   :  { %v1646_v33 = vmul.f32 1.442695, %v1610_v16 }
 0x4b9   :  { %7522 = vpow2.f32 %v1646_v33 }
 0x4bc   :  { %v1531_v39 = vpop.xlane.xlu0 %1530 }
 0x4bd   :  { %v1599_v28 = vsub.f32 %v8930_v55, %v1531_v39 }
 0x4bf   :  { %v9039_v43 = vpop.eup %7522  ;;  %v1624_v5 = vmul.f32 1.442695, %v1599_v28 }
 0x4c0   :  { %v1582_v35 = vpop.xlane.xlu1 %1581  ;;  %v1706_v20 = vsel %vm1525_vm11, %v9039_v43, 0.0 }
 0x4c1   :  { %v1616_v6 = vsub.f32 %v8934_v18, %v1582_v35  ;;  %1707 = vadd.xlane.f32.xlu1 %v1706_v20 }
 0x4c2   :  { %v1546_v30 = vpop.xlane.xlu2 %1545 }
 0x4c3   :  { %v1658_v14 = vmul.f32 1.442695, %v1616_v6  ;;  %v1604_v3 = vsub.f32 %v8936_v53, %v1546_v30 }
 0x4c5   :  { %7524 = vpow2.f32 %v1658_v14  ;;  %v1634_v40 = vmul.f32 1.442695, %v1604_v3 }
 0x4c7   :  { %7526 = vpow2.f32 %v1634_v40 }
 0x4c8   :  { %v1567_v63 = vpop.xlane.xlu1 %1566  ;;  %7528 = vpow2.f32 %v1624_v5 }
 0x4c9   :  { %v1611_v8 = vsub.f32 %v8942_v34, %v1567_v63 }
 0x4ca   :  { %v1549_v61 = vpop.xlane.xlu2 %1548 }
 0x4cb   :  { %v9047_v48 = vpop.eup %7524  ;;  %v1648_v49 = vmul.f32 1.442695, %v1611_v8  ;;  %v1605_v52 = vsub.f32 %v8944_v9, %v1549_v61 }
 0x4cc   :  { %v1724_v18 = vsel %vm1525_vm11, %v9047_v48, 0.0 }
 0x4cd   :  { %v9051_v13 = vpop.eup %7526  ;;  %7530 = vpow2.f32 %v1648_v49  ;;  %1725 = vadd.xlane.f32.xlu0 %v1724_v18  ;;  %v1636_v30 = vmul.f32 1.442695, %v1605_v52 }
 0x4ce   :  { %v1688_v55 = vsel %vm1525_vm11, %v9051_v13, 0.0  ;;  %v9056_v44 = vpop.eup %7528 }
 0x4cf   :  { %1689 = vadd.xlane.f32.xlu2 %v1688_v55  ;;  %v1673_v25 = vsel %vm1525_vm11, %v9056_v44, 0.0 }
 0x4d0   :  { %v1585_v53 = vpop.xlane.xlu1 %1584  ;;  %v1588_v26 = vpop.xlane.xlu0 %1587 }
 0x4d1   :  { %v1617_v34 = vsub.f32 %v8950_v7, %v1585_v53  ;;  %v1618_v55 = vsub.f32 %v8955_v23, %v1588_v26 }
 0x4d3   :  { %v9058_v15 = vpop.eup %7530  ;;  %v1660_v47 = vmul.f32 1.442695, %v1617_v34  ;;  %v1552_v62 = vpop.xlane.xlu2 %1551 }
 0x4d4   :  { %v1709_v36 = vsel %vm1525_vm11, %v9058_v15, 0.0  ;;  %v1606_v35 = vsub.f32 %v8959_v32, %v1552_v62 }
 0x4d5   :  { %7532 = vpow2.f32 %v1660_v47  ;;  %1710 = vadd.xlane.f32.xlu1 %v1709_v36  ;;  %v1662_v36 = vmul.f32 1.442695, %v1618_v55 }
 0x4d6   :  { %v1638_v14 = vmul.f32 1.442695, %v1606_v35 }
 0x4d7   :  { %1674 = vadd.xlane.f32.xlu2 %v1673_v25 }
 0x4d8   :  { %v1570_v56 = vpop.xlane.xlu1 %1569  ;;  %v1534_v38 = vpop.xlane.xlu0 %1533 }
 0x4d9   :  { %v1612_v11 = vsub.f32 %v8965_v31, %v1570_v56  ;;  %v1600_v7 = vsub.f32 %v8967_v29, %v1534_v38 }
 0x4db   :  { %v9066_v16 = vpop.eup %7532  ;;  %v1650_v33 = vmul.f32 1.442695, %v1612_v11  ;;  %v1626_v20 = vmul.f32 1.442695, %v1600_v7  ;;  %v1591_v6 = vpop.xlane.xlu2 %1590 }
 0x4dc   :  { %v1727_v39 = vsel %vm1525_vm11, %v9066_v16, 0.0  ;;  %v1619_v9 = vsub.f32 %v8972_v42, %v1591_v6 }
 0x4dd   :  { %7534 = vpow2.f32 %v1650_v33  ;;  %1728 = vadd.xlane.f32.xlu1 %v1727_v39 }
 0x4de   :  { %7536 = vpow2.f32 %v1626_v20  ;;  %v1664_v40 = vmul.f32 1.442695, %v1619_v9 }
 0x4df   :  { %7538 = vpow2.f32 %v1636_v30 }
 0x4e0   :  { %v9072_v31 = vpop.xlane.xlu0 %1572  ;;  %7540 = vpow2.f32 %v1638_v14  ;;  %v1555_v5 = vpop.xlane.xlu1 %1554 }
 0x4e1   :  { %7542 = vpow2.f32 %v1664_v40 }
 0x4e3   :  { %v9074_v29 = vpop.eup %7534  ;;  %v1576_v63 = vpop.xlane.xlu2 %1575 }
 0x4e4   :  { %v9077_v3 = vpop.eup %7536  ;;  %v1712_v32 = vsel %vm1525_vm11, %v9074_v29, 0.0  ;;  %v1614_v18 = vsub.f32 %v8987_v54, %v1576_v63  ;;  %v1607_v54 = vsub.f32 %v8980_v37, %v1555_v5 }
 0x4e5   :  { %v1676_v28 = vsel %vm1525_vm11, %v9077_v3, 0.0  ;;  %1713 = vadd.xlane.f32.xlu2 %v1712_v32  ;;  %v9083_v8 = vpop.eup %7538 }
 0x4e6   :  { %1677 = vadd.xlane.f32.xlu1 %v1676_v28  ;;  %v9085_v49 = vpop.eup %7540  ;;  %v1691_v34 = vsel %vm1525_vm11, %v9083_v8, 0.0  ;;  %v1654_v62 = vmul.f32 1.442695, %v1614_v18  ;;  %v1640_v7 = vmul.f32 1.442695, %v1607_v54 }
 0x4e7   :  { %v1694_v47 = vsel %vm1525_vm11, %v9085_v49, 0.0  ;;  %v9094_v25 = vpop.eup %7542 }
 0x4e8   :  { %v1537_v61 = vpop.xlane.xlu0 %1536  ;;  %v1733_v38 = vsel %vm1525_vm11, %v9094_v25, 0.0 }
 0x4e9   :  { %v1601_v42 = vsub.f32 %v8997_v24, %v1537_v61  ;;  %v1594_v24 = vpop.xlane.xlu1 %1593 }
 0x4ea   :  { %v1620_v26 = vsub.f32 %v8995_v60, %v1594_v24 }
 0x4eb   :  { %v1628_v53 = vmul.f32 1.442695, %v1601_v42  ;;  %v1540_v52 = vpop.xlane.xlu2 %1539  ;;  %v7389_v42 = vpack.i.bf16 %v8815_v46, %v8808_v2 }
 0x4ec   :  { %v1666_v33 = vmul.f32 1.442695, %v1620_v26  ;;  %v1602_v39 = vsub.f32 %v8999_v22, %v1540_v52 }
 0x4ed   :  { %1692 = vadd.xlane.f32.xlu2 %v1691_v34  ;;  %7544 = vpow2.f32 %v1628_v53 }
 0x4ee   :  { %1695 = vadd.xlane.f32.xlu1 %v1694_v47  ;;  %7546 = vpow2.f32 %v1654_v62  ;;  %v1630_v14 = vmul.f32 1.442695, %v1602_v39 }
 0x4ef   :  { %7548 = vpow2.f32 %v1662_v36 }
 0x4f0   :  { %v9096_v56 = vpop.xlane.xlu0 %1578  ;;  %7550 = vpow2.f32 %v1640_v7 }
 0x4f1   :  { %7552 = vpow2.f32 %v1666_v33  ;;  %v1543_v9 = vpop.xlane.xlu1 %1542  ;;  %v1615_v24 = vsub.f32 %v9012_v0, %v9096_v56  ;;  %v1613_v56 = vsub.f32 %v8982_v50, %v9072_v31 }
 0x4f2   :  { %7554 = vpow2.f32 %v1630_v14  ;;  %v1603_v22 = vsub.f32 %v9010_v4, %v1543_v9 }
 0x4f3   :  { %v9099_v23 = vpop.eup %7544  ;;  %v1561_v40 = vpop.xlane.xlu2 %1560  ;;  %v1656_v7 = vmul.f32 1.442695, %v1615_v24 }
 0x4f4   :  { %v1679_v11 = vsel %vm1525_vm11, %v9099_v23, 0.0  ;;  %v9106_v35 = vpop.eup %7546  ;;  %v1632_v18 = vmul.f32 1.442695, %v1603_v22 }
 0x4f5   :  { %1734 = vadd.xlane.f32.xlu2 %v1733_v38  ;;  %1680 = vadd.xlane.f32.xlu0 %v1679_v11  ;;  %v9108_v20 = vpop.eup %7548  ;;  %v1718_v6 = vsel %vm1525_vm11, %v9106_v35, 0.0 }
 0x4f6   :  { %v1730_v30 = vsel %vm1525_vm11, %v9108_v20, 0.0  ;;  %v9116_v28 = vpop.eup %7550 }
 0x4f7   :  { %v9118_v5 = vpop.eup %7552  ;;  %v1697_v63 = vsel %vm1525_vm11, %v9116_v28, 0.0 }
 0x4f8   :  { %v1558_v37 = vpop.xlane.xlu0 %1557  ;;  %v1736_v61 = vsel %vm1525_vm11, %v9118_v5, 0.0  ;;  %v9129_v4 = vpop.eup %7554 }
 0x4f9   :  { %v1608_v60 = vsub.f32 %v9022_v19, %v1558_v37  ;;  %v1609_v19 = vsub.f32 %v9014_v1, %v1561_v40  ;;  %v1682_v47 = vsel %vm1525_vm11, %v9129_v4, 0.0  ;;  %v1652_v37 = vmul.f32 1.442695, %v1613_v56 }
 0x4fb   :  { %v1642_v32 = vmul.f32 1.442695, %v1608_v60  ;;  %v1644_v55 = vmul.f32 1.442695, %v1609_v19 }
 0x4fd   :  { %1719 = vadd.xlane.f32.xlu2 %v1718_v6  ;;  %1731 = vadd.xlane.f32.xlu0 %v1730_v30  ;;  %7556 = vpow2.f32 %v1642_v32 }
 0x4fe   :  { %7558 = vpow2.f32 %v1632_v18 }
 0x4ff   :  { %7560 = vpow2.f32 %v1644_v55 }
 0x500   :  { %v1597_v53 = vpop.xlane.xlu0 %1596 }
 0x501   :  { %v1621_v34 = vsub.f32 %v9026_v27, %v1597_v53 }
 0x503   :  { %v9131_v1 = vpop.eup %7556  ;;  %v1668_v46 = vmul.f32 1.442695, %v1621_v34 }
 0x504   :  { %v1700_v2 = vsel %vm1525_vm11, %v9131_v1, 0.0  ;;  %v9138_v62 = vpop.eup %7558 }
 0x505   :  { %1698 = vadd.xlane.f32.xlu2 %v1697_v63  ;;  %1737 = vadd.xlane.f32.xlu0 %v1736_v61  ;;  %v9140_v36 = vpop.eup %7560  ;;  %7562 = vpow2.f32 %v1668_v46  ;;  %v1685_v27 = vsel %vm1525_vm11, %v9138_v62, 0.0 }
 0x506   :  { %v1703_v11 = vsel %vm1525_vm11, %v9140_v36, 0.0  ;;  %7564 = vpow2.f32 %v1656_v7 }
 0x507   :  { %7390 = vrot.lane.b32.xlu1 %v7389_v42, %s7837_s9  ;;  %7566 = vpow2.f32 %v1652_v37 }
 0x50b   :  { %v9148_v52 = vpop.eup %7562 }
 0x50c   :  { %v1739_v0 = vsel %vm1525_vm11, %v9148_v52, 0.0  ;;  %v9154_v33 = vpop.eup %7564 }
 0x50d   :  { %1683 = vadd.xlane.f32.xlu2 %v1682_v47  ;;  %1701 = vadd.xlane.f32.xlu0 %v1700_v2  ;;  %v1721_v39 = vsel %vm1525_vm11, %v9154_v33, 0.0  ;;  %v9158_v6 = vpop.eup %7566 }
 0x50e   :  { %v1715_v30 = vsel %vm1525_vm11, %v9158_v6, 0.0 }
 0x513   :  { %v7386_v54 = vpop.permute.xlu0 %7385 }
 0x514   :  { %v7388_v26 = vunpack.i.h.bf16 %v7386_v54  ;;  %v7387_v38 = vunpack.i.l.bf16 %v7386_v54 }
 0x515   :  { %1686 = vadd.xlane.f32.xlu2 %v1685_v27  ;;  %1704 = vadd.xlane.f32.xlu0 %v1703_v11 }
 0x516   :  { %2224 = vmatpush.msra.mxu3 %v7387_v38  ;;  %2364 = vmatpush.msrb.mxu0 %v7388_v26 }
 0x517   :  { %7318 = vmatpush.msra.mxu2 %v7388_v26 }
 0x51d   :  { %1740 = vadd.xlane.f32.xlu2 %v1739_v0 }
 0x525   :  { %1722 = vadd.xlane.f32.xlu2 %v1721_v39 }
 0x529   :  { %v1672_v60 = vpop.xlane.xlu2 %1671 }
 0x52a   :  { %7568 = vrcp.f32 %v1672_v60  ;;  %v1753_v31 = vand.u32 2147483648, %v1672_v60  ;;  %v1751_v22 = vand.u32 2147483647, %v1672_v60  ;;  %vm1747_vm13 = vweird.f32 %v1672_v60 }
 0x52c   :  { %v1754_v63 = vor.u32 1.1754944e-38, %v1753_v31  ;;  %vm1752_vm15 = vcmp.eq.f32.partialorder %v1751_v22, 8.507059e+37 }
 0x530   :  { %v7569_v14 = vpop.eup %7568 }
 0x531   :  { %1716 = vadd.xlane.f32.xlu1 %v1715_v30  ;;  %v1743_v9 = vmul.f32 %v7569_v14, %v1672_v60  ;;  %vm1748_vm12 = vweird.f32 %v7569_v14 }
 0x532   :  { %vm1749_vm14 = vmor %vm1747_vm13, %vm1748_vm12 }
 0x533   :  { %v1744_v32 = vsub.f32 1.0, %v1743_v9 }
 0x534   :  { %v1708_v50 = vpop.xlane.xlu1 %1707 }
 0x535   :  { %7570 = vrcp.f32 %v1708_v50  ;;  %v1745_v40 = vmul.f32 %v7569_v14, %v1744_v32  ;;  %v1933_v47 = vand.u32 2147483648, %v1708_v50  ;;  %v1931_v46 = vand.u32 2147483647, %v1708_v50 }
 0x536   :  { %vm1927_vm2 = vweird.f32 %v1708_v50 }
 0x537   :  { %v1746_v19 = vadd.f32 %v7569_v14, %v1745_v40  ;;  %v1934_v27 = vor.u32 1.1754944e-38, %v1933_v47  ;;  %vm1932_vm4 = vcmp.eq.f32.partialorder %v1931_v46, 8.507059e+37 }
 0x539   :  { %v1750_v61 = vsel %vm1749_vm14, %v7569_v14, %v1746_v19 }
 0x53a   :  { %v1755_v18 = vsel %vm1752_vm15, %v1754_v63, %v1750_v61 }
 0x53b   :  { %v7571_v42 = vpop.eup %7570  ;;  %v1756_v53 = vmul.f32 %v9034_v10, %v1755_v18 }
 0x53c   :  { %v1923_v55 = vmul.f32 %v7571_v42, %v1708_v50  ;;  %vm1928_vm0 = vweird.f32 %v7571_v42 }
 0x53d   :  { %7138 = vmatmul.msk.f32.vlgmr.msrb.gmra.mxu2 %vm1525_vm11, %v1756_v53  ;;  %vm1929_vm3 = vmor %vm1927_vm2, %vm1928_vm0 }
 0x53e   :  { %v1924_v34 = vsub.f32 1.0, %v1923_v55 }
 0x540   :  { %v1925_v2 = vmul.f32 %v7571_v42, %v1924_v34  ;;  %v9168_v40 = vpop.xlane.xlu0 %1725 }
 0x542   :  { %v1926_v24 = vadd.f32 %v7571_v42, %v1925_v2  ;;  %v1690_v54 = vpop.xlane.xlu2 %1689 }
 0x543   :  { %7572 = vrcp.f32 %v1690_v54  ;;  %v1843_v39 = vand.u32 2147483648, %v1690_v54  ;;  %v1841_v30 = vand.u32 2147483647, %v1690_v54  ;;  %vm1837_vm6 = vweird.f32 %v1690_v54 }
 0x544   :  { %v1930_v26 = vsel %vm1929_vm3, %v7571_v42, %v1926_v24 }
 0x545   :  { %v1935_v38 = vsel %vm1932_vm4, %v1934_v27, %v1930_v26  ;;  %v1844_v31 = vor.u32 1.1754944e-38, %v1843_v39  ;;  %vm1842_vm8 = vcmp.eq.f32.partialorder %v1841_v30, 8.507059e+37 }
 0x546   :  { %v1936_v11 = vmul.f32 %v9039_v43, %v1935_v38 }
 0x548   :  { %v1711_v7 = vpop.xlane.xlu1 %1710  ;;  %7150 = vmatmul.msk.f32.vlgmr.msra.gmra.mxu0 %vm1525_vm11, %v1936_v11 }
 0x549   :  { %v7573_v10 = vpop.eup %7572  ;;  %7574 = vrcp.f32 %v1711_v7  ;;  %v1948_v42 = vand.u32 2147483648, %v1711_v7  ;;  %vm1942_vm13 = vweird.f32 %v1711_v7  ;;  %v1946_v34 = vand.u32 2147483647, %v1711_v7 }
 0x54a   :  { %v1833_v0 = vmul.f32 %v7573_v10, %v1690_v54  ;;  %v1675_v56 = vpop.xlane.xlu2 %1674  ;;  %vm1838_vm5 = vweird.f32 %v7573_v10 }
 0x54b   :  { %7576 = vrcp.f32 %v1675_v56  ;;  %vm1839_vm7 = vmor %vm1837_vm6, %vm1838_vm5  ;;  %v1768_v47 = vand.u32 2147483648, %v1675_v56  ;;  %v1766_v24 = vand.u32 2147483647, %v1675_v56  ;;  %v1949_v26 = vor.u32 1.1754944e-38, %v1948_v42 }
 0x54c   :  { %v1834_v37 = vsub.f32 1.0, %v1833_v0  ;;  %7578 = vrcp.f32 %v9168_v40  ;;  %vm1762_vm0 = vweird.f32 %v1675_v56  ;;  %vm1947_vm2 = vcmp.eq.f32.partialorder %v1946_v34, 8.507059e+37 }
 0x54d   :  { %v1769_v11 = vor.u32 1.1754944e-38, %v1768_v47  ;;  %vm1767_vm4 = vcmp.eq.f32.partialorder %v1766_v24, 8.507059e+37 }
 0x54e   :  { %v1835_v60 = vmul.f32 %v7573_v10, %v1834_v37 }
 0x54f   :  { %v7575_v14 = vpop.eup %7574 }
 0x550   :  { %v1836_v9 = vadd.f32 %v7573_v10, %v1835_v60  ;;  %v1938_v32 = vmul.f32 %v7575_v14, %v1711_v7  ;;  %v9166_v50 = vpop.xlane.xlu1 %1728  ;;  %vm1943_vm12 = vweird.f32 %v7575_v14 }
 0x551   :  { %v7577_v43 = vpop.eup %7576  ;;  %vm1944_vm15 = vmor %vm1942_vm13, %vm1943_vm12 }
 0x552   :  { %v1840_v22 = vsel %vm1839_vm7, %v7573_v10, %v1836_v9  ;;  %v1939_v19 = vsub.f32 1.0, %v1938_v32  ;;  %v1758_v63 = vmul.f32 %v7577_v43, %v1675_v56  ;;  %vm1763_vm14 = vweird.f32 %v7577_v43  ;;  %v9173_v0 = vpop.eup %7578 }
 0x553   :  { %v1845_v61 = vsel %vm1842_vm8, %v1844_v31, %v1840_v22  ;;  %vm1764_vm3 = vmor %vm1762_vm0, %vm1763_vm14  ;;  %v2013_v30 = vmul.f32 %v9173_v0, %v9168_v40 }
 0x554   :  { %v1759_v18 = vsub.f32 1.0, %v1758_v63  ;;  %v1846_v55 = vmul.f32 %v9051_v13, %v1845_v61  ;;  %v1940_v53 = vmul.f32 %v7575_v14, %v1939_v19 }
 0x556   :  { %7144 = vmatmul.msk.f32.vlgmr.msra.gmra.mxu3 %vm1525_vm11, %v1846_v55  ;;  %v1941_v2 = vadd.f32 %v7575_v14, %v1940_v53  ;;  %v1760_v46 = vmul.f32 %v7577_v43, %v1759_v18 }
 0x558   :  { %v1714_v54 = vpop.xlane.xlu2 %1713  ;;  %v1945_v27 = vsel %vm1944_vm15, %v7575_v14, %v1941_v2  ;;  %v1761_v38 = vadd.f32 %v7577_v43, %v1760_v46  ;;  %v2036_v2 = vand.u32 2147483647, %v9166_v50 }
 0x559   :  { %v1678_v13 = vpop.xlane.xlu1 %1677  ;;  %7580 = vrcp.f32 %v1714_v54  ;;  %v1950_v7 = vsel %vm1947_vm2, %v1949_v26, %v1945_v27  ;;  %v1963_v19 = vand.u32 2147483648, %v1714_v54  ;;  %v1961_v61 = vand.u32 2147483647, %v1714_v54 }
 0x55a   :  { %7582 = vrcp.f32 %v1678_v13  ;;  %v1765_v10 = vsel %vm1764_vm3, %v7577_v43, %v1761_v38  ;;  %v1951_v37 = vmul.f32 %v9058_v15, %v1950_v7  ;;  %v1783_v42 = vand.u32 2147483648, %v1678_v13 }
 0x55b   :  { %v1770_v39 = vsel %vm1767_vm4, %v1769_v11, %v1765_v10  ;;  %v1781_v55 = vand.u32 2147483647, %v1678_v13  ;;  %vm1957_vm7 = vweird.f32 %v1714_v54  ;;  %v1964_v46 = vor.u32 1.1754944e-38, %v1963_v19 }
 0x55c   :  { %v1771_v60 = vmul.f32 %v9056_v44, %v1770_v39  ;;  %7151 = vmatmul.msk.f32.gmra.mxu0 %vm1525_vm11, %v1951_v37  ;;  %v2014_v44 = vsub.f32 1.0, %v2013_v30  ;;  %vm1777_vm12 = vweird.f32 %v1678_v13  ;;  %vm1962_vm13 = vcmp.eq.f32.partialorder %v1961_v61, 8.507059e+37 }
 0x55d   :  { %vm1782_vm15 = vcmp.eq.f32.partialorder %v1781_v55, 8.507059e+37  ;;  %vm2018_vm2 = vweird.f32 %v9173_v0  ;;  %vm2017_vm4 = vweird.f32 %v9168_v40  ;;  %v2023_v61 = vand.u32 2147483648, %v9168_v40 }
 0x55e   :  { %7139 = vmatmul.msk.f32.gmra.mxu2 %vm1525_vm11, %v1771_v60  ;;  %v2015_v47 = vmul.f32 %v9173_v0, %v2014_v44 }
 0x55f   :  { %v7581_v56 = vpop.eup %7580 }
 0x560   :  { %v7583_v14 = vpop.eup %7582  ;;  %v1953_v9 = vmul.f32 %v7581_v56, %v1714_v54  ;;  %v9181_v32 = vpop.xlane.xlu2 %1692  ;;  %vm1958_vm5 = vweird.f32 %v7581_v56  ;;  %v1784_v54 = vor.u32 1.1754944e-38, %v1783_v42 }
 0x561   :  { %v1773_v43 = vmul.f32 %v7583_v14, %v1678_v13  ;;  %v9183_v31 = vpop.xlane.xlu1 %1695  ;;  %7584 = vrcp.f32 %v9181_v32  ;;  %vm1778_vm6 = vweird.f32 %v7583_v14  ;;  %vm9189_vm8 = vmor %vm1957_vm7, %vm1958_vm5  ;;  %vm1852_vm3 = vweird.f32 %v9181_v32 }
 0x562   :  { %v1954_v15 = vsub.f32 1.0, %v1953_v9  ;;  %7586 = vrcp.f32 %v9183_v31  ;;  %vm1779_vm14 = vmor %vm1777_vm12, %vm1778_vm6  ;;  %vm1867_vm12 = vweird.f32 %v9183_v31 }
 0x563   :  { %7588 = vrcp.f32 %v9166_v50  ;;  %v1774_v22 = vsub.f32 1.0, %v1773_v43  ;;  %vm9226_vm7 = vmor %vm2017_vm4, %vm2018_vm2 }
 0x564   :  { %v1955_v63 = vmul.f32 %v7581_v56, %v1954_v15  ;;  %v1858_v15 = vand.u32 2147483648, %v9181_v32 }
 0x565   :  { %v1775_v18 = vmul.f32 %v7583_v14, %v1774_v22 }
 0x566   :  { %v1956_v53 = vadd.f32 %v7581_v56, %v1955_v63  ;;  %v2021_v63 = vand.u32 2147483647, %v9168_v40  ;;  %v1859_v42 = vor.u32 1.1754944e-38, %v1858_v15 }
 0x567   :  { %v7585_v34 = vpop.eup %7584  ;;  %v1776_v24 = vadd.f32 %v7583_v14, %v1775_v18 }
 0x568   :  { %v9193_v27 = vpop.eup %7586  ;;  %v1960_v26 = vsel %vm9189_vm8, %v7581_v56, %v1956_v53  ;;  %v1848_v38 = vmul.f32 %v7585_v34, %v9181_v32  ;;  %v9198_v11 = vpop.xlane.xlu2 %1734  ;;  %vm1853_vm0 = vweird.f32 %v7585_v34 }
 0x569   :  { %v9201_v7 = vpop.eup %7588  ;;  %v1863_v10 = vmul.f32 %v9193_v27, %v9183_v31  ;;  %v9205_v37 = vpop.xlane.xlu0 %1680  ;;  %v1780_v13 = vsel %vm1779_vm14, %v7583_v14, %v1776_v24  ;;  %v1965_v39 = vsel %vm1962_vm13, %v1964_v46, %v1960_v26  ;;  %v1856_v14 = vand.u32 2147483647, %v9181_v32  ;;  %vm1854_vm5 = vmor %vm1852_vm3, %vm1853_vm0 }
 0x56a   :  { %v1849_v60 = vsub.f32 1.0, %v1848_v38  ;;  %7590 = vrcp.f32 %v9205_v37  ;;  %v1785_v56 = vsel %vm1782_vm15, %v1784_v54, %v1780_v13  ;;  %v1966_v30 = vmul.f32 %v9074_v29, %v1965_v39 }
 0x56b   :  { %v1864_v9 = vsub.f32 1.0, %v1863_v10  ;;  %v1786_v43 = vmul.f32 %v9077_v3, %v1785_v56  ;;  %v2028_v44 = vmul.f32 %v9201_v7, %v9166_v50  ;;  %v2016_v29 = vadd.f32 %v9173_v0, %v2015_v47 }
 0x56c   :  { %7152 = vmatmul.msk.f32.vlgmr.msra.gmra.mxu1 %vm1525_vm11, %v1966_v30  ;;  %v1850_v22 = vmul.f32 %v7585_v34, %v1849_v60  ;;  %7592 = vrcp.f32 %v9198_v11  ;;  %vm1857_vm6 = vcmp.eq.f32.partialorder %v1856_v14, 8.507059e+37  ;;  %vm1868_vm8 = vweird.f32 %v9193_v27 }
 0x56d   :  { %7140 = vmatmul.msk.f32.gmra.mxu2 %vm1525_vm11, %v1786_v43  ;;  %v1865_v19 = vmul.f32 %v9193_v27, %v1864_v9  ;;  %v2029_v55 = vsub.f32 1.0, %v2028_v44  ;;  %v2020_v26 = vsel %vm9226_vm7, %v9173_v0, %v2016_v29  ;;  %v1873_v38 = vand.u32 2147483648, %v9183_v31  ;;  %vm9246_vm14 = vmor %vm1867_vm12, %vm1868_vm8 }
 0x56e   :  { %v1851_v3 = vadd.f32 %v7585_v34, %v1850_v22  ;;  %v1796_v10 = vand.u32 2147483647, %v9205_v37  ;;  %v1871_v13 = vand.u32 2147483647, %v9183_v31  ;;  %vm2022_vm13 = vcmp.eq.f32.partialorder %v2021_v63, 8.507059e+37 }
 0x56f   :  { %v1866_v40 = vadd.f32 %v9193_v27, %v1865_v19  ;;  %v2024_v39 = vor.u32 1.1754944e-38, %v2023_v61  ;;  %v1798_v60 = vand.u32 2147483648, %v9205_v37  ;;  %v2030_v30 = vmul.f32 %v9201_v7, %v2029_v55 }
 0x570   :  { %v7591_v18 = vpop.eup %7590  ;;  %v9224_v53 = vpop.xlane.xlu2 %1719  ;;  %v1855_v47 = vsel %vm1854_vm5, %v7585_v34, %v1851_v3  ;;  %v1874_v31 = vor.u32 1.1754944e-38, %v1873_v38  ;;  %vm1792_vm0 = vweird.f32 %v9205_v37  ;;  %vm9257_vm2 = vcmp.eq.f32.partialorder %v1796_v10, 8.507059e+37 }
 0x571   :  { %v1788_v32 = vmul.f32 %v7591_v18, %v9205_v37  ;;  %v9231_v46 = vpop.xlane.xlu0 %1731  ;;  %v1860_v24 = vsel %vm1857_vm6, %v1859_v42, %v1855_v47  ;;  %vm1793_vm15 = vweird.f32 %v7591_v18  ;;  %v1870_v56 = vsel %vm9246_vm14, %v9193_v27, %v1866_v40 }
 0x572   :  { %7594 = vrcp.f32 %v9231_v46  ;;  %v1861_v34 = vmul.f32 %v9083_v8, %v1860_v24  ;;  %v9254_v9 = vpop.eup %7592  ;;  %v2025_v43 = vsel %vm2022_vm13, %v2024_v39, %v2020_v26  ;;  %vm1872_vm3 = vcmp.eq.f32.partialorder %v1871_v13, 8.507059e+37  ;;  %vm9265_vm4 = vmor %vm1792_vm0, %vm1793_vm15 }
 0x573   :  { %v1789_v54 = vsub.f32 1.0, %v1788_v32  ;;  %v1799_v19 = vor.u32 1.1754944e-38, %v1798_v60  ;;  %v1875_v29 = vsel %vm1872_vm3, %v1874_v31, %v1870_v56  ;;  %vm2032_vm5 = vweird.f32 %v9166_v50 }
 0x574   :  { %7145 = vmatmul.msk.f32.gmra.mxu3 %vm1525_vm11, %v1861_v34  ;;  %vm2033_vm6 = vweird.f32 %v9201_v7  ;;  %v2031_v42 = vadd.f32 %v9201_v7, %v2030_v30  ;;  %v2058_v55 = vmul.f32 %v9254_v9, %v9198_v11  ;;  %v2038_v32 = vand.u32 2147483648, %v9166_v50 }
 0x575   :  { %v1790_v8 = vmul.f32 %v7591_v18, %v1789_v54  ;;  %v1876_v26 = vmul.f32 %v9085_v49, %v1875_v29  ;;  %vm9292_vm7 = vmor %vm2032_vm5, %vm2033_vm6  ;;  %v2026_v54 = vmul.f32 %v9047_v48, %v2025_v43  ;;  %vm2037_vm8 = vcmp.eq.f32.partialorder %v2036_v2, 8.507059e+37 }
 0x576   :  { %v2035_v49 = vsel %vm9292_vm7, %v9201_v7, %v2031_v42  ;;  %v2059_v13 = vsub.f32 1.0, %v2058_v55  ;;  %v2051_v39 = vand.u32 2147483647, %v9231_v46  ;;  %v2053_v43 = vand.u32 2147483648, %v9231_v46 }
 0x577   :  { %v1791_v15 = vadd.f32 %v7591_v18, %v1790_v8  ;;  %vm2047_vm13 = vweird.f32 %v9231_v46  ;;  %vm2063_vm5 = vweird.f32 %v9254_v9  ;;  %v2066_v38 = vand.u32 2147483647, %v9198_v11 }
 0x578   :  { %v9261_v22 = vpop.eup %7594  ;;  %v9263_v14 = vpop.xlane.xlu2 %1698  ;;  %v2060_v44 = vmul.f32 %v9254_v9, %v2059_v13  ;;  %vm9326_vm15 = vcmp.eq.f32.partialorder %v2051_v39, 8.507059e+37  ;;  %v2054_v42 = vor.u32 1.1754944e-38, %v2053_v43 }
 0x579   :  { %v2043_v37 = vmul.f32 %v9261_v22, %v9231_v46  ;;  %v9273_v3 = vpop.xlane.xlu0 %1737  ;;  %v7391_v63 = vpop.permute.xlu1 %7390  ;;  %7596 = vrcp.f32 %v9263_v14  ;;  %v1795_v61 = vsel %vm9265_vm4, %v7591_v18, %v1791_v15  ;;  %vm2048_vm12 = vweird.f32 %v9261_v22 }
 0x57a   :  { %v7392_v47 = vunpack.i.l.bf16 %v7391_v63  ;;  %7598 = vrcp.f32 %v9273_v3  ;;  %v1800_v40 = vsel %vm9257_vm2, %v1799_v19, %v1795_v61  ;;  %v7393_v34 = vunpack.i.h.bf16 %v7391_v63  ;;  %vm9322_vm14 = vmor %vm2047_vm13, %vm2048_vm12 }
 0x57b   :  { %v2044_v24 = vsub.f32 1.0, %v2043_v37  ;;  %v1801_v18 = vmul.f32 %v9099_v23, %v1800_v40  ;;  %v2039_v23 = vor.u32 1.1754944e-38, %v2038_v32  ;;  %v1886_v30 = vand.u32 2147483647, %v9263_v14 }
 0x57c   :  { %2365 = vmatpush.msrb.mxu0 %v7392_v47  ;;  %7319 = vmatpush.msra.mxu2 %v7392_v47  ;;  %v1888_v31 = vand.u32 2147483648, %v9263_v14  ;;  %vm1882_vm2 = vweird.f32 %v9263_v14  ;;  %v2061_v47 = vadd.f32 %v9254_v9, %v2060_v44  ;;  %vm2062_vm4 = vweird.f32 %v9198_v11 }
 0x57d   :  { %7146 = vmatmul.msk.f32.gmra.mxu3 %vm1525_vm11, %v1876_v26  ;;  %v2045_v10 = vmul.f32 %v9261_v22, %v2044_v24  ;;  %7141 = vmatmul.msk.f32.gmra.mxu2 %vm1525_vm11, %v1801_v18  ;;  %v2040_v0 = vsel %vm2037_vm8, %v2039_v23, %v2035_v49  ;;  %vm9336_vm3 = vcmp.eq.f32.partialorder %v1886_v30, 8.507059e+37  ;;  %v2068_v32 = vand.u32 2147483648, %v9198_v11  ;;  %vm9364_vm8 = vmor %vm2062_vm4, %vm2063_vm5 }
 0x57e   :  { %2366 = vmatpush.msrb.mxu0 %v7393_v34  ;;  %7320 = vmatpush.msra.mxu2 %v7393_v34  ;;  %v2041_v27 = vmul.f32 %v9066_v16, %v2040_v0  ;;  %v1889_v61 = vor.u32 1.1754944e-38, %v1888_v31  ;;  %vm2067_vm13 = vcmp.eq.f32.partialorder %v2066_v38, 8.507059e+37  ;;  %vm2077_vm4 = vweird.f32 %v9273_v3 }
 0x57f   :  { %v7597_v50 = vpop.eup %7596  ;;  %7156 = vmatmul.msk.f32.vlgmr.msrb.gmra.mxu0 %vm1525_vm11, %v2026_v54  ;;  %v2046_v7 = vadd.f32 %v9261_v22, %v2045_v10  ;;  %v2069_v31 = vor.u32 1.1754944e-38, %v2068_v32 }
 0x580   :  { %v1878_v48 = vmul.f32 %v7597_v50, %v9263_v14  ;;  %v9306_v60 = vpop.xlane.xlu2 %1683  ;;  %v9310_v8 = vpop.eup %7598  ;;  %vm1883_vm0 = vweird.f32 %v7597_v50 }
 0x581   :  { %v9312_v56 = vpop.xlane.xlu0 %1701  ;;  %7600 = vrcp.f32 %v9306_v60  ;;  %v2073_v37 = vmul.f32 %v9310_v8, %v9273_v3  ;;  %v2050_v46 = vsel %vm9322_vm14, %v9261_v22, %v2046_v7  ;;  %vm1884_vm6 = vmor %vm1882_vm2, %vm1883_vm0  ;;  %vm1807_vm7 = vweird.f32 %v9306_v60 }
 0x582   :  { %v1879_v15 = vsub.f32 1.0, %v1878_v48  ;;  %7602 = vrcp.f32 %v9312_v56  ;;  %v2055_v22 = vsel %vm9326_vm15, %v2054_v42, %v2050_v46  ;;  %v1811_v14 = vand.u32 2147483647, %v9306_v60 }
 0x583   :  { %v2074_v40 = vsub.f32 1.0, %v2073_v37  ;;  %v1813_v13 = vand.u32 2147483648, %v9306_v60  ;;  %v2065_v48 = vsel %vm9364_vm8, %v9254_v9, %v2061_v47  ;;  %v1901_v7 = vand.u32 2147483647, %v9312_v56 }
 0x584   :  { %v1880_v63 = vmul.f32 %v7597_v50, %v1879_v15  ;;  %v1903_v30 = vand.u32 2147483648, %v9312_v56  ;;  %v2056_v11 = vmul.f32 %v9108_v20, %v2055_v22  ;;  %vm9377_vm14 = vcmp.eq.f32.partialorder %v1811_v14, 8.507059e+37 }
 0x585   :  { %vm1897_vm15 = vweird.f32 %v9312_v56  ;;  %v2070_v9 = vsel %vm2067_vm13, %v2069_v31, %v2065_v48  ;;  %v2075_v19 = vmul.f32 %v9310_v8, %v2074_v40 }
 0x586   :  { %v1881_v55 = vadd.f32 %v7597_v50, %v1880_v63  ;;  %v1904_v46 = vor.u32 1.1754944e-38, %v1903_v30 }
 0x587   :  { %v7601_v2 = vpop.eup %7600  ;;  %7157 = vmatmul.msk.f32.gmra.mxu0 %vm1525_vm11, %v2041_v27  ;;  %v1814_v27 = vor.u32 1.1754944e-38, %v1813_v13  ;;  %v2083_v13 = vand.u32 2147483648, %v9273_v3 }
 0x588   :  { %v7603_v24 = vpop.eup %7602  ;;  %v1803_v26 = vmul.f32 %v7601_v2, %v9306_v60  ;;  %v9350_v34 = vpop.xlane.xlu2 %1686  ;;  %v1885_v18 = vsel %vm1884_vm6, %v7597_v50, %v1881_v55  ;;  %vm1808_vm12 = vweird.f32 %v7601_v2  ;;  %v2071_v55 = vmul.f32 %v9094_v25, %v2070_v9 }
 0x589   :  { %v1893_v54 = vmul.f32 %v7603_v24, %v9312_v56  ;;  %v9354_v49 = vpop.xlane.xlu0 %1704  ;;  %7604 = vrcp.f32 %v9350_v34  ;;  %v1890_v10 = vsel %vm9336_vm3, %v1889_v61, %v1885_v18  ;;  %vm1898_vm0 = vweird.f32 %v7603_v24  ;;  %vm9386_vm2 = vmor %vm1807_vm7, %vm1808_vm12 }
 0x58a   :  { %v1804_v50 = vsub.f32 1.0, %v1803_v26  ;;  %7606 = vrcp.f32 %v9354_v49  ;;  %v1891_v39 = vmul.f32 %v9116_v28, %v1890_v10  ;;  %vm9390_vm3 = vcmp.eq.f32.partialorder %v1901_v7, 8.507059e+37  ;;  %vm1899_vm5 = vmor %vm1897_vm15, %vm1898_vm0 }
 0x58b   :  { %v1894_v0 = vsub.f32 1.0, %v1893_v54  ;;  %v1826_v47 = vand.u32 2147483647, %v9350_v34  ;;  %v1828_v14 = vand.u32 2147483648, %v9350_v34  ;;  %v1918_v32 = vand.u32 2147483648, %v9354_v49 }
 0x58c   :  { %7147 = vmatmul.msk.f32.gmra.mxu3 %vm1525_vm11, %v1891_v39  ;;  %v1805_v43 = vmul.f32 %v7601_v2, %v1804_v50  ;;  %v2076_v25 = vadd.f32 %v9310_v8, %v2075_v19  ;;  %vm2078_vm6 = vweird.f32 %v9310_v8  ;;  %v2081_v50 = vand.u32 2147483647, %v9273_v3 }
 0x58d   :  { %v1895_v28 = vmul.f32 %v7603_v24, %v1894_v0  ;;  %vm1822_vm12 = vweird.f32 %v9350_v34  ;;  %vm1912_vm13 = vweird.f32 %v9354_v49  ;;  %vm1827_vm0 = vcmp.eq.f32.partialorder %v1826_v47, 8.507059e+37 }
 0x58e   :  { %v1806_v44 = vadd.f32 %v7601_v2, %v1805_v43  ;;  %v1829_v48 = vor.u32 1.1754944e-38, %v1828_v14  ;;  %v1919_v3 = vor.u32 1.1754944e-38, %v1918_v32  ;;  %v2084_v30 = vor.u32 1.1754944e-38, %v2083_v13 }
 0x58f   :  { %v7605_v29 = vpop.eup %7604  ;;  %7158 = vmatmul.msk.f32.gmra.mxu0 %vm1525_vm11, %v2056_v11  ;;  %v1896_v37 = vadd.f32 %v7603_v24, %v1895_v28 }
 0x590   :  { %v7607_v16 = vpop.eup %7606  ;;  %v1818_v61 = vmul.f32 %v7605_v29, %v9350_v34  ;;  %v9396_v42 = vpop.xlane.xlu2 %1740  ;;  %v1810_v60 = vsel %vm9386_vm2, %v7601_v2, %v1806_v44  ;;  %vm1823_vm7 = vweird.f32 %v7605_v29 }
 0x591   :  { %v1908_v22 = vmul.f32 %v7607_v16, %v9354_v49  ;;  %7608 = vrcp.f32 %v9396_v42  ;;  %v1815_v2 = vsel %vm9377_vm14, %v1814_v27, %v1810_v60  ;;  %v1900_v26 = vsel %vm1899_vm5, %v7603_v24, %v1896_v37  ;;  %vm9426_vm14 = vmor %vm2077_vm4, %vm2078_vm6 }
 0x592   :  { %v1819_v40 = vsub.f32 1.0, %v1818_v61  ;;  %v1816_v38 = vmul.f32 %v9129_v4, %v1815_v2  ;;  %v1905_v54 = vsel %vm9390_vm3, %v1904_v46, %v1900_v26  ;;  %vm1913_vm8 = vweird.f32 %v7607_v16  ;;  %vm1824_vm15 = vmor %vm1822_vm12, %vm1823_vm7 }
 0x593   :  { %v1909_v18 = vsub.f32 1.0, %v1908_v22  ;;  %v1906_v56 = vmul.f32 %v9131_v1, %v1905_v54  ;;  %v1916_v24 = vand.u32 2147483647, %v9354_v49  ;;  %v2080_v7 = vsel %vm9426_vm14, %v9310_v8, %v2076_v25  ;;  %vm1914_vm2 = vmor %vm1912_vm13, %vm1913_vm8 }
 0x594   :  { %v1820_v10 = vmul.f32 %v7605_v29, %v1819_v40  ;;  %7142 = vmatmul.msk.f32.gmra.mxu2 %vm1525_vm11, %v1816_v38  ;;  %vm2082_vm4 = vcmp.eq.f32.partialorder %v2081_v50, 8.507059e+37  ;;  %v2098_v44 = vand.u32 2147483648, %v9396_v42  ;;  %v2096_v19 = vand.u32 2147483647, %v9396_v42 }
 0x595   :  { %v1910_v23 = vmul.f32 %v7607_v16, %v1909_v18  ;;  %7148 = vmatmul.msk.f32.gmra.mxu3 %vm1525_vm11, %v1906_v56  ;;  %vm1917_vm3 = vcmp.eq.f32.partialorder %v1916_v24, 8.507059e+37  ;;  %v2085_v9 = vsel %vm2082_vm4, %v2084_v30, %v2080_v7  ;;  %7610 = vrcp.f32 %v9224_v53 }
 0x596   :  { %v1821_v4 = vadd.f32 %v7605_v29, %v1820_v10  ;;  %vm2092_vm6 = vweird.f32 %v9396_v42  ;;  %vm2097_vm8 = vcmp.eq.f32.partialorder %v2096_v19, 8.507059e+37  ;;  %v1993_v10 = vand.u32 2147483648, %v9224_v53 }
 0x597   :  { %v7609_v39 = vpop.eup %7608  ;;  %7159 = vmatmul.msk.f32.gmra.mxu0 %vm1525_vm11, %v2071_v55  ;;  %v1911_v0 = vadd.f32 %v7607_v16, %v1910_v23  ;;  %v1991_v23 = vand.u32 2147483647, %v9224_v53 }
 0x598   :  { %v2088_v34 = vmul.f32 %v7609_v39, %v9396_v42  ;;  %v1825_v49 = vsel %vm1824_vm15, %v7605_v29, %v1821_v4  ;;  %vm2093_vm5 = vweird.f32 %v7609_v39  ;;  %v2086_v29 = vmul.f32 %v9118_v5, %v2085_v9 }
 0x599   :  { %v1830_v31 = vsel %vm1827_vm0, %v1829_v48, %v1825_v49  ;;  %v1915_v11 = vsel %vm1914_vm2, %v7607_v16, %v1911_v0  ;;  %vm2094_vm7 = vmor %vm2092_vm6, %vm2093_vm5  ;;  %v1723_v16 = vpop.xlane.xlu2 %1722  ;;  %vm1987_vm2 = vweird.f32 %v9224_v53  ;;  %v1994_v4 = vor.u32 1.1754944e-38, %v1993_v10 }
 0x59a   :  { %v2089_v43 = vsub.f32 1.0, %v2088_v34  ;;  %v1831_v15 = vmul.f32 %v9138_v62, %v1830_v31  ;;  %v1920_v28 = vsel %vm1917_vm3, %v1919_v3, %v1915_v11  ;;  %v2099_v62 = vor.u32 1.1754944e-38, %v2098_v44  ;;  %v3140_v31 = vld [vmem:[%s11919_s1 + $0x20] sm:$0xff] }
 0x59b   :  { %v1921_v8 = vmul.f32 %v9140_v36, %v1920_v28  ;;  %v7611_v46 = vpop.eup %7610  ;;  %vm1992_vm4 = vcmp.eq.f32.partialorder %v1991_v23, 8.507059e+37  ;;  %v2008_v48 = vand.u32 2147483648, %v1723_v16  ;;  %vm2002_vm6 = vweird.f32 %v1723_v16 }
 0x59c   :  { %v2090_v27 = vmul.f32 %v7609_v39, %v2089_v43  ;;  %7143 = vmatmul.msk.f32.gmra.mxu2 %vm1525_vm11, %v1831_v15  ;;  %v1983_v5 = vmul.f32 %v7611_v46, %v9224_v53  ;;  %vm1988_vm15 = vweird.f32 %v7611_v46  ;;  %v2006_v7 = vand.u32 2147483647, %v1723_v16 }
 0x59d   :  { %7149 = vmatmul.msk.f32.gmra.mxu3 %vm1525_vm11, %v1921_v8  ;;  %vm1989_vm3 = vmor %vm1987_vm2, %vm1988_vm15  ;;  %v2009_v53 = vor.u32 1.1754944e-38, %v2008_v48 }
 0x59e   :  { %v2091_v20 = vadd.f32 %v7609_v39, %v2090_v27  ;;  %v1984_v60 = vsub.f32 1.0, %v1983_v5 }
 0x59f   :  { %7160 = vmatmul.msk.f32.gmra.mxu0 %vm1525_vm11, %v2086_v29 }
 0x5a0   :  { %v2095_v36 = vsel %vm2094_vm7, %v7609_v39, %v2091_v20  ;;  %v1985_v32 = vmul.f32 %v7611_v46, %v1984_v60 }
 0x5a1   :  { %v2100_v37 = vsel %vm2097_vm8, %v2099_v62, %v2095_v36  ;;  %vm2007_vm8 = vcmp.eq.f32.partialorder %v2006_v7, 8.507059e+37  ;;  %v3138_v62 = vld [vmem:[%s11919_s1] sm:$0xff]  ;;  %v3139_v36 = vld [vmem:[%s11919_s1 + $0x10] sm:$0xff] }
 0x5a2   :  { %v2101_v63 = vmul.f32 %v9148_v52, %v2100_v37  ;;  %v1986_v54 = vadd.f32 %v7611_v46, %v1985_v32 }
 0x5a4   :  { %v1717_v61 = vpop.xlane.xlu1 %1716  ;;  %7161 = vmatmul.msk.f32.vlgmr.msra.gmra.mxu2 %vm1525_vm11, %v2101_v63  ;;  %v1990_v24 = vsel %vm1989_vm3, %v7611_v46, %v1986_v54  ;;  %v7399_v46 = vpack.i.bf16 %v3138_v62, %v3139_v36 }
 0x5a5   :  { %7612 = vrcp.f32 %v1717_v61  ;;  %v1978_v14 = vand.u32 2147483648, %v1717_v61  ;;  %v1976_v52 = vand.u32 2147483647, %v1717_v61  ;;  %vm1972_vm13 = vweird.f32 %v1717_v61 }
 0x5a6   :  { %7614 = vrcp.f32 %v1723_v16  ;;  %v1995_v1 = vsel %vm1992_vm4, %v1994_v4, %v1990_v24  ;;  %7400 = vrot.lane.b32.xlu1 %v7399_v46, %s7838_s26 }
 0x5a7   :  { %v1979_v25 = vor.u32 1.1754944e-38, %v1978_v14  ;;  %vm1977_vm0 = vcmp.eq.f32.partialorder %v1976_v52, 8.507059e+37  ;;  %v1996_v0 = vmul.f32 %v9106_v35, %v1995_v1  ;;  %v3141_v35 = vld [vmem:[%s11919_s1 + $0x30] sm:$0xff] }
 0x5a8   :  { %v7394_v11 = vpack.i.bf16 %v3140_v31, %v3141_v35 }
 0x5aa   :  { %7395 = vrot.lane.b32.xlu0 %v7394_v11, %s7838_s26 }
 0x5ab   :  { %v7613_v42 = vpop.eup %7612 }
 0x5ac   :  { %v1968_v55 = vmul.f32 %v7613_v42, %v1717_v61  ;;  %v7615_v47 = vpop.eup %7614  ;;  %vm1973_vm12 = vweird.f32 %v7613_v42 }
 0x5ad   :  { %v1998_v40 = vmul.f32 %v7615_v47, %v1723_v16  ;;  %vm1974_vm14 = vmor %vm1972_vm13, %vm1973_vm12  ;;  %vm2003_vm5 = vweird.f32 %v7615_v47  ;;  %vm3124_vm12 = vcmask 130048   ;;  %vm3131_vm13 = vcmask 195584  }
 0x5ae   :  { %v1969_v22 = vsub.f32 1.0, %v1968_v55  ;;  %vm2004_vm7 = vmor %vm2002_vm6, %vm2003_vm5 }
 0x5af   :  { %v1999_v18 = vsub.f32 1.0, %v1998_v40 }
 0x5b0   :  { %v1970_v2 = vmul.f32 %v7613_v42, %v1969_v22 }
 0x5b1   :  { %v2000_v50 = vmul.f32 %v7615_v47, %v1999_v18 }
 0x5b2   :  { %v1971_v26 = vadd.f32 %v7613_v42, %v1970_v2 }
 0x5b3   :  { %v2001_v39 = vadd.f32 %v7615_v47, %v2000_v50 }
 0x5b4   :  { %v1975_v38 = vsel %vm1974_vm14, %v7613_v42, %v1971_v26 }
 0x5b5   :  { %v1980_v56 = vsel %vm1977_vm0, %v1979_v25, %v1975_v38 }
 0x5b6   :  { %v1981_v13 = vmul.f32 %v9158_v6, %v1980_v56  ;;  %v2005_v6 = vsel %vm2004_vm7, %v7615_v47, %v2001_v39 }
 0x5b7   :  { %v2010_v34 = vsel %vm2007_vm8, %v2009_v53, %v2005_v6 }
 0x5b8   :  { %7153 = vmatmul.msk.f32.gmra.mxu1 %vm1525_vm11, %v1981_v13  ;;  %v2011_v49 = vmul.f32 %v9154_v33, %v2010_v34 }
 0x5c0   :  { %7154 = vmatmul.msk.f32.gmra.mxu1 %vm1525_vm11, %v1996_v0  ;;  %v2155_v30 = vpop.f32.mrf.mxu2 }
 0x5c1   :  { %v2388_v28 = vrot.slane %v2155_v30, 4 }
 0x5c5   :  { %v2297_v3 = vpop.f32.mrf.mxu0 }
 0x5c6   :  { %v2386_v43 = vrot.slane %v2297_v3, 4  ;;  %v2389_v9 = vsel %vm556_vm9, %v2297_v3, %v2388_v28 }
 0x5c7   :  { %v2397_v29 = vperm.slane %v2389_v9, %v8226_v12 }
 0x5c8   :  { %7155 = vmatmul.msk.f32.gmra.mxu1 %vm1525_vm11, %v2011_v49  ;;  %v2387_v8 = vsel %vm556_vm9, %v2386_v43, %v2155_v30 }
 0x5c9   :  { %v2393_v37 = vperm.slane %v2387_v8, %v8226_v12  ;;  %v2424_v55 = vrot.slane %v2397_v29, 4 }
 0x5cb   :  { %v2412_v22 = vrot.slane %v2393_v37, 4 }
 0x5d9   :  { %v2300_v15 = vpop.f32.mrf.mxu0  ;;  %v2226_v44 = vpop.f32.mrf.mxu3 }
 0x5da   :  { %v2442_v27 = vrot.slane %v2300_v15, 4  ;;  %v2400_v63 = vrot.slane %v2226_v44, 4 }
 0x5e1   :  { %v2158_v33 = vpop.f32.mrf.mxu2 }
 0x5e2   :  { %v2444_v19 = vrot.slane %v2158_v33, 4  ;;  %v2443_v20 = vsel %vm556_vm9, %v2442_v27, %v2158_v33 }
 0x5e3   :  { %v9478_v5 = vperm.slane %v2443_v20, %v8226_v12 }
 0x5e4   :  { %v2445_v61 = vsel %vm556_vm9, %v2300_v15, %v2444_v19 }
 0x5e5   :  { %v2453_v2 = vperm.slane %v2445_v61, %v8226_v12  ;;  %v2468_v38 = vrot.slane %v9478_v5, 4 }
 0x5e7   :  { %v2480_v39 = vrot.slane %v2453_v2, 4 }
 0x5e9   :  { %v2303_v14 = vpop.f32.mrf.mxu1 }
 0x5ea   :  { %v2498_v56 = vrot.slane %v2303_v14, 4 }
 0x5f0   :  { %v2161_v52 = vpop.f32.mrf.mxu2 }
 0x5f1   :  { %v2500_v24 = vrot.slane %v2161_v52, 4  ;;  %v2499_v48 = vsel %vm556_vm9, %v2498_v56, %v2161_v52 }
 0x5f2   :  { %v2505_v61 = vperm.slane %v2499_v48, %v8226_v12 }
 0x5f3   :  { %v2501_v43 = vsel %vm556_vm9, %v2303_v14, %v2500_v24 }
 0x5f7   :  { %v2229_v32 = vpop.f32.mrf.mxu3 }
 0x5f8   :  { %v2456_v0 = vrot.slane %v2229_v32, 4 }
 0x5fc   :  { %v2368_v16 = vpop.f32.mrf.mxu0 }
 0x5fd   :  { %v2398_v42 = vrot.slane %v2368_v16, 4  ;;  %v2401_v60 = vsel %vm556_vm9, %v2368_v16, %v2400_v63 }
 0x5fe   :  { %v2409_v47 = vperm.slane %v2401_v60, %v8226_v12  ;;  %v2509_v60 = vperm.slane %v2501_v43, %v8226_v12 }
 0x5ff   :  { %v2399_v40 = vsel %vm556_vm9, %v2398_v42, %v2226_v44 }
 0x600   :  { %v2405_v26 = vperm.slane %v2399_v40, %v8226_v12  ;;  %v2422_v25 = vrot.slane %v2409_v47, 4  ;;  %v2425_v18 = vsel %vm556_vm9, %v2409_v47, %v2424_v55 }
 0x601   :  { %v2433_v54 = vperm.slane %v2425_v18, %v8235_v51 }
 0x602   :  { %v2410_v10 = vrot.slane %v2405_v26, 4  ;;  %v2413_v13 = vsel %vm556_vm9, %v2405_v26, %v2412_v22  ;;  %v2423_v23 = vsel %vm556_vm9, %v2422_v25, %v2397_v29  ;;  %v2232_v29 = vpop.f32.mrf.mxu3 }
 0x603   :  { %v2421_v50 = vperm.slane %v2413_v13, %v8235_v51  ;;  %v2429_v4 = vperm.slane %v2423_v23, %v8235_v51  ;;  %v2440_v1 = vrot.slane %v2433_v54, 4  ;;  %v2512_v55 = vrot.slane %v2232_v29, 4 }
 0x604   :  { %v2411_v7 = vsel %vm556_vm9, %v2410_v10, %v2393_v37  ;;  %v2371_v6 = vpop.f32.mrf.mxu0  ;;  %v2524_v10 = vrot.slane %v2505_v61, 4  ;;  %v2536_v13 = vrot.slane %v2509_v60, 4 }
 0x605   :  { %v2417_v53 = vperm.slane %v2411_v7, %v8235_v51  ;;  %v2436_v34 = vrot.slane %v2421_v50, 4  ;;  %v2438_v49 = vrot.slane %v2429_v4, 4  ;;  %v2441_v3 = vsel %vm556_vm9, 0.0, %v2440_v1 }
 0x606   :  { %v2733_v30 = vsel %vm556_vm9, %v2440_v1, %v2429_v4  ;;  %v2738_v31 = vrot.slane %v2441_v3, 4  ;;  %v2454_v35 = vrot.slane %v2371_v6, 4  ;;  %v2457_v11 = vsel %vm556_vm9, %v2371_v6, %v2456_v0 }
 0x607   :  { %v2434_v15 = vrot.slane %v2417_v53, 4  ;;  %v2437_v28 = vsel %vm556_vm9, 0.0, %v2436_v34  ;;  %v2439_v33 = vsel %vm556_vm9, 0.0, %v2438_v49  ;;  %v2465_v8 = vperm.slane %v2457_v11, %v8226_v12 }
 0x608   :  { %v2727_v9 = vrot.slane %v2437_v28, 4  ;;  %v2455_v44 = vsel %vm556_vm9, %v2454_v35, %v2229_v32  ;;  %v2722_v27 = vsel %vm556_vm9, %v2436_v34, %v2417_v53  ;;  %v9506_v19 = vperm.slane %v2733_v30, %v8226_v12  ;;  %v9534_v53 = vpop.f32.mrf.mxu2 }
 0x609   :  { %v2461_v20 = vperm.slane %v2455_v44, %v8226_v12  ;;  %v2435_v62 = vsel %vm556_vm9, 0.0, %v2434_v15  ;;  %v2739_v36 = vsel %vm556_vm9, %v2738_v31, %v2439_v33  ;;  %v2478_v37 = vrot.slane %v2465_v8, 4 }
 0x60a   :  { %v2481_v63 = vsel %vm556_vm9, %v2465_v8, %v2480_v39  ;;  %v2726_v46 = vperm.slane %v2722_v27, %v8226_v12  ;;  %v2728_v16 = vsel %vm556_vm9, %v2727_v9, %v2435_v62  ;;  %v2743_v14 = vperm.slane %v2739_v36, %v8226_v12 }
 0x60b   :  { %v2469_v42 = vsel %vm556_vm9, %v2461_v20, %v2468_v38  ;;  %v2466_v47 = vrot.slane %v2461_v20, 4  ;;  %v2489_v40 = vperm.slane %v2481_v63, %v8235_v51  ;;  %v2732_v26 = vperm.slane %v2728_v16, %v8226_v12 }
 0x60c   :  { %v2374_v22 = vpop.f32.mrf.mxu0  ;;  %v2477_v32 = vperm.slane %v2469_v42, %v8235_v51  ;;  %v2479_v25 = vsel %vm556_vm9, %v2478_v37, %v2453_v2  ;;  %v2746_v54 = vrot.slane %v2726_v46, 4  ;;  %v2758_v38 = vrot.slane %v9506_v19, 4 }
 0x60d   :  { %v2510_v52 = vrot.slane %v2374_v22, 4  ;;  %v2513_v18 = vsel %vm556_vm9, %v2374_v22, %v2512_v55  ;;  %v2467_v23 = vsel %vm556_vm9, %v2466_v47, %v9478_v5  ;;  %v2485_v24 = vperm.slane %v2479_v25, %v8235_v51 }
 0x60e   :  { %v2496_v50 = vrot.slane %v2489_v40, 4  ;;  %v2521_v1 = vperm.slane %v2513_v18, %v8226_v12  ;;  %v2492_v2 = vrot.slane %v2477_v32, 4  ;;  %v2747_v39 = vsel %vm556_vm9, %v2732_v26, %v2746_v54 }
 0x60f   :  { %v2511_v56 = vsel %vm556_vm9, %v2510_v52, %v2232_v29  ;;  %v2759_v48 = vsel %vm556_vm9, %v2743_v14, %v2758_v38  ;;  %v2744_v0 = vrot.slane %v2732_v26, 4  ;;  %v2473_v7 = vperm.slane %v2467_v23, %v8235_v51 }
 0x610   :  { %v2517_v4 = vperm.slane %v2511_v56, %v8226_v12  ;;  %v2534_v34 = vrot.slane %v2521_v1, 4  ;;  %v2537_v49 = vsel %vm556_vm9, %v2521_v1, %v2536_v13  ;;  %v9538_v3 = vperm.slane %v2759_v48, %v8235_v51 }
 0x611   :  { %v2494_v30 = vrot.slane %v2485_v24, 4  ;;  %v2497_v31 = vsel %vm556_vm9, 0.0, %v2496_v50  ;;  %v9542_v35 = vperm.slane %v2747_v39, %v8235_v51  ;;  %v2745_v11 = vsel %vm556_vm9, %v2744_v0, %v2726_v46 }
 0x612   :  { %v2525_v6 = vsel %vm556_vm9, %v2517_v4, %v2524_v10  ;;  %v2522_v5 = vrot.slane %v2517_v4, 4  ;;  %v2493_v43 = vsel %vm556_vm9, 0.0, %v2492_v2  ;;  %v2490_v28 = vrot.slane %v2473_v7, 4 }
 0x613   :  { %v2533_v15 = vperm.slane %v2525_v6, %v8235_v51  ;;  %v2787_v33 = vsel %vm556_vm9, %v2496_v50, %v2485_v24  ;;  %v2545_v9 = vperm.slane %v2537_v49, %v8235_v51  ;;  %v2772_v44 = vrot.slane %v9538_v3, 4 }
 0x614   :  { %v2792_v8 = vrot.slane %v2497_v31, 4  ;;  %v2523_v27 = vsel %vm556_vm9, %v2522_v5, %v2505_v61  ;;  %v2535_v29 = vsel %vm556_vm9, %v2534_v34, %v2509_v60  ;;  %v9553_v20 = vperm.slane %v2745_v11, %v8235_v51 }
 0x615   :  { %v2495_v62 = vsel %vm556_vm9, 0.0, %v2494_v30  ;;  %v2781_v36 = vrot.slane %v2493_v43, 4  ;;  %v2773_v37 = vsel %vm556_vm9, %v2772_v44, %v9542_v35  ;;  %v2791_v63 = vperm.slane %v2787_v33, %v8226_v12  ;;  %v2377_v30 = vpop.f32.mrf.mxu0 }
 0x616   :  { %v2548_v46 = vrot.slane %v2533_v15, 4  ;;  %3076 = vrot.lane.b32.xlu0 %v2773_v37, %s7839_s11  ;;  %v2529_v16 = vperm.slane %v2523_v27, %v8235_v51  ;;  %v2541_v61 = vperm.slane %v2535_v29, %v8235_v51  ;;  %v2552_v42 = vrot.slane %v2545_v9, 4 }
 0x617   :  { %v2756_v60 = vrot.slane %v2743_v14, 4  ;;  %v2770_v55 = vrot.slane %v9553_v20, 4  ;;  %v9563_v47 = vpop.f32.mrf.mxu2  ;;  %v2491_v22 = vsel %vm556_vm9, 0.0, %v2490_v28  ;;  %v2776_v32 = vsel %vm556_vm9, %v2492_v2, %v2473_v7 }
 0x618   :  { %v2793_v40 = vsel %vm556_vm9, %v2792_v8, %v2495_v62  ;;  %v2780_v26 = vperm.slane %v2776_v32, %v8226_v12  ;;  %v2782_v25 = vsel %vm556_vm9, %v2781_v36, %v2491_v22  ;;  %v2549_v14 = vsel %vm556_vm9, 0.0, %v2548_v46 }
 0x619   :  { %v2757_v52 = vsel %vm556_vm9, %v2756_v60, %v9506_v19  ;;  %v2797_v18 = vperm.slane %v2793_v40, %v8226_v12  ;;  %v2786_v38 = vperm.slane %v2782_v25, %v8226_v12  ;;  %v2812_v56 = vrot.slane %v2791_v63, 4  ;;  %v2235_v19 = vpop.f32.mrf.mxu3 }
 0x61a   :  { %v9575_v54 = vperm.slane %v2757_v52, %v8235_v51  ;;  %v2550_v10 = vrot.slane %v2541_v61, 4  ;;  %v2553_v13 = vsel %vm556_vm9, 0.0, %v2552_v42  ;;  %v2841_v23 = vsel %vm556_vm9, %v2552_v42, %v2541_v61 }
 0x61b   :  { %v2800_v24 = vrot.slane %v2780_v26, 4  ;;  %v2546_v50 = vrot.slane %v2529_v16, 4  ;;  %v2813_v1 = vsel %vm556_vm9, %v2797_v18, %v2812_v56  ;;  %v2810_v2 = vrot.slane %v2797_v18, 4 }
 0x61c   :  { %v2771_v4 = vsel %vm556_vm9, %v9575_v54, %v2770_v55  ;;  %v2835_v39 = vrot.slane %v2549_v14, 4  ;;  %v2821_v0 = vperm.slane %v2813_v1, %v8235_v51  ;;  %v2845_v7 = vperm.slane %v2841_v23, %v8226_v12 }
 0x61d   :  { %3052 = vrot.lane.b32.xlu2 %v2771_v4, %s7840_s12  ;;  %v2801_v48 = vsel %vm556_vm9, %v2786_v38, %v2800_v24  ;;  %v2846_v6 = vrot.slane %v2553_v13, 4  ;;  %v2798_v34 = vrot.slane %v2786_v38, 4  ;;  %v2551_v49 = vsel %vm556_vm9, 0.0, %v2550_v10  ;;  %v2380_v23 = vpop.f32.mrf.mxu0 }
 0x61e   :  { %v2809_v5 = vperm.slane %v2801_v48, %v8235_v51  ;;  %v2826_v31 = vrot.slane %v2821_v0, 4  ;;  %v2774_v11 = vrot.slane %v9542_v35, 4  ;;  %v2811_v15 = vsel %vm556_vm9, %v2810_v2, %v2791_v63 }
 0x61f   :  { %v2799_v43 = vsel %vm556_vm9, %v2798_v34, %v2780_v26  ;;  %v2547_v28 = vsel %vm556_vm9, 0.0, %v2546_v50  ;;  %v2830_v44 = vsel %vm556_vm9, %v2548_v46, %v2529_v16  ;;  %v9599_v8 = vpop.f32.mrf.mxu2  ;;  %v2847_v29 = vsel %vm556_vm9, %v2846_v6, %v2551_v49 }
 0x620   :  { %v2827_v33 = vsel %vm556_vm9, %v2826_v31, %v2809_v5  ;;  %v9595_v9 = vperm.slane %v2799_v43, %v8235_v51  ;;  %v2834_v27 = vperm.slane %v2830_v44, %v8226_v12  ;;  %v2836_v35 = vsel %vm556_vm9, %v2835_v39, %v2547_v28 }
 0x621   :  { %3078 = vrot.lane.b32.xlu1 %v2827_v33, %s7839_s11  ;;  %v2866_v62 = vrot.slane %v2845_v7, 4  ;;  %v9605_v36 = vperm.slane %v2811_v15, %v8235_v51  ;;  %v2840_v63 = vperm.slane %v2836_v35, %v8226_v12  ;;  %v2851_v46 = vperm.slane %v2847_v29, %v8226_v12  ;;  %v2238_v42 = vpop.f32.mrf.mxu3 }
 0x622   :  { %v2824_v37 = vrot.slane %v9595_v9, 4  ;;  %v2775_v16 = vsel %vm556_vm9, %v9538_v3, %v2774_v11  ;;  %v2854_v61 = vrot.slane %v2834_v27, 4  ;;  %v2568_v32 = vrot.slane %v2235_v19, 4 }
 0x623   :  { %v2867_v55 = vsel %vm556_vm9, %v2851_v46, %v2866_v62  ;;  %v2852_v22 = vrot.slane %v2840_v63, 4  ;;  %v2864_v26 = vrot.slane %v2851_v46, 4  ;;  %v2566_v3 = vrot.slane %v2377_v30, 4 }
 0x624   :  { %v2825_v60 = vsel %vm556_vm9, %v9605_v36, %v2824_v37  ;;  %v2855_v40 = vsel %vm556_vm9, %v2840_v63, %v2854_v61  ;;  %v2875_v52 = vperm.slane %v2867_v55, %v8235_v51  ;;  %v2768_v25 = vrot.slane %v9575_v54, 4 }
 0x625   :  { %3100 = vrot.lane.b32.xlu2 %v2775_v16, %s7841_s13  ;;  %3054 = vrot.lane.b32.xlu0 %v2825_v60, %s7840_s12  ;;  %v2863_v18 = vperm.slane %v2855_v40, %v8235_v51  ;;  %v2853_v14 = vsel %vm556_vm9, %v2852_v22, %v2834_v27  ;;  %v2828_v56 = vrot.slane %v2809_v5, 4  ;;  %v2865_v13 = vsel %vm556_vm9, %v2864_v26, %v2845_v7 }
 0x626   :  { %v2880_v38 = vrot.slane %v2875_v52, 4  ;;  %v9623_v10 = vperm.slane %v2853_v14, %v8235_v51  ;;  %v2569_v24 = vsel %vm556_vm9, %v2377_v30, %v2568_v32  ;;  %v9629_v4 = vperm.slane %v2865_v13, %v8235_v51 }
 0x627   :  { %v2567_v1 = vsel %vm556_vm9, %v2566_v3, %v2235_v19  ;;  %v2622_v2 = vrot.slane %v2380_v23, 4  ;;  %v2829_v39 = vsel %vm556_vm9, %v2821_v0, %v2828_v56  ;;  %v2383_v7 = vpop.f32.mrf.mxu2  ;;  %v9639_v6 = vsel %vm556_vm9, %v2768_v25, %v9553_v20 }
 0x628   :  { %v2881_v50 = vsel %vm556_vm9, %v2880_v38, %v2863_v18  ;;  %v2878_v54 = vrot.slane %v9623_v10, 4  ;;  %v2577_v5 = vperm.slane %v2569_v24, %v8226_v12  ;;  %v2556_v19 = vrot.slane %v9534_v53, 4 }
 0x629   :  { %3080 = vrot.lane.b32.xlu1 %v2881_v50, %s7839_s11  ;;  %v2573_v34 = vperm.slane %v2567_v1, %v8226_v12  ;;  %v2241_v49 = vpop.f32.mrf.mxu3  ;;  %v2678_v0 = vrot.slane %v2383_v7, 4  ;;  %v2624_v30 = vrot.slane %v2238_v42, 4  ;;  %v2623_v31 = vsel %vm556_vm9, %v2622_v2, %v2238_v42 }
 0x62a   :  { %v2879_v48 = vsel %vm556_vm9, %v9629_v4, %v2878_v54  ;;  %v2822_v11 = vrot.slane %v9605_v36, 4  ;;  %v2882_v43 = vrot.slane %v2863_v18, 4  ;;  %v2590_v20 = vrot.slane %v2577_v5, 4 }
 0x62b   :  { %v2625_v28 = vsel %vm556_vm9, %v2380_v23, %v2624_v30  ;;  %v2680_v33 = vrot.slane %v2241_v49, 4  ;;  %v2578_v35 = vrot.slane %v2573_v34, 4  ;;  %v2629_v29 = vperm.slane %v2623_v31, %v8226_v12 }
 0x62c   :  { %v2679_v62 = vsel %vm556_vm9, %v2678_v0, %v2241_v49  ;;  %v2883_v36 = vsel %vm556_vm9, %v2875_v52, %v2882_v43  ;;  %v9659_v16 = vsel %vm556_vm9, %v2822_v11, %v9595_v9  ;;  %v2633_v61 = vperm.slane %v2625_v28, %v8226_v12 }
 0x62d   :  { %3102 = vrot.lane.b32.xlu2 %v2829_v39, %s7841_s13  ;;  %3056 = vrot.lane.b32.xlu0 %v2879_v48, %s7840_s12  ;;  %v2681_v63 = vsel %vm556_vm9, %v2383_v7, %v2680_v33  ;;  %v9666_v22 = vperm.slane %v2679_v62, %v8226_v12  ;;  %v2612_v26 = vrot.slane %v9563_v47, 4  ;;  %v2634_v18 = vrot.slane %v2629_v29, 4 }
 0x62e   :  { %v2646_v14 = vrot.slane %v2633_v61, 4  ;;  %v2668_v23 = vrot.slane %v9599_v8, 4 }
 0x62f   :  { %v2690_v24 = vrot.slane %v9666_v22, 4 }
 0x635   :  { %v2306_v15 = vpop.f32.mrf.mxu1  ;;  %3104 = vrot.lane.b32.xlu2 %v2883_v36, %s7841_s13 }
 0x636   :  { %v2554_v44 = vrot.slane %v2306_v15, 4  ;;  %v2557_v27 = vsel %vm556_vm9, %v2306_v15, %v2556_v19 }
 0x637   :  { %v2565_v37 = vperm.slane %v2557_v27, %v8226_v12 }
 0x638   :  { %v2555_v46 = vsel %vm556_vm9, %v2554_v44, %v9534_v53  ;;  %v9670_v53 = vperm.slane %v2681_v63, %v8226_v12 }
 0x639   :  { %v2561_v42 = vperm.slane %v2555_v46, %v8226_v12  ;;  %v2591_v60 = vsel %vm556_vm9, %v2590_v20, %v2565_v37  ;;  %v2592_v55 = vrot.slane %v2565_v37, 4 }
 0x63a   :  { %v2597_v32 = vperm.slane %v2591_v60, %v8235_v51  ;;  %v2702_v1 = vrot.slane %v9670_v53, 4 }
 0x63b   :  { %v2579_v9 = vsel %vm556_vm9, %v2578_v35, %v2561_v42  ;;  %v2580_v40 = vrot.slane %v2561_v42, 4  ;;  %v2593_v52 = vsel %vm556_vm9, %v2577_v5, %v2592_v55 }
 0x63c   :  { %v2585_v3 = vperm.slane %v2579_v9, %v8235_v51  ;;  %v2601_v25 = vperm.slane %v2593_v52, %v8235_v51  ;;  %v2606_v56 = vrot.slane %v2597_v32, 4 }
 0x63d   :  { %v2581_v38 = vsel %vm556_vm9, %v2573_v34, %v2580_v40  ;;  %v2309_v13 = vpop.f32.mrf.mxu1 }
 0x63e   :  { %v2589_v50 = vperm.slane %v2581_v38, %v8235_v51  ;;  %v2608_v54 = vrot.slane %v2601_v25, 4  ;;  %v2602_v2 = vrot.slane %v2585_v3, 4  ;;  %v2610_v39 = vrot.slane %v2309_v13, 4 }
 0x63f   :  { %v2613_v48 = vsel %vm556_vm9, %v2309_v13, %v2612_v26  ;;  %v2607_v49 = vsel %vm556_vm9, 0.0, %v2606_v56 }
 0x640   :  { %v2604_v7 = vrot.slane %v2589_v50, 4  ;;  %v2609_v5 = vsel %vm556_vm9, 0.0, %v2608_v54  ;;  %v2895_v19 = vsel %vm556_vm9, %v2608_v54, %v2597_v32  ;;  %v2621_v34 = vperm.slane %v2613_v48, %v8226_v12 }
 0x641   :  { %v9688_v0 = vperm.slane %v2895_v19, %v8226_v12  ;;  %v2900_v30 = vrot.slane %v2609_v5, 4  ;;  %v2611_v31 = vsel %vm556_vm9, %v2610_v39, %v9563_v47  ;;  %v2603_v33 = vsel %vm556_vm9, 0.0, %v2602_v2 }
 0x642   :  { %v2617_v11 = vperm.slane %v2611_v31, %v8226_v12  ;;  %v2647_v43 = vsel %vm556_vm9, %v2646_v14, %v2621_v34  ;;  %v2648_v20 = vrot.slane %v2621_v34, 4  ;;  %v2605_v15 = vsel %vm556_vm9, 0.0, %v2604_v7 }
 0x643   :  { %v2653_v28 = vperm.slane %v2647_v43, %v8235_v51  ;;  %v2884_v44 = vsel %vm556_vm9, %v2604_v7, %v2585_v3  ;;  %v2889_v27 = vrot.slane %v2605_v15, 4  ;;  %v2901_v40 = vsel %vm556_vm9, %v2900_v30, %v2607_v49 }
 0x644   :  { %v2635_v35 = vsel %vm556_vm9, %v2634_v18, %v2617_v11  ;;  %v2636_v62 = vrot.slane %v2617_v11, 4  ;;  %v2649_v37 = vsel %vm556_vm9, %v2633_v61, %v2648_v20  ;;  %v2888_v47 = vperm.slane %v2884_v44, %v8226_v12 }
 0x645   :  { %v9702_v63 = vperm.slane %v2635_v35, %v8235_v51  ;;  %v2657_v36 = vperm.slane %v2649_v37, %v8235_v51  ;;  %v2662_v46 = vrot.slane %v2653_v28, 4  ;;  %v2312_v42 = vpop.f32.mrf.mxu1  ;;  %v2890_v60 = vsel %vm556_vm9, %v2889_v27, %v2603_v33 }
 0x646   :  { %v2637_v55 = vsel %vm556_vm9, %v2629_v29, %v2636_v62  ;;  %v2666_v32 = vrot.slane %v2312_v42, 4  ;;  %v2669_v9 = vsel %vm556_vm9, %v2312_v42, %v2668_v23  ;;  %v2894_v3 = vperm.slane %v2890_v60, %v8226_v12 }
 0x647   :  { %v2645_v61 = vperm.slane %v2637_v55, %v8235_v51  ;;  %v2658_v52 = vrot.slane %v9702_v63, 4  ;;  %v2664_v26 = vrot.slane %v2657_v36, 4  ;;  %v2663_v25 = vsel %vm556_vm9, 0.0, %v2662_v46 }
 0x648   :  { %v2667_v18 = vsel %vm556_vm9, %v2666_v32, %v9599_v8  ;;  %v2677_v14 = vperm.slane %v2669_v9, %v8226_v12  ;;  %v2908_v29 = vrot.slane %v2888_v47, 4  ;;  %v2905_v23 = vperm.slane %v2901_v40, %v8226_v12 }
 0x649   :  { %v2660_v38 = vrot.slane %v2645_v61, 4  ;;  %v2949_v56 = vsel %vm556_vm9, %v2664_v26, %v2653_v28  ;;  %v2673_v13 = vperm.slane %v2667_v18, %v8226_v12  ;;  %v2665_v50 = vsel %vm556_vm9, 0.0, %v2664_v26 }
 0x64a   :  { %v9721_v54 = vperm.slane %v2949_v56, %v8226_v12  ;;  %v2703_v2 = vsel %vm556_vm9, %v2702_v1, %v2677_v14  ;;  %v2704_v39 = vrot.slane %v2677_v14, 4  ;;  %v2909_v5 = vsel %vm556_vm9, %v2894_v3, %v2908_v29 }
 0x64b   :  { %v2691_v8 = vsel %vm556_vm9, %v2690_v24, %v2673_v13  ;;  %v2692_v48 = vrot.slane %v2673_v13, 4  ;;  %v2709_v7 = vperm.slane %v2703_v2, %v8235_v51  ;;  %v2917_v49 = vperm.slane %v2909_v5, %v8235_v51 }
 0x64c   :  { %v2697_v19 = vperm.slane %v2691_v8, %v8235_v51  ;;  %v2705_v34 = vsel %vm556_vm9, %v9670_v53, %v2704_v39  ;;  %v2920_v30 = vrot.slane %v9688_v0, 4  ;;  %v2906_v11 = vrot.slane %v2894_v3, 4 }
 0x64d   :  { %v2693_v1 = vsel %vm556_vm9, %v9666_v22, %v2692_v48  ;;  %v2713_v31 = vperm.slane %v2705_v34, %v8235_v51  ;;  %v2718_v24 = vrot.slane %v2709_v7, 4  ;;  %v2954_v43 = vrot.slane %v2665_v50, 4 }
 0x64e   :  { %v2701_v20 = vperm.slane %v2693_v1, %v8235_v51  ;;  %v2921_v15 = vsel %vm556_vm9, %v2905_v23, %v2920_v30  ;;  %v2936_v28 = vrot.slane %v2917_v49, 4  ;;  %v2714_v33 = vrot.slane %v2697_v19, 4 }
 0x64f   :  { %v2720_v44 = vrot.slane %v2713_v31, 4  ;;  %v2929_v53 = vperm.slane %v2921_v15, %v8235_v51  ;;  %v2907_v27 = vsel %vm556_vm9, %v2906_v11, %v2888_v47  ;;  %v2719_v62 = vsel %vm556_vm9, 0.0, %v2718_v24 }
 0x650   :  { %v2716_v35 = vrot.slane %v2701_v20, 4  ;;  %v9741_v22 = vperm.slane %v2907_v27, %v8235_v51  ;;  %v2918_v37 = vrot.slane %v2905_v23, 4  ;;  %v2661_v26 = vsel %vm556_vm9, 0.0, %v2660_v38 }
 0x651   :  { %v2721_v36 = vsel %vm556_vm9, 0.0, %v2720_v44  ;;  %v3003_v46 = vsel %vm556_vm9, %v2720_v44, %v2709_v7  ;;  %v2934_v42 = vrot.slane %v2929_v53, 4  ;;  %v2937_v60 = vsel %vm556_vm9, %v2929_v53, %v2936_v28 }
 0x652   :  { %v9747_v55 = vperm.slane %v3003_v46, %v8226_v12  ;;  %v3008_v32 = vrot.slane %v2721_v36, 4  ;;  %3106 = vrot.lane.b32.xlu2 %v2937_v60, %s7841_s13  ;;  %v2919_v47 = vsel %vm556_vm9, %v2918_v37, %v9688_v0  ;;  %v2932_v9 = vrot.slane %v9741_v22, 4 }
 0x653   :  { %v2935_v40 = vsel %vm556_vm9, %v2934_v42, %v2917_v49  ;;  %v9755_v61 = vperm.slane %v2919_v47, %v8235_v51  ;;  %v2938_v3 = vsel %vm556_vm9, %v2660_v38, %v9702_v63  ;;  %v2943_v14 = vrot.slane %v2661_v26, 4 }
 0x654   :  { %3082 = vrot.lane.b32.xlu1 %v2935_v40, %s7839_s11  ;;  %v2942_v18 = vperm.slane %v2938_v3, %v8226_v12  ;;  %v2955_v29 = vsel %vm556_vm9, %v2954_v43, %v2663_v25  ;;  %v2974_v0 = vrot.slane %v9721_v54, 4  ;;  %v2659_v13 = vsel %vm556_vm9, 0.0, %v2658_v52 }
 0x655   :  { %v2933_v56 = vsel %vm556_vm9, %v9755_v61, %v2932_v9  ;;  %v2959_v23 = vperm.slane %v2955_v29, %v8226_v12  ;;  %v2715_v50 = vsel %vm556_vm9, 0.0, %v2714_v33  ;;  %v2944_v63 = vsel %vm556_vm9, %v2943_v14, %v2659_v13  ;;  %v7396_v13 = vpop.permute.xlu0 %7395 }
 0x656   :  { %3058 = vrot.lane.b32.xlu0 %v2933_v56, %s7840_s12  ;;  %v2962_v38 = vrot.slane %v2942_v18, 4  ;;  %v2717_v2 = vsel %vm556_vm9, 0.0, %v2716_v35  ;;  %v2992_v25 = vsel %vm556_vm9, %v2716_v35, %v2697_v19  ;;  %v2948_v39 = vperm.slane %v2944_v63, %v8226_v12 }
 0x657   :  { %v2975_v8 = vsel %vm556_vm9, %v2959_v23, %v2974_v0  ;;  %v2972_v48 = vrot.slane %v2959_v23, 4  ;;  %v2996_v52 = vperm.slane %v2992_v25, %v8226_v12  ;;  %v2997_v5 = vrot.slane %v2717_v2, 4  ;;  %v7401_v2 = vpop.permute.xlu1 %7400 }
 0x658   :  { %v2983_v7 = vperm.slane %v2975_v8, %v8235_v51  ;;  %v3009_v34 = vsel %vm556_vm9, %v3008_v32, %v2719_v62  ;;  %v3028_v49 = vrot.slane %v9747_v55, 4  ;;  %v2963_v30 = vsel %vm556_vm9, %v2948_v39, %v2962_v38 }
 0x659   :  { %v2960_v1 = vrot.slane %v2948_v39, 4  ;;  %v2973_v19 = vsel %vm556_vm9, %v2972_v48, %v9721_v54  ;;  %v3013_v31 = vperm.slane %v3009_v34, %v8226_v12  ;;  %v2876_v24 = vrot.slane %v9629_v4, 4 }
 0x65a   :  { %v2971_v11 = vperm.slane %v2963_v30, %v8235_v51  ;;  %v2988_v43 = vrot.slane %v2983_v7, 4  ;;  %v2998_v20 = vsel %vm556_vm9, %v2997_v5, %v2715_v50  ;;  %v3016_v33 = vrot.slane %v2996_v52, 4 }
 0x65b   :  { %v2961_v15 = vsel %vm556_vm9, %v2960_v1, %v2942_v18  ;;  %v3002_v28 = vperm.slane %v2998_v20, %v8226_v12  ;;  %v3029_v44 = vsel %vm556_vm9, %v3013_v31, %v3028_v49  ;;  %v2979_v35 = vperm.slane %v2973_v19, %v8235_v51 }
 0x65c   :  { %v2989_v53 = vsel %vm556_vm9, %v2988_v43, %v2971_v11  ;;  %v2990_v27 = vrot.slane %v2971_v11, 4  ;;  %v2967_v54 = vperm.slane %v2961_v15, %v8235_v51  ;;  %v3037_v62 = vperm.slane %v3029_v44, %v8235_v51 }
 0x65d   :  { %3084 = vrot.lane.b32.xlu1 %v2989_v53, %s7839_s11  ;;  %v3017_v4 = vsel %vm556_vm9, %v3002_v28, %v3016_v33  ;;  %v3014_v37 = vrot.slane %v3002_v28, 4  ;;  %v3026_v36 = vrot.slane %v3013_v31, 4  ;;  %v2877_v32 = vsel %vm556_vm9, %v2876_v24, %v9623_v10 }
 0x65e   :  { %v2991_v46 = vsel %vm556_vm9, %v2983_v7, %v2990_v27  ;;  %v2986_v42 = vrot.slane %v2967_v54, 4  ;;  %v3025_v60 = vperm.slane %v3017_v4, %v8235_v51  ;;  %v3042_v47 = vrot.slane %v3037_v62, 4 }
 0x65f   :  { %3108 = vrot.lane.b32.xlu2 %v2991_v46, %s7841_s13  ;;  %v3015_v9 = vsel %vm556_vm9, %v3014_v37, %v2996_v52  ;;  %v3027_v18 = vsel %vm556_vm9, %v3026_v36, %v9747_v55  ;;  %v2930_v23 = vrot.slane %v9755_v61, 4  ;;  %v7398_v50 = vunpack.i.h.bf16 %v7396_v13 }
 0x660   :  { %v2987_v40 = vsel %vm556_vm9, %v2979_v35, %v2986_v42  ;;  %v3044_v26 = vrot.slane %v3025_v60, 4  ;;  %v3021_v3 = vperm.slane %v3015_v9, %v8235_v51  ;;  %v3043_v14 = vsel %vm556_vm9, %v3042_v47, %v3025_v60 }
 0x661   :  { %3060 = vrot.lane.b32.xlu0 %v2987_v40, %s7840_s12  ;;  %v3033_v0 = vperm.slane %v3027_v18, %v8235_v51  ;;  %v7397_v63 = vunpack.i.l.bf16 %v7396_v13  ;;  %v2931_v55 = vsel %vm556_vm9, %v2930_v23, %v9741_v22  ;;  %v2984_v38 = vrot.slane %v2979_v35, 4 }
 0x662   :  { %v3040_v29 = vrot.slane %v3021_v3, 4  ;;  %v3045_v10 = vsel %vm556_vm9, %v3037_v62, %v3044_v26  ;;  %v7403_v25 = vunpack.i.h.bf16 %v7401_v2  ;;  %v7402_v39 = vunpack.i.l.bf16 %v7401_v2 }
 0x663   :  { %3188 = vmatpush.msrb.mxu2 %v7397_v63  ;;  %v2985_v8 = vsel %vm556_vm9, %v2984_v38, %v2967_v54  ;;  %v3038_v61 = vrot.slane %v3033_v0, 4 }
 0x664   :  { %v3041_v56 = vsel %vm556_vm9, %v3033_v0, %v3040_v29 }
 0x665   :  { %3086 = vrot.lane.b32.xlu1 %v3043_v14, %s7839_s11  ;;  %3189 = vmatpush.msrb.mxu2 %v7398_v50  ;;  %v3039_v48 = vsel %vm556_vm9, %v3038_v61, %v3021_v3  ;;  %v7479_v3 = vld [vmem:[%s11922_s4 + $0x7] ss:$0 sm:$0xff] }
 0x667   :  { %3110 = vrot.lane.b32.xlu2 %v3045_v10, %s7841_s13  ;;  %3190 = vmatpush.msrb.mxu2 %v7402_v39 }
 0x669   :  { %3062 = vrot.lane.b32.xlu0 %v3041_v56, %s7840_s12  ;;  %3191 = vmatpush.msrb.mxu2 %v7403_v25 }
 0x677   :  { %v3053_v52 = vpop.permute.xlu2 %3052 }
 0x678   :  { %v3118_v7 = vsel %vm1234_vm10, %v9639_v6, %v3053_v52 }
 0x67f   :  { %v3101_v34 = vpop.permute.xlu2 %3100 }
 0x687   :  { %v3103_v1 = vpop.permute.xlu2 %3102 }
 0x688   :  { %v3077_v5 = vpop.permute.xlu0 %3076 }
 0x689   :  { %v3125_v22 = vsel %vm3124_vm12, %v3118_v7, %v3077_v5 }
 0x68a   :  { %v3132_v49 = vsel %vm3131_vm13, %v3125_v22, %v3101_v34 }
 0x68b   :  { %7162 = vmatmul.msk.f32.vlgmr.msrb.gmra.mxu2 %vm104_vm1, %v3132_v49 }
 0x68f   :  { %v3105_v15 = vpop.permute.xlu2 %3104 }
 0x693   :  { %v3079_v30 = vpop.permute.xlu1 %3078 }
 0x697   :  { %v3055_v19 = vpop.permute.xlu0 %3054 }
 0x698   :  { %v3119_v31 = vsel %vm1234_vm10, %v9659_v16, %v3055_v19 }
 0x699   :  { %v3126_v24 = vsel %vm3124_vm12, %v3119_v31, %v3079_v30 }
 0x69a   :  { %v3133_v11 = vsel %vm3131_vm13, %v3126_v24, %v3103_v1 }
 0x69b   :  { %7163 = vmatmul.msk.f32.gmra.mxu2 %vm104_vm1, %v3133_v11  ;;  %v3081_v43 = vpop.permute.xlu1 %3080 }
 0x69f   :  { %v3057_v6 = vpop.permute.xlu0 %3056 }
 0x6a0   :  { %v3120_v20 = vsel %vm1234_vm10, %v2877_v32, %v3057_v6 }
 0x6a1   :  { %v3127_v28 = vsel %vm3124_vm12, %v3120_v20, %v3081_v43 }
 0x6a2   :  { %v3134_v33 = vsel %vm3131_vm13, %v3127_v28, %v3105_v15 }
 0x6a3   :  { %7164 = vmatmul.msk.f32.gmra.mxu2 %vm104_vm1, %v3134_v33 }
 0x6ac   :  { %v3107_v16 = vpop.permute.xlu2 %3106 }
 0x6b9   :  { %v3109_v62 = vpop.permute.xlu2 %3108 }
 0x6c1   :  { %v3111_v9 = vpop.permute.xlu2 %3110 }
 0x6c6   :  { %v3083_v44 = vpop.permute.xlu1 %3082 }
 0x6c8   :  { %v3059_v53 = vpop.permute.xlu0 %3058 }
 0x6c9   :  { %v3121_v27 = vsel %vm1234_vm10, %v2931_v55, %v3059_v53 }
 0x6ca   :  { %v3128_v54 = vsel %vm3124_vm12, %v3121_v27, %v3083_v44  ;;  %v3387_v27 = vld [vmem:[%s11919_s1 + $0x28] sm:$0xff] }
 0x6cb   :  { %v3135_v35 = vsel %vm3131_vm13, %v3128_v54, %v3107_v16  ;;  %v3388_v16 = vld [vmem:[%s11919_s1 + $0x38] sm:$0xff] }
 0x6cc   :  { %7165 = vmatmul.msk.f32.gmra.mxu2 %vm104_vm1, %v3135_v35  ;;  %3421 = vmatpush.msrb.mxu3 %v3388_v16 }
 0x6ce   :  { %3422 = vmatpush.msrb.mxu3 %v3387_v27 }
 0x6cf   :  { %v3085_v4 = vpop.permute.xlu1 %3084 }
 0x6d3   :  { %v3061_v37 = vpop.permute.xlu0 %3060 }
 0x6d4   :  { %v3122_v36 = vsel %vm1234_vm10, %v2985_v8, %v3061_v37 }
 0x6d5   :  { %v3129_v46 = vsel %vm3124_vm12, %v3122_v36, %v3085_v4  ;;  %v3386_v4 = vld [vmem:[%s11919_s1 + $0x18] sm:$0xff] }
 0x6d6   :  { %v3136_v42 = vsel %vm3131_vm13, %v3129_v46, %v3109_v62  ;;  %v3385_v46 = vld [vmem:[%s11919_s1 + $0x8] sm:$0xff]  ;;  %3423 = vmatpush.msrb.mxu3 %v3386_v4 }
 0x6d7   :  { %7166 = vmatmul.msk.f32.gmra.mxu2 %vm104_vm1, %v3136_v42  ;;  %v3087_v32 = vpop.permute.xlu1 %3086 }
 0x6d8   :  { %3424 = vmatpush.msrb.mxu3 %v3385_v46 }
 0x6db   :  { %v3063_v60 = vpop.permute.xlu0 %3062 }
 0x6dc   :  { %v3123_v47 = vsel %vm1234_vm10, %v3039_v48, %v3063_v60 }
 0x6dd   :  { %v3130_v40 = vsel %vm3124_vm12, %v3123_v47, %v3087_v32 }
 0x6de   :  { %v3137_v26 = vsel %vm3131_vm13, %v3130_v40, %v3111_v9 }
 0x6df   :  { %7167 = vmatmul.msk.f32.gmra.mxu2 %vm104_vm1, %v3137_v26 }
 0x70e   :  { %v3193_v18 = vpop.f32.mrf.mxu2 }
 0x70f   :  { %v3211_v14 = vadd.f32 %v3193_v18, %v8070_v41 }
 0x711   :  { %v9848_v29 = vadd.f32 %v7479_v3, %v3211_v14  ;;  %v9915_v14 = vld [vmem:[%s11922_s4 + $0x8] ss:$0 sm:$0xff] }
 0x713   :  { %v3227_v10 = vsel %vm104_vm1, %v9848_v29, 0.0  ;;  %v3251_v0 = vmul.f32 %v9848_v29, %v9848_v29 }
 0x714   :  { %3228 = vadd.xlane.f32.xlu0 %v3227_v10 }
 0x715   :  { %v3257_v56 = vsel %vm104_vm1, %v3251_v0, 0.0 }
 0x716   :  { %3258 = vadd.xlane.f32.xlu1 %v3257_v56 }
 0x71e   :  { %v3196_v13 = vpop.f32.mrf.mxu2 }
 0x71f   :  { %v3212_v23 = vadd.f32 %v3196_v13, %v8084_v59 }
 0x721   :  { %v9856_v50 = vadd.f32 %v7479_v3, %v3212_v23  ;;  %v9921_v23 = vld [vmem:[%s11922_s4 + $0x9] ss:$0 sm:$0xff] }
 0x723   :  { %v3230_v41 = vsel %vm104_vm1, %v9856_v50, 0.0  ;;  %v3252_v63 = vmul.f32 %v9856_v50, %v9856_v50 }
 0x724   :  { %3231 = vadd.xlane.f32.xlu2 %v3230_v41 }
 0x725   :  { %v3260_v55 = vsel %vm104_vm1, %v3252_v63, 0.0 }
 0x726   :  { %v3199_v38 = vpop.f32.mrf.mxu2  ;;  %3261 = vadd.xlane.f32.xlu0 %v3260_v55 }
 0x727   :  { %v3213_v2 = vadd.f32 %v3199_v38, %v8093_v45 }
 0x729   :  { %v9864_v25 = vadd.f32 %v7479_v3, %v3213_v2 }
 0x72b   :  { %v3233_v59 = vsel %vm104_vm1, %v9864_v25, 0.0  ;;  %v3253_v39 = vmul.f32 %v9864_v25, %v9864_v25 }
 0x72c   :  { %3234 = vadd.xlane.f32.xlu1 %v3233_v59 }
 0x72d   :  { %v3263_v8 = vsel %vm104_vm1, %v3253_v39, 0.0 }
 0x72e   :  { %3264 = vadd.xlane.f32.xlu2 %v3263_v8 }
 0x74f   :  { %v3202_v61 = vpop.f32.mrf.mxu2 }
 0x750   :  { %v3214_v48 = vadd.f32 %v3202_v61, %v8027_v58 }
 0x752   :  { %v9872_v52 = vadd.f32 %v7479_v3, %v3214_v48 }
 0x754   :  { %v3236_v45 = vsel %vm104_vm1, %v9872_v52, 0.0  ;;  %v3254_v7 = vmul.f32 %v9872_v52, %v9872_v52 }
 0x755   :  { %3237 = vadd.xlane.f32.xlu0 %v3236_v45 }
 0x756   :  { %v3266_v5 = vsel %vm104_vm1, %v3254_v7, 0.0 }
 0x757   :  { %3267 = vadd.xlane.f32.xlu1 %v3266_v5 }
 0x75a   :  { %v3205_v34 = vpop.f32.mrf.mxu2 }
 0x75b   :  { %v3215_v22 = vadd.f32 %v3205_v34, %v8051_v17 }
 0x75d   :  { %v9880_v49 = vadd.f32 %v7479_v3, %v3215_v22 }
 0x75f   :  { %v3239_v58 = vsel %vm104_vm1, %v9880_v49, 0.0  ;;  %v3255_v30 = vmul.f32 %v9880_v49, %v9880_v49 }
 0x760   :  { %3240 = vadd.xlane.f32.xlu2 %v3239_v58 }
 0x761   :  { %v3269_v1 = vsel %vm104_vm1, %v3255_v30, 0.0 }
 0x762   :  { %3270 = vadd.xlane.f32.xlu0 %v3269_v1  ;;  %v3208_v19 = vpop.f32.mrf.mxu2 }
 0x763   :  { %v3216_v31 = vadd.f32 %v3208_v19, %v8054_v21 }
 0x765   :  { %v9888_v24 = vadd.f32 %v7479_v3, %v3216_v31 }
 0x767   :  { %v3242_v17 = vsel %vm104_vm1, %v9888_v24, 0.0  ;;  %v3256_v11 = vmul.f32 %v9888_v24, %v9888_v24 }
 0x768   :  { %3243 = vadd.xlane.f32.xlu1 %v3242_v17 }
 0x769   :  { %v3272_v6 = vsel %vm104_vm1, %v3256_v11, 0.0 }
 0x76a   :  { %3273 = vadd.xlane.f32.xlu2 %v3272_v6 }
 0x787   :  { %v3229_v43 = vpop.xlane.xlu0 %3228 }
 0x788   :  { %v3245_v20 = vmul.f32 %v3229_v43, %v7980_v57 }
 0x789   :  { %v3259_v15 = vpop.xlane.xlu1 %3258 }
 0x78a   :  { %v3287_v28 = vmul.f32 %v3245_v20, %v3245_v20  ;;  %v3275_v33 = vmul.f32 %v3259_v15, %v7980_v57  ;;  %v3281_v3 = vsub.f32 %v9848_v29, %v3245_v20 }
 0x78c   :  { %v3293_v21 = vsub.f32 %v3275_v33, %v3287_v28 }
 0x78e   :  { %v3299_v44 = vadd.f32 1e-05, %v3293_v21 }
 0x790   :  { %7616 = vrsqrt.f32 %v3299_v44  ;;  %vm3311_vm15 = vweird.f32 %v3299_v44 }
 0x796   :  { %v7617_v53 = vpop.eup %7616 }
 0x797   :  { %v3306_v54 = vmul.f32 %v7617_v53, %v3299_v44  ;;  %v3232_v35 = vpop.xlane.xlu2 %3231  ;;  %vm3312_vm14 = vweird.f32 %v7617_v53 }
 0x798   :  { %v3246_v37 = vmul.f32 %v3232_v35, %v7980_v57  ;;  %vm3313_vm0 = vmor %vm3311_vm15, %vm3312_vm14 }
 0x799   :  { %v3307_v62 = vmul.f32 %v7617_v53, %v3306_v54  ;;  %v3262_v36 = vpop.xlane.xlu0 %3261 }
 0x79a   :  { %v3288_v60 = vmul.f32 %v3246_v37, %v3246_v37  ;;  %v3276_v32 = vmul.f32 %v3262_v36, %v7980_v57  ;;  %v3282_v22 = vsub.f32 %v9856_v50, %v3246_v37 }
 0x79b   :  { %v3308_v42 = vmul.f32 0.5, %v3307_v62 }
 0x79c   :  { %v3294_v9 = vsub.f32 %v3276_v32, %v3288_v60 }
 0x79d   :  { %v3309_v47 = vsub.f32 1.5, %v3308_v42 }
 0x79e   :  { %v3300_v26 = vadd.f32 1e-05, %v3294_v9 }
 0x79f   :  { %v3310_v40 = vmul.f32 %v7617_v53, %v3309_v47  ;;  %v3235_v18 = vpop.xlane.xlu1 %3234 }
 0x7a0   :  { %7618 = vrsqrt.f32 %v3300_v26  ;;  %v3247_v0 = vmul.f32 %v3235_v18, %v7980_v57  ;;  %vm3321_vm3 = vweird.f32 %v3300_v26 }
 0x7a1   :  { %v3314_v10 = vsel %vm3313_vm0, %v7617_v53, %v3310_v40  ;;  %v3265_v13 = vpop.xlane.xlu2 %3264 }
 0x7a2   :  { %v3365_v56 = vmul.f32 %v3314_v10, %v3281_v3  ;;  %v3289_v41 = vmul.f32 %v3247_v0, %v3247_v0  ;;  %v3277_v63 = vmul.f32 %v3265_v13, %v7980_v57  ;;  %v3283_v43 = vsub.f32 %v9864_v25, %v3247_v0 }
 0x7a4   :  { %v3372_v55 = vmul.f32 %v9915_v14, %v3365_v56  ;;  %v3295_v38 = vsub.f32 %v3277_v63, %v3289_v41 }
 0x7a6   :  { %v3379_v2 = vadd.f32 %v9921_v23, %v3372_v55  ;;  %v7619_v59 = vpop.eup %7618  ;;  %v3301_v39 = vadd.f32 1e-05, %v3295_v38 }
 0x7a7   :  { %v3316_v8 = vmul.f32 %v7619_v59, %v3300_v26  ;;  %vm3322_vm2 = vweird.f32 %v7619_v59 }
 0x7a8   :  { %7168 = vmatmul.msk.f32.vlgmr.msrb.gmra.mxu3 %vm104_vm1, %v3379_v2  ;;  %7620 = vrsqrt.f32 %v3301_v39  ;;  %vm3323_vm4 = vmor %vm3321_vm3, %vm3322_vm2  ;;  %vm3331_vm6 = vweird.f32 %v3301_v39 }
 0x7a9   :  { %v3317_v61 = vmul.f32 %v7619_v59, %v3316_v8 }
 0x7ab   :  { %v3318_v48 = vmul.f32 0.5, %v3317_v61 }
 0x7ad   :  { %v3319_v45 = vsub.f32 1.5, %v3318_v48 }
 0x7ae   :  { %v7621_v7 = vpop.eup %7620 }
 0x7af   :  { %v3326_v5 = vmul.f32 %v7621_v7, %v3301_v39  ;;  %v3320_v34 = vmul.f32 %v7619_v59, %v3319_v45  ;;  %vm3332_vm5 = vweird.f32 %v7621_v7 }
 0x7b0   :  { %vm3333_vm7 = vmor %vm3331_vm6, %vm3332_vm5 }
 0x7b1   :  { %v3327_v58 = vmul.f32 %v7621_v7, %v3326_v5  ;;  %v3324_v30 = vsel %vm3323_vm4, %v7619_v59, %v3320_v34 }
 0x7b2   :  { %v3366_v1 = vmul.f32 %v3324_v30, %v3282_v22 }
 0x7b3   :  { %v3328_v19 = vmul.f32 0.5, %v3327_v58 }
 0x7b4   :  { %v3373_v31 = vmul.f32 %v9915_v14, %v3366_v1 }
 0x7b5   :  { %v3329_v17 = vsub.f32 1.5, %v3328_v19 }
 0x7b6   :  { %v3380_v11 = vadd.f32 %v9921_v23, %v3373_v31 }
 0x7b7   :  { %v3330_v6 = vmul.f32 %v7621_v7, %v3329_v17 }
 0x7b8   :  { %7169 = vmatmul.msk.f32.gmra.mxu3 %vm104_vm1, %v3380_v11 }
 0x7b9   :  { %v3334_v20 = vsel %vm3333_vm7, %v7621_v7, %v3330_v6 }
 0x7ba   :  { %v3367_v15 = vmul.f32 %v3334_v20, %v3283_v43 }
 0x7bc   :  { %v3374_v28 = vmul.f32 %v9915_v14, %v3367_v15 }
 0x7be   :  { %v3381_v33 = vadd.f32 %v9921_v23, %v3374_v28 }
 0x7c0   :  { %7170 = vmatmul.msk.f32.gmra.mxu3 %vm104_vm1, %v3381_v33 }
 0x7c8   :  { %v3238_v21 = vpop.xlane.xlu0 %3237 }
 0x7c9   :  { %v3248_v44 = vmul.f32 %v3238_v21, %v7980_v57 }
 0x7ca   :  { %v3268_v53 = vpop.xlane.xlu1 %3267 }
 0x7cb   :  { %v3290_v16 = vmul.f32 %v3248_v44, %v3248_v44  ;;  %v3278_v27 = vmul.f32 %v3268_v53, %v7980_v57  ;;  %v3284_v63 = vsub.f32 %v9872_v52, %v3248_v44  ;;  %v9956_v44 = vld [vmem:[%s11922_s4 + $0xa] ss:$0 sm:$0xff] }
 0x7cd   :  { %v3296_v54 = vsub.f32 %v3278_v27, %v3290_v16  ;;  %v3585_v27 = vld [vmem:[%s11920_s2 + $0x78] sm:$0xff] }
 0x7ce   :  { %3586 = vmatpush.msrb.mxu1 %v3585_v27 }
 0x7cf   :  { %v3302_v35 = vadd.f32 1e-05, %v3296_v54  ;;  %v3583_v54 = vld [vmem:[%s11920_s2 + $0x68] sm:$0xff] }
 0x7d1   :  { %7622 = vrsqrt.f32 %v3302_v35  ;;  %vm3341_vm14 = vweird.f32 %v3302_v35 }
 0x7d3   :  { %v3241_v4 = vpop.xlane.xlu2 %3240 }
 0x7d4   :  { %v3249_v62 = vmul.f32 %v3241_v4, %v7980_v57  ;;  %v3582_v4 = vld [vmem:[%s11920_s2 + $0x60] sm:$0xff] }
 0x7d5   :  { %v3271_v37 = vpop.xlane.xlu0 %3270 }
 0x7d6   :  { %v3291_v36 = vmul.f32 %v3249_v62, %v3249_v62  ;;  %v3279_v46 = vmul.f32 %v3271_v37, %v7980_v57  ;;  %v3285_v58 = vsub.f32 %v9880_v49, %v3249_v62  ;;  %v3581_v62 = vld [vmem:[%s11920_s2 + $0x58] sm:$0xff]  ;;  %v3580_v37 = vld [vmem:[%s11920_s2 + $0x50] sm:$0xff] }
 0x7d7   :  { %v7623_v42 = vpop.eup %7622 }
 0x7d8   :  { %v3336_v60 = vmul.f32 %v7623_v42, %v3302_v35  ;;  %v3297_v32 = vsub.f32 %v3279_v46, %v3291_v36  ;;  %vm3342_vm8 = vweird.f32 %v7623_v42  ;;  %v3579_v36 = vld [vmem:[%s11920_s2 + $0x48] sm:$0xff] }
 0x7d9   :  { %vm3343_vm15 = vmor %vm3341_vm14, %vm3342_vm8 }
 0x7da   :  { %v3337_v47 = vmul.f32 %v7623_v42, %v3336_v60  ;;  %v3303_v9 = vadd.f32 1e-05, %v3297_v32  ;;  %v3577_v32 = vld [vmem:[%s11920_s2 + $0x38] sm:$0xff] }
 0x7db   :  { %v3244_v40 = vpop.xlane.xlu1 %3243 }
 0x7dc   :  { %v3338_v26 = vmul.f32 0.5, %v3337_v47  ;;  %7624 = vrsqrt.f32 %v3303_v9  ;;  %v3250_v3 = vmul.f32 %v3244_v40, %v7980_v57  ;;  %vm3351_vm2 = vweird.f32 %v3303_v9 }
 0x7dd   :  { %v3274_v18 = vpop.xlane.xlu2 %3273 }
 0x7de   :  { %v3339_v10 = vsub.f32 1.5, %v3338_v26  ;;  %v3292_v0 = vmul.f32 %v3250_v3, %v3250_v3  ;;  %v3280_v56 = vmul.f32 %v3274_v18, %v7980_v57  ;;  %v3286_v20 = vsub.f32 %v9888_v24, %v3250_v3  ;;  %v3575_v26 = vld [vmem:[%s11920_s2 + $0x28] sm:$0xff]  ;;  %v3574_v18 = vld [vmem:[%s11920_s2 + $0x20] sm:$0xff] }
 0x7e0   :  { %v3298_v13 = vsub.f32 %v3280_v56, %v3292_v0  ;;  %v3340_v41 = vmul.f32 %v7623_v42, %v3339_v10 }
 0x7e2   :  { %v7625_v55 = vpop.eup %7624  ;;  %v3304_v38 = vadd.f32 1e-05, %v3298_v13  ;;  %v3344_v2 = vsel %vm3343_vm15, %v7623_v42, %v3340_v41  ;;  %v3578_v42 = vld [vmem:[%s11920_s2 + $0x40] sm:$0xff]  ;;  %v3573_v13 = vld [vmem:[%s11920_s2 + $0x18] sm:$0xff] }
 0x7e3   :  { %v3346_v59 = vmul.f32 %v7625_v55, %v3303_v9  ;;  %v3368_v39 = vmul.f32 %v3344_v2, %v3284_v63  ;;  %vm3352_vm0 = vweird.f32 %v7625_v55  ;;  %v3576_v9 = vld [vmem:[%s11920_s2 + $0x30] sm:$0xff] }
 0x7e4   :  { %7626 = vrsqrt.f32 %v3304_v38  ;;  %vm3353_vm3 = vmor %vm3351_vm2, %vm3352_vm0  ;;  %vm3361_vm5 = vweird.f32 %v3304_v38 }
 0x7e5   :  { %v3347_v8 = vmul.f32 %v7625_v55, %v3346_v59  ;;  %v3375_v61 = vmul.f32 %v9915_v14, %v3368_v39 }
 0x7e7   :  { %v3348_v48 = vmul.f32 0.5, %v3347_v8  ;;  %v3382_v45 = vadd.f32 %v9921_v23, %v3375_v61  ;;  %v3571_v8 = vld [vmem:[%s11920_s2 + $0x8] sm:$0xff] }
 0x7e9   :  { %v3349_v7 = vsub.f32 1.5, %v3348_v48  ;;  %7171 = vmatmul.msk.f32.gmra.mxu3 %vm104_vm1, %v3382_v45  ;;  %v3570_v45 = vld [vmem:[%s11920_s2] sm:$0xff] }
 0x7ea   :  { %v7627_v5 = vpop.eup %7626 }
 0x7eb   :  { %v3356_v34 = vmul.f32 %v7627_v5, %v3304_v38  ;;  %v3350_v22 = vmul.f32 %v7625_v55, %v3349_v7  ;;  %vm3362_vm4 = vweird.f32 %v7627_v5 }
 0x7ec   :  { %vm3363_vm6 = vmor %vm3361_vm5, %vm3362_vm4 }
 0x7ed   :  { %v3357_v30 = vmul.f32 %v7627_v5, %v3356_v34  ;;  %v3354_v1 = vsel %vm3353_vm3, %v7625_v55, %v3350_v22  ;;  %v3572_v55 = vld [vmem:[%s11920_s2 + $0x10] sm:$0xff] }
 0x7ee   :  { %v3369_v19 = vmul.f32 %v3354_v1, %v3285_v58 }
 0x7ef   :  { %v3358_v31 = vmul.f32 0.5, %v3357_v30 }
 0x7f0   :  { %v3376_v17 = vmul.f32 %v9915_v14, %v3369_v19 }
 0x7f1   :  { %v3359_v11 = vsub.f32 1.5, %v3358_v31 }
 0x7f2   :  { %v3383_v6 = vadd.f32 %v9921_v23, %v3376_v17 }
 0x7f3   :  { %v3360_v43 = vmul.f32 %v7627_v5, %v3359_v11 }
 0x7f4   :  { %7172 = vmatmul.msk.f32.gmra.mxu3 %vm104_vm1, %v3383_v6 }
 0x7f5   :  { %v3364_v15 = vsel %vm3363_vm6, %v7627_v5, %v3360_v43 }
 0x7f6   :  { %v3370_v28 = vmul.f32 %v3364_v15, %v3286_v20 }
 0x7f8   :  { %v3377_v33 = vmul.f32 %v9915_v14, %v3370_v28  ;;  %v3584_v14 = vld [vmem:[%s11920_s2 + $0x70] sm:$0xff] }
 0x7f9   :  { %3587 = vmatpush.msrb.mxu1 %v3584_v14 }
 0x7fa   :  { %v3384_v21 = vadd.f32 %v9921_v23, %v3377_v33 }
 0x7fb   :  { %3588 = vmatpush.msrb.mxu1 %v3583_v54 }
 0x7fc   :  { %7173 = vmatmul.msk.f32.gmra.mxu3 %vm104_vm1, %v3384_v21 }
 0x7fd   :  { %3589 = vmatpush.msrb.mxu1 %v3582_v4 }
 0x7ff   :  { %3590 = vmatpush.msrb.mxu1 %v3581_v62 }
 0x801   :  { %3591 = vmatpush.msrb.mxu1 %v3580_v37 }
 0x803   :  { %3592 = vmatpush.msrb.mxu1 %v3579_v36 }
 0x805   :  { %3593 = vmatpush.msrb.mxu1 %v3578_v42 }
 0x807   :  { %3594 = vmatpush.msrb.mxu1 %v3577_v32 }
 0x809   :  { %3595 = vmatpush.msrb.mxu1 %v3576_v9 }
 0x80b   :  { %3596 = vmatpush.msrb.mxu1 %v3575_v26 }
 0x80d   :  { %3597 = vmatpush.msrb.mxu1 %v3574_v18 }
 0x80f   :  { %3598 = vmatpush.msrb.mxu1 %v3573_v13 }
 0x811   :  { %3599 = vmatpush.msrb.mxu1 %v3572_v55 }
 0x813   :  { %3600 = vmatpush.msrb.mxu1 %v3571_v8 }
 0x815   :  { %3601 = vmatpush.msrb.mxu1 %v3570_v45 }
 0x82b   :  { %v3426_v53 = vpop.f32.mrf.mxu3 }
 0x82c   :  { %v9959_v16 = vadd.f32 %v9956_v44, %v3426_v53 }
 0x82e   :  { %v7174_v23 = vmul.f32 -1.702, %v9959_v16 }
 0x830   :  { %v3456_v35 = vmul.f32 1.442695, %v7174_v23 }
 0x832   :  { %7628 = vpow2.f32 %v3456_v35 }
 0x838   :  { %v7629_v46 = vpop.eup %7628 }
 0x839   :  { %v3468_v60 = vadd.f32 1.0, %v7629_v46 }
 0x83b   :  { %7630 = vrcp.f32 %v3468_v60  ;;  %v3429_v47 = vpop.f32.mrf.mxu3  ;;  %v3485_v38 = vand.u32 2147483648, %v3468_v60  ;;  %v3483_v39 = vand.u32 2147483647, %v3468_v60  ;;  %vm3479_vm8 = vweird.f32 %v3468_v60 }
 0x83c   :  { %v3430_v40 = vadd.f32 %v9956_v44, %v3429_v47 }
 0x83d   :  { %v3486_v5 = vor.u32 1.1754944e-38, %v3485_v38  ;;  %vm3484_vm15 = vcmp.eq.f32.partialorder %v3483_v39, 8.507059e+37 }
 0x83e   :  { %v7175_v3 = vmul.f32 -1.702, %v3430_v40 }
 0x840   :  { %v3458_v0 = vmul.f32 1.442695, %v7175_v3 }
 0x841   :  { %v7631_v10 = vpop.eup %7630 }
 0x842   :  { %v3475_v56 = vmul.f32 %v7631_v10, %v3468_v60  ;;  %7632 = vpow2.f32 %v3458_v0  ;;  %vm3480_vm7 = vweird.f32 %v7631_v10 }
 0x843   :  { %v3432_v63 = vpop.f32.mrf.mxu3  ;;  %vm3481_vm14 = vmor %vm3479_vm8, %vm3480_vm7 }
 0x844   :  { %v3476_v41 = vsub.f32 1.0, %v3475_v56  ;;  %v3433_v2 = vadd.f32 %v9956_v44, %v3432_v63 }
 0x846   :  { %v3477_v59 = vmul.f32 %v7631_v10, %v3476_v41  ;;  %v7176_v61 = vmul.f32 -1.702, %v3433_v2 }
 0x848   :  { %v3478_v48 = vadd.f32 %v7631_v10, %v3477_v59  ;;  %v7633_v7 = vpop.eup %7632  ;;  %v3460_v34 = vmul.f32 1.442695, %v7176_v61 }
 0x849   :  { %v3469_v58 = vadd.f32 1.0, %v7633_v7 }
 0x84a   :  { %v3482_v22 = vsel %vm3481_vm14, %v7631_v10, %v3478_v48  ;;  %7634 = vpow2.f32 %v3460_v34 }
 0x84b   :  { %v3487_v30 = vsel %vm3484_vm15, %v3486_v5, %v3482_v22  ;;  %7636 = vrcp.f32 %v3469_v58  ;;  %v3500_v43 = vand.u32 2147483648, %v3469_v58  ;;  %v3498_v15 = vand.u32 2147483647, %v3469_v58 }
 0x84c   :  { %v3564_v1 = vmul.f32 %v3487_v30, %v9959_v16  ;;  %vm3494_vm2 = vweird.f32 %v3469_v58 }
 0x84d   :  { %v3501_v21 = vor.u32 1.1754944e-38, %v3500_v43  ;;  %vm3499_vm4 = vcmp.eq.f32.partialorder %v3498_v15, 8.507059e+37 }
 0x84e   :  { %3602 = vmatmul.f32.vlgmr.msrb.gmra.mxu1 %v3564_v1 }
 0x850   :  { %v7635_v19 = vpop.eup %7634 }
 0x851   :  { %v7637_v31 = vpop.eup %7636  ;;  %v3470_v17 = vadd.f32 1.0, %v7635_v19 }
 0x852   :  { %v3490_v11 = vmul.f32 %v7637_v31, %v3469_v58  ;;  %vm3495_vm0 = vweird.f32 %v7637_v31 }
 0x853   :  { %7638 = vrcp.f32 %v3470_v17  ;;  %vm3496_vm3 = vmor %vm3494_vm2, %vm3495_vm0  ;;  %v3515_v54 = vand.u32 2147483648, %v3470_v17  ;;  %v3513_v4 = vand.u32 2147483647, %v3470_v17  ;;  %vm3509_vm6 = vweird.f32 %v3470_v17 }
 0x854   :  { %v3491_v6 = vsub.f32 1.0, %v3490_v11 }
 0x855   :  { %v3516_v37 = vor.u32 1.1754944e-38, %v3515_v54  ;;  %vm3514_vm8 = vcmp.eq.f32.partialorder %v3513_v4, 8.507059e+37 }
 0x856   :  { %v3492_v20 = vmul.f32 %v7637_v31, %v3491_v6 }
 0x858   :  { %v3493_v28 = vadd.f32 %v7637_v31, %v3492_v20 }
 0x859   :  { %v7639_v33 = vpop.eup %7638 }
 0x85a   :  { %v3497_v53 = vsel %vm3496_vm3, %v7637_v31, %v3493_v28  ;;  %v3505_v16 = vmul.f32 %v7639_v33, %v3470_v17  ;;  %vm3510_vm5 = vweird.f32 %v7639_v33 }
 0x85b   :  { %v3502_v27 = vsel %vm3499_vm4, %v3501_v21, %v3497_v53  ;;  %vm3511_vm7 = vmor %vm3509_vm6, %vm3510_vm5 }
 0x85c   :  { %v3565_v14 = vmul.f32 %v3502_v27, %v3430_v40  ;;  %v3506_v23 = vsub.f32 1.0, %v3505_v16 }
 0x85e   :  { %3605 = vmatmul.f32.gmra.mxu1 %v3565_v14  ;;  %v3507_v35 = vmul.f32 %v7639_v33, %v3506_v23 }
 0x860   :  { %v3508_v62 = vadd.f32 %v7639_v33, %v3507_v35 }
 0x862   :  { %v3512_v36 = vsel %vm3511_vm7, %v7639_v33, %v3508_v62 }
 0x863   :  { %v3517_v46 = vsel %vm3514_vm8, %v3516_v37, %v3512_v36  ;;  %v7483_v37 = vld [vmem:[%s11922_s4 + $0xb] ss:$0 sm:$0xff] }
 0x864   :  { %v3566_v42 = vmul.f32 %v3517_v46, %v3433_v2 }
 0x866   :  { %3608 = vmatmul.f32.gmra.mxu1 %v3566_v42 }
 0x86c   :  { %v3435_v60 = vpop.f32.mrf.mxu3 }
 0x86d   :  { %v3436_v32 = vadd.f32 %v9956_v44, %v3435_v60 }
 0x86f   :  { %v7177_v47 = vmul.f32 -1.702, %v3436_v32 }
 0x871   :  { %v3462_v9 = vmul.f32 1.442695, %v7177_v47 }
 0x873   :  { %7640 = vpow2.f32 %v3462_v9 }
 0x877   :  { %v3438_v40 = vpop.f32.mrf.mxu3 }
 0x878   :  { %v3439_v26 = vadd.f32 %v9956_v44, %v3438_v40 }
 0x879   :  { %v7641_v3 = vpop.eup %7640 }
 0x87a   :  { %v3471_v18 = vadd.f32 1.0, %v7641_v3  ;;  %v7178_v10 = vmul.f32 -1.702, %v3439_v26 }
 0x87c   :  { %7642 = vrcp.f32 %v3471_v18  ;;  %v3464_v0 = vmul.f32 1.442695, %v7178_v10  ;;  %v3530_v8 = vand.u32 2147483648, %v3471_v18  ;;  %v3528_v48 = vand.u32 2147483647, %v3471_v18 }
 0x87d   :  { %vm3524_vm15 = vweird.f32 %v3471_v18 }
 0x87e   :  { %7644 = vpow2.f32 %v3464_v0  ;;  %v3531_v7 = vor.u32 1.1754944e-38, %v3530_v8  ;;  %vm3529_vm2 = vcmp.eq.f32.partialorder %v3528_v48, 8.507059e+37 }
 0x87f   :  { %v3441_v56 = vpop.f32.mrf.mxu3 }
 0x880   :  { %v3442_v13 = vadd.f32 %v9956_v44, %v3441_v56 }
 0x882   :  { %v7643_v41 = vpop.eup %7642  ;;  %v7179_v63 = vmul.f32 -1.702, %v3442_v13 }
 0x883   :  { %v3520_v55 = vmul.f32 %v7643_v41, %v3471_v18  ;;  %vm3525_vm14 = vweird.f32 %v7643_v41 }
 0x884   :  { %v7645_v38 = vpop.eup %7644  ;;  %v3466_v2 = vmul.f32 1.442695, %v7179_v63  ;;  %vm3526_vm0 = vmor %vm3524_vm15, %vm3525_vm14 }
 0x885   :  { %v3472_v59 = vadd.f32 1.0, %v7645_v38  ;;  %v3521_v39 = vsub.f32 1.0, %v3520_v55 }
 0x886   :  { %7646 = vpow2.f32 %v3466_v2 }
 0x887   :  { %7648 = vrcp.f32 %v3472_v59  ;;  %v3522_v61 = vmul.f32 %v7643_v41, %v3521_v39  ;;  %v3545_v31 = vand.u32 2147483648, %v3472_v59  ;;  %v3543_v11 = vand.u32 2147483647, %v3472_v59 }
 0x888   :  { %vm3539_vm4 = vweird.f32 %v3472_v59 }
 0x889   :  { %v3523_v45 = vadd.f32 %v7643_v41, %v3522_v61  ;;  %v3546_v20 = vor.u32 1.1754944e-38, %v3545_v31  ;;  %vm3544_vm6 = vcmp.eq.f32.partialorder %v3543_v11, 8.507059e+37 }
 0x88b   :  { %v3527_v5 = vsel %vm3526_vm0, %v7643_v41, %v3523_v45 }
 0x88c   :  { %v7647_v44 = vpop.eup %7646  ;;  %v3532_v34 = vsel %vm3529_vm2, %v3531_v7, %v3527_v5 }
 0x88d   :  { %v7649_v22 = vpop.eup %7648  ;;  %v3473_v58 = vadd.f32 1.0, %v7647_v44  ;;  %v3567_v30 = vmul.f32 %v3532_v34, %v3436_v32 }
 0x88e   :  { %v3535_v1 = vmul.f32 %v7649_v22, %v3472_v59  ;;  %vm3540_vm3 = vweird.f32 %v7649_v22 }
 0x88f   :  { %7650 = vrcp.f32 %v3473_v58  ;;  %3611 = vmatmul.f32.gmra.mxu1 %v3567_v30  ;;  %vm3541_vm5 = vmor %vm3539_vm4, %vm3540_vm3  ;;  %v3560_v16 = vand.u32 2147483648, %v3473_v58  ;;  %v3558_v14 = vand.u32 2147483647, %v3473_v58  ;;  %vm3554_vm8 = vweird.f32 %v3473_v58 }
 0x890   :  { %v3536_v19 = vsub.f32 1.0, %v3535_v1 }
 0x891   :  { %v3561_v54 = vor.u32 1.1754944e-38, %v3560_v16  ;;  %vm3559_vm15 = vcmp.eq.f32.partialorder %v3558_v14, 8.507059e+37 }
 0x892   :  { %v3537_v17 = vmul.f32 %v7649_v22, %v3536_v19 }
 0x894   :  { %v3538_v6 = vadd.f32 %v7649_v22, %v3537_v17 }
 0x895   :  { %v7651_v43 = vpop.eup %7650 }
 0x896   :  { %v3542_v15 = vsel %vm3541_vm5, %v7649_v22, %v3538_v6  ;;  %v3550_v28 = vmul.f32 %v7651_v43, %v3473_v58  ;;  %vm3555_vm7 = vweird.f32 %v7651_v43 }
 0x897   :  { %v3547_v33 = vsel %vm3544_vm6, %v3546_v20, %v3542_v15  ;;  %vm3556_vm14 = vmor %vm3554_vm8, %vm3555_vm7  ;;  %v7183_v20 = vld [vmem:[%s11919_s1 + $0x70] sm:$0xff]  ;;  %v7182_v15 = vld [vmem:[%s11919_s1 + $0x60] sm:$0xff] }
 0x898   :  { %v3568_v21 = vmul.f32 %v3547_v33, %v3439_v26  ;;  %v3551_v53 = vsub.f32 1.0, %v3550_v28  ;;  %3832 = vmatpush.msra.mxu0 %v7183_v20 }
 0x89a   :  { %3614 = vmatmul.f32.gmra.mxu1 %v3568_v21  ;;  %v3552_v27 = vmul.f32 %v7651_v43, %v3551_v53  ;;  %v7181_v53 = vld [vmem:[%s11919_s1 + $0x50] sm:$0xff]  ;;  %3833 = vmatpush.msra.mxu0 %v7182_v15 }
 0x89c   :  { %v3553_v23 = vadd.f32 %v7651_v43, %v3552_v27  ;;  %3834 = vmatpush.msra.mxu0 %v7181_v53 }
 0x89e   :  { %v3557_v35 = vsel %vm3556_vm14, %v7651_v43, %v3553_v23  ;;  %v7180_v23 = vld [vmem:[%s11919_s1 + $0x40] sm:$0xff] }
 0x89f   :  { %v3562_v4 = vsel %vm3559_vm15, %v3561_v54, %v3557_v35  ;;  %3835 = vmatpush.msra.mxu0 %v7180_v23 }
 0x8a0   :  { %v3569_v62 = vmul.f32 %v3562_v4, %v3442_v13 }
 0x8a2   :  { %3617 = vmatmul.f32.gmra.mxu1 %v3569_v62 }
 0x8cb   :  { %v3603_v36 = vpop.f32.mrf.mxu1 }
 0x8cc   :  { %v3621_v46 = vadd.f32 %v3603_v36, %v9848_v29  ;;  %v10087_v36 = vld [vmem:[%s11922_s4 + $0xc] ss:$0 sm:$0xff] }
 0x8ce   :  { %v10020_v42 = vadd.f32 %v7483_v37, %v3621_v46 }
 0x8d0   :  { %v3637_v60 = vsel %vm104_vm1, %v10020_v42, 0.0  ;;  %v3661_v32 = vmul.f32 %v10020_v42, %v10020_v42 }
 0x8d1   :  { %3638 = vadd.xlane.f32.xlu0 %v3637_v60 }
 0x8d2   :  { %v3667_v47 = vsel %vm104_vm1, %v3661_v32, 0.0 }
 0x8d3   :  { %3668 = vadd.xlane.f32.xlu1 %v3667_v47 }
 0x8db   :  { %v3606_v9 = vpop.f32.mrf.mxu1 }
 0x8dc   :  { %v3622_v40 = vadd.f32 %v3606_v9, %v9856_v50 }
 0x8de   :  { %v10028_v26 = vadd.f32 %v7483_v37, %v3622_v40  ;;  %v10093_v40 = vld [vmem:[%s11922_s4 + $0xd] ss:$0 sm:$0xff] }
 0x8e0   :  { %v3640_v29 = vsel %vm104_vm1, %v10028_v26, 0.0  ;;  %v3662_v3 = vmul.f32 %v10028_v26, %v10028_v26 }
 0x8e1   :  { %3641 = vadd.xlane.f32.xlu2 %v3640_v29 }
 0x8e2   :  { %v3670_v18 = vsel %vm104_vm1, %v3662_v3, 0.0 }
 0x8e3   :  { %v3609_v10 = vpop.f32.mrf.mxu1  ;;  %3671 = vadd.xlane.f32.xlu0 %v3670_v18 }
 0x8e4   :  { %v3623_v0 = vadd.f32 %v3609_v10, %v9864_v25 }
 0x8e6   :  { %v10036_v56 = vadd.f32 %v7483_v37, %v3623_v0 }
 0x8e8   :  { %v3643_v50 = vsel %vm104_vm1, %v10036_v56, 0.0  ;;  %v3663_v13 = vmul.f32 %v10036_v56, %v10036_v56 }
 0x8e9   :  { %3644 = vadd.xlane.f32.xlu1 %v3643_v50 }
 0x8ea   :  { %v3673_v41 = vsel %vm104_vm1, %v3663_v13, 0.0 }
 0x8eb   :  { %3674 = vadd.xlane.f32.xlu2 %v3673_v41 }
 0x90c   :  { %v3612_v63 = vpop.f32.mrf.mxu1 }
 0x90d   :  { %v3624_v55 = vadd.f32 %v3612_v63, %v9872_v52 }
 0x90f   :  { %v10044_v38 = vadd.f32 %v7483_v37, %v3624_v55 }
 0x911   :  { %v3646_v25 = vsel %vm104_vm1, %v10044_v38, 0.0  ;;  %v3664_v2 = vmul.f32 %v10044_v38, %v10044_v38 }
 0x912   :  { %3647 = vadd.xlane.f32.xlu0 %v3646_v25 }
 0x913   :  { %v3676_v59 = vsel %vm104_vm1, %v3664_v2, 0.0 }
 0x914   :  { %3677 = vadd.xlane.f32.xlu1 %v3676_v59 }
 0x917   :  { %v3615_v39 = vpop.f32.mrf.mxu1 }
 0x918   :  { %v3625_v8 = vadd.f32 %v3615_v39, %v9880_v49 }
 0x91a   :  { %v10052_v61 = vadd.f32 %v7483_v37, %v3625_v8 }
 0x91c   :  { %v3649_v52 = vsel %vm104_vm1, %v10052_v61, 0.0  ;;  %v3665_v48 = vmul.f32 %v10052_v61, %v10052_v61 }
 0x91d   :  { %3650 = vadd.xlane.f32.xlu2 %v3649_v52 }
 0x91e   :  { %v3679_v45 = vsel %vm104_vm1, %v3665_v48, 0.0 }
 0x91f   :  { %3680 = vadd.xlane.f32.xlu0 %v3679_v45  ;;  %v3618_v7 = vpop.f32.mrf.mxu1 }
 0x920   :  { %v3626_v5 = vadd.f32 %v3618_v7, %v9888_v24 }
 0x922   :  { %v10060_v44 = vadd.f32 %v7483_v37, %v3626_v5 }
 0x924   :  { %v3652_v49 = vsel %vm104_vm1, %v10060_v44, 0.0  ;;  %v3666_v34 = vmul.f32 %v10060_v44, %v10060_v44 }
 0x925   :  { %3653 = vadd.xlane.f32.xlu1 %v3652_v49 }
 0x926   :  { %v3682_v22 = vsel %vm104_vm1, %v3666_v34, 0.0 }
 0x927   :  { %3683 = vadd.xlane.f32.xlu2 %v3682_v22 }
 0x944   :  { %v3639_v58 = vpop.xlane.xlu0 %3638 }
 0x945   :  { %v3655_v30 = vmul.f32 %v3639_v58, %v7980_v57 }
 0x946   :  { %v3669_v1 = vpop.xlane.xlu1 %3668 }
 0x947   :  { %v3697_v19 = vmul.f32 %v3655_v30, %v3655_v30  ;;  %v3685_v31 = vmul.f32 %v3669_v1, %v7980_v57  ;;  %v3691_v37 = vsub.f32 %v10020_v42, %v3655_v30 }
 0x949   :  { %v3703_v24 = vsub.f32 %v3685_v31, %v3697_v19 }
 0x94b   :  { %v3709_v17 = vadd.f32 1e-05, %v3703_v24 }
 0x94d   :  { %7652 = vrsqrt.f32 %v3709_v17  ;;  %vm3721_vm2 = vweird.f32 %v3709_v17 }
 0x953   :  { %v7653_v11 = vpop.eup %7652 }
 0x954   :  { %v3716_v6 = vmul.f32 %v7653_v11, %v3709_v17  ;;  %v3642_v43 = vpop.xlane.xlu2 %3641  ;;  %vm3722_vm0 = vweird.f32 %v7653_v11 }
 0x955   :  { %v3656_v33 = vmul.f32 %v3642_v43, %v7980_v57  ;;  %vm3723_vm3 = vmor %vm3721_vm2, %vm3722_vm0 }
 0x956   :  { %v3717_v28 = vmul.f32 %v7653_v11, %v3716_v6  ;;  %v3672_v21 = vpop.xlane.xlu0 %3671 }
 0x957   :  { %v3698_v27 = vmul.f32 %v3656_v33, %v3656_v33  ;;  %v3686_v14 = vmul.f32 %v3672_v21, %v7980_v57  ;;  %v3692_v8 = vsub.f32 %v10028_v26, %v3656_v33 }
 0x958   :  { %v3718_v16 = vmul.f32 0.5, %v3717_v28 }
 0x959   :  { %v3704_v35 = vsub.f32 %v3686_v14, %v3698_v27 }
 0x95a   :  { %v3719_v54 = vsub.f32 1.5, %v3718_v16 }
 0x95b   :  { %v3710_v62 = vadd.f32 1e-05, %v3704_v35 }
 0x95c   :  { %v3720_v4 = vmul.f32 %v7653_v11, %v3719_v54  ;;  %v3645_v46 = vpop.xlane.xlu1 %3644 }
 0x95d   :  { %7654 = vrsqrt.f32 %v3710_v62  ;;  %v3657_v32 = vmul.f32 %v3645_v46, %v7980_v57  ;;  %vm3731_vm5 = vweird.f32 %v3710_v62 }
 0x95e   :  { %v3724_v60 = vsel %vm3723_vm3, %v7653_v11, %v3720_v4  ;;  %v3675_v9 = vpop.xlane.xlu2 %3674 }
 0x95f   :  { %v3775_v47 = vmul.f32 %v3724_v60, %v3691_v37  ;;  %v3699_v29 = vmul.f32 %v3657_v32, %v3657_v32  ;;  %v3687_v3 = vmul.f32 %v3675_v9, %v7980_v57  ;;  %v3693_v58 = vsub.f32 %v10036_v56, %v3657_v32 }
 0x961   :  { %v3782_v18 = vmul.f32 %v10087_v36, %v3775_v47  ;;  %v3705_v10 = vsub.f32 %v3687_v3, %v3699_v29 }
 0x963   :  { %v3789_v0 = vadd.f32 %v10093_v40, %v3782_v18  ;;  %v7655_v50 = vpop.eup %7654  ;;  %v3711_v13 = vadd.f32 1e-05, %v3705_v10 }
 0x964   :  { %v3726_v41 = vmul.f32 %v7655_v50, %v3710_v62  ;;  %vm3732_vm4 = vweird.f32 %v7655_v50 }
 0x965   :  { %7184 = vmatmul.msk.f32.vlgmr.msra.gmra.mxu0 %vm104_vm1, %v3789_v0  ;;  %7656 = vrsqrt.f32 %v3711_v13  ;;  %vm3733_vm6 = vmor %vm3731_vm5, %vm3732_vm4  ;;  %vm3741_vm8 = vweird.f32 %v3711_v13 }
 0x966   :  { %v3727_v63 = vmul.f32 %v7655_v50, %v3726_v41 }
 0x968   :  { %v3728_v55 = vmul.f32 0.5, %v3727_v63 }
 0x96a   :  { %v3729_v25 = vsub.f32 1.5, %v3728_v55 }
 0x96b   :  { %v7657_v2 = vpop.eup %7656 }
 0x96c   :  { %v3736_v59 = vmul.f32 %v7657_v2, %v3711_v13  ;;  %v3730_v39 = vmul.f32 %v7655_v50, %v3729_v25  ;;  %vm3742_vm7 = vweird.f32 %v7657_v2 }
 0x96d   :  { %vm3743_vm14 = vmor %vm3741_vm8, %vm3742_vm7 }
 0x96e   :  { %v3737_v52 = vmul.f32 %v7657_v2, %v3736_v59  ;;  %v3734_v48 = vsel %vm3733_vm6, %v7655_v50, %v3730_v39 }
 0x96f   :  { %v3776_v45 = vmul.f32 %v3734_v48, %v3692_v8 }
 0x970   :  { %v3738_v7 = vmul.f32 0.5, %v3737_v52 }
 0x971   :  { %v3783_v5 = vmul.f32 %v10087_v36, %v3776_v45 }
 0x972   :  { %v3739_v49 = vsub.f32 1.5, %v3738_v7 }
 0x973   :  { %v3790_v34 = vadd.f32 %v10093_v40, %v3783_v5 }
 0x974   :  { %v3740_v22 = vmul.f32 %v7657_v2, %v3739_v49 }
 0x975   :  { %7185 = vmatmul.msk.f32.gmra.mxu0 %vm104_vm1, %v3790_v34 }
 0x976   :  { %v3744_v30 = vsel %vm3743_vm14, %v7657_v2, %v3740_v22 }
 0x977   :  { %v3777_v1 = vmul.f32 %v3744_v30, %v3693_v58 }
 0x979   :  { %v3784_v19 = vmul.f32 %v10087_v36, %v3777_v1 }
 0x97b   :  { %v3791_v31 = vadd.f32 %v10093_v40, %v3784_v19 }
 0x97d   :  { %7186 = vmatmul.msk.f32.gmra.mxu0 %vm104_vm1, %v3791_v31 }
 0x985   :  { %v3648_v24 = vpop.xlane.xlu0 %3647 }
 0x986   :  { %v3658_v17 = vmul.f32 %v3648_v24, %v7980_v57 }
 0x987   :  { %v3678_v11 = vpop.xlane.xlu1 %3677 }
 0x988   :  { %v3700_v6 = vmul.f32 %v3658_v17, %v3658_v17  ;;  %v3688_v43 = vmul.f32 %v3678_v11, %v7980_v57  ;;  %v3694_v3 = vsub.f32 %v10044_v38, %v3658_v17 }
 0x98a   :  { %v3706_v20 = vsub.f32 %v3688_v43, %v3700_v6  ;;  %v7486_v43 = vld [vmem:[%s11922_s4 + $0xe] ss:$0 sm:$0xff] }
 0x98c   :  { %v3712_v15 = vadd.f32 1e-05, %v3706_v20 }
 0x98e   :  { %7658 = vrsqrt.f32 %v3712_v15  ;;  %vm3751_vm0 = vweird.f32 %v3712_v15 }
 0x990   :  { %v3651_v28 = vpop.xlane.xlu2 %3650 }
 0x991   :  { %v3659_v33 = vmul.f32 %v3651_v28, %v7980_v57 }
 0x992   :  { %v3681_v21 = vpop.xlane.xlu0 %3680 }
 0x993   :  { %v3701_v53 = vmul.f32 %v3659_v33, %v3659_v33  ;;  %v3689_v16 = vmul.f32 %v3681_v21, %v7980_v57  ;;  %v3695_v52 = vsub.f32 %v10052_v61, %v3659_v33 }
 0x994   :  { %v7659_v27 = vpop.eup %7658 }
 0x995   :  { %v3746_v14 = vmul.f32 %v7659_v27, %v3712_v15  ;;  %v3707_v23 = vsub.f32 %v3689_v16, %v3701_v53  ;;  %vm3752_vm15 = vweird.f32 %v7659_v27 }
 0x996   :  { %vm3753_vm2 = vmor %vm3751_vm0, %vm3752_vm15 }
 0x997   :  { %v3747_v54 = vmul.f32 %v7659_v27, %v3746_v14  ;;  %v3713_v35 = vadd.f32 1e-05, %v3707_v23 }
 0x998   :  { %v3654_v4 = vpop.xlane.xlu1 %3653 }
 0x999   :  { %v3748_v62 = vmul.f32 0.5, %v3747_v54  ;;  %7660 = vrsqrt.f32 %v3713_v35  ;;  %v3660_v37 = vmul.f32 %v3654_v4, %v7980_v57  ;;  %vm3761_vm4 = vweird.f32 %v3713_v35 }
 0x99a   :  { %v3684_v46 = vpop.xlane.xlu2 %3683 }
 0x99b   :  { %v3749_v60 = vsub.f32 1.5, %v3748_v62  ;;  %v3702_v32 = vmul.f32 %v3660_v37, %v3660_v37  ;;  %v3690_v47 = vmul.f32 %v3684_v46, %v7980_v57  ;;  %v3696_v30 = vsub.f32 %v10060_v44, %v3660_v37 }
 0x99d   :  { %v3750_v9 = vmul.f32 %v7659_v27, %v3749_v60  ;;  %v3708_v29 = vsub.f32 %v3690_v47, %v3702_v32 }
 0x99f   :  { %v7661_v18 = vpop.eup %7660  ;;  %v3714_v10 = vadd.f32 1e-05, %v3708_v29  ;;  %v3754_v0 = vsel %vm3753_vm2, %v7659_v27, %v3750_v9 }
 0x9a0   :  { %v3756_v50 = vmul.f32 %v7661_v18, %v3713_v35  ;;  %v3778_v13 = vmul.f32 %v3754_v0, %v3694_v3  ;;  %vm3762_vm3 = vweird.f32 %v7661_v18 }
 0x9a1   :  { %7662 = vrsqrt.f32 %v3714_v10  ;;  %vm3763_vm5 = vmor %vm3761_vm4, %vm3762_vm3  ;;  %vm3771_vm7 = vweird.f32 %v3714_v10 }
 0x9a2   :  { %v3757_v41 = vmul.f32 %v7661_v18, %v3756_v50  ;;  %v3785_v63 = vmul.f32 %v10087_v36, %v3778_v13 }
 0x9a4   :  { %v3758_v55 = vmul.f32 0.5, %v3757_v41  ;;  %v3792_v25 = vadd.f32 %v10093_v40, %v3785_v63 }
 0x9a6   :  { %v3759_v2 = vsub.f32 1.5, %v3758_v55  ;;  %7187 = vmatmul.msk.f32.gmra.mxu0 %vm104_vm1, %v3792_v25 }
 0x9a7   :  { %v7663_v59 = vpop.eup %7662 }
 0x9a8   :  { %v3760_v39 = vmul.f32 %v7661_v18, %v3759_v2  ;;  %v3766_v8 = vmul.f32 %v7663_v59, %v3714_v10  ;;  %vm3772_vm6 = vweird.f32 %v7663_v59 }
 0x9a9   :  { %vm3773_vm8 = vmor %vm3771_vm7, %vm3772_vm6 }
 0x9aa   :  { %v3767_v48 = vmul.f32 %v7663_v59, %v3766_v8  ;;  %v3764_v45 = vsel %vm3763_vm5, %v7661_v18, %v3760_v39 }
 0x9ab   :  { %v3779_v7 = vmul.f32 %v3764_v45, %v3695_v52 }
 0x9ac   :  { %v3768_v5 = vmul.f32 0.5, %v3767_v48 }
 0x9ad   :  { %v3786_v49 = vmul.f32 %v10087_v36, %v3779_v7 }
 0x9ae   :  { %v3769_v34 = vsub.f32 1.5, %v3768_v5 }
 0x9af   :  { %v3793_v22 = vadd.f32 %v10093_v40, %v3786_v49 }
 0x9b0   :  { %v3770_v58 = vmul.f32 %v7663_v59, %v3769_v34 }
 0x9b1   :  { %7188 = vmatmul.msk.f32.gmra.mxu0 %vm104_vm1, %v3793_v22 }
 0x9b2   :  { %v3774_v1 = vsel %vm3773_vm8, %v7663_v59, %v3770_v58 }
 0x9b3   :  { %v3780_v19 = vmul.f32 %v3774_v1, %v3696_v30 }
 0x9b5   :  { %v3787_v31 = vmul.f32 %v10087_v36, %v3780_v19 }
 0x9b7   :  { %v3794_v24 = vadd.f32 %v10093_v40, %v3787_v31 }
 0x9b9   :  { %7189 = vmatmul.msk.f32.gmra.mxu0 %vm104_vm1, %v3794_v24 }
 0x9e2   :  { %v3837_v17 = vpop.f32.mrf.mxu0 }
 0x9e3   :  { %v10156_v16 = vadd.f32 %v7486_v43, %v3837_v17 }
 0x9f2   :  { %v3840_v11 = vpop.f32.mrf.mxu0 }
 0x9f3   :  { %v10148_v53 = vadd.f32 %v7486_v43, %v3840_v11 }
 0x9fa   :  { %v3843_v6 = vpop.f32.mrf.mxu0 }
 0x9fb   :  { %v10140_v21 = vadd.f32 %v7486_v43, %v3843_v6 }
 0xa23   :  { %v3846_v20 = vpop.f32.mrf.mxu0 }
 0xa24   :  { %v3847_v15 = vadd.f32 %v7486_v43, %v3846_v20 }
 0xa26   :  { %3903 = vrot.lane.b32.xlu0 %v3847_v15, %s7833_s7  ;;  %3885 = vrot.lane.b32.xlu1 %v3847_v15, %s7832_s30  ;;  %v4085_v14 = vrot.slane %v3847_v15, 4 }
 0xa27   :  { %3867 = vrot.lane.b32.xlu2 %v3847_v15, %s7831_s29 }
 0xa2e   :  { %v3849_v36 = vpop.f32.mrf.mxu0 }
 0xa2f   :  { %v3850_v28 = vadd.f32 %v7486_v43, %v3849_v36 }
 0xa31   :  { %3869 = vrot.lane.b32.xlu0 %v3850_v28, %s7831_s29  ;;  %3887 = vrot.lane.b32.xlu1 %v3850_v28, %s7832_s30  ;;  %v4141_v63 = vrot.slane %v3850_v28, 4 }
 0xa36   :  { %v3852_v40 = vpop.f32.mrf.mxu0 }
 0xa37   :  { %v10133_v33 = vadd.f32 %v7486_v43, %v3852_v40 }
 0xa39   :  { %3905 = vrot.lane.b32.xlu0 %v3850_v28, %s7833_s7  ;;  %3907 = vrot.lane.b32.xlu2 %v10133_v33, %s7833_s7 }
 0xa3a   :  { %3889 = vrot.lane.b32.xlu1 %v10133_v33, %s7832_s30 }
 0xa41   :  { %3865 = vrot.lane.b32.xlu2 %v10140_v21, %s7831_s29  ;;  %3871 = vrot.lane.b32.xlu0 %v10133_v33, %s7831_s29 }
 0xa42   :  { %3883 = vrot.lane.b32.xlu1 %v10140_v21, %s7832_s30 }
 0xa49   :  { %3863 = vrot.lane.b32.xlu2 %v10148_v53, %s7831_s29  ;;  %3901 = vrot.lane.b32.xlu0 %v10140_v21, %s7833_s7 }
 0xa4a   :  { %3881 = vrot.lane.b32.xlu1 %v10148_v53, %s7832_s30 }
 0xa51   :  { %3861 = vrot.lane.b32.xlu2 %v10156_v16, %s7831_s29  ;;  %3899 = vrot.lane.b32.xlu0 %v10148_v53, %s7833_s7 }
 0xa52   :  { %3879 = vrot.lane.b32.xlu1 %v10156_v16, %s7832_s30 }
 0xa59   :  { %3897 = vrot.lane.b32.xlu0 %v10156_v16, %s7833_s7 }
 0xa81   :  { %v3868_v27 = vpop.permute.xlu2 %3867 }
 0xa82   :  { %v4097_v37 = vrot.slane %v3868_v27, 4 }
 0xa93   :  { %v10168_v46 = vpop.permute.xlu2 %3907 }
 0xa98   :  { %v3886_v23 = vpop.permute.xlu1 %3885  ;;  %v3904_v54 = vpop.permute.xlu0 %3903 }
 0xa99   :  { %v4086_v35 = vsel %vm556_vm9, %v3886_v23, %v4085_v14  ;;  %v4083_v4 = vrot.slane %v3886_v23, 4  ;;  %v4095_v60 = vrot.slane %v3904_v54, 4  ;;  %v4098_v32 = vsel %vm556_vm9, %v3904_v54, %v4097_v37 }
 0xa9a   :  { %v4094_v62 = vperm.slane %v4086_v35, %v8226_v12  ;;  %v4106_v29 = vperm.slane %v4098_v32, %v8226_v12  ;;  %v3917_v54 = vrot.slane %v10156_v16, 4  ;;  %v3973_v37 = vrot.slane %v10148_v53, 4 }
 0xa9b   :  { %v4084_v47 = vsel %vm556_vm9, %v4083_v4, %v3847_v15  ;;  %v4096_v3 = vsel %vm556_vm9, %v4095_v60, %v3868_v27  ;;  %v10177_v55 = vpop.permute.xlu2 %3865  ;;  %v4207_v60 = vrot.slane %v10168_v46, 4  ;;  %v4197_v32 = vrot.slane %v10133_v33, 4 }
 0xa9c   :  { %v4121_v9 = vrot.slane %v4094_v62, 4  ;;  %v4090_v18 = vperm.slane %v4084_v47, %v8226_v12  ;;  %v4102_v13 = vperm.slane %v4096_v3, %v8226_v12  ;;  %v4119_v41 = vrot.slane %v4106_v29, 4 }
 0xa9e   :  { %v4122_v10 = vsel %vm556_vm9, %v4106_v29, %v4121_v9  ;;  %v4109_v25 = vrot.slane %v4090_v18, 4  ;;  %v4107_v52 = vrot.slane %v4102_v13, 4  ;;  %v4120_v48 = vsel %vm556_vm9, %v4119_v41, %v4094_v62 }
 0xa9f   :  { %v4130_v2 = vperm.slane %v4122_v10, %v8235_v51  ;;  %v4126_v58 = vperm.slane %v4120_v48, %v8235_v51  ;;  %v4029_v9 = vrot.slane %v10140_v21, 4 }
 0xaa0   :  { %v4110_v45 = vsel %vm556_vm9, %v4102_v13, %v4109_v25  ;;  %v4108_v31 = vsel %vm556_vm9, %v4107_v52, %v4090_v18 }
 0xaa1   :  { %v4137_v7 = vrot.slane %v4130_v2, 4  ;;  %v4118_v24 = vperm.slane %v4110_v45, %v8235_v51  ;;  %v10195_v40 = vperm.slane %v4108_v31, %v8235_v51  ;;  %v4135_v27 = vrot.slane %v4126_v58, 4 }
 0xaa3   :  { %v3870_v0 = vpop.permute.xlu0 %3869  ;;  %v3888_v50 = vpop.permute.xlu1 %3887  ;;  %v4138_v11 = vsel %vm556_vm9, 0.0, %v4137_v7  ;;  %v10201_v35 = vrot.slane %v4118_v24, 4  ;;  %v4131_v13 = vrot.slane %v10195_v40, 4  ;;  %v4136_v41 = vsel %vm556_vm9, 0.0, %v4135_v27 }
 0xaa4   :  { %v4139_v59 = vrot.slane %v3888_v50, 4  ;;  %v4142_v39 = vsel %vm556_vm9, %v3888_v50, %v4141_v63  ;;  %v4153_v5 = vrot.slane %v3870_v0, 4  ;;  %v10197_v14 = vpop.permute.xlu2 %3863  ;;  %v4429_v4 = vrot.slane %v4138_v11, 4 }
 0xaa5   :  { %v4150_v49 = vperm.slane %v4142_v39, %v8226_v12  ;;  %v4041_v50 = vrot.slane %v10177_v55, 4  ;;  %v4424_v63 = vsel %vm556_vm9, %v4137_v7, %v4126_v58  ;;  %v10231_v58 = vsel %vm556_vm9, 0.0, %v4131_v13 }
 0xaa6   :  { %v4140_v8 = vsel %vm556_vm9, %v4139_v59, %v3850_v28  ;;  %v4430_v2 = vsel %vm556_vm9, %v4429_v4, %v4136_v41 }
 0xaa7   :  { %v4146_v34 = vperm.slane %v4140_v8, %v8226_v12  ;;  %v4177_v6 = vrot.slane %v4150_v49, 4  ;;  %v10245_v11 = vperm.slane %v4430_v2, %v8226_v12 }
 0xaa9   :  { %v4165_v15 = vrot.slane %v4146_v34, 4 }
 0xaab   :  { %v3906_v22 = vpop.permute.xlu0 %3905 }
 0xaac   :  { %v4151_v30 = vrot.slane %v3906_v22, 4  ;;  %v4154_v1 = vsel %vm556_vm9, %v3906_v22, %v4153_v5  ;;  %v3890_v19 = vpop.permute.xlu1 %3889 }
 0xaad   :  { %v4162_v17 = vperm.slane %v4154_v1, %v8226_v12  ;;  %v4195_v20 = vrot.slane %v3890_v19, 4  ;;  %v4198_v52 = vsel %vm556_vm9, %v3890_v19, %v4197_v32  ;;  %v3985_v1 = vrot.slane %v10197_v14, 4 }
 0xaae   :  { %v4152_v43 = vsel %vm556_vm9, %v4151_v30, %v3870_v0  ;;  %v10234_v30 = vperm.slane %v4424_v63, %v8226_v12  ;;  %v4206_v24 = vperm.slane %v4198_v52, %v8226_v12 }
 0xaaf   :  { %v4158_v36 = vperm.slane %v4152_v43, %v8226_v12  ;;  %v4175_v28 = vrot.slane %v4162_v17, 4  ;;  %v4178_v23 = vsel %vm556_vm9, %v4162_v17, %v4177_v6  ;;  %v4196_v47 = vsel %vm556_vm9, %v4195_v20, %v10133_v33  ;;  %v10250_v43 = vpop.permute.xlu2 %3861 }
 0xab0   :  { %v4186_v10 = vperm.slane %v4178_v23, %v8235_v51  ;;  %v10219_v33 = vsel %vm556_vm9, 0.0, %v10201_v35  ;;  %v4202_v48 = vperm.slane %v4196_v47, %v8226_v12  ;;  %v3929_v47 = vrot.slane %v10250_v43, 4 }
 0xab1   :  { %v4166_v62 = vsel %vm556_vm9, %v4158_v36, %v4165_v15  ;;  %v4163_v29 = vrot.slane %v4158_v36, 4  ;;  %v4176_v18 = vsel %vm556_vm9, %v4175_v28, %v4150_v49  ;;  %v4418_v31 = vrot.slane %v10219_v33, 4 }
 0xab2   :  { %v4174_v3 = vperm.slane %v4166_v62, %v8235_v51  ;;  %v4182_v8 = vperm.slane %v4176_v18, %v8235_v51  ;;  %v4193_v49 = vrot.slane %v4186_v10, 4  ;;  %v4221_v20 = vrot.slane %v4202_v48, 4 }
 0xab3   :  { %v3872_v0 = vpop.permute.xlu0 %3871  ;;  %v4164_v7 = vsel %vm556_vm9, %v4163_v29, %v4146_v34 }
 0xab4   :  { %v3884_v25 = vpop.permute.xlu1 %3883  ;;  %v4208_v59 = vsel %vm556_vm9, %v4207_v60, %v3872_v0  ;;  %v4209_v39 = vrot.slane %v3872_v0, 4  ;;  %v10228_v5 = vrot.slane %v4174_v3, 4  ;;  %v10248_v6 = vperm.slane %v4164_v7, %v8235_v51 }
 0xab5   :  { %v4214_v45 = vperm.slane %v4208_v59, %v8226_v12  ;;  %v4027_v22 = vrot.slane %v3884_v25, 4  ;;  %v4030_v17 = vsel %vm556_vm9, %v3884_v25, %v4029_v9  ;;  %v4191_v36 = vrot.slane %v4182_v8, 4 }
 0xab6   :  { %v4210_v19 = vsel %vm556_vm9, %v10168_v46, %v4209_v39  ;;  %v10254_v46 = vsel %vm556_vm9, 0.0, %v10228_v5  ;;  %v4194_v28 = vsel %vm556_vm9, 0.0, %v4193_v49  ;;  %v4038_v62 = vperm.slane %v4030_v17, %v8226_v12 }
 0xab7   :  { %v4028_v34 = vsel %vm556_vm9, %v4027_v22, %v10140_v21  ;;  %v4219_v15 = vrot.slane %v4214_v45, 4  ;;  %v4218_v21 = vperm.slane %v4210_v19, %v8226_v12  ;;  %v4222_v23 = vsel %vm556_vm9, %v4214_v45, %v4221_v20 }
 0xab8   :  { %v4034_v4 = vperm.slane %v4028_v34, %v8226_v12  ;;  %v10262_v32 = vsel %vm556_vm9, %v4193_v49, %v4182_v8  ;;  %v4233_v9 = vrot.slane %v4206_v24, 4  ;;  %v4187_v3 = vrot.slane %v10248_v6, 4 }
 0xab9   :  { %v4483_v18 = vrot.slane %v4194_v28, 4  ;;  %v4220_v10 = vsel %vm556_vm9, %v4219_v15, %v4202_v48  ;;  %v4192_v41 = vsel %vm556_vm9, 0.0, %v4191_v36  ;;  %v4472_v63 = vrot.slane %v10254_v46, 4 }
 0xaba   :  { %v4230_v25 = vperm.slane %v4222_v23, %v8235_v51  ;;  %v4231_v2 = vrot.slane %v4218_v21, 4  ;;  %v4053_v59 = vrot.slane %v4034_v4, 4  ;;  %v4065_v39 = vrot.slane %v4038_v62, 4 }
 0xabb   :  { %v3902_v27 = vpop.permute.xlu0 %3901  ;;  %v4226_v52 = vperm.slane %v4220_v10, %v8235_v51  ;;  %v4234_v48 = vsel %vm556_vm9, %v4218_v21, %v4233_v9 }
 0xabc   :  { %v4039_v60 = vrot.slane %v3902_v27, 4  ;;  %v4042_v29 = vsel %vm556_vm9, %v3902_v27, %v4041_v50  ;;  %v3882_v13 = vpop.permute.xlu1 %3881  ;;  %v4232_v34 = vsel %vm556_vm9, %v4231_v2, %v4206_v24  ;;  %v4245_v17 = vrot.slane %v4230_v25, 4 }
 0xabd   :  { %v4050_v8 = vperm.slane %v4042_v29, %v8226_v12  ;;  %v3971_v45 = vrot.slane %v3882_v13, 4  ;;  %v10293_v29 = vsel %vm556_vm9, %v4483_v18, %v4192_v41  ;;  %v10307_v2 = vperm.slane %v4232_v34, %v8235_v51 }
 0xabe   :  { %v4040_v0 = vsel %vm556_vm9, %v4039_v60, %v10177_v55  ;;  %v3974_v55 = vsel %vm556_vm9, %v3882_v13, %v3973_v37  ;;  %v4243_v18 = vrot.slane %v4226_v52, 4 }
 0xabf   :  { %v4046_v50 = vperm.slane %v4040_v0, %v8226_v12  ;;  %v4063_v22 = vrot.slane %v4050_v8, 4  ;;  %v4066_v19 = vsel %vm556_vm9, %v4050_v8, %v4065_v39  ;;  %v3972_v15 = vsel %vm556_vm9, %v3971_v45, %v10148_v53 }
 0xac0   :  { %v4074_v20 = vperm.slane %v4066_v19, %v8235_v51  ;;  %v3982_v37 = vperm.slane %v3974_v55, %v8226_v12  ;;  %v3978_v24 = vperm.slane %v3972_v15, %v8226_v12  ;;  %v4242_v53 = vperm.slane %v4234_v48, %v8235_v51 }
 0xac1   :  { %v4051_v7 = vrot.slane %v4046_v50, 4  ;;  %v4054_v49 = vsel %vm556_vm9, %v4046_v50, %v4053_v59  ;;  %v4064_v21 = vsel %vm556_vm9, %v4063_v22, %v4038_v62  ;;  %v10300_v0 = vsel %vm556_vm9, 0.0, %v4187_v3 }
 0xac2   :  { %v4062_v28 = vperm.slane %v4054_v49, %v8235_v51  ;;  %v4070_v60 = vperm.slane %v4064_v21, %v8235_v51  ;;  %v4081_v9 = vrot.slane %v4074_v20, 4  ;;  %v3997_v39 = vrot.slane %v3978_v24, 4 }
 0xac3   :  { %v3900_v36 = vpop.permute.xlu0 %3899  ;;  %v4052_v23 = vsel %vm556_vm9, %v4051_v7, %v4034_v4  ;;  %v10303_v4 = vsel %vm556_vm9, 0.0, %v4245_v17  ;;  %v4249_v50 = vrot.slane %v4242_v53, 4  ;;  %v4521_v8 = vsel %vm556_vm9, %v4245_v17, %v4226_v52 }
 0xac4   :  { %v3983_v27 = vrot.slane %v3900_v36, 4  ;;  %v3986_v62 = vsel %vm556_vm9, %v3900_v36, %v3985_v1  ;;  %v4079_v13 = vrot.slane %v4070_v60, 4  ;;  %v4082_v25 = vsel %vm556_vm9, 0.0, %v4081_v9  ;;  %v3880_v55 = vpop.permute.xlu1 %3879 }
 0xac5   :  { %v4058_v41 = vperm.slane %v4052_v23, %v8235_v51  ;;  %v4009_v1 = vrot.slane %v3982_v37, 4  ;;  %v3994_v3 = vperm.slane %v3986_v62, %v8226_v12  ;;  %v4526_v48 = vrot.slane %v10303_v4, 4 }
 0xac6   :  { %v3984_v10 = vsel %vm556_vm9, %v3983_v27, %v10197_v14  ;;  %v4077_v14 = vrot.slane %v4062_v28, 4  ;;  %v4375_v45 = vrot.slane %v4082_v25, 4  ;;  %v4080_v7 = vsel %vm556_vm9, 0.0, %v4079_v13 }
 0xac7   :  { %v3990_v59 = vperm.slane %v3984_v10, %v8226_v12  ;;  %v4007_v22 = vrot.slane %v3994_v3, 4  ;;  %v4010_v19 = vsel %vm556_vm9, %v3994_v3, %v4009_v1  ;;  %v10318_v34 = vsel %vm556_vm9, 0.0, %v4243_v18 }
 0xac8   :  { %v4247_v20 = vrot.slane %v10307_v2, 4  ;;  %v4075_v15 = vrot.slane %v4058_v41, 4  ;;  %v4018_v36 = vperm.slane %v4010_v19, %v8235_v51  ;;  %v4078_v17 = vsel %vm556_vm9, 0.0, %v4077_v14 }
 0xac9   :  { %v3998_v49 = vsel %vm556_vm9, %v3990_v59, %v3997_v39  ;;  %v3995_v28 = vrot.slane %v3990_v59, 4  ;;  %v4008_v21 = vsel %vm556_vm9, %v4007_v22, %v3982_v37  ;;  %v3915_v27 = vrot.slane %v3880_v55, 4 }
 0xaca   :  { %v4376_v23 = vsel %vm556_vm9, %v4375_v45, %v4080_v7  ;;  %v4006_v53 = vperm.slane %v3998_v49, %v8235_v51  ;;  %v4014_v10 = vperm.slane %v4008_v21, %v8235_v51  ;;  %v4025_v62 = vrot.slane %v4018_v36, 4 }
 0xacb   :  { %v3898_v52 = vpop.permute.xlu0 %3897  ;;  %v10328_v13 = vsel %vm556_vm9, 0.0, %v4249_v50  ;;  %v10331_v25 = vperm.slane %v4521_v8, %v8226_v12  ;;  %v10335_v18 = vsel %vm556_vm9, %v4249_v50, %v10307_v2  ;;  %v4364_v37 = vrot.slane %v4078_v17, 4 }
 0xacc   :  { %v3927_v59 = vrot.slane %v3898_v52, 4  ;;  %v4023_v39 = vrot.slane %v4014_v10, 4  ;;  %v4026_v1 = vsel %vm556_vm9, 0.0, %v4025_v62  ;;  %v3918_v3 = vsel %vm556_vm9, %v3880_v55, %v3917_v54 }
 0xacd   :  { %v4370_v45 = vsel %vm556_vm9, %v4081_v9, %v4070_v60  ;;  %v10343_v7 = vperm.slane %v4376_v23, %v8226_v12  ;;  %v3996_v8 = vsel %vm556_vm9, %v3995_v28, %v3978_v24  ;;  %v3916_v50 = vsel %vm556_vm9, %v3915_v27, %v10156_v16 }
 0xace   :  { %v4537_v49 = vrot.slane %v10328_v13, 4  ;;  %v4021_v22 = vrot.slane %v4006_v53, 4  ;;  %v3930_v19 = vsel %vm556_vm9, %v3898_v52, %v3929_v47  ;;  %v4076_v36 = vsel %vm556_vm9, 0.0, %v4075_v15 }
 0xacf   :  { %v4321_v54 = vrot.slane %v4026_v1, 4  ;;  %v10354_v60 = vperm.slane %v3918_v3, %v8226_v12  ;;  %v3928_v9 = vsel %vm556_vm9, %v3927_v59, %v10250_v43  ;;  %v4413_v16 = vsel %vm556_vm9, %v10201_v35, %v10195_v40 }
 0xad0   :  { %v10362_v24 = vperm.slane %v4370_v45, %v8226_v12  ;;  %v4002_v55 = vperm.slane %v3996_v8, %v8235_v51  ;;  %v4024_v47 = vsel %vm556_vm9, 0.0, %v4023_v39  ;;  %v10367_v15 = vperm.slane %v3916_v50, %v8226_v12 }
 0xad1   :  { %v10370_v52 = vperm.slane %v3930_v19, %v8226_v12  ;;  %v4359_v17 = vsel %vm556_vm9, %v4077_v14, %v4058_v41  ;;  %v4365_v43 = vsel %vm556_vm9, %v4364_v37, %v4076_v36  ;;  %v4393_v28 = vrot.slane %v10343_v7, 4 }
 0xad2   :  { %v4022_v40 = vsel %vm556_vm9, 0.0, %v4021_v22  ;;  %v4316_v35 = vsel %vm556_vm9, %v4025_v62, %v4014_v10  ;;  %v10378_v21 = vperm.slane %v3928_v9, %v8226_v12  ;;  %v10381_v27 = vperm.slane %v4365_v43, %v8226_v12 }
 0xad3   :  { %v4322_v23 = vsel %vm556_vm9, %v4321_v54, %v4024_v47  ;;  %v3953_v53 = vrot.slane %v10354_v60, 4  ;;  %v4394_v41 = vsel %vm556_vm9, %v4393_v28, %v10362_v24  ;;  %v4419_v14 = vsel %vm556_vm9, %v4418_v31, %v10231_v58 }
 0xad4   :  { %v4019_v59 = vrot.slane %v4002_v55, 4  ;;  %v3941_v10 = vrot.slane %v10367_v15, 4  ;;  %v10393_v62 = vperm.slane %v4359_v17, %v8226_v12  ;;  %v4381_v37 = vrot.slane %v10381_v27, 4 }
 0xad5   :  { %v4310_v39 = vrot.slane %v4022_v40, 4  ;;  %v10397_v1 = vperm.slane %v4316_v35, %v8226_v12  ;;  %v3951_v3 = vrot.slane %v10370_v52, 4  ;;  %v3954_v45 = vsel %vm556_vm9, %v10370_v52, %v3953_v53 }
 0xad6   :  { %v10403_v33 = vperm.slane %v4322_v23, %v8226_v12  ;;  %v3939_v58 = vrot.slane %v10378_v21, 4  ;;  %v4382_v31 = vsel %vm556_vm9, %v4381_v37, %v10393_v62  ;;  %v4400_v8 = vperm.slane %v4394_v41, %v8235_v51 }
 0xad7   :  { %v10411_v50 = vsel %vm556_vm9, %v10378_v21, %v3941_v10  ;;  %v4388_v19 = vperm.slane %v4382_v31, %v8235_v51  ;;  %v10415_v36 = vperm.slane %v4419_v14, %v8226_v12  ;;  %v4447_v54 = vrot.slane %v10245_v11, 4 }
 0xad8   :  { %v4405_v9 = vrot.slane %v4400_v8, 4  ;;  %v10419_v47 = vperm.slane %v4413_v16, %v8226_v12  ;;  %v4020_v52 = vsel %vm556_vm9, 0.0, %v4019_v59  ;;  %v4305_v17 = vsel %vm556_vm9, %v4021_v22, %v4002_v55 }
 0xad9   :  { %v4407_v43 = vrot.slane %v4388_v19, 4  ;;  %v4435_v28 = vrot.slane %v10415_v36, 4  ;;  %v4448_v40 = vsel %vm556_vm9, %v4447_v54, %v10234_v30  ;;  %v10427_v35 = vperm.slane %v4305_v17, %v8226_v12 }
 0xada   :  { %v10430_v21 = vsel %vm556_vm9, %v4405_v9, %v4388_v19  ;;  %v10433_v23 = vperm.slane %v4448_v40, %v8235_v51  ;;  %v4311_v16 = vsel %vm556_vm9, %v4310_v39, %v4020_v52  ;;  %v4339_v53 = vrot.slane %v10403_v33, 4 }
 0xadb   :  { %4585 = vrot.lane.b32.xlu1 %v10430_v21, %s7836_s8  ;;  %v10440_v22 = vsel %vm556_vm9, %v4400_v8, %v4407_v43  ;;  %v4436_v55 = vsel %vm556_vm9, %v4435_v28, %v10419_v47  ;;  %v10445_v41 = vperm.slane %v4311_v16, %v8226_v12  ;;  %v4467_v14 = vsel %vm556_vm9, %v10228_v5, %v10248_v6 }
 0xadc   :  { %4662 = vrot.lane.b32.xlu2 %v10440_v22, %s7836_s8  ;;  %v4442_v59 = vperm.slane %v4436_v55, %v8235_v51  ;;  %v4459_v10 = vrot.slane %v10433_v23, 4  ;;  %v4340_v37 = vsel %vm556_vm9, %v4339_v53, %v10397_v1  ;;  %v4471_v39 = vperm.slane %v4467_v14, %v8226_v12 }
 0xadd   :  { %v4327_v31 = vrot.slane %v10445_v41, 4  ;;  %v10459_v8 = vperm.slane %v4340_v37, %v8235_v51  ;;  %v4473_v5 = vsel %vm556_vm9, %v4472_v63, %v10300_v0  ;;  %v4482_v6 = vperm.slane %v10262_v32, %v8226_v12 }
 0xade   :  { %v3962_v19 = vperm.slane %v3954_v45, %v8235_v51  ;;  %v4477_v54 = vperm.slane %v4473_v5, %v8226_v12  ;;  %v4488_v9 = vperm.slane %v10293_v29, %v8226_v12  ;;  %v4491_v52 = vrot.slane %v4471_v39, 4 }
 0xadf   :  { %v3950_v17 = vperm.slane %v10411_v50, %v8235_v51  ;;  %v4328_v43 = vsel %vm556_vm9, %v4327_v31, %v10427_v35  ;;  %v4351_v46 = vrot.slane %v10459_v8, 4  ;;  %v4503_v63 = vrot.slane %v4482_v6, 4 }
 0xae0   :  { %v3952_v32 = vsel %vm556_vm9, %v3951_v3, %v10354_v60  ;;  %v10479_v0 = vperm.slane %v4328_v43, %v8235_v51  ;;  %v4489_v45 = vrot.slane %v4477_v54, 4  ;;  %v4501_v28 = vrot.slane %v4488_v9, 4 }
 0xae1   :  { %v10482_v29 = vsel %vm556_vm9, %v4459_v10, %v4442_v59  ;;  %v4492_v40 = vsel %vm556_vm9, %v4477_v54, %v4491_v52  ;;  %v4504_v50 = vsel %vm556_vm9, %v4488_v9, %v4503_v63  ;;  %v4248_v16 = vsel %vm556_vm9, 0.0, %v4247_v20 }
 0xae2   :  { %v10491_v53 = vsel %vm556_vm9, %v4351_v46, %v10479_v0  ;;  %v4490_v60 = vsel %vm556_vm9, %v4489_v45, %v4471_v39  ;;  %v4502_v3 = vsel %vm556_vm9, %v4501_v28, %v4482_v6  ;;  %v10496_v55 = vperm.slane %v4504_v50, %v8235_v51 }
 0xae3   :  { %v3940_v14 = vsel %vm556_vm9, %v3939_v58, %v10367_v15  ;;  %v3958_v10 = vperm.slane %v3952_v32, %v8235_v51  ;;  %v3969_v37 = vrot.slane %v3962_v19, 4  ;;  %4587 = vrot.lane.b32.xlu1 %v10482_v29, %s7836_s8  ;;  %4583 = vrot.lane.b32.xlu0 %v10491_v53, %s7836_s8  ;;  %v4496_v2 = vperm.slane %v4490_v60, %v8235_v51 }
 0xae4   :  { %v10507_v20 = vperm.slane %v4492_v40, %v8235_v51  ;;  %v4461_v39 = vrot.slane %v4442_v59, 4  ;;  %v4527_v15 = vsel %vm556_vm9, %v4526_v48, %v10318_v34  ;;  %v4536_v58 = vperm.slane %v10335_v18, %v8226_v12 }
 0xae5   :  { %v4508_v31 = vperm.slane %v4502_v3, %v8235_v51  ;;  %v4515_v5 = vrot.slane %v4496_v2, 4  ;;  %v4531_v6 = vperm.slane %v4527_v15, %v8226_v12  ;;  %v4538_v19 = vsel %vm556_vm9, %v4537_v49, %v4248_v16 }
 0xae6   :  { %v4517_v54 = vrot.slane %v10496_v55, 4  ;;  %v4542_v59 = vperm.slane %v4538_v19, %v8226_v12  ;;  %v4545_v4 = vrot.slane %v10331_v25, 4  ;;  %v4557_v9 = vrot.slane %v4536_v58, 4 }
 0xae7   :  { %v10524_v48 = vsel %vm556_vm9, %v4508_v31, %v4515_v5  ;;  %v4543_v34 = vrot.slane %v4531_v6, 4  ;;  %v3946_v18 = vperm.slane %v3940_v14, %v8235_v51  ;;  %v3965_v52 = vrot.slane %v3950_v17, 4 }
 0xae8   :  { %4666 = vrot.lane.b32.xlu2 %v10524_v48, %s7836_s8  ;;  %v4558_v13 = vsel %vm556_vm9, %v4542_v59, %v4557_v9  ;;  %v4555_v49 = vrot.slane %v4542_v59, 4  ;;  %v3967_v43 = vrot.slane %v3958_v10, 4  ;;  %v3970_v46 = vsel %vm556_vm9, 0.0, %v3969_v37 }
 0xae9   :  { %v4566_v63 = vperm.slane %v4558_v13, %v8235_v51  ;;  %v4544_v32 = vsel %vm556_vm9, %v4543_v34, %v10331_v25  ;;  %v10536_v45 = vsel %vm556_vm9, %v4517_v54, %v10507_v20  ;;  %v10540_v17 = vsel %vm556_vm9, %v10433_v23, %v4461_v39 }
 0xaea   :  { %v4546_v28 = vsel %vm556_vm9, %v4531_v6, %v4545_v4  ;;  %v4550_v40 = vperm.slane %v4544_v32, %v8235_v51  ;;  %v4556_v25 = vsel %vm556_vm9, %v4555_v49, %v4536_v58  ;;  %v3963_v16 = vrot.slane %v3946_v18, 4 }
 0xaeb   :  { %4743 = vrot.lane.b32.xlu1 %v10536_v45, %s7836_s8  ;;  %4664 = vrot.lane.b32.xlu0 %v10540_v17, %s7836_s8  ;;  %v4571_v50 = vrot.slane %v4566_v63, 4  ;;  %v3966_v60 = vsel %vm556_vm9, 0.0, %v3965_v52  ;;  %v4267_v3 = vrot.slane %v3970_v46, 4  ;;  %v4554_v23 = vperm.slane %v4546_v28, %v8235_v51 }
 0xaec   :  { %v3968_v14 = vsel %vm556_vm9, 0.0, %v3967_v43  ;;  %v4562_v39 = vperm.slane %v4556_v25, %v8235_v51  ;;  %v4569_v15 = vrot.slane %v4550_v40, 4  ;;  %v4513_v5 = vrot.slane %v4508_v31, 4 }
 0xaed   :  { %v10554_v6 = vsel %vm556_vm9, %v4571_v50, %v4554_v23  ;;  %v4256_v19 = vrot.slane %v3966_v60, 4  ;;  %v4268_v58 = vsel %vm556_vm9, %v4267_v3, %v3968_v14  ;;  %v3964_v54 = vsel %vm556_vm9, 0.0, %v3963_v16 }
 0xaee   :  { %v10561_v59 = vsel %vm556_vm9, %v4562_v39, %v4569_v15  ;;  %v10564_v4 = vsel %vm556_vm9, %v4513_v5, %v4496_v2  ;;  %v4567_v31 = vrot.slane %v4562_v39, 4  ;;  %v4437_v9 = vrot.slane %v10419_v47, 4 }
 0xaef   :  { %v4449_v34 = vrot.slane %v10234_v30, 4  ;;  %v4272_v13 = vperm.slane %v4268_v58, %v8226_v12  ;;  %v4257_v49 = vsel %vm556_vm9, %v4256_v19, %v3964_v54  ;;  %v4353_v43 = vrot.slane %v10479_v0, 4 }
 0xaf0   :  { %4745 = vrot.lane.b32.xlu2 %v10554_v6, %s7836_s8  ;;  %v4262_v2 = vsel %vm556_vm9, %v3969_v37, %v3958_v10  ;;  %v4573_v46 = vrot.slane %v4554_v23, 4  ;;  %v10577_v32 = vsel %vm556_vm9, %v4567_v31, %v4550_v40  ;;  %v4438_v28 = vsel %vm556_vm9, %v10415_v36, %v4437_v9 }
 0xaf1   :  { %v4450_v47 = vsel %vm556_vm9, %v10245_v11, %v4449_v34  ;;  %v4261_v30 = vperm.slane %v4257_v49, %v8226_v12  ;;  %v4285_v50 = vrot.slane %v4272_v13, 4  ;;  %v4266_v0 = vperm.slane %v4262_v2, %v8226_v12 }
 0xaf2   :  { %v10589_v10 = vsel %vm556_vm9, %v10459_v8, %v4353_v43  ;;  %v10592_v37 = vsel %vm556_vm9, %v4566_v63, %v4573_v46  ;;  %v4446_v36 = vperm.slane %v4438_v28, %v8235_v51  ;;  %v4458_v40 = vperm.slane %v4450_v47, %v8235_v51 }
 0xaf3   :  { %4668 = vrot.lane.b32.xlu1 %v10561_v59, %s7836_s8  ;;  %4589 = vrot.lane.b32.xlu0 %v10564_v4, %s7836_s8  ;;  %v4251_v11 = vsel %vm556_vm9, %v3965_v52, %v3946_v18  ;;  %v4519_v25 = vrot.slane %v10507_v20, 4  ;;  %v4273_v16 = vrot.slane %v4261_v30, 4  ;;  %v4383_v8 = vrot.slane %v10393_v62, 4 }
 0xaf4   :  { %v4286_v63 = vsel %vm556_vm9, %v4285_v50, %v4266_v0  ;;  %v4255_v60 = vperm.slane %v4251_v11, %v8226_v12  ;;  %v4465_v3 = vrot.slane %v4446_v36, 4  ;;  %v4463_v23 = vrot.slane %v4458_v40, 4 }
 0xaf5   :  { %v10607_v18 = vsel %vm556_vm9, %v10496_v55, %v4519_v25  ;;  %v4292_v14 = vperm.slane %v4286_v63, %v8235_v51  ;;  %v4384_v20 = vsel %vm556_vm9, %v10381_v27, %v4383_v8  ;;  %v4395_v62 = vrot.slane %v10362_v24, 4 }
 0xaf6   :  { %v4274_v52 = vsel %vm556_vm9, %v4273_v16, %v4255_v60  ;;  %v10617_v39 = vsel %vm556_vm9, %v4458_v40, %v4465_v3  ;;  %v10620_v15 = vsel %vm556_vm9, %v4463_v23, %v4446_v36  ;;  %v4392_v5 = vperm.slane %v4384_v20, %v8235_v51 }
 0xaf7   :  { %v4280_v55 = vperm.slane %v4274_v52, %v8235_v51  ;;  %v4297_v27 = vrot.slane %v4292_v14, 4  ;;  %v4287_v19 = vrot.slane %v4266_v0, 4  ;;  %v4341_v24 = vrot.slane %v10397_v1, 4 }
 0xaf8   :  { %4591 = vrot.lane.b32.xlu2 %v10577_v32, %s7836_s8  ;;  %v4396_v58 = vsel %vm556_vm9, %v10343_v7, %v4395_v62  ;;  %v4411_v54 = vrot.slane %v4392_v5, 4  ;;  %v4275_v9 = vrot.slane %v4255_v60, 4  ;;  %v4329_v34 = vrot.slane %v10427_v35, 4 }
 0xaf9   :  { %v4299_v31 = vrot.slane %v4280_v55, 4  ;;  %v10633_v49 = vsel %vm556_vm9, %v4297_v27, %v4280_v55  ;;  %v4404_v43 = vperm.slane %v4396_v58, %v8235_v51  ;;  %v4288_v2 = vsel %vm556_vm9, %v4272_v13, %v4287_v19 }
 0xafa   :  { %v4342_v46 = vsel %vm556_vm9, %v10403_v33, %v4341_v24  ;;  %v4296_v35 = vperm.slane %v4288_v2, %v8235_v51  ;;  %v4276_v13 = vsel %vm556_vm9, %v4261_v30, %v4275_v9  ;;  %v4330_v47 = vsel %vm556_vm9, %v10445_v41, %v4329_v34 }
 0xafb   :  { %4660 = vrot.lane.b32.xlu1 %v10589_v10, %s7836_s8  ;;  %4822 = vrot.lane.b32.xlu0 %v10592_v37, %s7836_s8  ;;  %v10642_v7 = vsel %vm556_vm9, %v4404_v43, %v4411_v54  ;;  %v10645_v1 = vsel %vm556_vm9, %v4292_v14, %v4299_v31  ;;  %v4350_v28 = vperm.slane %v4342_v46, %v8235_v51  ;;  %v4409_v33 = vrot.slane %v4404_v43, 4 }
 0xafc   :  { %v4284_v50 = vperm.slane %v4276_v13, %v8235_v51  ;;  %v4301_v0 = vrot.slane %v4296_v35, 4  ;;  %v4338_v36 = vperm.slane %v4330_v47, %v8235_v51  ;;  %v7409_v63 = vpack.i.bf16 %v10554_v6, %v10524_v48 }
 0xafd   :  { %v4355_v40 = vrot.slane %v4350_v28, 4  ;;  %v10659_v11 = vsel %vm556_vm9, %v4409_v33, %v4392_v5  ;;  %v7404_v3 = vpack.i.bf16 %v10564_v4, %v10577_v32  ;;  %v7424_v23 = vpack.i.bf16 %v10440_v22, %v10491_v53 }
 0xafe   :  { %v10664_v25 = vsel %vm556_vm9, %v4301_v0, %v4284_v50  ;;  %v4357_v41 = vrot.slane %v4338_v36, 4  ;;  %v4303_v16 = vrot.slane %v4284_v50, 4  ;;  %v7414_v52 = vpack.i.bf16 %v10540_v17, %v10430_v21 }
 0xaff   :  { %v10667_v30 = vsel %vm556_vm9, %v4355_v40, %v4338_v36  ;;  %v7419_v14 = vpack.i.bf16 %v10592_v37, %v10536_v45  ;;  %v7429_v20 = vpack.i.bf16 %v10607_v18, %v10620_v15  ;;  %v7434_v62 = vpack.i.bf16 %v10482_v29, %v10561_v59 }
 0xb00   :  { %4820 = vrot.lane.b32.xlu2 %v10607_v18, %s7836_s8  ;;  %v10674_v8 = vsel %vm556_vm9, %v4350_v28, %v4357_v41  ;;  %v10681_v60 = vsel %vm556_vm9, %v4296_v35, %v4303_v16 }
 0xb03   :  { %4818 = vrot.lane.b32.xlu1 %v10617_v39, %s7836_s8  ;;  %4741 = vrot.lane.b32.xlu0 %v10620_v15, %s7836_s8 }
 0xb08   :  { %4581 = vrot.lane.b32.xlu2 %v10633_v49, %s7836_s8 }
 0xb0b   :  { %4816 = vrot.lane.b32.xlu1 %v10642_v7, %s7836_s8  ;;  %4658 = vrot.lane.b32.xlu0 %v10645_v1, %s7836_s8 }
 0xb10   :  { %4739 = vrot.lane.b32.xlu2 %v10659_v11, %s7836_s8 }
 0xb13   :  { %4735 = vrot.lane.b32.xlu1 %v10664_v25, %s7836_s8  ;;  %4737 = vrot.lane.b32.xlu0 %v10667_v30, %s7836_s8 }
 0xb18   :  { %4814 = vrot.lane.b32.xlu2 %v10674_v8, %s7836_s8 }
 0xb1b   :  { %7410 = vrot.lane.b32.xlu1 %v7409_v63, %s7837_s9  ;;  %4812 = vrot.lane.b32.xlu0 %v10681_v60, %s7836_s8 }
 0xb20   :  { %7405 = vrot.lane.b32.xlu2 %v7404_v3, %s7837_s9 }
 0xb23   :  { %7425 = vrot.lane.b32.xlu1 %v7424_v23, %s7837_s9  ;;  %7415 = vrot.lane.b32.xlu0 %v7414_v52, %s7837_s9 }
 0xb2b   :  { %7430 = vrot.lane.b32.xlu1 %v7429_v20, %s7837_s9  ;;  %7420 = vrot.lane.b32.xlu0 %v7419_v14, %s7837_s9 }
 0xb33   :  { %7435 = vrot.lane.b32.xlu0 %v7434_v62, %s7837_s9 }
 0xb36   :  { %v4663_v55 = vpop.permute.xlu2 %4662 }
 0xb42   :  { %v4667_v5 = vpop.permute.xlu2 %4666 }
 0xb4a   :  { %v4746_v27 = vpop.permute.xlu2 %4745 }
 0xb4b   :  { %7214 = vmatpush.xpose.msk.msra.mxu1 %vm1234_vm10, %v4746_v27 }
 0xb4d   :  { %v4586_v19 = vpop.permute.xlu1 %4585 }
 0xb52   :  { %v4592_v24 = vpop.permute.xlu2 %4591 }
 0xb53   :  { %7190 = vmatpush.xpose.msk.msra.mxu2 %vm1234_vm10, %v4592_v24 }
 0xb55   :  { %v4584_v58 = vpop.permute.xlu0 %4583  ;;  %v4588_v54 = vpop.permute.xlu1 %4587 }
 0xb5a   :  { %v4821_v31 = vpop.permute.xlu2 %4820 }
 0xb5d   :  { %v4665_v9 = vpop.permute.xlu0 %4664  ;;  %v4744_v34 = vpop.permute.xlu1 %4743 }
 0xb5e   :  { %7215 = vmatpush.xpose.msk.msra.mxu1 %vm1234_vm10, %v4744_v34 }
 0xb62   :  { %v4582_v43 = vpop.permute.xlu2 %4581 }
 0xb65   :  { %v4590_v2 = vpop.permute.xlu0 %4589  ;;  %v4669_v46 = vpop.permute.xlu1 %4668 }
 0xb66   :  { %7191 = vmatpush.xpose.msk.msra.mxu2 %vm1234_vm10, %v4590_v2  ;;  %7202 = vmatpush.xpose.msk.msra.mxu3 %vm1234_vm10, %v4669_v46  ;;  %v7799_v2 = vld [vmem:[%s11923_s5 + $0x8] sm:$0xff] }
 0xb6a   :  { %v4740_v35 = vpop.permute.xlu2 %4739  ;;  %7192 = vmatpush.xpose.msk.msra.mxu2 %vm1234_vm10, %v4588_v54  ;;  %7203 = vmatpush.xpose.msk.msra.mxu3 %vm1234_vm10, %v4667_v5 }
 0xb6d   :  { %v4823_v28 = vpop.permute.xlu0 %4822  ;;  %v4661_v33 = vpop.permute.xlu1 %4660 }
 0xb6e   :  { %7193 = vmatpush.xpose.msk.msra.mxu2 %vm1234_vm10, %v4586_v19  ;;  %7204 = vmatpush.xpose.msk.msra.mxu3 %vm1234_vm10, %v4665_v9 }
 0xb6f   :  { %7226 = vmatpush.xpose.msk.msrb.mxu0 %vm1234_vm10, %v4823_v28 }
 0xb72   :  { %v4815_v13 = vpop.permute.xlu2 %4814  ;;  %7194 = vmatpush.xpose.msk.msra.mxu2 %vm1234_vm10, %v4584_v58  ;;  %7205 = vmatpush.xpose.msk.msra.mxu3 %vm1234_vm10, %v4663_v55 }
 0xb73   :  { %7227 = vmatpush.xpose.msk.msrb.mxu0 %vm1234_vm10, %v4821_v31 }
 0xb75   :  { %v4742_v47 = vpop.permute.xlu0 %4741  ;;  %v4819_v50 = vpop.permute.xlu1 %4818 }
 0xb76   :  { %7195 = vmatpush.xpose.msk.msra.mxu2 %vm1234_vm10, %v4582_v43  ;;  %7206 = vmatpush.xpose.msk.msra.mxu3 %vm1234_vm10, %v4661_v33 }
 0xb77   :  { %7216 = vmatpush.xpose.msk.msra.mxu1 %vm1234_vm10, %v4742_v47  ;;  %7228 = vmatpush.xpose.msk.msrb.mxu0 %vm1234_vm10, %v4819_v50 }
 0xb79   :  { %7196 = vmatmul.msk.f32.vlgmr.msra.gmra.mxu2 %vm1234_vm10, %v10633_v49 }
 0xb7a   :  { %v7406_v0 = vpop.permute.xlu2 %7405 }
 0xb7b   :  { %v7407_v36 = vunpack.i.l.bf16 %v7406_v0  ;;  %7217 = vmatpush.xpose.msk.msra.mxu1 %vm1234_vm10, %v4740_v35  ;;  %v7408_v40 = vunpack.i.h.bf16 %v7406_v0 }
 0xb7d   :  { %5505 = vmatpush.msrb.mxu2 %v7407_v36  ;;  %v4659_v41 = vpop.permute.xlu0 %4658  ;;  %v4817_v16 = vpop.permute.xlu1 %4816 }
 0xb7e   :  { %7207 = vmatpush.xpose.msk.msra.mxu3 %vm1234_vm10, %v4659_v41  ;;  %7229 = vmatpush.xpose.msk.msrb.mxu0 %vm1234_vm10, %v4817_v16 }
 0xb7f   :  { %5506 = vmatpush.msrb.mxu2 %v7408_v40 }
 0xb81   :  { %7197 = vmatmul.msk.f32.gmra.mxu2 %vm1234_vm10, %v10491_v53  ;;  %7208 = vmatmul.msk.f32.vlgmr.msra.gmra.mxu3 %vm1234_vm10, %v10645_v1 }
 0xb82   :  { %7230 = vmatpush.xpose.msk.msrb.mxu0 %vm1234_vm10, %v4815_v13 }
 0xb85   :  { %v4738_v63 = vpop.permute.xlu0 %4737  ;;  %v4736_v3 = vpop.permute.xlu1 %4735 }
 0xb86   :  { %7218 = vmatpush.xpose.msk.msra.mxu1 %vm1234_vm10, %v4738_v63 }
 0xb89   :  { %7198 = vmatmul.msk.f32.gmra.mxu2 %vm1234_vm10, %v10430_v21  ;;  %7209 = vmatmul.msk.f32.gmra.mxu3 %vm1234_vm10, %v10589_v10 }
 0xb8a   :  { %7219 = vmatpush.xpose.msk.msra.mxu1 %vm1234_vm10, %v4736_v3  ;;  %v7800_v3 = vld [vmem:[%s11923_s5 + $0x10] sm:$0xff] }
 0xb8d   :  { %v4813_v23 = vpop.permute.xlu0 %4812  ;;  %7220 = vmatmul.msk.f32.vlgmr.msra.gmra.mxu1 %vm1234_vm10, %v10664_v25  ;;  %v7411_v53 = vpop.permute.xlu1 %7410 }
 0xb8e   :  { %v7413_v52 = vunpack.i.h.bf16 %v7411_v53  ;;  %7231 = vmatpush.xpose.msk.msrb.mxu0 %vm1234_vm10, %v4813_v23  ;;  %v7412_v24 = vunpack.i.l.bf16 %v7411_v53 }
 0xb90   :  { %5647 = vmatpush.msrb.mxu1 %v7413_v52 }
 0xb91   :  { %7199 = vmatmul.msk.f32.gmra.mxu2 %vm1234_vm10, %v10482_v29  ;;  %7210 = vmatmul.msk.f32.gmra.mxu3 %vm1234_vm10, %v10440_v22 }
 0xb92   :  { %7232 = vmatmul.msk.f32.vlgmr.msrb.gmra.mxu0 %vm1234_vm10, %v10681_v60 }
 0xb95   :  { %v7416_v21 = vpop.permute.xlu0 %7415  ;;  %7221 = vmatmul.msk.f32.gmra.mxu1 %vm1234_vm10, %v10667_v30  ;;  %v7426_v14 = vpop.permute.xlu1 %7425 }
 0xb96   :  { %v7417_v19 = vunpack.i.l.bf16 %v7416_v21  ;;  %v7428_v58 = vunpack.i.h.bf16 %v7426_v14 }
 0xb99   :  { %7200 = vmatmul.msk.f32.gmra.mxu2 %vm1234_vm10, %v10564_v4  ;;  %7211 = vmatmul.msk.f32.gmra.mxu3 %vm1234_vm10, %v10540_v17 }
 0xb9a   :  { %7233 = vmatmul.msk.f32.gmra.mxu0 %vm1234_vm10, %v10674_v8 }
 0xb9d   :  { %v7421_v29 = vpop.permute.xlu0 %7420  ;;  %7222 = vmatmul.msk.f32.gmra.mxu1 %vm1234_vm10, %v10659_v11  ;;  %v7431_v22 = vpop.permute.xlu1 %7430 }
 0xb9e   :  { %v7423_v20 = vunpack.i.h.bf16 %v7421_v29  ;;  %v7422_v62 = vunpack.i.l.bf16 %v7421_v29  ;;  %v7432_v55 = vunpack.i.l.bf16 %v7431_v22  ;;  %v7433_v5 = vunpack.i.h.bf16 %v7431_v22 }
 0xba0   :  { %5648 = vmatpush.msrb.mxu1 %v7422_v62  ;;  %5718 = vmatpush.msra.mxu0 %v7423_v20 }
 0xba1   :  { %7201 = vmatmul.msk.f32.gmra.mxu2 %vm1234_vm10, %v10577_v32  ;;  %7212 = vmatmul.msk.f32.gmra.mxu3 %vm1234_vm10, %v10524_v48  ;;  %v7427_v32 = vunpack.i.l.bf16 %v7426_v14  ;;  %v7418_v48 = vunpack.i.h.bf16 %v7416_v21 }
 0xba2   :  { %7234 = vmatmul.msk.f32.gmra.mxu0 %vm1234_vm10, %v10642_v7  ;;  %5649 = vmatpush.msrb.mxu1 %v7432_v55 }
 0xba3   :  { %5719 = vmatpush.msra.mxu0 %v7433_v5 }
 0xba5   :  { %v7436_v17 = vpop.permute.xlu0 %7435  ;;  %7223 = vmatmul.msk.f32.gmra.mxu1 %vm1234_vm10, %v10620_v15  ;;  %v7798_v15 = vld [vmem:[%s11923_s5] sm:$0xff] }
 0xba6   :  { %v7438_v4 = vunpack.i.h.bf16 %v7436_v17  ;;  %v7437_v27 = vunpack.i.l.bf16 %v7436_v17 }
 0xba8   :  { %5507 = vmatpush.msrb.mxu2 %v7438_v4  ;;  %5576 = vmatpush.msrb.mxu3 %v7437_v27 }
 0xba9   :  { %7213 = vmatmul.msk.f32.gmra.mxu3 %vm1234_vm10, %v10561_v59 }
 0xbaa   :  { %7235 = vmatmul.msk.f32.gmra.mxu0 %vm1234_vm10, %v10617_v39  ;;  %5508 = vmatpush.msrb.mxu2 %v7417_v19 }
 0xbab   :  { %5577 = vmatpush.msrb.mxu3 %v7412_v24  ;;  %v7801_v24 = vld [vmem:[%s11923_s5 + $0x18] sm:$0xff] }
 0xbac   :  { %5509 = vmatpush.msrb.mxu2 %v7427_v32 }
 0xbad   :  { %5578 = vmatpush.msrb.mxu3 %v7418_v48  ;;  %7224 = vmatmul.msk.f32.gmra.mxu1 %vm1234_vm10, %v10536_v45 }
 0xbaf   :  { %5579 = vmatpush.msrb.mxu3 %v7428_v58 }
 0xbb2   :  { %7236 = vmatmul.msk.f32.gmra.mxu0 %vm1234_vm10, %v10607_v18 }
 0xbb5   :  { %7225 = vmatmul.msk.f32.gmra.mxu1 %vm1234_vm10, %v10554_v6 }
 0xbba   :  { %7237 = vmatmul.msk.f32.gmra.mxu0 %vm1234_vm10, %v10592_v37 }
 0xbfc   :  { %v4634_v34 = vpop.f32.mrf.mxu2 }
 0xbfd   :  { %v10798_v33 = vadd.f32 %v7798_v15, %v4634_v34  ;;  %v7439_v34 = vpack.i.bf16 %v10589_v10, %v10633_v49 }
 0xbff   :  { %v4883_v40 = vsel %vm1525_vm11, %v10798_v33, -inf }
 0xc04   :  { %v4711_v59 = vpop.f32.mrf.mxu3  ;;  %v4637_v0 = vpop.f32.mrf.mxu2 }
 0xc05   :  { %v10779_v54 = vadd.f32 %v7798_v15, %v4711_v59  ;;  %v10806_v41 = vadd.f32 %v7799_v2, %v4637_v0 }
 0xc07   :  { %v4901_v45 = vsel %vm1525_vm11, %v10779_v54, -inf  ;;  %v4886_v52 = vsel %vm1525_vm11, %v10806_v41, -inf }
 0xc08   :  { %4902 = vmax.xlane.f32.xlu1 %v4901_v45 }
 0xc0a   :  { %v4788_v31 = vpop.f32.mrf.mxu1 }
 0xc0b   :  { %v10783_v9 = vadd.f32 %v7798_v15, %v4788_v31 }
 0xc0c   :  { %v4714_v18 = vpop.f32.mrf.mxu3  ;;  %v4640_v22 = vpop.f32.mrf.mxu2 }
 0xc0d   :  { %v4919_v6 = vsel %vm1525_vm11, %v10783_v9, -inf  ;;  %v10792_v46 = vadd.f32 %v7799_v2, %v4714_v18  ;;  %v10825_v55 = vadd.f32 %v7800_v3, %v4640_v22  ;;  %v7444_v18 = vpack.i.bf16 %v10617_v39, %v10659_v11 }
 0xc0e   :  { %4920 = vmax.xlane.f32.xlu0 %v4919_v6  ;;  %v7449_v6 = vpack.i.bf16 %v10667_v30, %v10645_v1 }
 0xc0f   :  { %v4865_v37 = vpop.f32.mrf.mxu0  ;;  %v4904_v28 = vsel %vm1525_vm11, %v10792_v46, -inf  ;;  %v4889_v27 = vsel %vm1525_vm11, %v10825_v55, -inf }
 0xc10   :  { %v10787_v43 = vadd.f32 %v7798_v15, %v4865_v37  ;;  %v7454_v37 = vpack.i.bf16 %v10664_v25, %v10642_v7 }
 0xc12   :  { %v4937_v35 = vsel %vm1525_vm11, %v10787_v43, -inf  ;;  %v4791_v47 = vpop.f32.mrf.mxu1 }
 0xc13   :  { %4938 = vmax.xlane.f32.xlu2 %v4937_v35  ;;  %v10808_v16 = vadd.f32 %v7799_v2, %v4791_v47 }
 0xc14   :  { %v4717_v29 = vpop.f32.mrf.mxu3  ;;  %v4643_v59 = vpop.f32.mrf.mxu2 }
 0xc15   :  { %v4922_v21 = vsel %vm1525_vm11, %v10808_v16, -inf  ;;  %v10821_v20 = vadd.f32 %v7800_v3, %v4717_v29  ;;  %v10844_v45 = vadd.f32 %v7801_v24, %v4643_v59 }
 0xc16   :  { %4905 = vmax.xlane.f32.xlu0 %v4904_v28 }
 0xc17   :  { %v4868_v13 = vpop.f32.mrf.mxu0  ;;  %v4907_v17 = vsel %vm1525_vm11, %v10821_v20, -inf  ;;  %v4892_v31 = vsel %vm1525_vm11, %v10844_v45, -inf }
 0xc18   :  { %v10800_v50 = vadd.f32 %v7799_v2, %v4868_v13 }
 0xc1a   :  { %v4940_v36 = vsel %vm1525_vm11, %v10800_v50, -inf  ;;  %v4794_v53 = vpop.f32.mrf.mxu1 }
 0xc1b   :  { %4941 = vmax.xlane.f32.xlu1 %v4940_v36  ;;  %4884 = vmax.xlane.f32.xlu2 %v4883_v40  ;;  %v10823_v62 = vadd.f32 %v7800_v3, %v4794_v53 }
 0xc1c   :  { %v4720_v2 = vpop.f32.mrf.mxu3 }
 0xc1d   :  { %v4925_v5 = vsel %vm1525_vm11, %v10823_v62, -inf  ;;  %v10860_v35 = vadd.f32 %v7801_v24, %v4720_v2 }
 0xc1f   :  { %v4871_v63 = vpop.f32.mrf.mxu0  ;;  %v4910_v1 = vsel %vm1525_vm11, %v10860_v35, -inf }
 0xc20   :  { %v10813_v23 = vadd.f32 %v7800_v3, %v4871_v63 }
 0xc22   :  { %v4943_v14 = vsel %vm1525_vm11, %v10813_v23, -inf  ;;  %v4797_v19 = vpop.f32.mrf.mxu1 }
 0xc23   :  { %4887 = vmax.xlane.f32.xlu1 %v4886_v52  ;;  %4923 = vmax.xlane.f32.xlu2 %v4922_v21  ;;  %v10838_v48 = vadd.f32 %v7801_v24, %v4797_v19 }
 0xc24   :  { %4944 = vmax.xlane.f32.xlu0 %v4943_v14 }
 0xc25   :  { %v4928_v15 = vsel %vm1525_vm11, %v10838_v48, -inf }
 0xc27   :  { %v4874_v4 = vpop.f32.mrf.mxu0 }
 0xc28   :  { %v10836_v32 = vadd.f32 %v7801_v24, %v4874_v4 }
 0xc2a   :  { %v4946_v58 = vsel %vm1525_vm11, %v10836_v32, -inf }
 0xc2b   :  { %4926 = vmax.xlane.f32.xlu1 %v4925_v5  ;;  %4908 = vmax.xlane.f32.xlu2 %v4907_v17 }
 0xc2c   :  { %4890 = vmax.xlane.f32.xlu0 %v4889_v27 }
 0xc33   :  { %4947 = vmax.xlane.f32.xlu2 %v4946_v58 }
 0xc34   :  { %4929 = vmax.xlane.f32.xlu0 %v4928_v15 }
 0xc3b   :  { %4893 = vmax.xlane.f32.xlu2 %v4892_v31 }
 0xc44   :  { %7450 = vrot.lane.b32.xlu1 %v7449_v6, %s7837_s9 }
 0xc48   :  { %7445 = vrot.lane.b32.xlu0 %v7444_v18, %s7837_s9 }
 0xc50   :  { %7455 = vrot.lane.b32.xlu0 %v7454_v37, %s7837_s9 }
 0xc53   :  { %7440 = vrot.lane.b32.xlu2 %v7439_v34, %s7837_s9 }
 0xc6e   :  { %4911 = vmax.xlane.f32.xlu1 %v4910_v1 }
 0xc7b   :  { %v4903_v39 = vpop.xlane.xlu1 %4902 }
 0xc7c   :  { %v4961_v11 = vsub.f32 %v10779_v54, %v4903_v39 }
 0xc7e   :  { %v4991_v30 = vmul.f32 1.442695, %v4961_v11 }
 0xc80   :  { %7664 = vpow2.f32 %v4991_v30 }
 0xc81   :  { %v4921_v7 = vpop.xlane.xlu0 %4920 }
 0xc82   :  { %v4967_v25 = vsub.f32 %v10783_v9, %v4921_v7 }
 0xc84   :  { %v5003_v28 = vmul.f32 1.442695, %v4967_v25 }
 0xc86   :  { %v10866_v13 = vpop.eup %7664  ;;  %7666 = vpow2.f32 %v5003_v28  ;;  %v4939_v10 = vpop.xlane.xlu2 %4938 }
 0xc87   :  { %v4973_v49 = vsub.f32 %v10787_v43, %v4939_v10  ;;  %v5045_v47 = vsel %vm1525_vm11, %v10866_v13, 0.0  ;;  %v10913_v10 = vpop.f32.mrf.mxu2 }
 0xc88   :  { %5046 = vadd.xlane.f32.xlu0 %v5045_v47 }
 0xc89   :  { %v5015_v0 = vmul.f32 1.442695, %v4973_v49  ;;  %v4906_v63 = vpop.xlane.xlu0 %4905 }
 0xc8b   :  { %7668 = vpow2.f32 %v5015_v0 }
 0xc8c   :  { %v10871_v36 = vpop.eup %7666 }
 0xc8d   :  { %v5063_v54 = vsel %vm1525_vm11, %v10871_v36, 0.0 }
 0xc8e   :  { %v4885_v40 = vpop.xlane.xlu2 %4884  ;;  %v4942_v9 = vpop.xlane.xlu1 %4941  ;;  %5064 = vadd.xlane.f32.xlu2 %v5063_v54 }
 0xc8f   :  { %v4955_v3 = vsub.f32 %v10798_v33, %v4885_v40  ;;  %v4974_v53 = vsub.f32 %v10800_v50, %v4942_v9  ;;  %v4962_v50 = vsub.f32 %v10792_v46, %v4906_v63 }
 0xc91   :  { %v10877_v43 = vpop.eup %7668  ;;  %v4979_v52 = vmul.f32 1.442695, %v4955_v3  ;;  %v5017_v21 = vmul.f32 1.442695, %v4974_v53  ;;  %v4649_v53 = vpop.f32.mrf.mxu2 }
 0xc92   :  { %v5081_v14 = vsel %vm1525_vm11, %v10877_v43, 0.0 }
 0xc93   :  { %7670 = vpow2.f32 %v4979_v52  ;;  %5082 = vadd.xlane.f32.xlu1 %v5081_v14 }
 0xc94   :  { %7672 = vpow2.f32 %v5017_v21 }
 0xc96   :  { %v4924_v29 = vpop.xlane.xlu2 %4923  ;;  %v4888_v22 = vpop.xlane.xlu1 %4887 }
 0xc97   :  { %v4968_v5 = vsub.f32 %v10808_v16, %v4924_v29  ;;  %v4945_v17 = vpop.xlane.xlu0 %4944  ;;  %v4956_v4 = vsub.f32 %v10806_v41, %v4888_v22  ;;  %v4993_v16 = vmul.f32 1.442695, %v4962_v50 }
 0xc98   :  { %v4975_v39 = vsub.f32 %v10813_v23, %v4945_v17 }
 0xc99   :  { %v10883_v33 = vpop.eup %7670  ;;  %v5005_v27 = vmul.f32 1.442695, %v4968_v5  ;;  %v4981_v19 = vmul.f32 1.442695, %v4956_v4 }
 0xc9a   :  { %v10886_v24 = vpop.eup %7672  ;;  %v5027_v58 = vsel %vm1525_vm11, %v10883_v33, 0.0  ;;  %v5019_v30 = vmul.f32 1.442695, %v4975_v39 }
 0xc9b   :  { %7674 = vpow2.f32 %v5005_v27  ;;  %5028 = vadd.xlane.f32.xlu1 %v5027_v58  ;;  %v5084_v59 = vsel %vm1525_vm11, %v10886_v24, 0.0 }
 0xc9c   :  { %5085 = vadd.xlane.f32.xlu2 %v5084_v59  ;;  %7676 = vpow2.f32 %v4981_v19  ;;  %v4723_v19 = vpop.f32.mrf.mxu3 }
 0xc9d   :  { %7678 = vpow2.f32 %v4993_v16 }
 0xc9e   :  { %v10892_v41 = vpop.xlane.xlu2 %4908  ;;  %v4927_v15 = vpop.xlane.xlu1 %4926 }
 0xc9f   :  { %v4891_v31 = vpop.xlane.xlu0 %4890  ;;  %v4969_v46 = vsub.f32 %v10823_v62, %v4927_v15  ;;  %v4800_v15 = vpop.f32.mrf.mxu1 }
 0xca0   :  { %v4957_v6 = vsub.f32 %v10825_v55, %v4891_v31 }
 0xca1   :  { %v10896_v18 = vpop.eup %7674  ;;  %v5007_v37 = vmul.f32 1.442695, %v4969_v46 }
 0xca2   :  { %v4983_v34 = vmul.f32 1.442695, %v4957_v6  ;;  %v5066_v2 = vsel %vm1525_vm11, %v10896_v18, 0.0  ;;  %v10900_v1 = vpop.eup %7676  ;;  %v7803_v6 = vld [vmem:[%s11923_s5 + $0x20] sm:$0xff] }
 0xca3   :  { %5067 = vadd.xlane.f32.xlu1 %v5066_v2  ;;  %v5030_v11 = vsel %vm1525_vm11, %v10900_v1, 0.0  ;;  %v10905_v55 = vpop.eup %7678 }
 0xca4   :  { %7680 = vpow2.f32 %v4983_v34  ;;  %5031 = vadd.xlane.f32.xlu0 %v5030_v11  ;;  %v5048_v25 = vsel %vm1525_vm11, %v10905_v55, 0.0  ;;  %v7459_v34 = vpack.i.bf16 %v10681_v60, %v10674_v8  ;;  %v4877_v11 = vpop.f32.mrf.mxu0 }
 0xca5   :  { %7682 = vpow2.f32 %v5007_v37  ;;  %v10945_v37 = vadd.f32 %v7803_v6, %v4800_v15 }
 0xca6   :  { %v4948_v62 = vpop.xlane.xlu2 %4947  ;;  %7684 = vpow2.f32 %v5019_v30 }
 0xca7   :  { %v4930_v47 = vpop.xlane.xlu0 %4929  ;;  %v4976_v17 = vsub.f32 %v10836_v32, %v4948_v62 }
 0xca8   :  { %v4970_v9 = vsub.f32 %v10838_v48, %v4930_v47 }
 0xca9   :  { %v5021_v31 = vmul.f32 1.442695, %v4976_v17  ;;  %v4803_v17 = vpop.f32.mrf.mxu1 }
 0xcaa   :  { %v10907_v7 = vpop.eup %7680  ;;  %v5009_v52 = vmul.f32 1.442695, %v4970_v9 }
 0xcab   :  { %v10911_v28 = vpop.eup %7682  ;;  %5049 = vadd.xlane.f32.xlu1 %v5048_v25  ;;  %v5033_v23 = vsel %vm1525_vm11, %v10907_v7, 0.0  ;;  %v4931_v25 = vsel %vm1525_vm11, %v10945_v37, -inf }
 0xcac   :  { %v5069_v49 = vsel %vm1525_vm11, %v10911_v28, 0.0  ;;  %5034 = vadd.xlane.f32.xlu0 %v5033_v23  ;;  %v10920_v40 = vpop.eup %7684  ;;  %v4726_v23 = vpop.f32.mrf.mxu3 }
 0xcad   :  { %5070 = vadd.xlane.f32.xlu2 %v5069_v49  ;;  %v5087_v3 = vsel %vm1525_vm11, %v10920_v40, 0.0 }
 0xcae   :  { %v4894_v0 = vpop.xlane.xlu2 %4893 }
 0xcaf   :  { %v4958_v54 = vsub.f32 %v10844_v45, %v4894_v0  ;;  %v10928_v45 = vld [vmem:[%s11923_s5 + $0x28] sm:$0xff]  ;;  %v4880_v0 = vpop.f32.mrf.mxu0 }
 0xcb0   :  { %v10931_v5 = vadd.f32 %v10928_v45, %v4649_v53  ;;  %v10957_v8 = vadd.f32 %v10928_v45, %v4726_v23  ;;  %v10967_v9 = vadd.f32 %v10928_v45, %v4880_v0  ;;  %v10973_v53 = vadd.f32 %v7803_v6, %v4723_v19 }
 0xcb1   :  { %v4985_v63 = vmul.f32 1.442695, %v4958_v54  ;;  %v10964_v54 = vadd.f32 %v7803_v6, %v10913_v10  ;;  %v4963_v10 = vsub.f32 %v10821_v20, %v10892_v41 }
 0xcb2   :  { %v4898_v16 = vsel %vm1525_vm11, %v10931_v5, -inf  ;;  %v4916_v47 = vsel %vm1525_vm11, %v10957_v8, -inf }
 0xcb3   :  { %7686 = vpow2.f32 %v4985_v63  ;;  %v4895_v63 = vsel %vm1525_vm11, %v10964_v54, -inf }
 0xcb4   :  { %5088 = vadd.xlane.f32.xlu0 %v5087_v3  ;;  %7688 = vpow2.f32 %v5009_v52  ;;  %v4952_v3 = vsel %vm1525_vm11, %v10967_v9, -inf  ;;  %v4913_v52 = vsel %vm1525_vm11, %v10973_v53, -inf }
 0xcb5   :  { %7690 = vpow2.f32 %v5021_v31 }
 0xcb6   :  { %v7441_v21 = vpop.permute.xlu2 %7440  ;;  %v7451_v14 = vpop.permute.xlu1 %7450 }
 0xcb7   :  { %v7443_v29 = vunpack.i.h.bf16 %v7441_v21  ;;  %v7442_v22 = vunpack.i.l.bf16 %v7441_v21  ;;  %v7452_v4 = vunpack.i.l.bf16 %v7451_v14  ;;  %v7453_v46 = vunpack.i.h.bf16 %v7451_v14 }
 0xcb8   :  { %v10979_v21 = vadd.f32 %v7803_v6, %v4877_v11  ;;  %v4995_v14 = vmul.f32 1.442695, %v4963_v10 }
 0xcb9   :  { %v10933_v48 = vpop.eup %7686  ;;  %5510 = vmatpush.msrb.mxu2 %v7442_v22  ;;  %5580 = vmatpush.msrb.mxu3 %v7443_v29 }
 0xcba   :  { %v7446_v50 = vpop.permute.xlu0 %7445  ;;  %v5036_v27 = vsel %vm1525_vm11, %v10933_v48, 0.0  ;;  %v10940_v32 = vpop.eup %7688  ;;  %v4949_v22 = vsel %vm1525_vm11, %v10979_v21, -inf  ;;  %7692 = vpow2.f32 %v4995_v14 }
 0xcbb   :  { %v7448_v58 = vunpack.i.h.bf16 %v7446_v50  ;;  %v7447_v59 = vunpack.i.l.bf16 %v7446_v50  ;;  %5037 = vadd.xlane.f32.xlu2 %v5036_v27  ;;  %5581 = vmatpush.msrb.mxu3 %v7452_v4  ;;  %v5072_v39 = vsel %vm1525_vm11, %v10940_v32, 0.0  ;;  %v10954_v49 = vpop.eup %7690  ;;  %v10985_v50 = vadd.f32 %v10928_v45, %v4803_v17 }
 0xcbc   :  { %4899 = vmax.xlane.f32.xlu0 %v4898_v16  ;;  %v5090_v60 = vsel %vm1525_vm11, %v10954_v49, 0.0 }
 0xcbd   :  { %5650 = vmatpush.msrb.mxu1 %v7447_v59  ;;  %5720 = vmatpush.msra.mxu0 %v7448_v58  ;;  %v4934_v20 = vsel %vm1525_vm11, %v10985_v50, -inf }
 0xcbf   :  { %5651 = vmatpush.msrb.mxu1 %v7453_v46 }
 0xcc0   :  { %v10987_v19 = vpop.eup %7692 }
 0xcc1   :  { %v5051_v41 = vsel %vm1525_vm11, %v10987_v19, 0.0 }
 0xcc2   :  { %v7456_v2 = vpop.permute.xlu0 %7455 }
 0xcc3   :  { %v7458_v62 = vunpack.i.h.bf16 %v7456_v2  ;;  %v7457_v30 = vunpack.i.l.bf16 %v7456_v2  ;;  %5073 = vadd.xlane.f32.xlu2 %v5072_v39  ;;  %v7263_v2 = vld [vmem:[%s11919_s1 + $0x50] sm:$0xff] }
 0xcc4   :  { %7460 = vrot.lane.b32.xlu1 %v7459_v34, %s7837_s9  ;;  %4932 = vmax.xlane.f32.xlu0 %v4931_v25  ;;  %v7262_v34 = vld [vmem:[%s11919_s1 + $0x40] sm:$0xff] }
 0xcc5   :  { %5652 = vmatpush.msrb.mxu1 %v7458_v62  ;;  %5721 = vmatpush.msra.mxu0 %v7457_v30  ;;  %v7469_v30 = vpack.i.bf16 %v7262_v34, %v7263_v2  ;;  %v7264_v2 = vld [vmem:[%s11919_s1 + $0x60] sm:$0xff] }
 0xccb   :  { %5091 = vadd.xlane.f32.xlu2 %v5090_v60 }
 0xccc   :  { %4917 = vmax.xlane.f32.xlu0 %v4916_v47 }
 0xcd3   :  { %4896 = vmax.xlane.f32.xlu2 %v4895_v63 }
 0xcd4   :  { %4953 = vmax.xlane.f32.xlu0 %v4952_v3 }
 0xcdb   :  { %4914 = vmax.xlane.f32.xlu2 %v4913_v52 }
 0xce1   :  { %v4912_v29 = vpop.xlane.xlu1 %4911 }
 0xce2   :  { %v4964_v4 = vsub.f32 %v10860_v35, %v4912_v29 }
 0xce3   :  { %4950 = vmax.xlane.f32.xlu2 %v4949_v22 }
 0xce4   :  { %v4997_v27 = vmul.f32 1.442695, %v4964_v4 }
 0xce6   :  { %7694 = vpow2.f32 %v4997_v27 }
 0xceb   :  { %4935 = vmax.xlane.f32.xlu2 %v4934_v20 }
 0xcec   :  { %v10993_v58 = vpop.eup %7694 }
 0xced   :  { %v5054_v35 = vsel %vm1525_vm11, %v10993_v58, 0.0 }
 0xcee   :  { %5052 = vadd.xlane.f32.xlu1 %v5051_v41 }
 0xcf6   :  { %5055 = vadd.xlane.f32.xlu1 %v5054_v35 }
 0xcfb   :  { %v5047_v45 = vpop.xlane.xlu0 %5046 }
 0xcfc   :  { %7696 = vrcp.f32 %v5047_v45  ;;  %v5200_v46 = vand.u32 2147483648, %v5047_v45  ;;  %v5198_v11 = vand.u32 2147483647, %v5047_v45  ;;  %vm5194_vm15 = vweird.f32 %v5047_v45 }
 0xcfe   :  { %v5201_v60 = vor.u32 1.1754944e-38, %v5200_v46  ;;  %vm5199_vm2 = vcmp.eq.f32.partialorder %v5198_v11, 8.507059e+37 }
 0xd01   :  { %v5065_v59 = vpop.xlane.xlu2 %5064 }
 0xd02   :  { %v7697_v16 = vpop.eup %7696  ;;  %7698 = vrcp.f32 %v5065_v59  ;;  %v5290_v3 = vand.u32 2147483648, %v5065_v59  ;;  %v5288_v14 = vand.u32 2147483647, %v5065_v59  ;;  %vm5284_vm4 = vweird.f32 %v5065_v59 }
 0xd03   :  { %v5190_v15 = vmul.f32 %v7697_v16, %v5047_v45  ;;  %vm5195_vm14 = vweird.f32 %v7697_v16  ;;  %7470 = vrot.lane.b32.xlu2 %v7469_v30, %s7838_s26 }
 0xd04   :  { %vm5196_vm0 = vmor %vm5194_vm15, %vm5195_vm14  ;;  %v5291_v17 = vor.u32 1.1754944e-38, %v5290_v3  ;;  %vm5289_vm6 = vcmp.eq.f32.partialorder %v5288_v14, 8.507059e+37 }
 0xd05   :  { %v5191_v31 = vsub.f32 1.0, %v5190_v15 }
 0xd06   :  { %v10997_v6 = vpop.xlane.xlu1 %5082 }
 0xd07   :  { %v5192_v39 = vmul.f32 %v7697_v16, %v5191_v31 }
 0xd08   :  { %v7699_v62 = vpop.eup %7698 }
 0xd09   :  { %v5193_v25 = vadd.f32 %v7697_v16, %v5192_v39  ;;  %v5280_v23 = vmul.f32 %v7699_v62, %v5065_v59  ;;  %vm5285_vm3 = vweird.f32 %v7699_v62  ;;  %v7265_v39 = vld [vmem:[%s11919_s1 + $0x70] sm:$0xff] }
 0xd0a   :  { %vm5286_vm5 = vmor %vm5284_vm4, %vm5285_vm3 }
 0xd0b   :  { %v5197_v47 = vsel %vm5196_vm0, %v7697_v16, %v5193_v25  ;;  %v5281_v0 = vsub.f32 1.0, %v5280_v23  ;;  %v7464_v25 = vpack.i.bf16 %v7264_v2, %v7265_v39 }
 0xd0c   :  { %v5202_v63 = vsel %vm5199_vm2, %v5201_v60, %v5197_v47 }
 0xd0d   :  { %v5203_v52 = vmul.f32 %v10866_v13, %v5202_v63  ;;  %v5282_v10 = vmul.f32 %v7699_v62, %v5281_v0  ;;  %7465 = vrot.lane.b32.xlu0 %v7464_v25, %s7838_s26 }
 0xd0e   :  { %v5029_v29 = vpop.xlane.xlu1 %5028 }
 0xd0f   :  { %v5283_v22 = vadd.f32 %v7699_v62, %v5282_v10  ;;  %7700 = vrcp.f32 %v5029_v29  ;;  %7244 = vmatmul.msk.f32.vlgmr.msrb.gmra.mxu3 %vm1525_vm11, %v5203_v52  ;;  %v11011_v45 = vpop.xlane.xlu2 %5085  ;;  %v5110_v15 = vand.u32 2147483648, %v5029_v29  ;;  %v5108_v34 = vand.u32 2147483647, %v5029_v29 }
 0xd10   :  { %7702 = vrcp.f32 %v10997_v6  ;;  %vm5104_vm8 = vweird.f32 %v5029_v29 }
 0xd11   :  { %v5287_v4 = vsel %vm5286_vm5, %v7699_v62, %v5283_v22  ;;  %v5111_v30 = vor.u32 1.1754944e-38, %v5110_v15  ;;  %vm5109_vm15 = vcmp.eq.f32.partialorder %v5108_v34, 8.507059e+37 }
 0xd12   :  { %v5292_v27 = vsel %vm5289_vm6, %v5291_v17, %v5287_v4 }
 0xd13   :  { %v5293_v20 = vmul.f32 %v10871_v36, %v5292_v27 }
 0xd15   :  { %v7701_v41 = vpop.eup %7700  ;;  %7250 = vmatmul.msk.f32.vlgmr.msrb.gmra.mxu1 %vm1525_vm11, %v5293_v20 }
 0xd16   :  { %v5100_v13 = vmul.f32 %v7701_v41, %v5029_v29  ;;  %v5068_v35 = vpop.xlane.xlu1 %5067  ;;  %v11013_v31 = vpop.eup %7702  ;;  %vm5105_vm7 = vweird.f32 %v7701_v41 }
 0xd17   :  { %7704 = vrcp.f32 %v5068_v35  ;;  %v5032_v16 = vpop.xlane.xlu0 %5031  ;;  %v5370_v62 = vmul.f32 %v11013_v31, %v10997_v6  ;;  %vm5106_vm14 = vmor %vm5104_vm8, %vm5105_vm7  ;;  %v5303_v20 = vand.u32 2147483647, %v5068_v35  ;;  %vm5299_vm3 = vweird.f32 %v5068_v35 }
 0xd18   :  { %v5101_v59 = vsub.f32 1.0, %v5100_v13  ;;  %7706 = vrcp.f32 %v5032_v16  ;;  %v5305_v13 = vand.u32 2147483648, %v5068_v35  ;;  %vm5119_vm4 = vweird.f32 %v5032_v16 }
 0xd19   :  { %7708 = vrcp.f32 %v11011_v45  ;;  %v5371_v22 = vsub.f32 1.0, %v5370_v62  ;;  %vm11055_vm6 = vcmp.eq.f32.partialorder %v5303_v20, 8.507059e+37 }
 0xd1a   :  { %v5102_v46 = vmul.f32 %v7701_v41, %v5101_v59 }
 0xd1b   :  { %v5372_v34 = vmul.f32 %v11013_v31, %v5371_v22 }
 0xd1c   :  { %v5103_v36 = vadd.f32 %v7701_v41, %v5102_v46 }
 0xd1d   :  { %v11022_v11 = vpop.eup %7704 }
 0xd1e   :  { %v5107_v23 = vsel %vm5106_vm14, %v7701_v41, %v5103_v36  ;;  %v5295_v60 = vmul.f32 %v11022_v11, %v5068_v35  ;;  %v11027_v47 = vpop.xlane.xlu1 %5049  ;;  %v7707_v0 = vpop.eup %7706  ;;  %v5125_v41 = vand.u32 2147483648, %v5032_v16  ;;  %vm5300_vm0 = vweird.f32 %v11022_v11 }
 0xd1f   :  { %v5112_v63 = vsel %vm5109_vm15, %v5111_v30, %v5107_v23  ;;  %7710 = vrcp.f32 %v11027_v47  ;;  %v5115_v52 = vmul.f32 %v7707_v0, %v5032_v16  ;;  %v11032_v14 = vpop.xlane.xlu0 %5034  ;;  %v11037_v17 = vpop.eup %7708  ;;  %vm5120_vm2 = vweird.f32 %v7707_v0  ;;  %vm11051_vm5 = vmor %vm5299_vm3, %vm5300_vm0 }
 0xd20   :  { %v5113_v3 = vmul.f32 %v10883_v33, %v5112_v63  ;;  %v5296_v10 = vsub.f32 1.0, %v5295_v60  ;;  %v11034_v29 = vpop.xlane.xlu2 %5070  ;;  %7712 = vrcp.f32 %v11032_v14  ;;  %v5123_v33 = vand.u32 2147483647, %v5032_v16  ;;  %vm11061_vm7 = vmor %vm5119_vm4, %vm5120_vm2 }
 0xd21   :  { %v5116_v4 = vsub.f32 1.0, %v5115_v52  ;;  %7714 = vrcp.f32 %v11034_v29  ;;  %v11049_v36 = vmul.f32 %v11037_v17, %v11011_v45  ;;  %v5126_v16 = vor.u32 1.1754944e-38, %v5125_v41 }
 0xd22   :  { %v5297_v27 = vmul.f32 %v11022_v11, %v5296_v10  ;;  %7238 = vmatmul.msk.f32.vlgmr.msrb.gmra.mxu2 %vm1525_vm11, %v5113_v3  ;;  %vm11065_vm8 = vcmp.eq.f32.partialorder %v5123_v33, 8.507059e+37  ;;  %v5306_v60 = vor.u32 1.1754944e-38, %v5305_v13  ;;  %vm5209_vm14 = vweird.f32 %v11027_v47 }
 0xd23   :  { %v5117_v59 = vmul.f32 %v7707_v0, %v5116_v4  ;;  %vm5375_vm15 = vweird.f32 %v11013_v31  ;;  %vm5134_vm0 = vweird.f32 %v11032_v14  ;;  %v5213_v33 = vand.u32 2147483647, %v11027_v47 }
 0xd24   :  { %v5298_v15 = vadd.f32 %v11022_v11, %v5297_v27  ;;  %v5140_v27 = vand.u32 2147483648, %v11032_v14  ;;  %v5138_v13 = vand.u32 2147483647, %v11032_v14 }
 0xd25   :  { %v11044_v46 = vpop.eup %7710  ;;  %v5118_v2 = vadd.f32 %v7707_v0, %v5117_v59 }
 0xd26   :  { %v5205_v30 = vmul.f32 %v11044_v46, %v11027_v47  ;;  %v7713_v25 = vpop.eup %7712  ;;  %v5302_v4 = vsel %vm11051_vm5, %v11022_v11, %v5298_v15  ;;  %vm5210_vm2 = vweird.f32 %v11044_v46  ;;  %v5215_v11 = vand.u32 2147483648, %v11027_v47 }
 0xd27   :  { %v11070_v63 = vpop.eup %7714  ;;  %v5130_v3 = vmul.f32 %v7713_v25, %v11032_v14  ;;  %v11073_v10 = vpop.xlane.xlu0 %5088  ;;  %v5122_v22 = vsel %vm11061_vm7, %v7707_v0, %v5118_v2  ;;  %v5307_v2 = vsel %vm11055_vm6, %v5306_v60, %v5302_v4  ;;  %vm5135_vm3 = vweird.f32 %v7713_v25  ;;  %vm11099_vm4 = vmor %vm5209_vm14, %vm5210_vm2 }
 0xd28   :  { %v5206_v52 = vsub.f32 1.0, %v5205_v30  ;;  %v5310_v20 = vmul.f32 %v11070_v63, %v11034_v29  ;;  %v5127_v15 = vsel %vm11065_vm8, %v5126_v16, %v5122_v22  ;;  %7716 = vrcp.f32 %v11073_v10  ;;  %vm5136_vm5 = vmor %vm5134_vm0, %vm5135_vm3 }
 0xd29   :  { %v5131_v41 = vsub.f32 1.0, %v5130_v3  ;;  %v5141_v23 = vor.u32 1.1754944e-38, %v5140_v27  ;;  %v5128_v35 = vmul.f32 %v10900_v1, %v5127_v15  ;;  %v5308_v62 = vmul.f32 %v10896_v18, %v5307_v2 }
 0xd2a   :  { %v5207_v0 = vmul.f32 %v11044_v46, %v5206_v52  ;;  %v5311_v59 = vsub.f32 1.0, %v5310_v20  ;;  %v5318_v60 = vand.u32 2147483647, %v11034_v29  ;;  %v5320_v22 = vand.u32 2147483648, %v11034_v29 }
 0xd2b   :  { %v5132_v39 = vmul.f32 %v7713_v25, %v5131_v41  ;;  %vm5315_vm6 = vweird.f32 %v11070_v63  ;;  %v5216_v1 = vor.u32 1.1754944e-38, %v5215_v11  ;;  %7239 = vmatmul.msk.f32.gmra.mxu2 %vm1525_vm11, %v5128_v35  ;;  %7251 = vmatmul.msk.f32.gmra.mxu1 %vm1525_vm11, %v5308_v62  ;;  %v5373_v18 = vadd.f32 %v11013_v31, %v5372_v34 }
 0xd2c   :  { %v5208_v30 = vadd.f32 %v11044_v46, %v5207_v0  ;;  %v5312_v3 = vmul.f32 %v11070_v63, %v5311_v59  ;;  %vm5139_vm7 = vcmp.eq.f32.partialorder %v5138_v13, 8.507059e+37  ;;  %vm5214_vm8 = vcmp.eq.f32.partialorder %v5213_v33, 8.507059e+37 }
 0xd2d   :  { %v5133_v16 = vadd.f32 %v7713_v25, %v5132_v39  ;;  %v5386_v14 = vsub.f32 1.0, %v11049_v36  ;;  %vm5314_vm14 = vweird.f32 %v11034_v29  ;;  %vm5374_vm0 = vweird.f32 %v10997_v6 }
 0xd2e   :  { %v11107_v4 = vpop.xlane.xlu2 %5037  ;;  %v5212_v27 = vsel %vm11099_vm4, %v11044_v46, %v5208_v30  ;;  %v5313_v47 = vadd.f32 %v11070_v63, %v5312_v3  ;;  %v11124_v59 = vpop.eup %7716  ;;  %v5380_v11 = vand.u32 2147483648, %v10997_v6  ;;  %vm5316_vm2 = vmor %vm5314_vm14, %vm5315_vm6  ;;  %v5321_v34 = vor.u32 1.1754944e-38, %v5320_v22 }
 0xd2f   :  { %7718 = vrcp.f32 %v11107_v4  ;;  %v11120_v20 = vpop.xlane.xlu0 %4899  ;;  %v5137_v46 = vsel %vm5136_vm5, %v7713_v25, %v5133_v16  ;;  %v5217_v0 = vsel %vm5214_vm8, %v5216_v1, %v5212_v27  ;;  %v5378_v25 = vand.u32 2147483647, %v10997_v6  ;;  %vm11136_vm4 = vmor %vm5374_vm0, %vm5375_vm15 }
 0xd30   :  { %v5142_v41 = vsel %vm5139_vm7, %v5141_v23, %v5137_v46  ;;  %v5218_v33 = vmul.f32 %v10905_v55, %v5217_v0  ;;  %vm5319_vm3 = vcmp.eq.f32.partialorder %v5318_v60, 8.507059e+37  ;;  %v5317_v29 = vsel %vm5316_vm2, %v11070_v63, %v5313_v47 }
 0xd31   :  { %v5143_v36 = vmul.f32 %v10907_v7, %v5142_v41  ;;  %v5322_v15 = vsel %vm5319_vm3, %v5321_v34, %v5317_v29  ;;  %v5377_v55 = vsel %vm11136_vm4, %v11013_v31, %v5373_v18  ;;  %v5387_v6 = vmul.f32 %v11037_v17, %v5386_v14 }
 0xd32   :  { %7245 = vmatmul.msk.f32.gmra.mxu3 %vm1525_vm11, %v5218_v33  ;;  %v5400_v7 = vmul.f32 %v11124_v59, %v11073_v10  ;;  %v5323_v63 = vmul.f32 %v10911_v28, %v5322_v15  ;;  %v5381_v39 = vor.u32 1.1754944e-38, %v5380_v11  ;;  %vm5379_vm15 = vcmp.eq.f32.partialorder %v5378_v25, 8.507059e+37 }
 0xd33   :  { %vm5389_vm5 = vweird.f32 %v11011_v45  ;;  %7240 = vmatmul.msk.f32.gmra.mxu2 %vm1525_vm11, %v5143_v36  ;;  %v5395_v52 = vand.u32 2147483648, %v11011_v45  ;;  %v5388_v16 = vadd.f32 %v11037_v17, %v5387_v6  ;;  %vm5390_vm6 = vweird.f32 %v11037_v17 }
 0xd34   :  { %7252 = vmatmul.msk.f32.gmra.mxu1 %vm1525_vm11, %v5323_v63  ;;  %v5382_v31 = vsel %vm5379_vm15, %v5381_v39, %v5377_v55  ;;  %v5401_v60 = vsub.f32 1.0, %v5400_v7  ;;  %v5155_v47 = vand.u32 2147483648, %v11107_v4  ;;  %v5393_v46 = vand.u32 2147483647, %v11011_v45  ;;  %vm11165_vm8 = vmor %vm5389_vm5, %vm5390_vm6 }
 0xd35   :  { %v7719_v2 = vpop.eup %7718  ;;  %v5383_v18 = vmul.f32 %v10877_v43, %v5382_v31  ;;  %v5153_v14 = vand.u32 2147483647, %v11107_v4  ;;  %vm5149_vm14 = vweird.f32 %v11107_v4  ;;  %v5392_v43 = vsel %vm11165_vm8, %v11037_v17, %v5388_v16 }
 0xd36   :  { %v5145_v30 = vmul.f32 %v7719_v2, %v11107_v4  ;;  %v11149_v23 = vpop.xlane.xlu2 %5073  ;;  %v7461_v3 = vpop.permute.xlu1 %7460  ;;  %vm5150_vm7 = vweird.f32 %v7719_v2  ;;  %v5402_v34 = vmul.f32 %v11124_v59, %v5401_v60  ;;  %v5396_v45 = vor.u32 1.1754944e-38, %v5395_v52 }
 0xd37   :  { %7720 = vrcp.f32 %v11149_v23  ;;  %v4933_v28 = vpop.xlane.xlu0 %4932  ;;  %v7462_v62 = vunpack.i.l.bf16 %v7461_v3  ;;  %v7463_v1 = vunpack.i.h.bf16 %v7461_v3  ;;  %vm5151_vm0 = vmor %vm5149_vm14, %vm5150_vm7  ;;  %v5156_v33 = vor.u32 1.1754944e-38, %v5155_v47 }
 0xd38   :  { %v5146_v35 = vsub.f32 1.0, %v5145_v30  ;;  %v4971_v22 = vsub.f32 %v10945_v37, %v4933_v28  ;;  %vm5394_vm2 = vcmp.eq.f32.partialorder %v5393_v46, 8.507059e+37  ;;  %vm5154_vm3 = vcmp.eq.f32.partialorder %v5153_v14, 8.507059e+37 }
 0xd39   :  { %5722 = vmatpush.msra.mxu0 %v7462_v62  ;;  %v5397_v15 = vsel %vm5394_vm2, %v5396_v45, %v5392_v43  ;;  %v5403_v55 = vadd.f32 %v11124_v59, %v5402_v34  ;;  %vm5405_vm4 = vweird.f32 %v11124_v59  ;;  %v5335_v6 = vand.u32 2147483648, %v11149_v23 }
 0xd3a   :  { %v5147_v27 = vmul.f32 %v7719_v2, %v5146_v35  ;;  %v5011_v41 = vmul.f32 1.442695, %v4971_v22  ;;  %v5410_v7 = vand.u32 2147483648, %v11073_v10  ;;  %vm5404_vm5 = vweird.f32 %v11073_v10 }
 0xd3b   :  { %5723 = vmatpush.msra.mxu0 %v7463_v1  ;;  %v5408_v30 = vand.u32 2147483647, %v11073_v10  ;;  %v5398_v3 = vmul.f32 %v10886_v24, %v5397_v15  ;;  %vm11188_vm6 = vmor %vm5404_vm5, %vm5405_vm4  ;;  %vm5329_vm7 = vweird.f32 %v11149_v23  ;;  %v5336_v28 = vor.u32 1.1754944e-38, %v5335_v6 }
 0xd3c   :  { %v5148_v37 = vadd.f32 %v7719_v2, %v5147_v27  ;;  %7722 = vpow2.f32 %v5011_v41  ;;  %7256 = vmatmul.msk.f32.vlgmr.msra.gmra.mxu0 %vm1525_vm11, %v5383_v18  ;;  %v5407_v24 = vsel %vm11188_vm6, %v11124_v59, %v5403_v55  ;;  %v5411_v10 = vor.u32 1.1754944e-38, %v5410_v7 }
 0xd3d   :  { %v7721_v11 = vpop.eup %7720  ;;  %v4960_v15 = vsub.f32 %v10931_v5, %v11120_v20 }
 0xd3e   :  { %v5325_v25 = vmul.f32 %v7721_v11, %v11149_v23  ;;  %v5092_v36 = vpop.xlane.xlu2 %5091  ;;  %v5152_v29 = vsel %vm5151_vm0, %v7719_v2, %v5148_v37  ;;  %vm5330_vm15 = vweird.f32 %v7721_v11  ;;  %v5333_v2 = vand.u32 2147483647, %v11149_v23 }
 0xd3f   :  { %7724 = vrcp.f32 %v5092_v36  ;;  %v5157_v13 = vsel %vm5154_vm3, %v5156_v33, %v5152_v29  ;;  %vm5331_vm8 = vmor %vm5329_vm7, %vm5330_vm15  ;;  %vm5409_vm0 = vcmp.eq.f32.partialorder %v5408_v30, 8.507059e+37  ;;  %v5425_v18 = vand.u32 2147483648, %v5092_v36  ;;  %v4918_v7 = vpop.xlane.xlu0 %4917 }
 0xd40   :  { %v5326_v4 = vsub.f32 1.0, %v5325_v25  ;;  %v5158_v17 = vmul.f32 %v10933_v48, %v5157_v13  ;;  %vm5334_vm14 = vcmp.eq.f32.partialorder %v5333_v2, 8.507059e+37  ;;  %v5412_v47 = vsel %vm5409_vm0, %v5411_v10, %v5407_v24 }
 0xd41   :  { %v5423_v46 = vand.u32 2147483647, %v5092_v36  ;;  %v5413_v14 = vmul.f32 %v10920_v40, %v5412_v47  ;;  %vm5419_vm3 = vweird.f32 %v5092_v36  ;;  %v5426_v41 = vor.u32 1.1754944e-38, %v5425_v18 }
 0xd42   :  { %v5327_v63 = vmul.f32 %v7721_v11, %v5326_v4  ;;  %v11182_v39 = vpop.eup %7722  ;;  %7241 = vmatmul.msk.f32.gmra.mxu2 %vm1525_vm11, %v5158_v17  ;;  %v4989_v6 = vmul.f32 1.442695, %v4960_v15  ;;  %v4966_v5 = vsub.f32 %v10957_v8, %v4918_v7 }
 0xd43   :  { %v5075_v52 = vsel %vm1525_vm11, %v11182_v39, 0.0  ;;  %vm5424_vm15 = vcmp.eq.f32.partialorder %v5423_v46, 8.507059e+37 }
 0xd44   :  { %v5328_v48 = vadd.f32 %v7721_v11, %v5327_v63  ;;  %5076 = vadd.xlane.f32.xlu2 %v5075_v52  ;;  %7257 = vmatmul.msk.f32.gmra.mxu0 %vm1525_vm11, %v5398_v3 }
 0xd45   :  { %v7725_v35 = vpop.eup %7724 }
 0xd46   :  { %v5415_v62 = vmul.f32 %v7725_v35, %v5092_v36  ;;  %v4897_v16 = vpop.xlane.xlu2 %4896  ;;  %v5332_v60 = vsel %vm5331_vm8, %v7721_v11, %v5328_v48  ;;  %vm5420_vm2 = vweird.f32 %v7725_v35 }
 0xd47   :  { %v5337_v23 = vsel %vm5334_vm14, %v5336_v28, %v5332_v60  ;;  %vm5421_vm4 = vmor %vm5419_vm3, %vm5420_vm2  ;;  %v4959_v25 = vsub.f32 %v10964_v54, %v4897_v16  ;;  %v5001_v28 = vmul.f32 1.442695, %v4966_v5 }
 0xd48   :  { %v5416_v22 = vsub.f32 1.0, %v5415_v62  ;;  %v5338_v27 = vmul.f32 %v10940_v32, %v5337_v23 }
 0xd4a   :  { %v5417_v1 = vmul.f32 %v7725_v35, %v5416_v22  ;;  %7253 = vmatmul.msk.f32.gmra.mxu1 %vm1525_vm11, %v5338_v27 }
 0xd4c   :  { %v5418_v59 = vadd.f32 %v7725_v35, %v5417_v1  ;;  %7258 = vmatmul.msk.f32.gmra.mxu0 %vm1525_vm11, %v5413_v14 }
 0xd4e   :  { %v4915_v0 = vpop.xlane.xlu2 %4914  ;;  %v5422_v37 = vsel %vm5421_vm4, %v7725_v35, %v5418_v59 }
 0xd4f   :  { %v4965_v32 = vsub.f32 %v10973_v53, %v4915_v0  ;;  %v5427_v11 = vsel %vm5424_vm15, %v5426_v41, %v5422_v37  ;;  %v4987_v53 = vmul.f32 1.442695, %v4959_v25 }
 0xd50   :  { %v5428_v43 = vmul.f32 %v10954_v49, %v5427_v11  ;;  %v11240_v11 = vpop.xlane.xlu0 %4953 }
 0xd51   :  { %v4999_v34 = vmul.f32 1.442695, %v4965_v32 }
 0xd53   :  { %7726 = vpow2.f32 %v4999_v34 }
 0xd54   :  { %7259 = vmatmul.msk.f32.gmra.mxu0 %vm1525_vm11, %v5428_v43 }
 0xd56   :  { %v4951_v45 = vpop.xlane.xlu2 %4950 }
 0xd57   :  { %v4977_v40 = vsub.f32 %v10979_v21, %v4951_v45 }
 0xd59   :  { %v11207_v33 = vpop.eup %7726  ;;  %v5023_v36 = vmul.f32 1.442695, %v4977_v40 }
 0xd5a   :  { %v5057_v29 = vsel %vm1525_vm11, %v11207_v33, 0.0 }
 0xd5b   :  { %7728 = vpow2.f32 %v5023_v36  ;;  %5058 = vadd.xlane.f32.xlu0 %v5057_v29 }
 0xd5c   :  { %7730 = vpow2.f32 %v4987_v53 }
 0xd5e   :  { %v4936_v4 = vpop.xlane.xlu2 %4935 }
 0xd5f   :  { %v4972_v13 = vsub.f32 %v10985_v50, %v4936_v4 }
 0xd61   :  { %v11213_v49 = vpop.eup %7728  ;;  %v5013_v21 = vmul.f32 1.442695, %v4972_v13  ;;  %v5053_v55 = vpop.xlane.xlu1 %5052 }
 0xd62   :  { %7732 = vrcp.f32 %v5053_v55  ;;  %v5093_v54 = vsel %vm1525_vm11, %v11213_v49, 0.0  ;;  %v11219_v17 = vpop.eup %7730  ;;  %v5230_v48 = vand.u32 2147483648, %v5053_v55  ;;  %v5228_v35 = vand.u32 2147483647, %v5053_v55 }
 0xd63   :  { %7734 = vpow2.f32 %v5013_v21  ;;  %5094 = vadd.xlane.f32.xlu1 %v5093_v54  ;;  %v5039_v31 = vsel %vm1525_vm11, %v11219_v17, 0.0  ;;  %vm5224_vm6 = vweird.f32 %v5053_v55 }
 0xd64   :  { %7736 = vpow2.f32 %v4989_v6  ;;  %v5231_v62 = vor.u32 1.1754944e-38, %v5230_v48  ;;  %vm5229_vm8 = vcmp.eq.f32.partialorder %v5228_v35, 8.507059e+37 }
 0xd66   :  { %v7471_v43 = vpop.permute.xlu2 %7470 }
 0xd67   :  { %v7472_v53 = vunpack.i.l.bf16 %v7471_v43  ;;  %v7473_v4 = vunpack.i.h.bf16 %v7471_v43 }
 0xd68   :  { %v7733_v63 = vpop.eup %7732 }
 0xd69   :  { %v11221_v50 = vpop.eup %7734  ;;  %v5220_v2 = vmul.f32 %v7733_v63, %v5053_v55  ;;  %v5056_v30 = vpop.xlane.xlu1 %5055  ;;  %vm5225_vm5 = vweird.f32 %v7733_v63 }
 0xd6a   :  { %7738 = vrcp.f32 %v5056_v30  ;;  %v5078_v3 = vsel %vm1525_vm11, %v11221_v50, 0.0  ;;  %v11228_v24 = vpop.eup %7736  ;;  %vm5226_vm7 = vmor %vm5224_vm6, %vm5225_vm5  ;;  %v5245_v1 = vand.u32 2147483648, %v5056_v30  ;;  %v5243_v46 = vand.u32 2147483647, %v5056_v30 }
 0xd6b   :  { %v5221_v20 = vsub.f32 1.0, %v5220_v2  ;;  %5079 = vadd.xlane.f32.xlu2 %v5078_v3  ;;  %5040 = vadd.xlane.f32.xlu1 %v5039_v31  ;;  %7740 = vpow2.f32 %v5001_v28  ;;  %v5042_v27 = vsel %vm1525_vm11, %v11228_v24, 0.0  ;;  %vm5239_vm0 = vweird.f32 %v5056_v30 }
 0xd6c   :  { %v5246_v41 = vor.u32 1.1754944e-38, %v5245_v1  ;;  %vm5244_vm3 = vcmp.eq.f32.partialorder %v5243_v46, 8.507059e+37 }
 0xd6d   :  { %v5222_v52 = vmul.f32 %v7733_v63, %v5221_v20 }
 0xd6f   :  { %v5223_v10 = vadd.f32 %v7733_v63, %v5222_v52 }
 0xd70   :  { %v7739_v8 = vpop.eup %7738 }
 0xd71   :  { %v5235_v16 = vmul.f32 %v7739_v8, %v5056_v30  ;;  %v5227_v60 = vsel %vm5226_vm7, %v7733_v63, %v5223_v10  ;;  %vm5240_vm14 = vweird.f32 %v7739_v8  ;;  %v11234_v59 = vpop.eup %7740 }
 0xd72   :  { %v5232_v23 = vsel %vm5229_vm8, %v5231_v62, %v5227_v60  ;;  %vm5241_vm2 = vmor %vm5239_vm0, %vm5240_vm14  ;;  %v5060_v32 = vsel %vm1525_vm11, %v11234_v59, 0.0 }
 0xd73   :  { %v5236_v22 = vsub.f32 1.0, %v5235_v16  ;;  %v5233_v47 = vmul.f32 %v10987_v19, %v5232_v23  ;;  %5043 = vadd.xlane.f32.xlu2 %v5042_v27 }
 0xd75   :  { %v5237_v18 = vmul.f32 %v7739_v8, %v5236_v22  ;;  %7246 = vmatmul.msk.f32.gmra.mxu3 %vm1525_vm11, %v5233_v47 }
 0xd77   :  { %v5238_v14 = vadd.f32 %v7739_v8, %v5237_v18 }
 0xd79   :  { %v5242_v0 = vsel %vm5241_vm2, %v7739_v8, %v5238_v14 }
 0xd7a   :  { %v5247_v37 = vsel %vm5244_vm3, %v5246_v41, %v5242_v0 }
 0xd7b   :  { %v5248_v19 = vmul.f32 %v10993_v58, %v5247_v37  ;;  %5061 = vadd.xlane.f32.xlu2 %v5060_v32 }
 0xd7d   :  { %7247 = vmatmul.msk.f32.gmra.mxu3 %vm1525_vm11, %v5248_v19 }
 0xd7f   :  { %v7466_v45 = vpop.permute.xlu0 %7465 }
 0xd80   :  { %v7468_v40 = vunpack.i.h.bf16 %v7466_v45  ;;  %v7467_v25 = vunpack.i.l.bf16 %v7466_v45 }
 0xd82   :  { %6543 = vmatpush.msra.mxu2 %v7467_v25 }
 0xd84   :  { %6544 = vmatpush.msra.mxu2 %v7468_v40 }
 0xd86   :  { %6545 = vmatpush.msra.mxu2 %v7472_v53 }
 0xd88   :  { %6546 = vmatpush.msra.mxu2 %v7473_v4 }
 0xd92   :  { %v5654_v36 = vpop.f32.mrf.mxu1  ;;  %v5583_v15 = vpop.f32.mrf.mxu3 }
 0xd93   :  { %v5743_v13 = vrot.slane %v5654_v36, 4  ;;  %v5757_v63 = vrot.slane %v5583_v15, 4 }
 0xda5   :  { %v5512_v34 = vpop.f32.mrf.mxu2 }
 0xda6   :  { %v5745_v29 = vrot.slane %v5512_v34, 4  ;;  %v5744_v21 = vsel %vm556_vm9, %v5743_v13, %v5512_v34 }
 0xda7   :  { %v5750_v2 = vperm.slane %v5744_v21, %v8226_v12 }
 0xda8   :  { %v5746_v58 = vsel %vm556_vm9, %v5654_v36, %v5745_v29  ;;  %v5657_v7 = vpop.f32.mrf.mxu1 }
 0xda9   :  { %v5754_v6 = vperm.slane %v5746_v58, %v8226_v12  ;;  %v5799_v20 = vrot.slane %v5657_v7, 4  ;;  %v5769_v35 = vrot.slane %v5750_v2, 4 }
 0xdab   :  { %v5781_v48 = vrot.slane %v5754_v6, 4 }
 0xdae   :  { %v5515_v55 = vpop.f32.mrf.mxu2 }
 0xdaf   :  { %v5801_v5 = vrot.slane %v5515_v55, 4  ;;  %v5800_v28 = vsel %vm556_vm9, %v5799_v20, %v5515_v55 }
 0xdb0   :  { %v5806_v1 = vperm.slane %v5800_v28, %v8226_v12 }
 0xdb1   :  { %v5802_v16 = vsel %vm556_vm9, %v5657_v7, %v5801_v5 }
 0xdb2   :  { %v5810_v41 = vperm.slane %v5802_v16, %v8226_v12  ;;  %v5825_v25 = vrot.slane %v5806_v1, 4 }
 0xdb4   :  { %v5837_v53 = vrot.slane %v5810_v41, 4 }
 0xdb5   :  { %v5586_v10 = vpop.f32.mrf.mxu3 }
 0xdb6   :  { %v5813_v18 = vrot.slane %v5586_v10, 4 }
 0xdb7   :  { %v11244_v54 = vpop.xlane.xlu2 %5076 }
 0xdb8   :  { %7742 = vrcp.f32 %v11244_v54  ;;  %v5348_v4 = vand.u32 2147483647, %v11244_v54  ;;  %v5350_v21 = vand.u32 2147483648, %v11244_v54  ;;  %vm5344_vm15 = vweird.f32 %v11244_v54 }
 0xdb9   :  { %v5725_v30 = vpop.f32.mrf.mxu0 }
 0xdba   :  { %v5755_v3 = vrot.slane %v5725_v30, 4  ;;  %v5758_v31 = vsel %vm556_vm9, %v5725_v30, %v5757_v63  ;;  %vm5349_vm5 = vcmp.eq.f32.partialorder %v5348_v4, 8.507059e+37 }
 0xdbb   :  { %v5766_v52 = vperm.slane %v5758_v31, %v8226_v12 }
 0xdbc   :  { %v5756_v8 = vsel %vm556_vm9, %v5755_v3, %v5583_v15 }
 0xdbd   :  { %v5762_v60 = vperm.slane %v5756_v8, %v8226_v12  ;;  %v5779_v23 = vrot.slane %v5766_v52, 4  ;;  %v5782_v22 = vsel %vm556_vm9, %v5766_v52, %v5781_v48 }
 0xdbe   :  { %v11253_v62 = vpop.eup %7742  ;;  %v5790_v47 = vperm.slane %v5782_v22, %v8235_v51 }
 0xdbf   :  { %v5340_v27 = vmul.f32 %v11253_v62, %v11244_v54  ;;  %v5770_v46 = vsel %vm556_vm9, %v5762_v60, %v5769_v35  ;;  %v5780_v14 = vsel %vm556_vm9, %v5779_v23, %v5754_v6  ;;  %v5767_v0 = vrot.slane %v5762_v60, 4 }
 0xdc0   :  { %v5778_v37 = vperm.slane %v5770_v46, %v8235_v51  ;;  %v5786_v45 = vperm.slane %v5780_v14, %v8235_v51  ;;  %v5797_v40 = vrot.slane %v5790_v47, 4  ;;  %vm5345_vm4 = vweird.f32 %v11253_v62 }
 0xdc1   :  { %v5728_v32 = vpop.f32.mrf.mxu0  ;;  %v5341_v19 = vsub.f32 1.0, %v5340_v27  ;;  %v5768_v13 = vsel %vm556_vm9, %v5767_v0, %v5750_v2  ;;  %vm5346_vm6 = vmor %vm5344_vm15, %vm5345_vm4 }
 0xdc2   :  { %v5811_v34 = vrot.slane %v5728_v32, 4  ;;  %v5814_v43 = vsel %vm556_vm9, %v5728_v32, %v5813_v18  ;;  %v5793_v15 = vrot.slane %v5778_v37, 4  ;;  %v5795_v6 = vrot.slane %v5786_v45, 4 }
 0xdc3   :  { %v5822_v29 = vperm.slane %v5814_v43, %v8226_v12  ;;  %v5342_v58 = vmul.f32 %v11253_v62, %v5341_v19  ;;  %v5798_v7 = vsel %vm556_vm9, 0.0, %v5797_v40  ;;  %v5774_v5 = vperm.slane %v5768_v13, %v8235_v51 }
 0xdc4   :  { %v5812_v36 = vsel %vm556_vm9, %v5811_v34, %v5586_v10  ;;  %v5794_v31 = vsel %vm556_vm9, 0.0, %v5793_v15  ;;  %v6090_v48 = vsel %vm556_vm9, %v5797_v40, %v5786_v45  ;;  %v6095_v28 = vrot.slane %v5798_v7, 4 }
 0xdc5   :  { %v5818_v55 = vperm.slane %v5812_v36, %v8226_v12  ;;  %v5835_v63 = vrot.slane %v5822_v29, 4  ;;  %v5838_v30 = vsel %vm556_vm9, %v5822_v29, %v5837_v53  ;;  %v5343_v60 = vadd.f32 %v11253_v62, %v5342_v58 }
 0xdc6   :  { %v5846_v3 = vperm.slane %v5838_v30, %v8235_v51  ;;  %v5796_v23 = vsel %vm556_vm9, 0.0, %v5795_v6  ;;  %v5791_v47 = vrot.slane %v5774_v5, 4  ;;  %v5351_v18 = vor.u32 1.1754944e-38, %v5350_v21 }
 0xdc7   :  { %v5823_v20 = vrot.slane %v5818_v55, 4  ;;  %v5826_v2 = vsel %vm556_vm9, %v5818_v55, %v5825_v25  ;;  %v5836_v35 = vsel %vm556_vm9, %v5835_v63, %v5810_v41  ;;  %v6084_v46 = vrot.slane %v5794_v31, 4 }
 0xdc8   :  { %v5834_v52 = vperm.slane %v5826_v2, %v8235_v51  ;;  %v5842_v8 = vperm.slane %v5836_v35, %v8235_v51  ;;  %v5853_v16 = vrot.slane %v5846_v3, 4  ;;  %v6096_v0 = vsel %vm556_vm9, %v6095_v28, %v5796_v23 }
 0xdc9   :  { %v5824_v10 = vsel %vm556_vm9, %v5823_v20, %v5806_v1  ;;  %v6094_v1 = vperm.slane %v6090_v48, %v8226_v12  ;;  %v5347_v34 = vsel %vm5346_vm6, %v11253_v62, %v5343_v60  ;;  %v5792_v40 = vsel %vm556_vm9, 0.0, %v5791_v47 }
 0xdca   :  { %v5830_v22 = vperm.slane %v5824_v10, %v8235_v51  ;;  %v5849_v27 = vrot.slane %v5834_v52, 4  ;;  %v5851_v37 = vrot.slane %v5842_v8, 4  ;;  %v5854_v32 = vsel %vm556_vm9, 0.0, %v5853_v16 }
 0xdcb   :  { %v6144_v54 = vsel %vm556_vm9, %v5853_v16, %v5842_v8  ;;  %v5352_v45 = vsel %vm5349_vm5, %v5351_v18, %v5347_v34  ;;  %v6079_v25 = vsel %vm556_vm9, %v5793_v15, %v5774_v5  ;;  %v6085_v4 = vsel %vm556_vm9, %v6084_v46, %v5792_v40  ;;  %v11344_v34 = vpop.f32.mrf.mxu1 }
 0xdcc   :  { %v5850_v14 = vsel %vm556_vm9, 0.0, %v5849_v27  ;;  %v5847_v19 = vrot.slane %v5830_v22, 4  ;;  %v6133_v36 = vsel %vm556_vm9, %v5849_v27, %v5830_v22  ;;  %v5353_v29 = vmul.f32 %v11182_v39, %v5352_v45 }
 0xdcd   :  { %v6138_v43 = vrot.slane %v5850_v14, 4  ;;  %v6083_v53 = vperm.slane %v6079_v25, %v8226_v12  ;;  %v6149_v13 = vrot.slane %v5854_v32, 4  ;;  %v6089_v58 = vperm.slane %v6085_v4, %v8226_v12 }
 0xdce   :  { %v11292_v41 = vpop.xlane.xlu0 %5058  ;;  %v6100_v62 = vperm.slane %v6096_v0, %v8226_v12  ;;  %v6115_v21 = vrot.slane %v6094_v1, 4  ;;  %v5852_v55 = vsel %vm556_vm9, 0.0, %v5851_v37  ;;  %7254 = vmatmul.msk.f32.gmra.mxu1 %vm1525_vm11, %v5353_v29  ;;  %v5848_v15 = vsel %vm556_vm9, 0.0, %v5847_v19 }
 0xdcf   :  { %7744 = vrcp.f32 %v11292_v41  ;;  %v6103_v6 = vrot.slane %v6083_v53, 4  ;;  %v6101_v39 = vrot.slane %v6089_v58, 4  ;;  %v6139_v63 = vsel %vm556_vm9, %v6138_v43, %v5848_v15 }
 0xdd0   :  { %v6116_v7 = vsel %vm556_vm9, %v6100_v62, %v6115_v21  ;;  %v11318_v5 = vperm.slane %v6144_v54, %v8226_v12  ;;  %v6137_v3 = vperm.slane %v6133_v36, %v8226_v12  ;;  %v6113_v35 = vrot.slane %v6100_v62, 4 }
 0xdd1   :  { %v6104_v20 = vsel %vm556_vm9, %v6089_v58, %v6103_v6  ;;  %v6124_v2 = vperm.slane %v6116_v7, %v8235_v51  ;;  %v6150_v28 = vsel %vm556_vm9, %v6149_v13, %v5852_v55  ;;  %v6102_v8 = vsel %vm556_vm9, %v6101_v39, %v6083_v53 }
 0xdd2   :  { %v6112_v48 = vperm.slane %v6104_v20, %v8235_v51  ;;  %v6143_v16 = vperm.slane %v6139_v63, %v8226_v12  ;;  %v6154_v27 = vperm.slane %v6150_v28, %v8226_v12  ;;  %v11337_v18 = vperm.slane %v6102_v8, %v8235_v51 }
 0xdd3   :  { %v6129_v10 = vrot.slane %v6124_v2, 4  ;;  %v6114_v46 = vsel %vm556_vm9, %v6113_v35, %v6094_v1  ;;  %v6157_v0 = vrot.slane %v6137_v3, 4  ;;  %v6169_v37 = vrot.slane %v11318_v5, 4 }
 0xdd4   :  { %v6131_v23 = vrot.slane %v6112_v48, 4  ;;  %v6155_v32 = vrot.slane %v6143_v16, 4  ;;  %v5258_v19 = vand.u32 2147483647, %v11292_v41  ;;  %v5260_v43 = vand.u32 2147483648, %v11292_v41 }
 0xdd5   :  { %v11315_v30 = vpop.eup %7744  ;;  %v6130_v22 = vsel %vm556_vm9, %v6129_v10, %v6112_v48  ;;  %v6158_v45 = vsel %vm556_vm9, %v6143_v16, %v6157_v0  ;;  %v6170_v1 = vsel %vm556_vm9, %v6154_v27, %v6169_v37  ;;  %v6120_v25 = vperm.slane %v6114_v46, %v8235_v51 }
 0xdd6   :  { %v5250_v31 = vmul.f32 %v11315_v30, %v11292_v41  ;;  %v11326_v52 = vpop.xlane.xlu1 %5094  ;;  %6433 = vrot.lane.b32.xlu0 %v6130_v22, %s7839_s11  ;;  %v6132_v47 = vsel %vm556_vm9, %v6124_v2, %v6131_v23  ;;  %vm5255_vm7 = vweird.f32 %v11315_v30  ;;  %v6127_v36 = vrot.slane %v11337_v18, 4 }
 0xdd7   :  { %7746 = vrcp.f32 %v11326_v52  ;;  %6457 = vrot.lane.b32.xlu1 %v6132_v47, %s7841_s13  ;;  %v11354_v29 = vperm.slane %v6158_v45, %v8235_v51  ;;  %v6156_v58 = vsel %vm556_vm9, %v6155_v32, %v6137_v3  ;;  %v6167_v62 = vrot.slane %v6154_v27, 4 }
 0xdd8   :  { %v5251_v60 = vsub.f32 1.0, %v5250_v31  ;;  %v11364_v55 = vperm.slane %v6170_v1, %v8235_v51  ;;  %v5855_v15 = vrot.slane %v11344_v34, 4  ;;  %vm5254_vm8 = vweird.f32 %v11292_v41  ;;  %v5518_v31 = vpop.f32.mrf.mxu2 }
 0xdd9   :  { %v6185_v6 = vrot.slane %v11354_v29, 4  ;;  %v5261_v7 = vor.u32 1.1754944e-38, %v5260_v43  ;;  %vm11372_vm14 = vmor %vm5254_vm8, %vm5255_vm7  ;;  %v6128_v20 = vsel %vm556_vm9, %v6120_v25, %v6127_v36  ;;  %v6162_v3 = vperm.slane %v6156_v58, %v8235_v51 }
 0xdda   :  { %v5252_v14 = vmul.f32 %v11315_v30, %v5251_v60  ;;  %vm5259_vm0 = vcmp.eq.f32.partialorder %v5258_v19, 8.507059e+37  ;;  %v5438_v48 = vand.u32 2147483647, %v11326_v52  ;;  %v5440_v41 = vand.u32 2147483648, %v11326_v52 }
 0xddb   :  { %v6186_v2 = vsel %vm556_vm9, %v11364_v55, %v6185_v6  ;;  %v6168_v10 = vsel %vm556_vm9, %v6167_v62, %v11318_v5  ;;  %v6125_v23 = vrot.slane %v6120_v25, 4  ;;  %v11391_v27 = vsel %vm556_vm9, %v5855_v15, %v5518_v31  ;;  %v5663_v62 = vpop.f32.mrf.mxu1 }
 0xddc   :  { %v5253_v13 = vadd.f32 %v11315_v30, %v5252_v14  ;;  %vm5434_vm3 = vweird.f32 %v11326_v52  ;;  %v6181_v46 = vrot.slane %v6162_v3, 4  ;;  %v5441_v14 = vor.u32 1.1754944e-38, %v5440_v41 }
 0xddd   :  { %v7747_v54 = vpop.eup %7746  ;;  %v6174_v0 = vperm.slane %v6168_v10, %v8235_v51  ;;  %vm5439_vm15 = vcmp.eq.f32.partialorder %v5438_v48, 8.507059e+37  ;;  %v11404_v45 = vsel %vm556_vm9, %v6125_v23, %v11337_v18  ;;  %v6183_v39 = vrot.slane %v11364_v55, 4 }
 0xdde   :  { %v5430_v40 = vmul.f32 %v7747_v54, %v11326_v52  ;;  %v11356_v53 = vpop.xlane.xlu2 %5079  ;;  %v11358_v4 = vpop.xlane.xlu1 %5040  ;;  %6459 = vrot.lane.b32.xlu0 %v6186_v2, %s7841_s13  ;;  %v5257_v35 = vsel %vm11372_vm14, %v11315_v30, %v5253_v13  ;;  %vm5435_vm2 = vweird.f32 %v7747_v54 }
 0xddf   :  { %7748 = vrcp.f32 %v11356_v53  ;;  %6409 = vrot.lane.b32.xlu1 %v6128_v20, %s7840_s12  ;;  %v5262_v8 = vsel %vm5259_vm0, %v5261_v7, %v5257_v35  ;;  %vm5436_vm4 = vmor %vm5434_vm3, %vm5435_vm2  ;;  %v5365_v52 = vand.u32 2147483648, %v11356_v53  ;;  %v5363_v36 = vand.u32 2147483647, %v11356_v53 }
 0xde0   :  { %v5431_v21 = vsub.f32 1.0, %v5430_v40  ;;  %7750 = vrcp.f32 %v11358_v4  ;;  %v5263_v60 = vmul.f32 %v11207_v33, %v5262_v8  ;;  %v5857_v33 = vrot.slane %v5518_v31, 4  ;;  %v5521_v55 = vpop.f32.mrf.mxu2 }
 0xde1   :  { %v6182_v40 = vsel %vm556_vm9, %v6174_v0, %v6181_v46  ;;  %v5170_v58 = vand.u32 2147483648, %v11358_v4  ;;  %vm5359_vm6 = vweird.f32 %v11356_v53  ;;  %v5168_v18 = vand.u32 2147483647, %v11358_v4 }
 0xde2   :  { %v5432_v63 = vmul.f32 %v7747_v54, %v5431_v21  ;;  %7248 = vmatmul.msk.f32.gmra.mxu3 %vm1525_vm11, %v5263_v60  ;;  %vm5164_vm14 = vweird.f32 %v11358_v4  ;;  %v5911_v31 = vrot.slane %v5663_v62, 4  ;;  %vm5364_vm0 = vcmp.eq.f32.partialorder %v5363_v36, 8.507059e+37 }
 0xde3   :  { %v5171_v48 = vor.u32 1.1754944e-38, %v5170_v58  ;;  %vm5169_vm3 = vcmp.eq.f32.partialorder %v5168_v18, 8.507059e+37  ;;  %v5913_v46 = vrot.slane %v5521_v55, 4 }
 0xde4   :  { %v5433_v28 = vadd.f32 %v7747_v54, %v5432_v63 }
 0xde5   :  { %v7749_v16 = vpop.eup %7748 }
 0xde6   :  { %v7751_v22 = vpop.eup %7750  ;;  %v5355_v47 = vmul.f32 %v7749_v16, %v11356_v53  ;;  %v11395_v30 = vpop.xlane.xlu2 %5043  ;;  %v5437_v32 = vsel %vm5436_vm4, %v7747_v54, %v5433_v28  ;;  %vm5360_vm5 = vweird.f32 %v7749_v16  ;;  %v6179_v54 = vrot.slane %v6174_v0, 4 }
 0xde7   :  { %v5160_v5 = vmul.f32 %v7751_v22, %v11358_v4  ;;  %7752 = vrcp.f32 %v11395_v30  ;;  %v5442_v43 = vsel %vm5439_vm15, %v5441_v14, %v5437_v32  ;;  %6411 = vrot.lane.b32.xlu1 %v6182_v40, %s7840_s12  ;;  %vm5165_vm7 = vweird.f32 %v7751_v22  ;;  %vm11417_vm8 = vmor %vm5359_vm6, %vm5360_vm5 }
 0xde8   :  { %v5356_v37 = vsub.f32 1.0, %v5355_v47  ;;  %v5443_v25 = vmul.f32 %v11213_v49, %v5442_v43  ;;  %v5858_v49 = vsel %vm556_vm9, %v11344_v34, %v5857_v33  ;;  %v11423_v63 = vsel %vm556_vm9, %v6179_v54, %v6162_v3  ;;  %vm5166_vm2 = vmor %vm5164_vm14, %vm5165_vm7 }
 0xde9   :  { %v5161_v19 = vsub.f32 1.0, %v5160_v5  ;;  %v5366_v53 = vor.u32 1.1754944e-38, %v5365_v52  ;;  %v5185_v4 = vand.u32 2147483648, %v11395_v30  ;;  %v6184_v28 = vsel %vm556_vm9, %v6183_v39, %v11354_v29 }
 0xdea   :  { %v5357_v1 = vmul.f32 %v7749_v16, %v5356_v37  ;;  %7260 = vmatmul.msk.f32.gmra.mxu0 %vm1525_vm11, %v5443_v25  ;;  %v5183_v23 = vand.u32 2147483647, %v11395_v30  ;;  %vm5179_vm15 = vweird.f32 %v11395_v30  ;;  %v4978_v29 = vsub.f32 %v10967_v9, %v11240_v11 }
 0xdeb   :  { %v5162_v13 = vmul.f32 %v7751_v22, %v5161_v19  ;;  %v5862_v5 = vperm.slane %v11391_v27, %v8226_v12  ;;  %v5186_v0 = vor.u32 1.1754944e-38, %v5185_v4 }
 0xdec   :  { %v5358_v21 = vadd.f32 %v7749_v16, %v5357_v1  ;;  %vm5184_vm6 = vcmp.eq.f32.partialorder %v5183_v23, 8.507059e+37 }
 0xded   :  { %v7753_v6 = vpop.eup %7752  ;;  %v5163_v7 = vadd.f32 %v7751_v22, %v5162_v13  ;;  %v5881_v13 = vrot.slane %v5862_v5, 4 }
 0xdee   :  { %v5175_v20 = vmul.f32 %v7753_v6, %v11395_v30  ;;  %v11427_v2 = vpop.xlane.xlu2 %5061  ;;  %v5362_v34 = vsel %vm11417_vm8, %v7749_v16, %v5358_v21  ;;  %v5731_v16 = vpop.f32.mrf.mxu0  ;;  %vm5180_vm4 = vweird.f32 %v7753_v6  ;;  %v5914_v30 = vsel %vm556_vm9, %v5663_v62, %v5913_v46 }
 0xdef   :  { %7754 = vrcp.f32 %v11427_v2  ;;  %v5167_v41 = vsel %vm5166_vm2, %v7751_v22, %v5163_v7  ;;  %v5367_v35 = vsel %vm5364_vm0, %v5366_v53, %v5362_v34  ;;  %6435 = vrot.lane.b32.xlu1 %v6184_v28, %s7839_s11  ;;  %v5912_v22 = vsel %vm556_vm9, %v5911_v31, %v5521_v55  ;;  %vm5181_vm5 = vmor %vm5179_vm15, %vm5180_vm4 }
 0xdf0   :  { %v5176_v3 = vsub.f32 1.0, %v5175_v20  ;;  %v5172_v10 = vsel %vm5169_vm3, %v5171_v48, %v5167_v41  ;;  %v5368_v8 = vmul.f32 %v11221_v50, %v5367_v35  ;;  %v5867_v33 = vrot.slane %v5731_v16, 4 }
 0xdf1   :  { %v5173_v47 = vmul.f32 %v11219_v17, %v5172_v10  ;;  %v5866_v17 = vperm.slane %v5858_v49, %v8226_v12  ;;  %v11452_v52 = vperm.slane %v5912_v22, %v8226_v12  ;;  %v5273_v19 = vand.u32 2147483647, %v11427_v2 }
 0xdf2   :  { %v5177_v60 = vmul.f32 %v7753_v6, %v5176_v3  ;;  %7255 = vmatmul.msk.f32.gmra.mxu1 %vm1525_vm11, %v5368_v8  ;;  %v5275_v54 = vand.u32 2147483648, %v11427_v2  ;;  %v11460_v62 = vperm.slane %v5914_v30, %v8226_v12  ;;  %vm5269_vm8 = vweird.f32 %v11427_v2 }
 0xdf3   :  { %7242 = vmatmul.msk.f32.gmra.mxu2 %vm1525_vm11, %v5173_v47  ;;  %v5893_v58 = vrot.slane %v5866_v17, 4  ;;  %v5937_v49 = vrot.slane %v11452_v52, 4  ;;  %vm11467_vm14 = vcmp.eq.f32.partialorder %v5273_v19, 8.507059e+37 }
 0xdf4   :  { %v5178_v14 = vadd.f32 %v7753_v6, %v5177_v60  ;;  %v5276_v31 = vor.u32 1.1754944e-38, %v5275_v54  ;;  %v5949_v28 = vrot.slane %v11460_v62, 4 }
 0xdf5   :  { %v7755_v50 = vpop.eup %7754 }
 0xdf6   :  { %v5265_v37 = vmul.f32 %v7755_v50, %v11427_v2  ;;  %v5182_v32 = vsel %vm5181_vm5, %v7753_v6, %v5178_v14  ;;  %vm5270_vm7 = vweird.f32 %v7755_v50  ;;  %v5734_v39 = vpop.f32.mrf.mxu0 }
 0xdf7   :  { %v5187_v1 = vsel %vm5184_vm6, %v5186_v0, %v5182_v32  ;;  %vm5271_vm0 = vmor %vm5269_vm8, %vm5270_vm7  ;;  %v5923_v10 = vrot.slane %v5734_v39, 4 }
 0xdf8   :  { %v5589_v43 = vpop.f32.mrf.mxu3  ;;  %v5266_v40 = vsub.f32 1.0, %v5265_v37  ;;  %v5188_v36 = vmul.f32 %v11228_v24, %v5187_v1 }
 0xdf9   :  { %v5868_v27 = vsel %vm556_vm9, %v5867_v33, %v5589_v43  ;;  %v5869_v25 = vrot.slane %v5589_v43, 4 }
 0xdfa   :  { %v5874_v21 = vperm.slane %v5868_v27, %v8226_v12  ;;  %v5267_v18 = vmul.f32 %v7755_v50, %v5266_v40 }
 0xdfb   :  { %v5870_v6 = vsel %vm556_vm9, %v5731_v16, %v5869_v25  ;;  %7243 = vmatmul.msk.f32.gmra.mxu2 %vm1525_vm11, %v5188_v36 }
 0xdfc   :  { %v5878_v15 = vperm.slane %v5870_v6, %v8226_v12  ;;  %v5879_v7 = vrot.slane %v5874_v21, 4  ;;  %v5882_v24 = vsel %vm556_vm9, %v5874_v21, %v5881_v13  ;;  %v5268_v53 = vadd.f32 %v7755_v50, %v5267_v18 }
 0xdfd   :  { %v5890_v34 = vperm.slane %v5882_v24, %v8235_v51 }
 0xdfe   :  { %v5880_v48 = vsel %vm556_vm9, %v5879_v7, %v5862_v5  ;;  %v5891_v55 = vrot.slane %v5878_v15, 4  ;;  %v5894_v3 = vsel %vm556_vm9, %v5878_v15, %v5893_v58  ;;  %v5272_v4 = vsel %vm5271_vm0, %v7755_v50, %v5268_v53 }
 0xdff   :  { %v5886_v41 = vperm.slane %v5880_v48, %v8235_v51  ;;  %v5902_v35 = vperm.slane %v5894_v3, %v8235_v51  ;;  %v5905_v2 = vrot.slane %v5890_v34, 4  ;;  %v5277_v60 = vsel %vm11467_vm14, %v5276_v31, %v5272_v4 }
 0xe00   :  { %v5892_v8 = vsel %vm556_vm9, %v5891_v55, %v5866_v17  ;;  %v5592_v16 = vpop.f32.mrf.mxu3  ;;  %v5278_v27 = vmul.f32 %v11234_v59, %v5277_v60 }
 0xe01   :  { %v5898_v23 = vperm.slane %v5892_v8, %v8235_v51  ;;  %v5903_v47 = vrot.slane %v5886_v41, 4  ;;  %v5906_v46 = vsel %vm556_vm9, 0.0, %v5905_v2  ;;  %v5909_v22 = vrot.slane %v5902_v35, 4 }
 0xe02   :  { %v6187_v14 = vsel %vm556_vm9, %v5905_v2, %v5886_v41  ;;  %v6192_v5 = vrot.slane %v5906_v46, 4  ;;  %v5924_v50 = vsel %vm556_vm9, %v5923_v10, %v5592_v16  ;;  %v5925_v0 = vrot.slane %v5592_v16, 4  ;;  %7249 = vmatmul.msk.f32.gmra.mxu3 %vm1525_vm11, %v5278_v27 }
 0xe03   :  { %v5904_v33 = vsel %vm556_vm9, 0.0, %v5903_v47  ;;  %v5907_v37 = vrot.slane %v5898_v23, 4  ;;  %v5910_v17 = vsel %vm556_vm9, 0.0, %v5909_v22  ;;  %v6191_v32 = vperm.slane %v6187_v14, %v8226_v12 }
 0xe04   :  { %v6193_v30 = vsel %vm556_vm9, %v6192_v5, %v5904_v33  ;;  %v6203_v19 = vrot.slane %v5910_v17, 4  ;;  %v5926_v43 = vsel %vm556_vm9, %v5734_v39, %v5925_v0  ;;  %v5930_v1 = vperm.slane %v5924_v50, %v8226_v12 }
 0xe05   :  { %v5934_v40 = vperm.slane %v5926_v43, %v8226_v12  ;;  %v5908_v25 = vsel %vm556_vm9, 0.0, %v5907_v37  ;;  %v6197_v36 = vperm.slane %v6193_v30, %v8226_v12  ;;  %v6198_v54 = vsel %vm556_vm9, %v5909_v22, %v5898_v23 }
 0xe06   :  { %v5935_v13 = vrot.slane %v5930_v1, 4  ;;  %v5938_v58 = vsel %vm556_vm9, %v5930_v1, %v5937_v49  ;;  %v6204_v21 = vsel %vm556_vm9, %v6203_v19, %v5908_v25  ;;  %v6202_v59 = vperm.slane %v6198_v54, %v8226_v12 }
 0xe07   :  { %v5946_v18 = vperm.slane %v5938_v58, %v8235_v51  ;;  %v5947_v6 = vrot.slane %v5934_v40, 4  ;;  %v5950_v15 = vsel %vm556_vm9, %v5934_v40, %v5949_v28  ;;  %v6208_v49 = vperm.slane %v6204_v21, %v8226_v12 }
 0xe08   :  { %v5936_v7 = vsel %vm556_vm9, %v5935_v13, %v11452_v52  ;;  %v5958_v24 = vperm.slane %v5950_v15, %v8235_v51  ;;  %v6211_v39 = vrot.slane %v6191_v32, 4  ;;  %v6223_v31 = vrot.slane %v6202_v59, 4 }
 0xe09   :  { %v5942_v53 = vperm.slane %v5936_v7, %v8235_v51  ;;  %v5948_v20 = vsel %vm556_vm9, %v5947_v6, %v11460_v62  ;;  %v5961_v34 = vrot.slane %v5946_v18, 4  ;;  %v6209_v41 = vrot.slane %v6197_v36, 4 }
 0xe0a   :  { %v5954_v48 = vperm.slane %v5948_v20, %v8235_v51  ;;  %v5965_v55 = vrot.slane %v5958_v24, 4  ;;  %v6212_v3 = vsel %vm556_vm9, %v6197_v36, %v6211_v39  ;;  %v6224_v23 = vsel %vm556_vm9, %v6208_v49, %v6223_v31 }
 0xe0b   :  { %v5959_v35 = vrot.slane %v5942_v53, 4  ;;  %v5962_v52 = vsel %vm556_vm9, 0.0, %v5961_v34  ;;  %v6241_v2 = vsel %vm556_vm9, %v5961_v34, %v5942_v53  ;;  %v6220_v4 = vperm.slane %v6212_v3, %v8235_v51 }
 0xe0c   :  { %v5963_v28 = vrot.slane %v5954_v48, 4  ;;  %v5966_v10 = vsel %vm556_vm9, 0.0, %v5965_v55  ;;  %v6245_v62 = vperm.slane %v6241_v2, %v8226_v12  ;;  %v6246_v8 = vrot.slane %v5962_v52, 4 }
 0xe0d   :  { %v5960_v16 = vsel %vm556_vm9, 0.0, %v5959_v35  ;;  %v6257_v60 = vrot.slane %v5966_v10, 4  ;;  %v6239_v47 = vrot.slane %v6220_v4, 4  ;;  %v6232_v22 = vperm.slane %v6224_v23, %v8235_v51 }
 0xe0e   :  { %v6247_v46 = vsel %vm556_vm9, %v6246_v8, %v5960_v16  ;;  %v6210_v14 = vsel %vm556_vm9, %v6209_v41, %v6191_v32  ;;  %v6221_v5 = vrot.slane %v6208_v49, 4  ;;  %v5964_v0 = vsel %vm556_vm9, 0.0, %v5963_v28 }
 0xe0f   :  { %v6216_v50 = vperm.slane %v6210_v14, %v8235_v51  ;;  %v6251_v33 = vperm.slane %v6247_v46, %v8226_v12  ;;  %v6252_v37 = vsel %vm556_vm9, %v5965_v55, %v5954_v48  ;;  %v5025_v17 = vmul.f32 1.442695, %v4978_v29 }
 0xe10   :  { %v6240_v30 = vsel %vm556_vm9, %v6232_v22, %v6239_v47  ;;  %v6222_v19 = vsel %vm556_vm9, %v6221_v5, %v6202_v59  ;;  %v6256_v43 = vperm.slane %v6252_v37, %v8226_v12  ;;  %v6258_v40 = vsel %vm556_vm9, %v6257_v60, %v5964_v0 }
 0xe11   :  { %6461 = vrot.lane.b32.xlu0 %v6240_v30, %s7841_s13  ;;  %v6228_v32 = vperm.slane %v6222_v19, %v8235_v51  ;;  %v6235_v1 = vrot.slane %v6216_v50, 4  ;;  %v6265_v27 = vrot.slane %v6245_v62, 4  ;;  %v6262_v25 = vperm.slane %v6258_v40, %v8226_v12 }
 0xe12   :  { %v6277_v36 = vrot.slane %v6256_v43, 4  ;;  %7756 = vpow2.f32 %v5025_v17  ;;  %v6237_v29 = vrot.slane %v6232_v22, 4  ;;  %v6263_v53 = vrot.slane %v6251_v33, 4 }
 0xe13   :  { %v6236_v9 = vsel %vm556_vm9, %v6228_v32, %v6235_v1  ;;  %v6266_v11 = vsel %vm556_vm9, %v6251_v33, %v6265_v27  ;;  %v6275_v49 = vrot.slane %v6262_v25, 4  ;;  %v6233_v39 = vrot.slane %v6228_v32, 4 }
 0xe14   :  { %6413 = vrot.lane.b32.xlu2 %v6236_v9, %s7840_s12  ;;  %v6274_v13 = vperm.slane %v6266_v11, %v8235_v51  ;;  %v6278_v58 = vsel %vm556_vm9, %v6262_v25, %v6277_v36  ;;  %v6238_v18 = vsel %vm556_vm9, %v6237_v29, %v6220_v4  ;;  %v6264_v48 = vsel %vm556_vm9, %v6263_v53, %v6245_v62 }
 0xe15   :  { %v6286_v54 = vperm.slane %v6278_v58, %v8235_v51  ;;  %v6276_v20 = vsel %vm556_vm9, %v6275_v49, %v6256_v43  ;;  %v11553_v34 = vsel %vm556_vm9, %v6233_v39, %v6216_v50  ;;  %v6270_v55 = vperm.slane %v6264_v48, %v8235_v51 }
 0xe16   :  { %v6293_v21 = vrot.slane %v6274_v13, 4  ;;  %v6282_v31 = vperm.slane %v6276_v20, %v8235_v51 }
 0xe17   :  { %v6291_v59 = vrot.slane %v6286_v54, 4  ;;  %v6289_v35 = vrot.slane %v6270_v55, 4 }
 0xe18   :  { %v11543_v6 = vpop.eup %7756  ;;  %v6294_v15 = vsel %vm556_vm9, %v6286_v54, %v6293_v21  ;;  %v6287_v3 = vrot.slane %v6282_v31, 4 }
 0xe19   :  { %6437 = vrot.lane.b32.xlu0 %v6238_v18, %s7839_s11  ;;  %v5096_v7 = vsel %vm1525_vm11, %v11543_v6, 0.0  ;;  %v6292_v24 = vsel %vm556_vm9, %v6291_v59, %v6274_v13  ;;  %v6290_v52 = vsel %vm556_vm9, %v6282_v31, %v6289_v35 }
 0xe1a   :  { %5097 = vadd.xlane.f32.xlu1 %v5096_v7  ;;  %v11559_v41 = vsel %vm556_vm9, %v6287_v3, %v6270_v55 }
 0xe1c   :  { %6463 = vrot.lane.b32.xlu2 %v6294_v15, %s7841_s13 }
 0xe21   :  { %6439 = vrot.lane.b32.xlu0 %v6292_v24, %s7839_s11 }
 0xe33   :  { %6415 = vrot.lane.b32.xlu1 %v6290_v52, %s7840_s12 }
 0xe48   :  { %v6434_v28 = vpop.permute.xlu0 %6433 }
 0xe49   :  { %v6458_v2 = vpop.permute.xlu1 %6457 }
 0xe4b   :  { %v5666_v33 = vpop.f32.mrf.mxu1 }
 0xe50   :  { %v6460_v47 = vpop.permute.xlu0 %6459 }
 0xe51   :  { %v6410_v4 = vpop.permute.xlu1 %6409 }
 0xe52   :  { %v6475_v10 = vsel %vm1234_vm10, %v11404_v45, %v6410_v4 }
 0xe53   :  { %v6481_v8 = vsel %vm3124_vm12, %v6475_v10, %v6434_v28 }
 0xe54   :  { %v6487_v62 = vsel %vm3131_vm13, %v6481_v8, %v6458_v2 }
 0xe55   :  { %7266 = vmatmul.msk.f32.vlgmr.msra.gmra.mxu2 %vm104_vm1, %v6487_v62 }
 0xe59   :  { %v6412_v16 = vpop.permute.xlu1 %6411 }
 0xe5a   :  { %v6476_v60 = vsel %vm1234_vm10, %v11423_v63, %v6412_v16  ;;  %v5967_v63 = vrot.slane %v5666_v33, 4 }
 0xe61   :  { %v6436_v23 = vpop.permute.xlu1 %6435 }
 0xe62   :  { %v6482_v46 = vsel %vm3124_vm12, %v6476_v60, %v6436_v23 }
 0xe63   :  { %v6488_v22 = vsel %vm3131_vm13, %v6482_v46, %v6460_v47 }
 0xe64   :  { %7267 = vmatmul.msk.f32.gmra.mxu2 %vm104_vm1, %v6488_v22 }
 0xe65   :  { %v5595_v45 = vpop.f32.mrf.mxu3 }
 0xe66   :  { %v5981_v50 = vrot.slane %v5595_v45, 4 }
 0xe67   :  { %v5737_v14 = vpop.f32.mrf.mxu0 }
 0xe68   :  { %v5979_v5 = vrot.slane %v5737_v14, 4  ;;  %v5982_v37 = vsel %vm556_vm9, %v5737_v14, %v5981_v50 }
 0xe69   :  { %v5990_v30 = vperm.slane %v5982_v37, %v8226_v12 }
 0xe6a   :  { %v5980_v0 = vsel %vm556_vm9, %v5979_v5, %v5595_v45 }
 0xe6b   :  { %v5986_v17 = vperm.slane %v5980_v0, %v8226_v12  ;;  %v6003_v25 = vrot.slane %v5990_v30, 4 }
 0xe6d   :  { %v5991_v1 = vrot.slane %v5986_v17, 4 }
 0xe6e   :  { %v6414_v10 = vpop.permute.xlu2 %6413 }
 0xe6f   :  { %v6477_v22 = vsel %vm1234_vm10, %v11553_v34, %v6414_v10 }
 0xe76   :  { %v5524_v19 = vpop.f32.mrf.mxu2 }
 0xe77   :  { %v5968_v43 = vsel %vm556_vm9, %v5967_v63, %v5524_v19  ;;  %v5969_v32 = vrot.slane %v5524_v19, 4 }
 0xe78   :  { %v5974_v40 = vperm.slane %v5968_v43, %v8226_v12 }
 0xe79   :  { %v5970_v27 = vsel %vm556_vm9, %v5666_v33, %v5969_v32 }
 0xe7a   :  { %v5978_v36 = vperm.slane %v5970_v27, %v8226_v12  ;;  %v5992_v9 = vsel %vm556_vm9, %v5991_v1, %v5974_v40  ;;  %v5993_v11 = vrot.slane %v5974_v40, 4 }
 0xe7b   :  { %v5998_v29 = vperm.slane %v5992_v9, %v8235_v51 }
 0xe7c   :  { %v5994_v13 = vsel %vm556_vm9, %v5986_v17, %v5993_v11  ;;  %v6004_v58 = vsel %vm556_vm9, %v6003_v25, %v5978_v36  ;;  %v6005_v54 = vrot.slane %v5978_v36, 4 }
 0xe7d   :  { %v6002_v21 = vperm.slane %v5994_v13, %v8235_v51  ;;  %v6010_v18 = vperm.slane %v6004_v58, %v8235_v51  ;;  %v6015_v7 = vrot.slane %v5998_v29, 4 }
 0xe7e   :  { %v6006_v15 = vsel %vm556_vm9, %v5990_v30, %v6005_v54 }
 0xe7f   :  { %v6014_v59 = vperm.slane %v6006_v15, %v8235_v51  ;;  %v6017_v24 = vrot.slane %v6002_v21, 4  ;;  %v6019_v39 = vrot.slane %v6010_v18, 4  ;;  %v6016_v3 = vsel %vm556_vm9, 0.0, %v6015_v7 }
 0xe81   :  { %v6018_v49 = vsel %vm556_vm9, 0.0, %v6017_v24  ;;  %v6021_v53 = vrot.slane %v6014_v59, 4  ;;  %v6295_v20 = vsel %vm556_vm9, %v6017_v24, %v5998_v29  ;;  %v6020_v8 = vsel %vm556_vm9, 0.0, %v6019_v39 }
 0xe82   :  { %v6299_v48 = vperm.slane %v6295_v20, %v8226_v12  ;;  %v6300_v55 = vrot.slane %v6018_v49, 4 }
 0xe83   :  { %v6462_v31 = vpop.permute.xlu0 %6461  ;;  %v6022_v35 = vsel %vm556_vm9, 0.0, %v6021_v53  ;;  %v6306_v52 = vsel %vm556_vm9, %v6021_v53, %v6010_v18 }
 0xe84   :  { %v6311_v2 = vrot.slane %v6022_v35, 4  ;;  %v6301_v4 = vsel %vm556_vm9, %v6300_v55, %v6016_v3  ;;  %v6310_v28 = vperm.slane %v6306_v52, %v8226_v12  ;;  %v6319_v16 = vrot.slane %v6299_v48, 4  ;;  %v5527_v3 = vpop.f32.mrf.mxu2 }
 0xe85   :  { %v6305_v62 = vperm.slane %v6301_v4, %v8226_v12 }
 0xe86   :  { %v6312_v60 = vsel %vm556_vm9, %v6311_v2, %v6020_v8  ;;  %v6331_v23 = vrot.slane %v6310_v28, 4 }
 0xe87   :  { %v6316_v47 = vperm.slane %v6312_v60, %v8226_v12  ;;  %v6317_v46 = vrot.slane %v6305_v62, 4  ;;  %v6320_v45 = vsel %vm556_vm9, %v6305_v62, %v6319_v16 }
 0xe88   :  { %v6328_v34 = vperm.slane %v6320_v45, %v8235_v51  ;;  %v6025_v45 = vrot.slane %v5527_v3, 4 }
 0xe89   :  { %v6332_v5 = vsel %vm556_vm9, %v6316_v47, %v6331_v23  ;;  %v6318_v50 = vsel %vm556_vm9, %v6317_v46, %v6299_v48  ;;  %v6329_v0 = vrot.slane %v6316_v47, 4 }
 0xe8a   :  { %v6340_v37 = vperm.slane %v6332_v5, %v8235_v51  ;;  %v6324_v17 = vperm.slane %v6318_v50, %v8235_v51  ;;  %v6347_v21 = vrot.slane %v6328_v34, 4  ;;  %v5669_v5 = vpop.f32.mrf.mxu1 }
 0xe8b   :  { %v6438_v14 = vpop.permute.xlu0 %6437  ;;  %v6330_v30 = vsel %vm556_vm9, %v6329_v0, %v6310_v28  ;;  %v6023_v50 = vrot.slane %v5669_v5, 4  ;;  %v6026_v0 = vsel %vm556_vm9, %v5669_v5, %v6025_v45 }
 0xe8c   :  { %v6483_v33 = vsel %vm3124_vm12, %v6477_v22, %v6438_v14  ;;  %v6345_v19 = vrot.slane %v6340_v37, 4  ;;  %v6336_v43 = vperm.slane %v6330_v30, %v8235_v51  ;;  %v6343_v32 = vrot.slane %v6324_v17, 4 }
 0xe8d   :  { %v6489_v63 = vsel %vm3131_vm13, %v6483_v33, %v6462_v31  ;;  %v5098_v27 = vpop.xlane.xlu1 %5097  ;;  %v11619_v59 = vsel %vm556_vm9, %v6340_v37, %v6347_v21  ;;  %v6464_v31 = vpop.permute.xlu2 %6463  ;;  %v6034_v37 = vperm.slane %v6026_v0, %v8226_v12 }
 0xe8e   :  { %7268 = vmatmul.msk.f32.gmra.mxu2 %vm104_vm1, %v6489_v63  ;;  %v6346_v1 = vsel %vm556_vm9, %v6345_v19, %v6328_v34  ;;  %v6344_v40 = vsel %vm556_vm9, %v6336_v43, %v6343_v32  ;;  %7758 = vrcp.f32 %v5098_v27  ;;  %v5455_v11 = vand.u32 2147483648, %v5098_v27  ;;  %v5598_v33 = vpop.f32.mrf.mxu3 }
 0xe8f   :  { %6441 = vrot.lane.b32.xlu1 %v6346_v1, %s7839_s11  ;;  %6417 = vrot.lane.b32.xlu0 %v6344_v40, %s7840_s12  ;;  %v5453_v13 = vand.u32 2147483647, %v5098_v27  ;;  %vm5449_vm3 = vweird.f32 %v5098_v27  ;;  %v6341_v24 = vrot.slane %v6336_v43, 4  ;;  %v6061_v43 = vrot.slane %v6034_v37, 4 }
 0xe90   :  { %v5456_v54 = vor.u32 1.1754944e-38, %v5455_v11 }
 0xe91   :  { %vm5454_vm15 = vcmp.eq.f32.partialorder %v5453_v13, 8.507059e+37  ;;  %v11624_v49 = vsel %vm556_vm9, %v6341_v24, %v6324_v17  ;;  %v6037_v17 = vrot.slane %v5598_v33, 4 }
 0xe93   :  { %v6440_v53 = vpop.permute.xlu0 %6439 }
 0xe94   :  { %v7759_v25 = vpop.eup %7758 }
 0xe95   :  { %v5445_v36 = vmul.f32 %v7759_v25, %v5098_v27  ;;  %vm5450_vm2 = vweird.f32 %v7759_v25 }
 0xe96   :  { %vm5451_vm4 = vmor %vm5449_vm3, %vm5450_vm2 }
 0xe97   :  { %v5446_v9 = vsub.f32 1.0, %v5445_v36 }
 0xe99   :  { %v5447_v29 = vmul.f32 %v7759_v25, %v5446_v9 }
 0xe9b   :  { %v5448_v58 = vadd.f32 %v7759_v25, %v5447_v29 }
 0xe9d   :  { %v5452_v18 = vsel %vm5451_vm4, %v7759_v25, %v5448_v58 }
 0xe9e   :  { %v5457_v15 = vsel %vm5454_vm15, %v5456_v54, %v5452_v18 }
 0xe9f   :  { %v5458_v7 = vmul.f32 %v11543_v6, %v5457_v15  ;;  %v11634_v6 = vld [vmem:[%s11922_s4 + $0xf] ss:$0 sm:$0xff] }
 0xea1   :  { %7261 = vmatmul.msk.f32.gmra.mxu0 %vm1525_vm11, %v5458_v7 }
 0xea5   :  { %v6416_v39 = vpop.permute.xlu1 %6415 }
 0xea6   :  { %v6478_v20 = vsel %vm1234_vm10, %v11559_v41, %v6416_v39 }
 0xea7   :  { %v6484_v48 = vsel %vm3124_vm12, %v6478_v20, %v6440_v53 }
 0xea8   :  { %v6490_v55 = vsel %vm3131_vm13, %v6484_v48, %v6464_v31 }
 0xea9   :  { %7269 = vmatmul.msk.f32.gmra.mxu2 %vm104_vm1, %v6490_v55 }
 0xed8   :  { %v6548_v35 = vpop.f32.mrf.mxu2 }
 0xed9   :  { %v6566_v52 = vadd.f32 %v6548_v35, %v10020_v42 }
 0xedb   :  { %v11638_v2 = vadd.f32 %v11634_v6, %v6566_v52 }
 0xedd   :  { %v6582_v41 = vsel %vm104_vm1, %v11638_v2, 0.0  ;;  %v6606_v4 = vmul.f32 %v11638_v2, %v11638_v2 }
 0xede   :  { %6583 = vadd.xlane.f32.xlu0 %v6582_v41 }
 0xedf   :  { %v6612_v28 = vsel %vm104_vm1, %v6606_v4, 0.0 }
 0xee0   :  { %6613 = vadd.xlane.f32.xlu2 %v6612_v28 }
 0xee7   :  { %v6551_v10 = vpop.f32.mrf.mxu2 }
 0xee8   :  { %v6567_v8 = vadd.f32 %v6551_v10, %v10028_v26 }
 0xeea   :  { %v11647_v62 = vadd.f32 %v11634_v6, %v6567_v8 }
 0xeec   :  { %v6585_v42 = vsel %vm104_vm1, %v11647_v62, 0.0  ;;  %v6607_v16 = vmul.f32 %v11647_v62, %v11647_v62 }
 0xeed   :  { %6586 = vadd.xlane.f32.xlu1 %v6585_v42 }
 0xeee   :  { %v6615_v60 = vsel %vm104_vm1, %v6607_v16, 0.0 }
 0xeef   :  { %6616 = vadd.xlane.f32.xlu0 %v6615_v60 }
 0xf11   :  { %v6554_v23 = vpop.f32.mrf.mxu2 }
 0xf12   :  { %v6568_v47 = vadd.f32 %v6554_v23, %v10036_v56  ;;  %v6024_v56 = vsel %vm556_vm9, %v6023_v50, %v5527_v3 }
 0xf13   :  { %v6030_v63 = vperm.slane %v6024_v56, %v8226_v12 }
 0xf14   :  { %v11656_v46 = vadd.f32 %v11634_v6, %v6568_v47 }
 0xf15   :  { %v6049_v40 = vrot.slane %v6030_v63, 4 }
 0xf16   :  { %v6588_v26 = vsel %vm104_vm1, %v11656_v46, 0.0  ;;  %v6608_v22 = vmul.f32 %v11656_v46, %v11656_v46 }
 0xf17   :  { %6589 = vadd.xlane.f32.xlu2 %v6588_v26 }
 0xf18   :  { %v6618_v14 = vsel %vm104_vm1, %v6608_v22, 0.0 }
 0xf19   :  { %6619 = vadd.xlane.f32.xlu0 %v6618_v14 }
 0xf1e   :  { %v5740_v30 = vpop.f32.mrf.mxu0 }
 0xf1f   :  { %v6035_v34 = vrot.slane %v5740_v30, 4  ;;  %v6038_v19 = vsel %vm556_vm9, %v5740_v30, %v6037_v17 }
 0xf20   :  { %v6046_v32 = vperm.slane %v6038_v19, %v8226_v12 }
 0xf21   :  { %v6036_v1 = vsel %vm556_vm9, %v6035_v34, %v5598_v33 }
 0xf22   :  { %v6042_v27 = vperm.slane %v6036_v1, %v8226_v12  ;;  %v6059_v25 = vrot.slane %v6046_v32, 4  ;;  %v6062_v36 = vsel %vm556_vm9, %v6046_v32, %v6061_v43 }
 0xf23   :  { %v6070_v9 = vperm.slane %v6062_v36, %v8235_v51 }
 0xf24   :  { %v6047_v11 = vrot.slane %v6042_v27, 4  ;;  %v6050_v29 = vsel %vm556_vm9, %v6042_v27, %v6049_v40  ;;  %v6060_v13 = vsel %vm556_vm9, %v6059_v25, %v6034_v37  ;;  %v11715_v27 = vpop.permute.xlu0 %6417 }
 0xf25   :  { %v6058_v58 = vperm.slane %v6050_v29, %v8235_v51  ;;  %v6066_v54 = vperm.slane %v6060_v13, %v8235_v51  ;;  %v6077_v21 = vrot.slane %v6070_v9, 4 }
 0xf26   :  { %v6048_v18 = vsel %vm556_vm9, %v6047_v11, %v6030_v63 }
 0xf27   :  { %v6054_v15 = vperm.slane %v6048_v18, %v8235_v51  ;;  %v6073_v7 = vrot.slane %v6058_v58, 4  ;;  %v6075_v24 = vrot.slane %v6066_v54, 4  ;;  %v6078_v39 = vsel %vm556_vm9, 0.0, %v6077_v21  ;;  %v11723_v58 = vpop.permute.xlu1 %6441  ;;  %v7273_v18 = vld [vmem:[%s11919_s1 + $0x58] sm:$0xff] }
 0xf28   :  { %v6365_v53 = vrot.slane %v6078_v39, 4  ;;  %v6360_v28 = vsel %vm556_vm9, %v6077_v21, %v6066_v54  ;;  %v7275_v21 = vld [vmem:[%s11919_s1 + $0x78] sm:$0xff] }
 0xf29   :  { %v6071_v20 = vrot.slane %v6054_v15, 4  ;;  %v6074_v31 = vsel %vm556_vm9, 0.0, %v6073_v7  ;;  %v6076_v48 = vsel %vm556_vm9, 0.0, %v6075_v24  ;;  %v6349_v55 = vsel %vm556_vm9, %v6073_v7, %v6054_v15  ;;  %6776 = vmatpush.msra.mxu3 %v7275_v21  ;;  %v7272_v15 = vld [vmem:[%s11919_s1 + $0x48] sm:$0xff] }
 0xf2a   :  { %v6354_v3 = vrot.slane %v6074_v31, 4  ;;  %v6366_v35 = vsel %vm556_vm9, %v6365_v53, %v6076_v48  ;;  %v6353_v41 = vperm.slane %v6349_v55, %v8226_v12  ;;  %v6364_v47 = vperm.slane %v6360_v28, %v8226_v12 }
 0xf2b   :  { %v6072_v52 = vsel %vm556_vm9, 0.0, %v6071_v20  ;;  %v6370_v4 = vperm.slane %v6366_v35, %v8226_v12 }
 0xf2c   :  { %v6557_v10 = vpop.f32.mrf.mxu2  ;;  %v6355_v8 = vsel %vm556_vm9, %v6354_v3, %v6072_v52  ;;  %v6373_v22 = vrot.slane %v6353_v41, 4  ;;  %v6385_v37 = vrot.slane %v6364_v47, 4 }
 0xf2d   :  { %v6569_v42 = vadd.f32 %v6557_v10, %v10044_v38  ;;  %v6359_v16 = vperm.slane %v6355_v8, %v8226_v12  ;;  %v6383_v60 = vrot.slane %v6370_v4, 4  ;;  %v11743_v10 = vld [vmem:[%s11922_s4 + $0x10] ss:$0 sm:$0xff] }
 0xf2e   :  { %v6386_v30 = vsel %vm556_vm9, %v6370_v4, %v6385_v37 }
 0xf2f   :  { %v11692_v23 = vadd.f32 %v11634_v6, %v6569_v42  ;;  %v6371_v26 = vrot.slane %v6359_v16, 4  ;;  %v6384_v38 = vsel %vm556_vm9, %v6383_v60, %v6364_v47  ;;  %v6374_v33 = vsel %vm556_vm9, %v6359_v16, %v6373_v22  ;;  %v11748_v42 = vld [vmem:[%s11922_s4 + $0x11] ss:$0 sm:$0xff] }
 0xf30   :  { %v6390_v12 = vperm.slane %v6384_v38, %v8235_v51  ;;  %v6382_v63 = vperm.slane %v6374_v33, %v8235_v51  ;;  %v6394_v19 = vperm.slane %v6386_v30, %v8235_v51 }
 0xf31   :  { %v6591_v14 = vsel %vm104_vm1, %v11692_v23, 0.0  ;;  %v6609_v45 = vmul.f32 %v11692_v23, %v11692_v23  ;;  %v6372_v5 = vsel %vm556_vm9, %v6371_v26, %v6353_v41 }
 0xf32   :  { %6592 = vadd.xlane.f32.xlu1 %v6591_v14  ;;  %v6378_v50 = vperm.slane %v6372_v5, %v8235_v51  ;;  %v6401_v34 = vrot.slane %v6382_v63, 4  ;;  %v6395_v43 = vrot.slane %v6390_v12, 4  ;;  %v6399_v40 = vrot.slane %v6394_v19, 4 }
 0xf33   :  { %v6621_v0 = vsel %vm104_vm1, %v6609_v45, 0.0 }
 0xf34   :  { %6622 = vadd.xlane.f32.xlu2 %v6621_v0  ;;  %v6397_v56 = vrot.slane %v6378_v50, 4  ;;  %v6402_v32 = vsel %vm556_vm9, %v6394_v19, %v6401_v34  ;;  %v11713_v1 = vsel %vm556_vm9, %v6395_v43, %v6378_v50  ;;  %v6400_v25 = vsel %vm556_vm9, %v6399_v40, %v6382_v63 }
 0xf36   :  { %v6398_v17 = vsel %vm556_vm9, %v6390_v12, %v6397_v56 }
 0xf37   :  { %6419 = vrot.lane.b32.xlu0 %v6398_v17, %s7840_s12 }
 0xf3f   :  { %6467 = vrot.lane.b32.xlu0 %v6402_v32, %s7841_s13 }
 0xf4b   :  { %6443 = vrot.lane.b32.xlu1 %v6400_v25, %s7839_s11 }
 0xf4c   :  { %6465 = vrot.lane.b32.xlu2 %v11619_v59, %s7841_s13  ;;  %v7274_v59 = vld [vmem:[%s11919_s1 + $0x68] sm:$0xff]  ;;  %s7842_s13 = smov [#allocation2]   ;;  %s7069_s1 = sshll.u32 %s11924_s6, 4  ;;  %s7070_s1 = int_to_ptr.hbm [resolvable:$true] %s7069_s1 }
 0xf4d   :  { %6777 = vmatpush.msra.mxu3 %v7274_v59  ;;  %s7067_s30 = sshll.u32 %s7842_s13, 4  ;;  %s7068_s30 = int_to_ptr.vmem [resolvable:$true] %s7067_s30 }
 0xf4f   :  { %6778 = vmatpush.msra.mxu3 %v7273_v18 }
 0xf51   :  { %v6584_v36 = vpop.xlane.xlu0 %6583  ;;  %6779 = vmatpush.msra.mxu3 %v7272_v15 }
 0xf52   :  { %v6600_v51 = vmul.f32 %v6584_v36, %v7980_v57 }
 0xf53   :  { %v6614_v9 = vpop.xlane.xlu2 %6613 }
 0xf54   :  { %v6642_v11 = vmul.f32 %v6600_v51, %v6600_v51  ;;  %v6630_v29 = vmul.f32 %v6614_v9, %v7980_v57  ;;  %v6636_v28 = vsub.f32 %v11638_v2, %v6600_v51 }
 0xf56   :  { %v6648_v13 = vsub.f32 %v6630_v29, %v6642_v11 }
 0xf58   :  { %v6654_v54 = vadd.f32 1e-05, %v6648_v13 }
 0xf5a   :  { %7760 = vrsqrt.f32 %v6654_v54  ;;  %vm6666_vm11 = vweird.f32 %v6654_v54 }
 0xf60   :  { %v7761_v7 = vpop.eup %7760  ;;  %v6587_v24 = vpop.xlane.xlu1 %6586 }
 0xf61   :  { %v6661_v39 = vmul.f32 %v7761_v7, %v6654_v54  ;;  %v6601_v53 = vmul.f32 %v6587_v24, %v7980_v57  ;;  %vm6667_vm9 = vweird.f32 %v7761_v7 }
 0xf62   :  { %v6617_v20 = vpop.xlane.xlu0 %6616  ;;  %vm6668_vm5 = vmor %vm6666_vm11, %vm6667_vm9 }
 0xf63   :  { %v6662_v31 = vmul.f32 %v7761_v7, %v6661_v39  ;;  %v6643_v48 = vmul.f32 %v6601_v53, %v6601_v53  ;;  %v6631_v55 = vmul.f32 %v6617_v20, %v7980_v57  ;;  %v6637_v50 = vsub.f32 %v11647_v62, %v6601_v53 }
 0xf65   :  { %v6663_v3 = vmul.f32 0.5, %v6662_v31  ;;  %v6649_v35 = vsub.f32 %v6631_v55, %v6643_v48 }
 0xf67   :  { %v6664_v52 = vsub.f32 1.5, %v6663_v3  ;;  %v6655_v41 = vadd.f32 1e-05, %v6649_v35 }
 0xf69   :  { %v6665_v4 = vmul.f32 %v7761_v7, %v6664_v52  ;;  %7762 = vrsqrt.f32 %v6655_v41  ;;  %vm6676_vm7 = vweird.f32 %v6655_v41 }
 0xf6b   :  { %v6669_v8 = vsel %vm6668_vm5, %v7761_v7, %v6665_v4 }
 0xf6c   :  { %v6720_v16 = vmul.f32 %v6669_v8, %v6636_v28 }
 0xf6e   :  { %v6727_v60 = vmul.f32 %v11743_v10, %v6720_v16 }
 0xf6f   :  { %v7763_v47 = vpop.eup %7762 }
 0xf70   :  { %v6734_v26 = vadd.f32 %v11748_v42, %v6727_v60  ;;  %v6671_v22 = vmul.f32 %v7763_v47, %v6655_v41  ;;  %vm6677_vm6 = vweird.f32 %v7763_v47 }
 0xf71   :  { %vm6678_vm8 = vmor %vm6676_vm7, %vm6677_vm6 }
 0xf72   :  { %v6672_v14 = vmul.f32 %v7763_v47, %v6671_v22  ;;  %7276 = vmatmul.msk.f32.vlgmr.msra.gmra.mxu3 %vm104_vm1, %v6734_v26 }
 0xf74   :  { %v6673_v45 = vmul.f32 0.5, %v6672_v14 }
 0xf76   :  { %v6674_v5 = vsub.f32 1.5, %v6673_v45 }
 0xf78   :  { %v6675_v38 = vmul.f32 %v7763_v47, %v6674_v5  ;;  %v7303_v5 = vld [vmem:[%s11920_s2 + $0xf8] sm:$0xff] }
 0xf79   :  { %6942 = vmatpush.msra.mxu1 %v7303_v5 }
 0xf7a   :  { %v6679_v0 = vsel %vm6678_vm8, %v7763_v47, %v6675_v38  ;;  %v7302_v38 = vld [vmem:[%s11920_s2 + $0xf0] sm:$0xff] }
 0xf7b   :  { %v6721_v33 = vmul.f32 %v6679_v0, %v6637_v50  ;;  %v7301_v0 = vld [vmem:[%s11920_s2 + $0xe8] sm:$0xff]  ;;  %6943 = vmatpush.msra.mxu1 %v7302_v38 }
 0xf7d   :  { %v6728_v12 = vmul.f32 %v11743_v10, %v6721_v33  ;;  %6944 = vmatpush.msra.mxu1 %v7301_v0 }
 0xf7f   :  { %v6735_v56 = vadd.f32 %v11748_v42, %v6728_v12  ;;  %v7300_v12 = vld [vmem:[%s11920_s2 + $0xe0] sm:$0xff] }
 0xf80   :  { %6945 = vmatpush.msra.mxu1 %v7300_v12 }
 0xf81   :  { %7277 = vmatmul.msk.f32.gmra.mxu3 %vm104_vm1, %v6735_v56  ;;  %v7299_v56 = vld [vmem:[%s11920_s2 + $0xd8] sm:$0xff] }
 0xf82   :  { %6946 = vmatpush.msra.mxu1 %v7299_v56 }
 0xf8a   :  { %v6590_v37 = vpop.xlane.xlu2 %6589 }
 0xf8b   :  { %v6602_v17 = vmul.f32 %v6590_v37, %v7980_v57  ;;  %v7298_v37 = vld [vmem:[%s11920_s2 + $0xd0] sm:$0xff] }
 0xf8c   :  { %v6620_v63 = vpop.xlane.xlu0 %6619  ;;  %6947 = vmatpush.msra.mxu1 %v7298_v37 }
 0xf8d   :  { %v6644_v30 = vmul.f32 %v6602_v17, %v6602_v17  ;;  %v6632_v34 = vmul.f32 %v6620_v63, %v7980_v57  ;;  %v6638_v9 = vsub.f32 %v11656_v46, %v6602_v17  ;;  %v6479_v46 = vsel %vm1234_vm10, %v11624_v49, %v11715_v27 }
 0xf8e   :  { %v6485_v20 = vsel %vm3124_vm12, %v6479_v46, %v11723_v58 }
 0xf8f   :  { %v6650_v19 = vsub.f32 %v6632_v34, %v6644_v30 }
 0xf91   :  { %v6656_v43 = vadd.f32 1e-05, %v6650_v19  ;;  %v7297_v19 = vld [vmem:[%s11920_s2 + $0xc8] sm:$0xff] }
 0xf92   :  { %6948 = vmatpush.msra.mxu1 %v7297_v19 }
 0xf93   :  { %7764 = vrsqrt.f32 %v6656_v43  ;;  %vm6686_vm0 = vweird.f32 %v6656_v43 }
 0xf99   :  { %v7765_v62 = vpop.eup %7764 }
 0xf9a   :  { %v6681_v32 = vmul.f32 %v7765_v62, %v6656_v43  ;;  %vm6687_vm14 = vweird.f32 %v7765_v62  ;;  %v7296_v43 = vld [vmem:[%s11920_s2 + $0xc0] sm:$0xff] }
 0xf9b   :  { %vm6688_vm2 = vmor %vm6686_vm0, %vm6687_vm14  ;;  %6949 = vmatpush.msra.mxu1 %v7296_v43 }
 0xf9c   :  { %v6682_v40 = vmul.f32 %v7765_v62, %v6681_v32  ;;  %v7295_v32 = vld [vmem:[%s11920_s2 + $0xb8] sm:$0xff] }
 0xf9d   :  { %6950 = vmatpush.msra.mxu1 %v7295_v32 }
 0xf9e   :  { %v6683_v25 = vmul.f32 0.5, %v6682_v40 }
 0xfa0   :  { %v6684_v36 = vsub.f32 1.5, %v6683_v25  ;;  %v7294_v25 = vld [vmem:[%s11920_s2 + $0xb0] sm:$0xff] }
 0xfa1   :  { %6951 = vmatpush.msra.mxu1 %v7294_v25 }
 0xfa2   :  { %v6685_v51 = vmul.f32 %v7765_v62, %v6684_v36 }
 0xfa4   :  { %v6689_v11 = vsel %vm6688_vm2, %v7765_v62, %v6685_v51 }
 0xfa5   :  { %v6722_v29 = vmul.f32 %v6689_v11, %v6638_v9  ;;  %v6593_v54 = vpop.xlane.xlu1 %6592  ;;  %v7293_v9 = vld [vmem:[%s11920_s2 + $0xa8] sm:$0xff] }
 0xfa6   :  { %v6603_v59 = vmul.f32 %v6593_v54, %v7980_v57  ;;  %6952 = vmatpush.msra.mxu1 %v7293_v9 }
 0xfa7   :  { %v6729_v13 = vmul.f32 %v11743_v10, %v6722_v29  ;;  %v6623_v18 = vpop.xlane.xlu2 %6622  ;;  %v7292_v29 = vld [vmem:[%s11920_s2 + $0xa0] sm:$0xff] }
 0xfa8   :  { %v6645_v15 = vmul.f32 %v6603_v59, %v6603_v59  ;;  %v6633_v7 = vmul.f32 %v6623_v18, %v7980_v57  ;;  %v6639_v28 = vsub.f32 %v11692_v23, %v6603_v59  ;;  %v7291_v59 = vld [vmem:[%s11920_s2 + $0x98] sm:$0xff]  ;;  %6953 = vmatpush.msra.mxu1 %v7292_v29 }
 0xfa9   :  { %v6736_v21 = vadd.f32 %v11748_v42, %v6729_v13  ;;  %v6420_v55 = vpop.permute.xlu0 %6419 }
 0xfaa   :  { %v6651_v24 = vsub.f32 %v6633_v7, %v6645_v15  ;;  %v6480_v49 = vsel %vm1234_vm10, %v11713_v1, %v6420_v55  ;;  %v11784_v1 = vld [vmem:[%s11922_s4 + $0x12] ss:$0 sm:$0xff]  ;;  %6954 = vmatpush.msra.mxu1 %v7291_v59 }
 0xfab   :  { %7278 = vmatmul.msk.f32.gmra.mxu3 %vm104_vm1, %v6736_v21  ;;  %v7290_v7 = vld [vmem:[%s11920_s2 + $0x90] sm:$0xff] }
 0xfac   :  { %v6657_v39 = vadd.f32 1e-05, %v6651_v24  ;;  %6955 = vmatpush.msra.mxu1 %v7290_v7 }
 0xfae   :  { %7766 = vrsqrt.f32 %v6657_v39  ;;  %vm6696_vm4 = vweird.f32 %v6657_v39 }
 0xfaf   :  { %v6466_v53 = vpop.permute.xlu2 %6465 }
 0xfb0   :  { %v6491_v31 = vsel %vm3131_vm13, %v6485_v20, %v6466_v53  ;;  %v7289_v53 = vld [vmem:[%s11920_s2 + $0x88] sm:$0xff] }
 0xfb1   :  { %7270 = vmatmul.msk.f32.gmra.mxu2 %vm104_vm1, %v6491_v31  ;;  %v6468_v58 = vpop.permute.xlu0 %6467  ;;  %6956 = vmatpush.msra.mxu1 %v7289_v53 }
 0xfb4   :  { %v7767_v48 = vpop.eup %7766 }
 0xfb5   :  { %v6691_v3 = vmul.f32 %v7767_v48, %v6657_v39  ;;  %vm6697_vm3 = vweird.f32 %v7767_v48 }
 0xfb6   :  { %vm6698_vm15 = vmor %vm6696_vm4, %vm6697_vm3 }
 0xfb7   :  { %v6692_v35 = vmul.f32 %v7767_v48, %v6691_v3 }
 0xfb9   :  { %v6693_v52 = vmul.f32 0.5, %v6692_v35 }
 0xfbb   :  { %v6694_v41 = vsub.f32 1.5, %v6693_v52 }
 0xfbd   :  { %v6695_v4 = vmul.f32 %v7767_v48, %v6694_v41  ;;  %v6444_v27 = vpop.permute.xlu1 %6443 }
 0xfbe   :  { %v6486_v8 = vsel %vm3124_vm12, %v6480_v49, %v6444_v27 }
 0xfbf   :  { %v6699_v16 = vsel %vm6698_vm15, %v7767_v48, %v6695_v4  ;;  %v6492_v60 = vsel %vm3131_vm13, %v6486_v8, %v6468_v58  ;;  %v7288_v48 = vld [vmem:[%s11920_s2 + $0x80] sm:$0xff] }
 0xfc0   :  { %7271 = vmatmul.msk.f32.gmra.mxu2 %vm104_vm1, %v6492_v60  ;;  %v6723_v47 = vmul.f32 %v6699_v16, %v6639_v28  ;;  %6957 = vmatpush.msra.mxu1 %v7288_v48 }
 0xfc2   :  { %v6730_v26 = vmul.f32 %v11743_v10, %v6723_v47 }
 0xfc4   :  { %v6737_v22 = vadd.f32 %v11748_v42, %v6730_v26 }
 0xfc6   :  { %7279 = vmatmul.msk.f32.gmra.mxu3 %vm104_vm1, %v6737_v22 }
 0xff5   :  { %v6781_v14 = vpop.f32.mrf.mxu3 }
 0xff6   :  { %v6782_v45 = vadd.f32 %v11784_v1, %v6781_v14 }
 0xff8   :  { %v7282_v50 = vmul.f32 -1.702, %v6782_v45 }
 0xffa   :  { %v6811_v33 = vmul.f32 1.442695, %v7282_v50 }
 0xffc   :  { %7768 = vpow2.f32 %v6811_v33 }
0x1002   :  { %v7769_v17 = vpop.eup %7768 }
0x1003   :  { %v6823_v63 = vadd.f32 1.0, %v7769_v17 }
0x1004   :  { %v6784_v30 = vpop.f32.mrf.mxu3 }
0x1005   :  { %7770 = vrcp.f32 %v6823_v63  ;;  %v6785_v34 = vadd.f32 %v11784_v1, %v6784_v30  ;;  %v6840_v13 = vand.u32 2147483648, %v6823_v63  ;;  %v6838_v21 = vand.u32 2147483647, %v6823_v63 }
0x1006   :  { %vm6834_vm12 = vweird.f32 %v6823_v63 }
0x1007   :  { %v7283_v62 = vmul.f32 -1.702, %v6785_v34  ;;  %v6841_v24 = vor.u32 1.1754944e-38, %v6840_v13  ;;  %vm6839_vm9 = vcmp.eq.f32.partialorder %v6838_v21, 8.507059e+37 }
0x1009   :  { %v6813_v40 = vmul.f32 1.442695, %v7283_v62 }
0x100b   :  { %v7771_v36 = vpop.eup %7770  ;;  %7772 = vpow2.f32 %v6813_v40 }
0x100c   :  { %v6830_v51 = vmul.f32 %v7771_v36, %v6823_v63  ;;  %vm6835_vm10 = vweird.f32 %v7771_v36 }
0x100d   :  { %vm6836_vm13 = vmor %vm6834_vm12, %vm6835_vm10 }
0x100e   :  { %v6831_v11 = vsub.f32 1.0, %v6830_v51 }
0x1010   :  { %v6832_v54 = vmul.f32 %v7771_v36, %v6831_v11 }
0x1011   :  { %v7773_v18 = vpop.eup %7772 }
0x1012   :  { %v6833_v15 = vadd.f32 %v7771_v36, %v6832_v54  ;;  %v6824_v46 = vadd.f32 1.0, %v7773_v18 }
0x1014   :  { %v6837_v39 = vsel %vm6836_vm13, %v7771_v36, %v6833_v15  ;;  %7774 = vrcp.f32 %v6824_v46  ;;  %v6855_v52 = vand.u32 2147483648, %v6824_v46  ;;  %v6853_v4 = vand.u32 2147483647, %v6824_v46 }
0x1015   :  { %v6842_v20 = vsel %vm6839_vm9, %v6841_v24, %v6837_v39  ;;  %vm6849_vm5 = vweird.f32 %v6824_v46 }
0x1016   :  { %v6919_v31 = vmul.f32 %v6842_v20, %v6782_v45  ;;  %v6856_v27 = vor.u32 1.1754944e-38, %v6855_v52  ;;  %vm6854_vm7 = vcmp.eq.f32.partialorder %v6853_v4, 8.507059e+37 }
0x1018   :  { %6958 = vmatmul.f32.vlgmr.msra.gmra.mxu1 %v6919_v31 }
0x101a   :  { %v7775_v55 = vpop.eup %7774 }
0x101b   :  { %v6845_v3 = vmul.f32 %v7775_v55, %v6824_v46  ;;  %vm6850_vm11 = vweird.f32 %v7775_v55 }
0x101c   :  { %vm6851_vm6 = vmor %vm6849_vm5, %vm6850_vm11 }
0x101d   :  { %v6846_v35 = vsub.f32 1.0, %v6845_v3 }
0x101f   :  { %v6847_v41 = vmul.f32 %v7775_v55, %v6846_v35 }
0x1021   :  { %v6848_v49 = vadd.f32 %v7775_v55, %v6847_v41 }
0x1023   :  { %v6852_v28 = vsel %vm6851_vm6, %v7775_v55, %v6848_v49 }
0x1024   :  { %v6857_v58 = vsel %vm6854_vm7, %v6856_v27, %v6852_v28  ;;  %vm6984_vm7 = vcmask 1041409  }
0x1025   :  { %v6920_v8 = vmul.f32 %v6857_v58, %v6785_v34 }
0x1027   :  { %6961 = vmatmul.f32.gmra.mxu1 %v6920_v8 }
0x102e   :  { %v6787_v16 = vpop.f32.mrf.mxu3 }
0x102f   :  { %v6788_v60 = vadd.f32 %v11784_v1, %v6787_v16 }
0x1031   :  { %v7284_v47 = vmul.f32 -1.702, %v6788_v60 }
0x1033   :  { %v6815_v26 = vmul.f32 1.442695, %v7284_v47 }
0x1034   :  { %v6560_v22 = vpop.f32.mrf.mxu2 }
0x1035   :  { %7776 = vpow2.f32 %v6815_v26  ;;  %v6570_v14 = vadd.f32 %v6560_v22, %v10052_v61 }
0x1037   :  { %v11839_v5 = vadd.f32 %v11634_v6, %v6570_v14 }
0x1039   :  { %v6594_v50 = vsel %vm104_vm1, %v11839_v5, 0.0  ;;  %v6610_v0 = vmul.f32 %v11839_v5, %v11839_v5 }
0x103a   :  { %6595 = vadd.xlane.f32.xlu2 %v6594_v50 }
0x103b   :  { %v7777_v45 = vpop.eup %7776  ;;  %v6624_v33 = vsel %vm104_vm1, %v6610_v0, 0.0 }
0x103c   :  { %v6825_v38 = vadd.f32 1.0, %v7777_v45  ;;  %6625 = vadd.xlane.f32.xlu1 %v6624_v33 }
0x103e   :  { %7778 = vrcp.f32 %v6825_v38  ;;  %v6870_v17 = vand.u32 2147483648, %v6825_v38  ;;  %v6868_v34 = vand.u32 2147483647, %v6825_v38  ;;  %vm6864_vm14 = vweird.f32 %v6825_v38 }
0x1040   :  { %v6871_v62 = vor.u32 1.1754944e-38, %v6870_v17  ;;  %vm6869_vm2 = vcmp.eq.f32.partialorder %v6868_v34, 8.507059e+37 }
0x1043   :  { %v6563_v61 = vpop.f32.mrf.mxu2 }
0x1044   :  { %v7779_v12 = vpop.eup %7778  ;;  %v6571_v63 = vadd.f32 %v6563_v61, %v10060_v44 }
0x1045   :  { %v6860_v56 = vmul.f32 %v7779_v12, %v6825_v38  ;;  %vm6865_vm8 = vweird.f32 %v7779_v12 }
0x1046   :  { %v11848_v19 = vadd.f32 %v11634_v6, %v6571_v63  ;;  %vm6866_vm0 = vmor %vm6864_vm14, %vm6865_vm8  ;;  %vm6987_vm8 = vcmask 254976  }
0x1047   :  { %v6861_v37 = vsub.f32 1.0, %v6860_v56 }
0x1048   :  { %v6597_v51 = vsel %vm104_vm1, %v11848_v19, 0.0  ;;  %v6611_v44 = vmul.f32 %v11848_v19, %v11848_v19 }
0x1049   :  { %v6862_v30 = vmul.f32 %v7779_v12, %v6861_v37  ;;  %v6790_v40 = vpop.f32.mrf.mxu3  ;;  %6598 = vadd.xlane.f32.xlu0 %v6597_v51 }
0x104a   :  { %v6791_v36 = vadd.f32 %v11784_v1, %v6790_v40  ;;  %v6627_v11 = vsel %vm104_vm1, %v6611_v44, 0.0 }
0x104b   :  { %v6863_v43 = vadd.f32 %v7779_v12, %v6862_v30  ;;  %6628 = vadd.xlane.f32.xlu2 %v6627_v11 }
0x104c   :  { %v7285_v6 = vmul.f32 -1.702, %v6791_v36 }
0x104d   :  { %v6867_v32 = vsel %vm6866_vm0, %v7779_v12, %v6863_v43 }
0x104e   :  { %v6872_v25 = vsel %vm6869_vm2, %v6871_v62, %v6867_v32  ;;  %v6817_v29 = vmul.f32 1.442695, %v7285_v6 }
0x104f   :  { %v6921_v9 = vmul.f32 %v6872_v25, %v6788_v60 }
0x1050   :  { %7780 = vpow2.f32 %v6817_v29 }
0x1051   :  { %6963 = vmatmul.f32.gmra.mxu1 %v6921_v9  ;;  %v7491_v9 = vld [vmem:[%s11922_s4 + $0x13] ss:$0 sm:$0xff] }
0x1056   :  { %v7781_v13 = vpop.eup %7780 }
0x1057   :  { %v6826_v54 = vadd.f32 1.0, %v7781_v13 }
0x1059   :  { %7782 = vrcp.f32 %v6826_v54  ;;  %v6885_v15 = vand.u32 2147483648, %v6826_v54  ;;  %v6883_v24 = vand.u32 2147483647, %v6826_v54  ;;  %vm6879_vm4 = vweird.f32 %v6826_v54 }
0x105b   :  { %v6886_v39 = vor.u32 1.1754944e-38, %v6885_v15  ;;  %vm6884_vm10 = vcmp.eq.f32.partialorder %v6883_v24, 8.507059e+37 }
0x105f   :  { %v7783_v21 = vpop.eup %7782 }
0x1060   :  { %v6875_v59 = vmul.f32 %v7783_v21, %v6826_v54  ;;  %vm6880_vm3 = vweird.f32 %v7783_v21 }
0x1061   :  { %vm6881_vm15 = vmor %vm6879_vm4, %vm6880_vm3 }
0x1062   :  { %v6876_v18 = vsub.f32 1.0, %v6875_v59 }
0x1064   :  { %v6877_v7 = vmul.f32 %v7783_v21, %v6876_v18 }
0x1066   :  { %v6878_v46 = vadd.f32 %v7783_v21, %v6877_v7 }
0x1068   :  { %v6882_v53 = vsel %vm6881_vm15, %v7783_v21, %v6878_v46 }
0x1069   :  { %v6887_v20 = vsel %vm6884_vm10, %v6886_v39, %v6882_v53 }
0x106a   :  { %v6922_v31 = vmul.f32 %v6887_v20, %v6791_v36 }
0x106c   :  { %6965 = vmatmul.f32.gmra.mxu1 %v6922_v31  ;;  %v35_v31 = vld [vmem:[%s11921_s3 + $0x58] sm:$0xff] }
0x106d   :  { %7052 = vmatpush.msrb.mxu1 %v35_v31 }
0x1095   :  { %v6959_v48 = vpop.f32.mrf.mxu1 }
0x1096   :  { %v6973_v44 = vadd.f32 %v6959_v48, %v11638_v2  ;;  %v34_v48 = vld [vmem:[%s11921_s3 + $0x50] sm:$0xff] }
0x1097   :  { %7053 = vmatpush.msrb.mxu1 %v34_v48 }
0x1098   :  { %v11873_v29 = vadd.f32 %v7491_v9, %v6973_v44 }
0x109a   :  { %v6992_v2 = vmul.f32 %v11873_v29, %v11873_v29 }
0x10a4   :  { %v6962_v55 = vpop.f32.mrf.mxu1 }
0x10ad   :  { %v6596_v3 = vpop.xlane.xlu2 %6595 }
0x10ae   :  { %v6604_v35 = vmul.f32 %v6596_v3, %v7980_v57 }
0x10af   :  { %v6626_v52 = vpop.xlane.xlu1 %6625 }
0x10b0   :  { %v6646_v41 = vmul.f32 %v6604_v35, %v6604_v35  ;;  %v6634_v4 = vmul.f32 %v6626_v52, %v7980_v57  ;;  %v6640_v33 = vsub.f32 %v11839_v5, %v6604_v35  ;;  %v33_v35 = vld [vmem:[%s11921_s3 + $0x48] sm:$0xff] }
0x10b1   :  { %7054 = vmatpush.msrb.mxu1 %v33_v35 }
0x10b2   :  { %v6652_v49 = vsub.f32 %v6634_v4, %v6646_v41 }
0x10b4   :  { %v6658_v27 = vadd.f32 1e-05, %v6652_v49  ;;  %v32_v49 = vld [vmem:[%s11921_s3 + $0x40] sm:$0xff] }
0x10b5   :  { %7055 = vmatpush.msrb.mxu1 %v32_v49 }
0x10b6   :  { %7784 = vrsqrt.f32 %v6658_v27  ;;  %vm6706_vm13 = vweird.f32 %v6658_v27 }
0x10bc   :  { %v7785_v28 = vpop.eup %7784  ;;  %v6599_v8 = vpop.xlane.xlu0 %6598 }
0x10bd   :  { %v6701_v58 = vmul.f32 %v7785_v28, %v6658_v27  ;;  %v6605_v60 = vmul.f32 %v6599_v8, %v7980_v57  ;;  %vm6707_vm12 = vweird.f32 %v7785_v28 }
0x10be   :  { %v6629_v47 = vpop.xlane.xlu2 %6628  ;;  %vm6708_vm9 = vmor %vm6706_vm13, %vm6707_vm12 }
0x10bf   :  { %v6702_v16 = vmul.f32 %v7785_v28, %v6701_v58  ;;  %v6647_v22 = vmul.f32 %v6605_v60, %v6605_v60  ;;  %v6635_v14 = vmul.f32 %v6629_v47, %v7980_v57  ;;  %v6641_v5 = vsub.f32 %v11848_v19, %v6605_v60 }
0x10c1   :  { %v6703_v26 = vmul.f32 0.5, %v6702_v16  ;;  %v6653_v38 = vsub.f32 %v6635_v14, %v6647_v22 }
0x10c3   :  { %v6704_v45 = vsub.f32 1.5, %v6703_v26  ;;  %v6659_v0 = vadd.f32 1e-05, %v6653_v38 }
0x10c5   :  { %v6705_v50 = vmul.f32 %v7785_v28, %v6704_v45  ;;  %7786 = vrsqrt.f32 %v6659_v0  ;;  %vm6716_vm5 = vweird.f32 %v6659_v0 }
0x10c7   :  { %v6709_v12 = vsel %vm6708_vm9, %v7785_v28, %v6705_v50 }
0x10c8   :  { %v6724_v56 = vmul.f32 %v6709_v12, %v6640_v33 }
0x10ca   :  { %v6731_v37 = vmul.f32 %v11743_v10, %v6724_v56 }
0x10cb   :  { %v7787_v63 = vpop.eup %7786 }
0x10cc   :  { %v6738_v17 = vadd.f32 %v11748_v42, %v6731_v37  ;;  %v6711_v30 = vmul.f32 %v7787_v63, %v6659_v0  ;;  %vm6717_vm11 = vweird.f32 %v7787_v63 }
0x10cd   :  { %vm6718_vm6 = vmor %vm6716_vm5, %vm6717_vm11  ;;  %vm7060_vm5 = vcmask 123904  }
0x10ce   :  { %v6964_v61 = vpop.f32.mrf.mxu1  ;;  %7280 = vmatmul.msk.f32.gmra.mxu3 %vm104_vm1, %v6738_v17  ;;  %v6712_v34 = vmul.f32 %v7787_v63, %v6711_v30 }
0x10d0   :  { %v6713_v43 = vmul.f32 0.5, %v6712_v34 }
0x10d2   :  { %v6714_v62 = vsub.f32 1.5, %v6713_v43 }
0x10d4   :  { %v6715_v32 = vmul.f32 %v7787_v63, %v6714_v62 }
0x10d6   :  { %v6719_v40 = vsel %vm6718_vm6, %v7787_v63, %v6715_v32 }
0x10d7   :  { %v6725_v25 = vmul.f32 %v6719_v40, %v6641_v5 }
0x10d9   :  { %v6732_v36 = vmul.f32 %v11743_v10, %v6725_v25 }
0x10db   :  { %v6739_v51 = vadd.f32 %v11748_v42, %v6732_v36 }
0x10dd   :  { %7281 = vmatmul.msk.f32.gmra.mxu3 %vm104_vm1, %v6739_v51 }
0x10e9   :  { %v6966_v6 = vpop.f32.mrf.mxu1 }
0x10ea   :  { %v6974_v11 = vadd.f32 %v6966_v6, %v11692_v23 }
0x10ec   :  { %v11875_v19 = vadd.f32 %v7491_v9, %v6974_v11  ;;  %v7492_v11 = vld [vmem:[%s11922_s4 + $0x2] ss:$0 sm:$0xff] }
0x10ee   :  { %v6983_v10 = vrot.slane %v11875_v19, 7  ;;  %v6993_v42 = vmul.f32 %v11875_v19, %v11875_v19 }
0x10f0   :  { %v6985_v13 = vsel %vm6984_vm7, %v6983_v10, %v11873_v29  ;;  %v6996_v54 = vrot.slane %v6993_v42, 7 }
0x10f1   :  { %v6988_v21 = vsel %vm6987_vm8, %v6985_v13, 0.0 }
0x10f2   :  { %6989 = vadd.xlane.f32.xlu1 %v6988_v21  ;;  %v6997_v23 = vsel %vm6984_vm7, %v6996_v54, %v6992_v2 }
0x10f3   :  { %v6999_v59 = vsel %vm6987_vm8, %v6997_v23, 0.0 }
0x10f4   :  { %7000 = vadd.xlane.f32.xlu0 %v6999_v59 }
0x1151   :  { %v6793_v18 = vpop.f32.mrf.mxu3 }
0x1152   :  { %v6794_v15 = vadd.f32 %v11784_v1, %v6793_v18 }
0x1154   :  { %v7286_v7 = vmul.f32 -1.702, %v6794_v15 }
0x1156   :  { %v6819_v24 = vmul.f32 1.442695, %v7286_v7 }
0x1158   :  { %7788 = vpow2.f32 %v6819_v24 }
0x115e   :  { %v7789_v46 = vpop.eup %7788 }
0x115f   :  { %v6827_v39 = vadd.f32 1.0, %v7789_v46 }
0x1160   :  { %v6796_v53 = vpop.f32.mrf.mxu3 }
0x1161   :  { %7790 = vrcp.f32 %v6827_v39  ;;  %v11887_v20 = vadd.f32 %v11784_v1, %v6796_v53  ;;  %v6900_v16 = vand.u32 2147483648, %v6827_v39  ;;  %v6898_v26 = vand.u32 2147483647, %v6827_v39 }
0x1162   :  { %vm6894_vm0 = vweird.f32 %v6827_v39 }
0x1163   :  { %v7287_v55 = vmul.f32 -1.702, %v11887_v20  ;;  %v6901_v38 = vor.u32 1.1754944e-38, %v6900_v16  ;;  %vm6899_vm3 = vcmp.eq.f32.partialorder %v6898_v26, 8.507059e+37 }
0x1165   :  { %v6990_v3 = vpop.xlane.xlu1 %6989  ;;  %v6821_v41 = vmul.f32 1.442695, %v7287_v55 }
0x1166   :  { %v6991_v52 = vmul.f32 %v6990_v3, %v7980_v57 }
0x1167   :  { %v7791_v1 = vpop.eup %7790  ;;  %v7001_v4 = vpop.xlane.xlu0 %7000  ;;  %7792 = vpow2.f32 %v6821_v41 }
0x1168   :  { %v6890_v27 = vmul.f32 %v7791_v1, %v6827_v39  ;;  %v7009_v28 = vmul.f32 %v6991_v52, %v6991_v52  ;;  %v7002_v58 = vmul.f32 %v7001_v4, %v7980_v57  ;;  %vm6895_vm14 = vweird.f32 %v7791_v1 }
0x1169   :  { %vm6896_vm2 = vmor %vm6894_vm0, %vm6895_vm14  ;;  %v7004_v43 = vrot.slane %v6991_v52, 1  ;;  %v7007_v36 = vsub.f32 %v11873_v29, %v6991_v52 }
0x116a   :  { %v6891_v8 = vsub.f32 1.0, %v6890_v27  ;;  %v7010_v60 = vsub.f32 %v7002_v58, %v7009_v28 }
0x116b   :  { %v7008_v44 = vsub.f32 %v11875_v19, %v7004_v43  ;;  %v7493_v19 = vld [vmem:[%s11922_s4 + $0x3] ss:$0 sm:$0xff] }
0x116c   :  { %v6892_v47 = vmul.f32 %v7791_v1, %v6891_v8  ;;  %v7011_v22 = vadd.f32 1e-05, %v7010_v60 }
0x116d   :  { %v7793_v45 = vpop.eup %7792 }
0x116e   :  { %v6893_v14 = vadd.f32 %v7791_v1, %v6892_v47  ;;  %7794 = vrsqrt.f32 %v7011_v22  ;;  %v6828_v0 = vadd.f32 1.0, %v7793_v45  ;;  %vm7018_vm10 = vweird.f32 %v7011_v22 }
0x1170   :  { %v6897_v50 = vsel %vm6896_vm2, %v7791_v1, %v6893_v14  ;;  %7796 = vrcp.f32 %v6828_v0  ;;  %v6915_v34 = vand.u32 2147483648, %v6828_v0  ;;  %v6913_v5 = vand.u32 2147483647, %v6828_v0 }
0x1171   :  { %v6902_v33 = vsel %vm6899_vm3, %v6901_v38, %v6897_v50  ;;  %vm6909_vm12 = vweird.f32 %v6828_v0 }
0x1172   :  { %v6923_v12 = vmul.f32 %v6902_v33, %v6794_v15  ;;  %v6916_v51 = vor.u32 1.1754944e-38, %v6915_v34  ;;  %vm6914_vm11 = vcmp.eq.f32.partialorder %v6913_v5, 8.507059e+37 }
0x1174   :  { %6968 = vmatmul.f32.gmra.mxu1 %v6923_v12  ;;  %v7795_v57 = vpop.eup %7794 }
0x1175   :  { %v7013_v56 = vmul.f32 %v7795_v57, %v7011_v22  ;;  %vm7019_vm4 = vweird.f32 %v7795_v57 }
0x1176   :  { %v7797_v37 = vpop.eup %7796  ;;  %vm7020_vm13 = vmor %vm7018_vm10, %vm7019_vm4 }
0x1177   :  { %v7014_v61 = vmul.f32 %v7795_v57, %v7013_v56  ;;  %v6905_v17 = vmul.f32 %v7797_v37, %v6828_v0  ;;  %vm6910_vm15 = vweird.f32 %v7797_v37 }
0x1178   :  { %vm6911_vm9 = vmor %vm6909_vm12, %vm6910_vm15 }
0x1179   :  { %v7015_v63 = vmul.f32 0.5, %v7014_v61  ;;  %v6906_v30 = vsub.f32 1.0, %v6905_v17 }
0x117b   :  { %v7016_v62 = vsub.f32 1.5, %v7015_v63  ;;  %v6907_v32 = vmul.f32 %v7797_v37, %v6906_v30 }
0x117d   :  { %v7017_v40 = vmul.f32 %v7795_v57, %v7016_v62  ;;  %v6908_v25 = vadd.f32 %v7797_v37, %v6907_v32 }
0x117f   :  { %v7021_v9 = vsel %vm7020_vm13, %v7795_v57, %v7017_v40  ;;  %v6912_v6 = vsel %vm6911_vm9, %v7797_v37, %v6908_v25 }
0x1180   :  { %v7023_v10 = vrot.slane %v7021_v9, 1  ;;  %v7026_v42 = vmul.f32 %v7021_v9, %v7007_v36  ;;  %v6917_v2 = vsel %vm6914_vm11, %v6916_v51, %v6912_v6 }
0x1181   :  { %v6924_v13 = vmul.f32 %v6917_v2, %v11887_v20 }
0x1182   :  { %v7027_v54 = vmul.f32 %v7023_v10, %v7008_v44  ;;  %v7029_v21 = vmul.f32 %v7492_v11, %v7026_v42 }
0x1183   :  { %6970 = vmatmul.f32.gmra.mxu1 %v6924_v13 }
0x1184   :  { %v7030_v29 = vmul.f32 %v7492_v11, %v7027_v54  ;;  %v7032_v59 = vadd.f32 %v7493_v19, %v7029_v21 }
0x1186   :  { %v7033_v23 = vadd.f32 %v7493_v19, %v7030_v29 }
0x1188   :  { %v7036_v18 = vrot.slane %v7033_v23, 7 }
0x118a   :  { %v7037_v15 = vsel %vm6984_vm7, %v7036_v18, %v7032_v59 }
0x118b   :  { %7304 = vmatmul.msk.f32.vlgmr.msrb.gmra.mxu1 %vm104_vm1, %v7037_v15 }
0x11f1   :  { %v6969_v7 = vpop.f32.mrf.mxu1 }
0x1200   :  { %v6971_v24 = vpop.f32.mrf.mxu1 }
0x1208   :  { %v7057_v46 = vpop.f32.mrf.mxu1 }
0x1209   :  { %7061 = vst.msk [vmem:[#allocation2] sm:$0x3] %vm7060_vm5, %v7057_v46 }
0x120a   :  { %7072 = dma.vmem_to_hbm [thread:$0]  %s7068_s30, 32, %s7070_s1, [#allocation3]  }
0x120b   :  { %7828 = dma.done.wait [#allocation3], 32  }
0x120c   :  { %7829 = vsyncadd [#allocation3], 4294967264 }
0x120d   :  { %7077 = vsyncpa [#allocation3], 1 }

</bundles_post_ra>
